<compile_context>
chip_gen: v5e
topology: v5e:2x2
jax: 0.10.0
libtpu: 0.0.40
codegen_flags: <defaults>
</compile_context>

<pallas_src>
import jax
import jax.numpy as jnp
import numpy as np
from jax import lax
from jax.experimental import pallas as pl
from jax.experimental.pallas import tpu as pltpu


def _make_fused_dip_kernel(n_layers, offs, Pp):
    """All conv layers fused; activations live in VMEM as (C, Pp)."""

    def kernel(*refs):
        x_ref = refs[0]                       # (1, Cin, Pp)  zero-padded frame
        wb = refs[1:1 + 2 * n_layers]         # w1, b1, ..., w6, b6
        mask_ref = refs[1 + 2 * n_layers]     # (Cout, Pp) interior mask (0/1)
        sel_ref = refs[2 + 2 * n_layers]      # (Pp, HW) 0/1 crop-selection matrix
        o_ref = refs[3 + 2 * n_layers]        # (1, Cout, HW) lane-dense output

        f32 = jnp.float32
        mask = mask_ref[...]                  # loaded once, reused every layer
        a = x_ref[0]                          # (Cin, Pp)

        for layer in range(n_layers):
            w_ref = wb[2 * layer]             # (9, Cout, Cin) per-tap weights
            b_ref = wb[2 * layer + 1]         # (Cout, 1)

            acc = None
            for ti, t in enumerate(offs):
                # Want shifted[:, p] == a[:, p + t].  roll(a, s)[:, p] == a[:, p - s]
                # (np.roll semantics), so s = (-t) mod Pp  (kept non-negative).
                shift = (-t) % Pp
                a_sh = a if shift == 0 else pltpu.roll(a, shift, 1)
                part = jnp.dot(w_ref[ti], a_sh, preferred_element_type=f32)
                acc = part if acc is None else acc + part
            y = acc + b_ref[...]              # (Cout, Pp)

            if layer < n_layers - 1:
                # ReLU + re-zero the padding ring / lane tail so the implicit
                # "same" zero padding stays exact for the next layer.
                a = jnp.maximum(y, 0.0) * mask
            else:
                # Last layer (no activation): crop interior pixels and emit the
                # lane-dense (Cout, H*W) tile with one small MXU selection
                # matmul (no strided slices, no transpose epilogue).
                o_ref[0, ...] = jnp.dot(y, sel_ref[...],
                                        preferred_element_type=f32)

    return kernel


def dip6_forward(x_nchw, params):
    """Fused forward pass: 6 x (3x3 same conv), ReLU after the first five."""
    N, Cin, H, W = x_nchw.shape
    n_layers = len(params)
    Hp, Wp = H + 2, W + 2
    P = Hp * Wp
    HW = H * W
    Pp = ((P + 127) // 128) * 128             # lane-pad spatial extent
    Cout = params[-1][0].shape[-1]

    # Tap offsets in the flattened padded frame (dy-major, dx-minor).
    offs = [(dy - 1) * Wp + (dx - 1) for dy in range(3) for dx in range(3)]

    # NCHW -> zero ring pad -> flatten spatial -> zero lane-pad tail.
    x_pad = jnp.pad(x_nchw, ((0, 0), (0, 0), (1, 1), (1, 1)))
    x_flat = jnp.pad(x_pad.reshape(N, Cin, P), ((0, 0), (0, 0), (0, Pp - P)))

    # Compile-time constants: interior mask + crop-selection matrix.
    m2d = np.zeros((Hp, Wp), np.float32)
    m2d[1:H + 1, 1:W + 1] = 1.0
    mflat = np.zeros((Pp,), np.float32)
    mflat[:P] = m2d.reshape(-1)
    mask = jnp.asarray(np.ascontiguousarray(np.broadcast_to(mflat, (Cout, Pp))))

    sel = np.zeros((Pp, HW), np.float32)
    rows = ((np.arange(H)[:, None] + 1) * Wp
            + (np.arange(W)[None, :] + 1)).reshape(-1)
    sel[rows, np.arange(HW)] = 1.0
    sel = jnp.asarray(sel)

    args = [x_flat]
    in_specs = [pl.BlockSpec((1, Cin, Pp), lambda n: (n, 0, 0))]
    for (w, b) in params:
        kh, kw, ci, co = w.shape
        # (3,3,Cin,Cout) -> (9, Cout, Cin): one (Cout,Cin) weight block per tap.
        w_taps = jnp.transpose(w.reshape(kh * kw, ci, co), (0, 2, 1))
        args += [w_taps, b.reshape(co, 1)]
        in_specs += [pl.BlockSpec((kh * kw, co, ci), lambda n: (0, 0, 0)),
                     pl.BlockSpec((co, 1), lambda n: (0, 0))]
    args += [mask, sel]
    in_specs += [pl.BlockSpec((Cout, Pp), lambda n: (0, 0)),
                 pl.BlockSpec((Pp, HW), lambda n: (0, 0))]

    out = pl.pallas_call(
        _make_fused_dip_kernel(n_layers, offs, Pp),
        out_shape=jax.ShapeDtypeStruct((N, Cout, HW), jnp.float32),
        grid=(N,),
        in_specs=in_specs,
        out_specs=pl.BlockSpec((1, Cout, HW), lambda n: (n, 0, 0)),
        compiler_params=pltpu.CompilerParams(
            dimension_semantics=("parallel",)),
    )(*args)
    # (N, Cout, H*W) -> NCHW is a free contiguous reshape (no transpose HLO).
    return out.reshape(N, Cout, H, W)


forward = jax.jit(dip6_forward)


def init_params(key, num_image_channels, n_features):
    """Parameters matching the PyTorch module's shapes/init:
    kaiming_uniform_ weights (a=0 -> gain=sqrt(2), fan_in=Cin*3*3) and the
    default Conv2d bias init. Stored as (kh, kw, Cin, Cout) HWIO."""
    params = []
    cin = num_image_channels
    for _ in range(6):
        cout = n_features
        key, kw_key, kb_key = jax.random.split(key, 3)
        fan_in = cin * 3 * 3
        w_bound = float(np.sqrt(2.0) * np.sqrt(3.0 / fan_in))
        w = jax.random.uniform(kw_key, (3, 3, cin, cout), jnp.float32,
                               minval=-w_bound, maxval=w_bound)
        b_bound = float(1.0 / np.sqrt(fan_in))
        b = jax.random.uniform(kb_key, (cout,), jnp.float32,
                               minval=-b_bound, maxval=b_bound)
        params.append((w, b))
        cin = cout
    return params


def _reference_forward(x_nchw, params):
    """Pure-JAX reference (lax.conv) for the correctness check."""
    x = jnp.transpose(x_nchw, (0, 2, 3, 1))
    n_layers = len(params)
    for layer_idx, (w, b) in enumerate(params):
        x = lax.conv_general_dilated(
            x, w, window_strides=(1, 1), padding="SAME",
            dimension_numbers=("NHWC", "HWIO", "NHWC"),
            precision=lax.Precision.HIGHEST)
        x = x + b[None, None, None, :]
        if layer_idx < n_layers - 1:
            x = jnp.maximum(x, 0.0)
    return jnp.transpose(x, (0, 3, 1, 2))


if __name__ == "__main__":
    numberOfImageChannels = 4
    nFeaturesIntermediateLayers = 32
    N, H, W = 2, 16, 16

    key = jax.random.PRNGKey(0)
    key, xkey = jax.random.split(key)
    x = jax.random.normal(xkey, (N, numberOfImageChannels, H, W), jnp.float32)

    params = tuple(init_params(key, numberOfImageChannels,
                               nFeaturesIntermediateLayers))

    out = jax.block_until_ready(forward(x, params))
    ref = jax.block_until_ready(_reference_forward(x, params))

    if not np.allclose(np.asarray(out), np.asarray(ref), rtol=1e-4, atol=1e-3):
        max_err = float(np.max(np.abs(np.asarray(out) - np.asarray(ref))))
        raise AssertionError(
            f"Pallas output mismatch vs. JAX reference (max abs err {max_err})")
    assert out.shape == (N, nFeaturesIntermediateLayers, H, W)
    print("KERNEL_OK")
</pallas_src>

<mosaic_0001>
module attributes {stable_mosaic.version = 11 : i64} {
  func.func @kernel(%arg0: i32, %arg1: memref<1x4x384xf32, #tpu.memory_space<vmem>>, %arg2: memref<9x32x4xf32, #tpu.memory_space<vmem>>, %arg3: memref<32x1xf32, #tpu.memory_space<vmem>>, %arg4: memref<9x32x32xf32, #tpu.memory_space<vmem>>, %arg5: memref<32x1xf32, #tpu.memory_space<vmem>>, %arg6: memref<9x32x32xf32, #tpu.memory_space<vmem>>, %arg7: memref<32x1xf32, #tpu.memory_space<vmem>>, %arg8: memref<9x32x32xf32, #tpu.memory_space<vmem>>, %arg9: memref<32x1xf32, #tpu.memory_space<vmem>>, %arg10: memref<9x32x32xf32, #tpu.memory_space<vmem>>, %arg11: memref<32x1xf32, #tpu.memory_space<vmem>>, %arg12: memref<9x32x32xf32, #tpu.memory_space<vmem>>, %arg13: memref<32x1xf32, #tpu.memory_space<vmem>>, %arg14: memref<32x384xf32, #tpu.memory_space<vmem>>, %arg15: memref<384x256xf32, #tpu.memory_space<vmem>>, %arg16: memref<1x32x256xf32, #tpu.memory_space<vmem>>) attributes {dimension_semantics = [#tpu.dimension_semantics<parallel>], iteration_bounds = array<i64: 2>, scalar_prefetch = 0 : i64, scratch_operands = 0 : i64, tpu.core_type = #tpu.core_type<tc>, window_params = [{transform_indices = @transform_0, window_bounds = array<i64: 1, 4, 384>}, {pipeline_mode = #tpu.pipeline_mode<synchronous>, transform_indices = @transform_1, window_bounds = array<i64: 9, 32, 4>}, {pipeline_mode = #tpu.pipeline_mode<synchronous>, transform_indices = @transform_2, window_bounds = array<i64: 32, 1>}, {pipeline_mode = #tpu.pipeline_mode<synchronous>, transform_indices = @transform_3, window_bounds = array<i64: 9, 32, 32>}, {pipeline_mode = #tpu.pipeline_mode<synchronous>, transform_indices = @transform_4, window_bounds = array<i64: 32, 1>}, {pipeline_mode = #tpu.pipeline_mode<synchronous>, transform_indices = @transform_5, window_bounds = array<i64: 9, 32, 32>}, {pipeline_mode = #tpu.pipeline_mode<synchronous>, transform_indices = @transform_6, window_bounds = array<i64: 32, 1>}, {pipeline_mode = #tpu.pipeline_mode<synchronous>, transform_indices = @transform_7, window_bounds = array<i64: 9, 32, 32>}, {pipeline_mode = #tpu.pipeline_mode<synchronous>, transform_indices = @transform_8, window_bounds = array<i64: 32, 1>}, {pipeline_mode = #tpu.pipeline_mode<synchronous>, transform_indices = @transform_9, window_bounds = array<i64: 9, 32, 32>}, {pipeline_mode = #tpu.pipeline_mode<synchronous>, transform_indices = @transform_10, window_bounds = array<i64: 32, 1>}, {pipeline_mode = #tpu.pipeline_mode<synchronous>, transform_indices = @transform_11, window_bounds = array<i64: 9, 32, 32>}, {pipeline_mode = #tpu.pipeline_mode<synchronous>, transform_indices = @transform_12, window_bounds = array<i64: 32, 1>}, {pipeline_mode = #tpu.pipeline_mode<synchronous>, transform_indices = @transform_13, window_bounds = array<i64: 32, 384>}, {pipeline_mode = #tpu.pipeline_mode<synchronous>, transform_indices = @transform_14, window_bounds = array<i64: 384, 256>}, {transform_indices = @transform_15, window_bounds = array<i64: 1, 32, 256>}]} {
    %c0 = arith.constant 0 : index
    %c0_0 = arith.constant 0 : index
    %0 = vector.load %arg14[%c0, %c0_0] : memref<32x384xf32, #tpu.memory_space<vmem>>, vector<32x384xf32>
    %c0_1 = arith.constant 0 : index
    %c0_2 = arith.constant 0 : index
    %c0_3 = arith.constant 0 : index
    %1 = vector.load %arg1[%c0_1, %c0_2, %c0_3] : memref<1x4x384xf32, #tpu.memory_space<vmem>>, vector<1x4x384xf32>
    %2 = vector.shape_cast %1 : vector<1x4x384xf32> to vector<4x384xf32>
    %c19_i32 = arith.constant 19 : i32
    %3 = tpu.dynamic_rotate %2 by %c19_i32 dim 1 : vector<4x384xf32>, i32 -> vector<4x384xf32>
    %c0_4 = arith.constant 0 : index
    %c0_5 = arith.constant 0 : index
    %c0_6 = arith.constant 0 : index
    %4 = vector.load %arg2[%c0_4, %c0_5, %c0_6] : memref<9x32x4xf32, #tpu.memory_space<vmem>>, vector<1x32x4xf32>
    %5 = vector.shape_cast %4 : vector<1x32x4xf32> to vector<32x4xf32>
    %cst = arith.constant dense<0.000000e+00> : vector<32x384xf32>
    %6 = tpu.matmul %5, %3, %cst {dimension_numbers = #tpu.dot_dimension_numbers<[1], [0], [0], [1], [0, 0, 1, 1], [], []>} : vector<32x4xf32>, vector<4x384xf32>, vector<32x384xf32> -> vector<32x384xf32>
    %c18_i32 = arith.constant 18 : i32
    %7 = tpu.dynamic_rotate %2 by %c18_i32 dim 1 : vector<4x384xf32>, i32 -> vector<4x384xf32>
    %c1 = arith.constant 1 : index
    %c0_7 = arith.constant 0 : index
    %c0_8 = arith.constant 0 : index
    %8 = vector.load %arg2[%c1, %c0_7, %c0_8] : memref<9x32x4xf32, #tpu.memory_space<vmem>>, vector<1x32x4xf32>
    %9 = vector.shape_cast %8 : vector<1x32x4xf32> to vector<32x4xf32>
    %cst_9 = arith.constant dense<0.000000e+00> : vector<32x384xf32>
    %10 = tpu.matmul %9, %7, %cst_9 {dimension_numbers = #tpu.dot_dimension_numbers<[1], [0], [0], [1], [0, 0, 1, 1], [], []>} : vector<32x4xf32>, vector<4x384xf32>, vector<32x384xf32> -> vector<32x384xf32>
    %11 = arith.addf %6, %10 : vector<32x384xf32>
    %c17_i32 = arith.constant 17 : i32
    %12 = tpu.dynamic_rotate %2 by %c17_i32 dim 1 : vector<4x384xf32>, i32 -> vector<4x384xf32>
    %c2 = arith.constant 2 : index
    %c0_10 = arith.constant 0 : index
    %c0_11 = arith.constant 0 : index
    %13 = vector.load %arg2[%c2, %c0_10, %c0_11] : memref<9x32x4xf32, #tpu.memory_space<vmem>>, vector<1x32x4xf32>
    %14 = vector.shape_cast %13 : vector<1x32x4xf32> to vector<32x4xf32>
    %cst_12 = arith.constant dense<0.000000e+00> : vector<32x384xf32>
    %15 = tpu.matmul %14, %12, %cst_12 {dimension_numbers = #tpu.dot_dimension_numbers<[1], [0], [0], [1], [0, 0, 1, 1], [], []>} : vector<32x4xf32>, vector<4x384xf32>, vector<32x384xf32> -> vector<32x384xf32>
    %16 = arith.addf %11, %15 : vector<32x384xf32>
    %c1_i32 = arith.constant 1 : i32
    %17 = tpu.dynamic_rotate %2 by %c1_i32 dim 1 : vector<4x384xf32>, i32 -> vector<4x384xf32>
    %c3 = arith.constant 3 : index
    %c0_13 = arith.constant 0 : index
    %c0_14 = arith.constant 0 : index
    %18 = vector.load %arg2[%c3, %c0_13, %c0_14] : memref<9x32x4xf32, #tpu.memory_space<vmem>>, vector<1x32x4xf32>
    %19 = vector.shape_cast %18 : vector<1x32x4xf32> to vector<32x4xf32>
    %cst_15 = arith.constant dense<0.000000e+00> : vector<32x384xf32>
    %20 = tpu.matmul %19, %17, %cst_15 {dimension_numbers = #tpu.dot_dimension_numbers<[1], [0], [0], [1], [0, 0, 1, 1], [], []>} : vector<32x4xf32>, vector<4x384xf32>, vector<32x384xf32> -> vector<32x384xf32>
    %21 = arith.addf %16, %20 : vector<32x384xf32>
    %c4 = arith.constant 4 : index
    %c0_16 = arith.constant 0 : index
    %c0_17 = arith.constant 0 : index
    %22 = vector.load %arg2[%c4, %c0_16, %c0_17] : memref<9x32x4xf32, #tpu.memory_space<vmem>>, vector<1x32x4xf32>
    %23 = vector.shape_cast %22 : vector<1x32x4xf32> to vector<32x4xf32>
    %cst_18 = arith.constant dense<0.000000e+00> : vector<32x384xf32>
    %24 = tpu.matmul %23, %2, %cst_18 {dimension_numbers = #tpu.dot_dimension_numbers<[1], [0], [0], [1], [0, 0, 1, 1], [], []>} : vector<32x4xf32>, vector<4x384xf32>, vector<32x384xf32> -> vector<32x384xf32>
    %25 = arith.addf %21, %24 : vector<32x384xf32>
    %c383_i32 = arith.constant 383 : i32
    %26 = tpu.dynamic_rotate %2 by %c383_i32 dim 1 : vector<4x384xf32>, i32 -> vector<4x384xf32>
    %c5 = arith.constant 5 : index
    %c0_19 = arith.constant 0 : index
    %c0_20 = arith.constant 0 : index
    %27 = vector.load %arg2[%c5, %c0_19, %c0_20] : memref<9x32x4xf32, #tpu.memory_space<vmem>>, vector<1x32x4xf32>
    %28 = vector.shape_cast %27 : vector<1x32x4xf32> to vector<32x4xf32>
    %cst_21 = arith.constant dense<0.000000e+00> : vector<32x384xf32>
    %29 = tpu.matmul %28, %26, %cst_21 {dimension_numbers = #tpu.dot_dimension_numbers<[1], [0], [0], [1], [0, 0, 1, 1], [], []>} : vector<32x4xf32>, vector<4x384xf32>, vector<32x384xf32> -> vector<32x384xf32>
    %30 = arith.addf %25, %29 : vector<32x384xf32>
    %c367_i32 = arith.constant 367 : i32
    %31 = tpu.dynamic_rotate %2 by %c367_i32 dim 1 : vector<4x384xf32>, i32 -> vector<4x384xf32>
    %c6 = arith.constant 6 : index
    %c0_22 = arith.constant 0 : index
    %c0_23 = arith.constant 0 : index
    %32 = vector.load %arg2[%c6, %c0_22, %c0_23] : memref<9x32x4xf32, #tpu.memory_space<vmem>>, vector<1x32x4xf32>
    %33 = vector.shape_cast %32 : vector<1x32x4xf32> to vector<32x4xf32>
    %cst_24 = arith.constant dense<0.000000e+00> : vector<32x384xf32>
    %34 = tpu.matmul %33, %31, %cst_24 {dimension_numbers = #tpu.dot_dimension_numbers<[1], [0], [0], [1], [0, 0, 1, 1], [], []>} : vector<32x4xf32>, vector<4x384xf32>, vector<32x384xf32> -> vector<32x384xf32>
    %35 = arith.addf %30, %34 : vector<32x384xf32>
    %c366_i32 = arith.constant 366 : i32
    %36 = tpu.dynamic_rotate %2 by %c366_i32 dim 1 : vector<4x384xf32>, i32 -> vector<4x384xf32>
    %c7 = arith.constant 7 : index
    %c0_25 = arith.constant 0 : index
    %c0_26 = arith.constant 0 : index
    %37 = vector.load %arg2[%c7, %c0_25, %c0_26] : memref<9x32x4xf32, #tpu.memory_space<vmem>>, vector<1x32x4xf32>
    %38 = vector.shape_cast %37 : vector<1x32x4xf32> to vector<32x4xf32>
    %cst_27 = arith.constant dense<0.000000e+00> : vector<32x384xf32>
    %39 = tpu.matmul %38, %36, %cst_27 {dimension_numbers = #tpu.dot_dimension_numbers<[1], [0], [0], [1], [0, 0, 1, 1], [], []>} : vector<32x4xf32>, vector<4x384xf32>, vector<32x384xf32> -> vector<32x384xf32>
    %40 = arith.addf %35, %39 : vector<32x384xf32>
    %c365_i32 = arith.constant 365 : i32
    %41 = tpu.dynamic_rotate %2 by %c365_i32 dim 1 : vector<4x384xf32>, i32 -> vector<4x384xf32>
    %c8 = arith.constant 8 : index
    %c0_28 = arith.constant 0 : index
    %c0_29 = arith.constant 0 : index
    %42 = vector.load %arg2[%c8, %c0_28, %c0_29] : memref<9x32x4xf32, #tpu.memory_space<vmem>>, vector<1x32x4xf32>
    %43 = vector.shape_cast %42 : vector<1x32x4xf32> to vector<32x4xf32>
    %cst_30 = arith.constant dense<0.000000e+00> : vector<32x384xf32>
    %44 = tpu.matmul %43, %41, %cst_30 {dimension_numbers = #tpu.dot_dimension_numbers<[1], [0], [0], [1], [0, 0, 1, 1], [], []>} : vector<32x4xf32>, vector<4x384xf32>, vector<32x384xf32> -> vector<32x384xf32>
    %45 = arith.addf %40, %44 : vector<32x384xf32>
    %c0_31 = arith.constant 0 : index
    %c0_32 = arith.constant 0 : index
    %46 = vector.load %arg3[%c0_31, %c0_32] : memref<32x1xf32, #tpu.memory_space<vmem>>, vector<32x1xf32>
    %47 = vector.broadcast %46 : vector<32x1xf32> to vector<32x384xf32>
    %48 = arith.addf %45, %47 : vector<32x384xf32>
    %cst_33 = arith.constant 0.000000e+00 : f32
    %49 = vector.broadcast %cst_33 : f32 to vector<32x384xf32>
    %50 = arith.maximumf %48, %49 : vector<32x384xf32>
    %51 = arith.mulf %50, %0 : vector<32x384xf32>
    %c19_i32_34 = arith.constant 19 : i32
    %52 = tpu.dynamic_rotate %51 by %c19_i32_34 dim 1 : vector<32x384xf32>, i32 -> vector<32x384xf32>
    %c0_35 = arith.constant 0 : index
    %c0_36 = arith.constant 0 : index
    %c0_37 = arith.constant 0 : index
    %53 = vector.load %arg4[%c0_35, %c0_36, %c0_37] : memref<9x32x32xf32, #tpu.memory_space<vmem>>, vector<1x32x32xf32>
    %54 = vector.shape_cast %53 : vector<1x32x32xf32> to vector<32x32xf32>
    %cst_38 = arith.constant dense<0.000000e+00> : vector<32x384xf32>
    %55 = tpu.matmul %54, %52, %cst_38 {dimension_numbers = #tpu.dot_dimension_numbers<[1], [0], [0], [1], [0, 0, 1, 1], [], []>} : vector<32x32xf32>, vector<32x384xf32>, vector<32x384xf32> -> vector<32x384xf32>
    %c18_i32_39 = arith.constant 18 : i32
    %56 = tpu.dynamic_rotate %51 by %c18_i32_39 dim 1 : vector<32x384xf32>, i32 -> vector<32x384xf32>
    %c1_40 = arith.constant 1 : index
    %c0_41 = arith.constant 0 : index
    %c0_42 = arith.constant 0 : index
    %57 = vector.load %arg4[%c1_40, %c0_41, %c0_42] : memref<9x32x32xf32, #tpu.memory_space<vmem>>, vector<1x32x32xf32>
    %58 = vector.shape_cast %57 : vector<1x32x32xf32> to vector<32x32xf32>
    %cst_43 = arith.constant dense<0.000000e+00> : vector<32x384xf32>
    %59 = tpu.matmul %58, %56, %cst_43 {dimension_numbers = #tpu.dot_dimension_numbers<[1], [0], [0], [1], [0, 0, 1, 1], [], []>} : vector<32x32xf32>, vector<32x384xf32>, vector<32x384xf32> -> vector<32x384xf32>
    %60 = arith.addf %55, %59 : vector<32x384xf32>
    %c17_i32_44 = arith.constant 17 : i32
    %61 = tpu.dynamic_rotate %51 by %c17_i32_44 dim 1 : vector<32x384xf32>, i32 -> vector<32x384xf32>
    %c2_45 = arith.constant 2 : index
    %c0_46 = arith.constant 0 : index
    %c0_47 = arith.constant 0 : index
    %62 = vector.load %arg4[%c2_45, %c0_46, %c0_47] : memref<9x32x32xf32, #tpu.memory_space<vmem>>, vector<1x32x32xf32>
    %63 = vector.shape_cast %62 : vector<1x32x32xf32> to vector<32x32xf32>
    %cst_48 = arith.constant dense<0.000000e+00> : vector<32x384xf32>
    %64 = tpu.matmul %63, %61, %cst_48 {dimension_numbers = #tpu.dot_dimension_numbers<[1], [0], [0], [1], [0, 0, 1, 1], [], []>} : vector<32x32xf32>, vector<32x384xf32>, vector<32x384xf32> -> vector<32x384xf32>
    %65 = arith.addf %60, %64 : vector<32x384xf32>
    %c1_i32_49 = arith.constant 1 : i32
    %66 = tpu.dynamic_rotate %51 by %c1_i32_49 dim 1 : vector<32x384xf32>, i32 -> vector<32x384xf32>
    %c3_50 = arith.constant 3 : index
    %c0_51 = arith.constant 0 : index
    %c0_52 = arith.constant 0 : index
    %67 = vector.load %arg4[%c3_50, %c0_51, %c0_52] : memref<9x32x32xf32, #tpu.memory_space<vmem>>, vector<1x32x32xf32>
    %68 = vector.shape_cast %67 : vector<1x32x32xf32> to vector<32x32xf32>
    %cst_53 = arith.constant dense<0.000000e+00> : vector<32x384xf32>
    %69 = tpu.matmul %68, %66, %cst_53 {dimension_numbers = #tpu.dot_dimension_numbers<[1], [0], [0], [1], [0, 0, 1, 1], [], []>} : vector<32x32xf32>, vector<32x384xf32>, vector<32x384xf32> -> vector<32x384xf32>
    %70 = arith.addf %65, %69 : vector<32x384xf32>
    %c4_54 = arith.constant 4 : index
    %c0_55 = arith.constant 0 : index
    %c0_56 = arith.constant 0 : index
    %71 = vector.load %arg4[%c4_54, %c0_55, %c0_56] : memref<9x32x32xf32, #tpu.memory_space<vmem>>, vector<1x32x32xf32>
    %72 = vector.shape_cast %71 : vector<1x32x32xf32> to vector<32x32xf32>
    %cst_57 = arith.constant dense<0.000000e+00> : vector<32x384xf32>
    %73 = tpu.matmul %72, %51, %cst_57 {dimension_numbers = #tpu.dot_dimension_numbers<[1], [0], [0], [1], [0, 0, 1, 1], [], []>} : vector<32x32xf32>, vector<32x384xf32>, vector<32x384xf32> -> vector<32x384xf32>
    %74 = arith.addf %70, %73 : vector<32x384xf32>
    %c383_i32_58 = arith.constant 383 : i32
    %75 = tpu.dynamic_rotate %51 by %c383_i32_58 dim 1 : vector<32x384xf32>, i32 -> vector<32x384xf32>
    %c5_59 = arith.constant 5 : index
    %c0_60 = arith.constant 0 : index
    %c0_61 = arith.constant 0 : index
    %76 = vector.load %arg4[%c5_59, %c0_60, %c0_61] : memref<9x32x32xf32, #tpu.memory_space<vmem>>, vector<1x32x32xf32>
    %77 = vector.shape_cast %76 : vector<1x32x32xf32> to vector<32x32xf32>
    %cst_62 = arith.constant dense<0.000000e+00> : vector<32x384xf32>
    %78 = tpu.matmul %77, %75, %cst_62 {dimension_numbers = #tpu.dot_dimension_numbers<[1], [0], [0], [1], [0, 0, 1, 1], [], []>} : vector<32x32xf32>, vector<32x384xf32>, vector<32x384xf32> -> vector<32x384xf32>
    %79 = arith.addf %74, %78 : vector<32x384xf32>
    %c367_i32_63 = arith.constant 367 : i32
    %80 = tpu.dynamic_rotate %51 by %c367_i32_63 dim 1 : vector<32x384xf32>, i32 -> vector<32x384xf32>
    %c6_64 = arith.constant 6 : index
    %c0_65 = arith.constant 0 : index
    %c0_66 = arith.constant 0 : index
    %81 = vector.load %arg4[%c6_64, %c0_65, %c0_66] : memref<9x32x32xf32, #tpu.memory_space<vmem>>, vector<1x32x32xf32>
    %82 = vector.shape_cast %81 : vector<1x32x32xf32> to vector<32x32xf32>
    %cst_67 = arith.constant dense<0.000000e+00> : vector<32x384xf32>
    %83 = tpu.matmul %82, %80, %cst_67 {dimension_numbers = #tpu.dot_dimension_numbers<[1], [0], [0], [1], [0, 0, 1, 1], [], []>} : vector<32x32xf32>, vector<32x384xf32>, vector<32x384xf32> -> vector<32x384xf32>
    %84 = arith.addf %79, %83 : vector<32x384xf32>
    %c366_i32_68 = arith.constant 366 : i32
    %85 = tpu.dynamic_rotate %51 by %c366_i32_68 dim 1 : vector<32x384xf32>, i32 -> vector<32x384xf32>
    %c7_69 = arith.constant 7 : index
    %c0_70 = arith.constant 0 : index
    %c0_71 = arith.constant 0 : index
    %86 = vector.load %arg4[%c7_69, %c0_70, %c0_71] : memref<9x32x32xf32, #tpu.memory_space<vmem>>, vector<1x32x32xf32>
    %87 = vector.shape_cast %86 : vector<1x32x32xf32> to vector<32x32xf32>
    %cst_72 = arith.constant dense<0.000000e+00> : vector<32x384xf32>
    %88 = tpu.matmul %87, %85, %cst_72 {dimension_numbers = #tpu.dot_dimension_numbers<[1], [0], [0], [1], [0, 0, 1, 1], [], []>} : vector<32x32xf32>, vector<32x384xf32>, vector<32x384xf32> -> vector<32x384xf32>
    %89 = arith.addf %84, %88 : vector<32x384xf32>
    %c365_i32_73 = arith.constant 365 : i32
    %90 = tpu.dynamic_rotate %51 by %c365_i32_73 dim 1 : vector<32x384xf32>, i32 -> vector<32x384xf32>
    %c8_74 = arith.constant 8 : index
    %c0_75 = arith.constant 0 : index
    %c0_76 = arith.constant 0 : index
    %91 = vector.load %arg4[%c8_74, %c0_75, %c0_76] : memref<9x32x32xf32, #tpu.memory_space<vmem>>, vector<1x32x32xf32>
    %92 = vector.shape_cast %91 : vector<1x32x32xf32> to vector<32x32xf32>
    %cst_77 = arith.constant dense<0.000000e+00> : vector<32x384xf32>
    %93 = tpu.matmul %92, %90, %cst_77 {dimension_numbers = #tpu.dot_dimension_numbers<[1], [0], [0], [1], [0, 0, 1, 1], [], []>} : vector<32x32xf32>, vector<32x384xf32>, vector<32x384xf32> -> vector<32x384xf32>
    %94 = arith.addf %89, %93 : vector<32x384xf32>
    %c0_78 = arith.constant 0 : index
    %c0_79 = arith.constant 0 : index
    %95 = vector.load %arg5[%c0_78, %c0_79] : memref<32x1xf32, #tpu.memory_space<vmem>>, vector<32x1xf32>
    %96 = vector.broadcast %95 : vector<32x1xf32> to vector<32x384xf32>
    %97 = arith.addf %94, %96 : vector<32x384xf32>
    %cst_80 = arith.constant 0.000000e+00 : f32
    %98 = vector.broadcast %cst_80 : f32 to vector<32x384xf32>
    %99 = arith.maximumf %97, %98 : vector<32x384xf32>
    %100 = arith.mulf %99, %0 : vector<32x384xf32>
    %c19_i32_81 = arith.constant 19 : i32
    %101 = tpu.dynamic_rotate %100 by %c19_i32_81 dim 1 : vector<32x384xf32>, i32 -> vector<32x384xf32>
    %c0_82 = arith.constant 0 : index
    %c0_83 = arith.constant 0 : index
    %c0_84 = arith.constant 0 : index
    %102 = vector.load %arg6[%c0_82, %c0_83, %c0_84] : memref<9x32x32xf32, #tpu.memory_space<vmem>>, vector<1x32x32xf32>
    %103 = vector.shape_cast %102 : vector<1x32x32xf32> to vector<32x32xf32>
    %cst_85 = arith.constant dense<0.000000e+00> : vector<32x384xf32>
    %104 = tpu.matmul %103, %101, %cst_85 {dimension_numbers = #tpu.dot_dimension_numbers<[1], [0], [0], [1], [0, 0, 1, 1], [], []>} : vector<32x32xf32>, vector<32x384xf32>, vector<32x384xf32> -> vector<32x384xf32>
    %c18_i32_86 = arith.constant 18 : i32
    %105 = tpu.dynamic_rotate %100 by %c18_i32_86 dim 1 : vector<32x384xf32>, i32 -> vector<32x384xf32>
    %c1_87 = arith.constant 1 : index
    %c0_88 = arith.constant 0 : index
    %c0_89 = arith.constant 0 : index
    %106 = vector.load %arg6[%c1_87, %c0_88, %c0_89] : memref<9x32x32xf32, #tpu.memory_space<vmem>>, vector<1x32x32xf32>
    %107 = vector.shape_cast %106 : vector<1x32x32xf32> to vector<32x32xf32>
    %cst_90 = arith.constant dense<0.000000e+00> : vector<32x384xf32>
    %108 = tpu.matmul %107, %105, %cst_90 {dimension_numbers = #tpu.dot_dimension_numbers<[1], [0], [0], [1], [0, 0, 1, 1], [], []>} : vector<32x32xf32>, vector<32x384xf32>, vector<32x384xf32> -> vector<32x384xf32>
    %109 = arith.addf %104, %108 : vector<32x384xf32>
    %c17_i32_91 = arith.constant 17 : i32
    %110 = tpu.dynamic_rotate %100 by %c17_i32_91 dim 1 : vector<32x384xf32>, i32 -> vector<32x384xf32>
    %c2_92 = arith.constant 2 : index
    %c0_93 = arith.constant 0 : index
    %c0_94 = arith.constant 0 : index
    %111 = vector.load %arg6[%c2_92, %c0_93, %c0_94] : memref<9x32x32xf32, #tpu.memory_space<vmem>>, vector<1x32x32xf32>
    %112 = vector.shape_cast %111 : vector<1x32x32xf32> to vector<32x32xf32>
    %cst_95 = arith.constant dense<0.000000e+00> : vector<32x384xf32>
    %113 = tpu.matmul %112, %110, %cst_95 {dimension_numbers = #tpu.dot_dimension_numbers<[1], [0], [0], [1], [0, 0, 1, 1], [], []>} : vector<32x32xf32>, vector<32x384xf32>, vector<32x384xf32> -> vector<32x384xf32>
    %114 = arith.addf %109, %113 : vector<32x384xf32>
    %c1_i32_96 = arith.constant 1 : i32
    %115 = tpu.dynamic_rotate %100 by %c1_i32_96 dim 1 : vector<32x384xf32>, i32 -> vector<32x384xf32>
    %c3_97 = arith.constant 3 : index
    %c0_98 = arith.constant 0 : index
    %c0_99 = arith.constant 0 : index
    %116 = vector.load %arg6[%c3_97, %c0_98, %c0_99] : memref<9x32x32xf32, #tpu.memory_space<vmem>>, vector<1x32x32xf32>
    %117 = vector.shape_cast %116 : vector<1x32x32xf32> to vector<32x32xf32>
    %cst_100 = arith.constant dense<0.000000e+00> : vector<32x384xf32>
    %118 = tpu.matmul %117, %115, %cst_100 {dimension_numbers = #tpu.dot_dimension_numbers<[1], [0], [0], [1], [0, 0, 1, 1], [], []>} : vector<32x32xf32>, vector<32x384xf32>, vector<32x384xf32> -> vector<32x384xf32>
    %119 = arith.addf %114, %118 : vector<32x384xf32>
    %c4_101 = arith.constant 4 : index
    %c0_102 = arith.constant 0 : index
    %c0_103 = arith.constant 0 : index
    %120 = vector.load %arg6[%c4_101, %c0_102, %c0_103] : memref<9x32x32xf32, #tpu.memory_space<vmem>>, vector<1x32x32xf32>
    %121 = vector.shape_cast %120 : vector<1x32x32xf32> to vector<32x32xf32>
    %cst_104 = arith.constant dense<0.000000e+00> : vector<32x384xf32>
    %122 = tpu.matmul %121, %100, %cst_104 {dimension_numbers = #tpu.dot_dimension_numbers<[1], [0], [0], [1], [0, 0, 1, 1], [], []>} : vector<32x32xf32>, vector<32x384xf32>, vector<32x384xf32> -> vector<32x384xf32>
    %123 = arith.addf %119, %122 : vector<32x384xf32>
    %c383_i32_105 = arith.constant 383 : i32
    %124 = tpu.dynamic_rotate %100 by %c383_i32_105 dim 1 : vector<32x384xf32>, i32 -> vector<32x384xf32>
    %c5_106 = arith.constant 5 : index
    %c0_107 = arith.constant 0 : index
    %c0_108 = arith.constant 0 : index
    %125 = vector.load %arg6[%c5_106, %c0_107, %c0_108] : memref<9x32x32xf32, #tpu.memory_space<vmem>>, vector<1x32x32xf32>
    %126 = vector.shape_cast %125 : vector<1x32x32xf32> to vector<32x32xf32>
    %cst_109 = arith.constant dense<0.000000e+00> : vector<32x384xf32>
    %127 = tpu.matmul %126, %124, %cst_109 {dimension_numbers = #tpu.dot_dimension_numbers<[1], [0], [0], [1], [0, 0, 1, 1], [], []>} : vector<32x32xf32>, vector<32x384xf32>, vector<32x384xf32> -> vector<32x384xf32>
    %128 = arith.addf %123, %127 : vector<32x384xf32>
    %c367_i32_110 = arith.constant 367 : i32
    %129 = tpu.dynamic_rotate %100 by %c367_i32_110 dim 1 : vector<32x384xf32>, i32 -> vector<32x384xf32>
    %c6_111 = arith.constant 6 : index
    %c0_112 = arith.constant 0 : index
    %c0_113 = arith.constant 0 : index
    %130 = vector.load %arg6[%c6_111, %c0_112, %c0_113] : memref<9x32x32xf32, #tpu.memory_space<vmem>>, vector<1x32x32xf32>
    %131 = vector.shape_cast %130 : vector<1x32x32xf32> to vector<32x32xf32>
    %cst_114 = arith.constant dense<0.000000e+00> : vector<32x384xf32>
    %132 = tpu.matmul %131, %129, %cst_114 {dimension_numbers = #tpu.dot_dimension_numbers<[1], [0], [0], [1], [0, 0, 1, 1], [], []>} : vector<32x32xf32>, vector<32x384xf32>, vector<32x384xf32> -> vector<32x384xf32>
    %133 = arith.addf %128, %132 : vector<32x384xf32>
    %c366_i32_115 = arith.constant 366 : i32
    %134 = tpu.dynamic_rotate %100 by %c366_i32_115 dim 1 : vector<32x384xf32>, i32 -> vector<32x384xf32>
    %c7_116 = arith.constant 7 : index
    %c0_117 = arith.constant 0 : index
    %c0_118 = arith.constant 0 : index
    %135 = vector.load %arg6[%c7_116, %c0_117, %c0_118] : memref<9x32x32xf32, #tpu.memory_space<vmem>>, vector<1x32x32xf32>
    %136 = vector.shape_cast %135 : vector<1x32x32xf32> to vector<32x32xf32>
    %cst_119 = arith.constant dense<0.000000e+00> : vector<32x384xf32>
    %137 = tpu.matmul %136, %134, %cst_119 {dimension_numbers = #tpu.dot_dimension_numbers<[1], [0], [0], [1], [0, 0, 1, 1], [], []>} : vector<32x32xf32>, vector<32x384xf32>, vector<32x384xf32> -> vector<32x384xf32>
    %138 = arith.addf %133, %137 : vector<32x384xf32>
    %c365_i32_120 = arith.constant 365 : i32
    %139 = tpu.dynamic_rotate %100 by %c365_i32_120 dim 1 : vector<32x384xf32>, i32 -> vector<32x384xf32>
    %c8_121 = arith.constant 8 : index
    %c0_122 = arith.constant 0 : index
    %c0_123 = arith.constant 0 : index
    %140 = vector.load %arg6[%c8_121, %c0_122, %c0_123] : memref<9x32x32xf32, #tpu.memory_space<vmem>>, vector<1x32x32xf32>
    %141 = vector.shape_cast %140 : vector<1x32x32xf32> to vector<32x32xf32>
    %cst_124 = arith.constant dense<0.000000e+00> : vector<32x384xf32>
    %142 = tpu.matmul %141, %139, %cst_124 {dimension_numbers = #tpu.dot_dimension_numbers<[1], [0], [0], [1], [0, 0, 1, 1], [], []>} : vector<32x32xf32>, vector<32x384xf32>, vector<32x384xf32> -> vector<32x384xf32>
    %143 = arith.addf %138, %142 : vector<32x384xf32>
    %c0_125 = arith.constant 0 : index
    %c0_126 = arith.constant 0 : index
    %144 = vector.load %arg7[%c0_125, %c0_126] : memref<32x1xf32, #tpu.memory_space<vmem>>, vector<32x1xf32>
    %145 = vector.broadcast %144 : vector<32x1xf32> to vector<32x384xf32>
    %146 = arith.addf %143, %145 : vector<32x384xf32>
    %cst_127 = arith.constant 0.000000e+00 : f32
    %147 = vector.broadcast %cst_127 : f32 to vector<32x384xf32>
    %148 = arith.maximumf %146, %147 : vector<32x384xf32>
    %149 = arith.mulf %148, %0 : vector<32x384xf32>
    %c19_i32_128 = arith.constant 19 : i32
    %150 = tpu.dynamic_rotate %149 by %c19_i32_128 dim 1 : vector<32x384xf32>, i32 -> vector<32x384xf32>
    %c0_129 = arith.constant 0 : index
    %c0_130 = arith.constant 0 : index
    %c0_131 = arith.constant 0 : index
    %151 = vector.load %arg8[%c0_129, %c0_130, %c0_131] : memref<9x32x32xf32, #tpu.memory_space<vmem>>, vector<1x32x32xf32>
    %152 = vector.shape_cast %151 : vector<1x32x32xf32> to vector<32x32xf32>
    %cst_132 = arith.constant dense<0.000000e+00> : vector<32x384xf32>
    %153 = tpu.matmul %152, %150, %cst_132 {dimension_numbers = #tpu.dot_dimension_numbers<[1], [0], [0], [1], [0, 0, 1, 1], [], []>} : vector<32x32xf32>, vector<32x384xf32>, vector<32x384xf32> -> vector<32x384xf32>
    %c18_i32_133 = arith.constant 18 : i32
    %154 = tpu.dynamic_rotate %149 by %c18_i32_133 dim 1 : vector<32x384xf32>, i32 -> vector<32x384xf32>
    %c1_134 = arith.constant 1 : index
    %c0_135 = arith.constant 0 : index
    %c0_136 = arith.constant 0 : index
    %155 = vector.load %arg8[%c1_134, %c0_135, %c0_136] : memref<9x32x32xf32, #tpu.memory_space<vmem>>, vector<1x32x32xf32>
    %156 = vector.shape_cast %155 : vector<1x32x32xf32> to vector<32x32xf32>
    %cst_137 = arith.constant dense<0.000000e+00> : vector<32x384xf32>
    %157 = tpu.matmul %156, %154, %cst_137 {dimension_numbers = #tpu.dot_dimension_numbers<[1], [0], [0], [1], [0, 0, 1, 1], [], []>} : vector<32x32xf32>, vector<32x384xf32>, vector<32x384xf32> -> vector<32x384xf32>
    %158 = arith.addf %153, %157 : vector<32x384xf32>
    %c17_i32_138 = arith.constant 17 : i32
    %159 = tpu.dynamic_rotate %149 by %c17_i32_138 dim 1 : vector<32x384xf32>, i32 -> vector<32x384xf32>
    %c2_139 = arith.constant 2 : index
    %c0_140 = arith.constant 0 : index
    %c0_141 = arith.constant 0 : index
    %160 = vector.load %arg8[%c2_139, %c0_140, %c0_141] : memref<9x32x32xf32, #tpu.memory_space<vmem>>, vector<1x32x32xf32>
    %161 = vector.shape_cast %160 : vector<1x32x32xf32> to vector<32x32xf32>
    %cst_142 = arith.constant dense<0.000000e+00> : vector<32x384xf32>
    %162 = tpu.matmul %161, %159, %cst_142 {dimension_numbers = #tpu.dot_dimension_numbers<[1], [0], [0], [1], [0, 0, 1, 1], [], []>} : vector<32x32xf32>, vector<32x384xf32>, vector<32x384xf32> -> vector<32x384xf32>
    %163 = arith.addf %158, %162 : vector<32x384xf32>
    %c1_i32_143 = arith.constant 1 : i32
    %164 = tpu.dynamic_rotate %149 by %c1_i32_143 dim 1 : vector<32x384xf32>, i32 -> vector<32x384xf32>
    %c3_144 = arith.constant 3 : index
    %c0_145 = arith.constant 0 : index
    %c0_146 = arith.constant 0 : index
    %165 = vector.load %arg8[%c3_144, %c0_145, %c0_146] : memref<9x32x32xf32, #tpu.memory_space<vmem>>, vector<1x32x32xf32>
    %166 = vector.shape_cast %165 : vector<1x32x32xf32> to vector<32x32xf32>
    %cst_147 = arith.constant dense<0.000000e+00> : vector<32x384xf32>
    %167 = tpu.matmul %166, %164, %cst_147 {dimension_numbers = #tpu.dot_dimension_numbers<[1], [0], [0], [1], [0, 0, 1, 1], [], []>} : vector<32x32xf32>, vector<32x384xf32>, vector<32x384xf32> -> vector<32x384xf32>
    %168 = arith.addf %163, %167 : vector<32x384xf32>
    %c4_148 = arith.constant 4 : index
    %c0_149 = arith.constant 0 : index
    %c0_150 = arith.constant 0 : index
    %169 = vector.load %arg8[%c4_148, %c0_149, %c0_150] : memref<9x32x32xf32, #tpu.memory_space<vmem>>, vector<1x32x32xf32>
    %170 = vector.shape_cast %169 : vector<1x32x32xf32> to vector<32x32xf32>
    %cst_151 = arith.constant dense<0.000000e+00> : vector<32x384xf32>
    %171 = tpu.matmul %170, %149, %cst_151 {dimension_numbers = #tpu.dot_dimension_numbers<[1], [0], [0], [1], [0, 0, 1, 1], [], []>} : vector<32x32xf32>, vector<32x384xf32>, vector<32x384xf32> -> vector<32x384xf32>
    %172 = arith.addf %168, %171 : vector<32x384xf32>
    %c383_i32_152 = arith.constant 383 : i32
    %173 = tpu.dynamic_rotate %149 by %c383_i32_152 dim 1 : vector<32x384xf32>, i32 -> vector<32x384xf32>
    %c5_153 = arith.constant 5 : index
    %c0_154 = arith.constant 0 : index
    %c0_155 = arith.constant 0 : index
    %174 = vector.load %arg8[%c5_153, %c0_154, %c0_155] : memref<9x32x32xf32, #tpu.memory_space<vmem>>, vector<1x32x32xf32>
    %175 = vector.shape_cast %174 : vector<1x32x32xf32> to vector<32x32xf32>
    %cst_156 = arith.constant dense<0.000000e+00> : vector<32x384xf32>
    %176 = tpu.matmul %175, %173, %cst_156 {dimension_numbers = #tpu.dot_dimension_numbers<[1], [0], [0], [1], [0, 0, 1, 1], [], []>} : vector<32x32xf32>, vector<32x384xf32>, vector<32x384xf32> -> vector<32x384xf32>
    %177 = arith.addf %172, %176 : vector<32x384xf32>
    %c367_i32_157 = arith.constant 367 : i32
    %178 = tpu.dynamic_rotate %149 by %c367_i32_157 dim 1 : vector<32x384xf32>, i32 -> vector<32x384xf32>
    %c6_158 = arith.constant 6 : index
    %c0_159 = arith.constant 0 : index
    %c0_160 = arith.constant 0 : index
    %179 = vector.load %arg8[%c6_158, %c0_159, %c0_160] : memref<9x32x32xf32, #tpu.memory_space<vmem>>, vector<1x32x32xf32>
    %180 = vector.shape_cast %179 : vector<1x32x32xf32> to vector<32x32xf32>
    %cst_161 = arith.constant dense<0.000000e+00> : vector<32x384xf32>
    %181 = tpu.matmul %180, %178, %cst_161 {dimension_numbers = #tpu.dot_dimension_numbers<[1], [0], [0], [1], [0, 0, 1, 1], [], []>} : vector<32x32xf32>, vector<32x384xf32>, vector<32x384xf32> -> vector<32x384xf32>
    %182 = arith.addf %177, %181 : vector<32x384xf32>
    %c366_i32_162 = arith.constant 366 : i32
    %183 = tpu.dynamic_rotate %149 by %c366_i32_162 dim 1 : vector<32x384xf32>, i32 -> vector<32x384xf32>
    %c7_163 = arith.constant 7 : index
    %c0_164 = arith.constant 0 : index
    %c0_165 = arith.constant 0 : index
    %184 = vector.load %arg8[%c7_163, %c0_164, %c0_165] : memref<9x32x32xf32, #tpu.memory_space<vmem>>, vector<1x32x32xf32>
    %185 = vector.shape_cast %184 : vector<1x32x32xf32> to vector<32x32xf32>
    %cst_166 = arith.constant dense<0.000000e+00> : vector<32x384xf32>
    %186 = tpu.matmul %185, %183, %cst_166 {dimension_numbers = #tpu.dot_dimension_numbers<[1], [0], [0], [1], [0, 0, 1, 1], [], []>} : vector<32x32xf32>, vector<32x384xf32>, vector<32x384xf32> -> vector<32x384xf32>
    %187 = arith.addf %182, %186 : vector<32x384xf32>
    %c365_i32_167 = arith.constant 365 : i32
    %188 = tpu.dynamic_rotate %149 by %c365_i32_167 dim 1 : vector<32x384xf32>, i32 -> vector<32x384xf32>
    %c8_168 = arith.constant 8 : index
    %c0_169 = arith.constant 0 : index
    %c0_170 = arith.constant 0 : index
    %189 = vector.load %arg8[%c8_168, %c0_169, %c0_170] : memref<9x32x32xf32, #tpu.memory_space<vmem>>, vector<1x32x32xf32>
    %190 = vector.shape_cast %189 : vector<1x32x32xf32> to vector<32x32xf32>
    %cst_171 = arith.constant dense<0.000000e+00> : vector<32x384xf32>
    %191 = tpu.matmul %190, %188, %cst_171 {dimension_numbers = #tpu.dot_dimension_numbers<[1], [0], [0], [1], [0, 0, 1, 1], [], []>} : vector<32x32xf32>, vector<32x384xf32>, vector<32x384xf32> -> vector<32x384xf32>
    %192 = arith.addf %187, %191 : vector<32x384xf32>
    %c0_172 = arith.constant 0 : index
    %c0_173 = arith.constant 0 : index
    %193 = vector.load %arg9[%c0_172, %c0_173] : memref<32x1xf32, #tpu.memory_space<vmem>>, vector<32x1xf32>
    %194 = vector.broadcast %193 : vector<32x1xf32> to vector<32x384xf32>
    %195 = arith.addf %192, %194 : vector<32x384xf32>
    %cst_174 = arith.constant 0.000000e+00 : f32
    %196 = vector.broadcast %cst_174 : f32 to vector<32x384xf32>
    %197 = arith.maximumf %195, %196 : vector<32x384xf32>
    %198 = arith.mulf %197, %0 : vector<32x384xf32>
    %c19_i32_175 = arith.constant 19 : i32
    %199 = tpu.dynamic_rotate %198 by %c19_i32_175 dim 1 : vector<32x384xf32>, i32 -> vector<32x384xf32>
    %c0_176 = arith.constant 0 : index
    %c0_177 = arith.constant 0 : index
    %c0_178 = arith.constant 0 : index
    %200 = vector.load %arg10[%c0_176, %c0_177, %c0_178] : memref<9x32x32xf32, #tpu.memory_space<vmem>>, vector<1x32x32xf32>
    %201 = vector.shape_cast %200 : vector<1x32x32xf32> to vector<32x32xf32>
    %cst_179 = arith.constant dense<0.000000e+00> : vector<32x384xf32>
    %202 = tpu.matmul %201, %199, %cst_179 {dimension_numbers = #tpu.dot_dimension_numbers<[1], [0], [0], [1], [0, 0, 1, 1], [], []>} : vector<32x32xf32>, vector<32x384xf32>, vector<32x384xf32> -> vector<32x384xf32>
    %c18_i32_180 = arith.constant 18 : i32
    %203 = tpu.dynamic_rotate %198 by %c18_i32_180 dim 1 : vector<32x384xf32>, i32 -> vector<32x384xf32>
    %c1_181 = arith.constant 1 : index
    %c0_182 = arith.constant 0 : index
    %c0_183 = arith.constant 0 : index
    %204 = vector.load %arg10[%c1_181, %c0_182, %c0_183] : memref<9x32x32xf32, #tpu.memory_space<vmem>>, vector<1x32x32xf32>
    %205 = vector.shape_cast %204 : vector<1x32x32xf32> to vector<32x32xf32>
    %cst_184 = arith.constant dense<0.000000e+00> : vector<32x384xf32>
    %206 = tpu.matmul %205, %203, %cst_184 {dimension_numbers = #tpu.dot_dimension_numbers<[1], [0], [0], [1], [0, 0, 1, 1], [], []>} : vector<32x32xf32>, vector<32x384xf32>, vector<32x384xf32> -> vector<32x384xf32>
    %207 = arith.addf %202, %206 : vector<32x384xf32>
    %c17_i32_185 = arith.constant 17 : i32
    %208 = tpu.dynamic_rotate %198 by %c17_i32_185 dim 1 : vector<32x384xf32>, i32 -> vector<32x384xf32>
    %c2_186 = arith.constant 2 : index
    %c0_187 = arith.constant 0 : index
    %c0_188 = arith.constant 0 : index
    %209 = vector.load %arg10[%c2_186, %c0_187, %c0_188] : memref<9x32x32xf32, #tpu.memory_space<vmem>>, vector<1x32x32xf32>
    %210 = vector.shape_cast %209 : vector<1x32x32xf32> to vector<32x32xf32>
    %cst_189 = arith.constant dense<0.000000e+00> : vector<32x384xf32>
    %211 = tpu.matmul %210, %208, %cst_189 {dimension_numbers = #tpu.dot_dimension_numbers<[1], [0], [0], [1], [0, 0, 1, 1], [], []>} : vector<32x32xf32>, vector<32x384xf32>, vector<32x384xf32> -> vector<32x384xf32>
    %212 = arith.addf %207, %211 : vector<32x384xf32>
    %c1_i32_190 = arith.constant 1 : i32
    %213 = tpu.dynamic_rotate %198 by %c1_i32_190 dim 1 : vector<32x384xf32>, i32 -> vector<32x384xf32>
    %c3_191 = arith.constant 3 : index
    %c0_192 = arith.constant 0 : index
    %c0_193 = arith.constant 0 : index
    %214 = vector.load %arg10[%c3_191, %c0_192, %c0_193] : memref<9x32x32xf32, #tpu.memory_space<vmem>>, vector<1x32x32xf32>
    %215 = vector.shape_cast %214 : vector<1x32x32xf32> to vector<32x32xf32>
    %cst_194 = arith.constant dense<0.000000e+00> : vector<32x384xf32>
    %216 = tpu.matmul %215, %213, %cst_194 {dimension_numbers = #tpu.dot_dimension_numbers<[1], [0], [0], [1], [0, 0, 1, 1], [], []>} : vector<32x32xf32>, vector<32x384xf32>, vector<32x384xf32> -> vector<32x384xf32>
    %217 = arith.addf %212, %216 : vector<32x384xf32>
    %c4_195 = arith.constant 4 : index
    %c0_196 = arith.constant 0 : index
    %c0_197 = arith.constant 0 : index
    %218 = vector.load %arg10[%c4_195, %c0_196, %c0_197] : memref<9x32x32xf32, #tpu.memory_space<vmem>>, vector<1x32x32xf32>
    %219 = vector.shape_cast %218 : vector<1x32x32xf32> to vector<32x32xf32>
    %cst_198 = arith.constant dense<0.000000e+00> : vector<32x384xf32>
    %220 = tpu.matmul %219, %198, %cst_198 {dimension_numbers = #tpu.dot_dimension_numbers<[1], [0], [0], [1], [0, 0, 1, 1], [], []>} : vector<32x32xf32>, vector<32x384xf32>, vector<32x384xf32> -> vector<32x384xf32>
    %221 = arith.addf %217, %220 : vector<32x384xf32>
    %c383_i32_199 = arith.constant 383 : i32
    %222 = tpu.dynamic_rotate %198 by %c383_i32_199 dim 1 : vector<32x384xf32>, i32 -> vector<32x384xf32>
    %c5_200 = arith.constant 5 : index
    %c0_201 = arith.constant 0 : index
    %c0_202 = arith.constant 0 : index
    %223 = vector.load %arg10[%c5_200, %c0_201, %c0_202] : memref<9x32x32xf32, #tpu.memory_space<vmem>>, vector<1x32x32xf32>
    %224 = vector.shape_cast %223 : vector<1x32x32xf32> to vector<32x32xf32>
    %cst_203 = arith.constant dense<0.000000e+00> : vector<32x384xf32>
    %225 = tpu.matmul %224, %222, %cst_203 {dimension_numbers = #tpu.dot_dimension_numbers<[1], [0], [0], [1], [0, 0, 1, 1], [], []>} : vector<32x32xf32>, vector<32x384xf32>, vector<32x384xf32> -> vector<32x384xf32>
    %226 = arith.addf %221, %225 : vector<32x384xf32>
    %c367_i32_204 = arith.constant 367 : i32
    %227 = tpu.dynamic_rotate %198 by %c367_i32_204 dim 1 : vector<32x384xf32>, i32 -> vector<32x384xf32>
    %c6_205 = arith.constant 6 : index
    %c0_206 = arith.constant 0 : index
    %c0_207 = arith.constant 0 : index
    %228 = vector.load %arg10[%c6_205, %c0_206, %c0_207] : memref<9x32x32xf32, #tpu.memory_space<vmem>>, vector<1x32x32xf32>
    %229 = vector.shape_cast %228 : vector<1x32x32xf32> to vector<32x32xf32>
    %cst_208 = arith.constant dense<0.000000e+00> : vector<32x384xf32>
    %230 = tpu.matmul %229, %227, %cst_208 {dimension_numbers = #tpu.dot_dimension_numbers<[1], [0], [0], [1], [0, 0, 1, 1], [], []>} : vector<32x32xf32>, vector<32x384xf32>, vector<32x384xf32> -> vector<32x384xf32>
    %231 = arith.addf %226, %230 : vector<32x384xf32>
    %c366_i32_209 = arith.constant 366 : i32
    %232 = tpu.dynamic_rotate %198 by %c366_i32_209 dim 1 : vector<32x384xf32>, i32 -> vector<32x384xf32>
    %c7_210 = arith.constant 7 : index
    %c0_211 = arith.constant 0 : index
    %c0_212 = arith.constant 0 : index
    %233 = vector.load %arg10[%c7_210, %c0_211, %c0_212] : memref<9x32x32xf32, #tpu.memory_space<vmem>>, vector<1x32x32xf32>
    %234 = vector.shape_cast %233 : vector<1x32x32xf32> to vector<32x32xf32>
    %cst_213 = arith.constant dense<0.000000e+00> : vector<32x384xf32>
    %235 = tpu.matmul %234, %232, %cst_213 {dimension_numbers = #tpu.dot_dimension_numbers<[1], [0], [0], [1], [0, 0, 1, 1], [], []>} : vector<32x32xf32>, vector<32x384xf32>, vector<32x384xf32> -> vector<32x384xf32>
    %236 = arith.addf %231, %235 : vector<32x384xf32>
    %c365_i32_214 = arith.constant 365 : i32
    %237 = tpu.dynamic_rotate %198 by %c365_i32_214 dim 1 : vector<32x384xf32>, i32 -> vector<32x384xf32>
    %c8_215 = arith.constant 8 : index
    %c0_216 = arith.constant 0 : index
    %c0_217 = arith.constant 0 : index
    %238 = vector.load %arg10[%c8_215, %c0_216, %c0_217] : memref<9x32x32xf32, #tpu.memory_space<vmem>>, vector<1x32x32xf32>
    %239 = vector.shape_cast %238 : vector<1x32x32xf32> to vector<32x32xf32>
    %cst_218 = arith.constant dense<0.000000e+00> : vector<32x384xf32>
    %240 = tpu.matmul %239, %237, %cst_218 {dimension_numbers = #tpu.dot_dimension_numbers<[1], [0], [0], [1], [0, 0, 1, 1], [], []>} : vector<32x32xf32>, vector<32x384xf32>, vector<32x384xf32> -> vector<32x384xf32>
    %241 = arith.addf %236, %240 : vector<32x384xf32>
    %c0_219 = arith.constant 0 : index
    %c0_220 = arith.constant 0 : index
    %242 = vector.load %arg11[%c0_219, %c0_220] : memref<32x1xf32, #tpu.memory_space<vmem>>, vector<32x1xf32>
    %243 = vector.broadcast %242 : vector<32x1xf32> to vector<32x384xf32>
    %244 = arith.addf %241, %243 : vector<32x384xf32>
    %cst_221 = arith.constant 0.000000e+00 : f32
    %245 = vector.broadcast %cst_221 : f32 to vector<32x384xf32>
    %246 = arith.maximumf %244, %245 : vector<32x384xf32>
    %247 = arith.mulf %246, %0 : vector<32x384xf32>
    %c19_i32_222 = arith.constant 19 : i32
    %248 = tpu.dynamic_rotate %247 by %c19_i32_222 dim 1 : vector<32x384xf32>, i32 -> vector<32x384xf32>
    %c0_223 = arith.constant 0 : index
    %c0_224 = arith.constant 0 : index
    %c0_225 = arith.constant 0 : index
    %249 = vector.load %arg12[%c0_223, %c0_224, %c0_225] : memref<9x32x32xf32, #tpu.memory_space<vmem>>, vector<1x32x32xf32>
    %250 = vector.shape_cast %249 : vector<1x32x32xf32> to vector<32x32xf32>
    %cst_226 = arith.constant dense<0.000000e+00> : vector<32x384xf32>
    %251 = tpu.matmul %250, %248, %cst_226 {dimension_numbers = #tpu.dot_dimension_numbers<[1], [0], [0], [1], [0, 0, 1, 1], [], []>} : vector<32x32xf32>, vector<32x384xf32>, vector<32x384xf32> -> vector<32x384xf32>
    %c18_i32_227 = arith.constant 18 : i32
    %252 = tpu.dynamic_rotate %247 by %c18_i32_227 dim 1 : vector<32x384xf32>, i32 -> vector<32x384xf32>
    %c1_228 = arith.constant 1 : index
    %c0_229 = arith.constant 0 : index
    %c0_230 = arith.constant 0 : index
    %253 = vector.load %arg12[%c1_228, %c0_229, %c0_230] : memref<9x32x32xf32, #tpu.memory_space<vmem>>, vector<1x32x32xf32>
    %254 = vector.shape_cast %253 : vector<1x32x32xf32> to vector<32x32xf32>
    %cst_231 = arith.constant dense<0.000000e+00> : vector<32x384xf32>
    %255 = tpu.matmul %254, %252, %cst_231 {dimension_numbers = #tpu.dot_dimension_numbers<[1], [0], [0], [1], [0, 0, 1, 1], [], []>} : vector<32x32xf32>, vector<32x384xf32>, vector<32x384xf32> -> vector<32x384xf32>
    %256 = arith.addf %251, %255 : vector<32x384xf32>
    %c17_i32_232 = arith.constant 17 : i32
    %257 = tpu.dynamic_rotate %247 by %c17_i32_232 dim 1 : vector<32x384xf32>, i32 -> vector<32x384xf32>
    %c2_233 = arith.constant 2 : index
    %c0_234 = arith.constant 0 : index
    %c0_235 = arith.constant 0 : index
    %258 = vector.load %arg12[%c2_233, %c0_234, %c0_235] : memref<9x32x32xf32, #tpu.memory_space<vmem>>, vector<1x32x32xf32>
    %259 = vector.shape_cast %258 : vector<1x32x32xf32> to vector<32x32xf32>
    %cst_236 = arith.constant dense<0.000000e+00> : vector<32x384xf32>
    %260 = tpu.matmul %259, %257, %cst_236 {dimension_numbers = #tpu.dot_dimension_numbers<[1], [0], [0], [1], [0, 0, 1, 1], [], []>} : vector<32x32xf32>, vector<32x384xf32>, vector<32x384xf32> -> vector<32x384xf32>
    %261 = arith.addf %256, %260 : vector<32x384xf32>
    %c1_i32_237 = arith.constant 1 : i32
    %262 = tpu.dynamic_rotate %247 by %c1_i32_237 dim 1 : vector<32x384xf32>, i32 -> vector<32x384xf32>
    %c3_238 = arith.constant 3 : index
    %c0_239 = arith.constant 0 : index
    %c0_240 = arith.constant 0 : index
    %263 = vector.load %arg12[%c3_238, %c0_239, %c0_240] : memref<9x32x32xf32, #tpu.memory_space<vmem>>, vector<1x32x32xf32>
    %264 = vector.shape_cast %263 : vector<1x32x32xf32> to vector<32x32xf32>
    %cst_241 = arith.constant dense<0.000000e+00> : vector<32x384xf32>
    %265 = tpu.matmul %264, %262, %cst_241 {dimension_numbers = #tpu.dot_dimension_numbers<[1], [0], [0], [1], [0, 0, 1, 1], [], []>} : vector<32x32xf32>, vector<32x384xf32>, vector<32x384xf32> -> vector<32x384xf32>
    %266 = arith.addf %261, %265 : vector<32x384xf32>
    %c4_242 = arith.constant 4 : index
    %c0_243 = arith.constant 0 : index
    %c0_244 = arith.constant 0 : index
    %267 = vector.load %arg12[%c4_242, %c0_243, %c0_244] : memref<9x32x32xf32, #tpu.memory_space<vmem>>, vector<1x32x32xf32>
    %268 = vector.shape_cast %267 : vector<1x32x32xf32> to vector<32x32xf32>
    %cst_245 = arith.constant dense<0.000000e+00> : vector<32x384xf32>
    %269 = tpu.matmul %268, %247, %cst_245 {dimension_numbers = #tpu.dot_dimension_numbers<[1], [0], [0], [1], [0, 0, 1, 1], [], []>} : vector<32x32xf32>, vector<32x384xf32>, vector<32x384xf32> -> vector<32x384xf32>
    %270 = arith.addf %266, %269 : vector<32x384xf32>
    %c383_i32_246 = arith.constant 383 : i32
    %271 = tpu.dynamic_rotate %247 by %c383_i32_246 dim 1 : vector<32x384xf32>, i32 -> vector<32x384xf32>
    %c5_247 = arith.constant 5 : index
    %c0_248 = arith.constant 0 : index
    %c0_249 = arith.constant 0 : index
    %272 = vector.load %arg12[%c5_247, %c0_248, %c0_249] : memref<9x32x32xf32, #tpu.memory_space<vmem>>, vector<1x32x32xf32>
    %273 = vector.shape_cast %272 : vector<1x32x32xf32> to vector<32x32xf32>
    %cst_250 = arith.constant dense<0.000000e+00> : vector<32x384xf32>
    %274 = tpu.matmul %273, %271, %cst_250 {dimension_numbers = #tpu.dot_dimension_numbers<[1], [0], [0], [1], [0, 0, 1, 1], [], []>} : vector<32x32xf32>, vector<32x384xf32>, vector<32x384xf32> -> vector<32x384xf32>
    %275 = arith.addf %270, %274 : vector<32x384xf32>
    %c367_i32_251 = arith.constant 367 : i32
    %276 = tpu.dynamic_rotate %247 by %c367_i32_251 dim 1 : vector<32x384xf32>, i32 -> vector<32x384xf32>
    %c6_252 = arith.constant 6 : index
    %c0_253 = arith.constant 0 : index
    %c0_254 = arith.constant 0 : index
    %277 = vector.load %arg12[%c6_252, %c0_253, %c0_254] : memref<9x32x32xf32, #tpu.memory_space<vmem>>, vector<1x32x32xf32>
    %278 = vector.shape_cast %277 : vector<1x32x32xf32> to vector<32x32xf32>
    %cst_255 = arith.constant dense<0.000000e+00> : vector<32x384xf32>
    %279 = tpu.matmul %278, %276, %cst_255 {dimension_numbers = #tpu.dot_dimension_numbers<[1], [0], [0], [1], [0, 0, 1, 1], [], []>} : vector<32x32xf32>, vector<32x384xf32>, vector<32x384xf32> -> vector<32x384xf32>
    %280 = arith.addf %275, %279 : vector<32x384xf32>
    %c366_i32_256 = arith.constant 366 : i32
    %281 = tpu.dynamic_rotate %247 by %c366_i32_256 dim 1 : vector<32x384xf32>, i32 -> vector<32x384xf32>
    %c7_257 = arith.constant 7 : index
    %c0_258 = arith.constant 0 : index
    %c0_259 = arith.constant 0 : index
    %282 = vector.load %arg12[%c7_257, %c0_258, %c0_259] : memref<9x32x32xf32, #tpu.memory_space<vmem>>, vector<1x32x32xf32>
    %283 = vector.shape_cast %282 : vector<1x32x32xf32> to vector<32x32xf32>
    %cst_260 = arith.constant dense<0.000000e+00> : vector<32x384xf32>
    %284 = tpu.matmul %283, %281, %cst_260 {dimension_numbers = #tpu.dot_dimension_numbers<[1], [0], [0], [1], [0, 0, 1, 1], [], []>} : vector<32x32xf32>, vector<32x384xf32>, vector<32x384xf32> -> vector<32x384xf32>
    %285 = arith.addf %280, %284 : vector<32x384xf32>
    %c365_i32_261 = arith.constant 365 : i32
    %286 = tpu.dynamic_rotate %247 by %c365_i32_261 dim 1 : vector<32x384xf32>, i32 -> vector<32x384xf32>
    %c8_262 = arith.constant 8 : index
    %c0_263 = arith.constant 0 : index
    %c0_264 = arith.constant 0 : index
    %287 = vector.load %arg12[%c8_262, %c0_263, %c0_264] : memref<9x32x32xf32, #tpu.memory_space<vmem>>, vector<1x32x32xf32>
    %288 = vector.shape_cast %287 : vector<1x32x32xf32> to vector<32x32xf32>
    %cst_265 = arith.constant dense<0.000000e+00> : vector<32x384xf32>
    %289 = tpu.matmul %288, %286, %cst_265 {dimension_numbers = #tpu.dot_dimension_numbers<[1], [0], [0], [1], [0, 0, 1, 1], [], []>} : vector<32x32xf32>, vector<32x384xf32>, vector<32x384xf32> -> vector<32x384xf32>
    %290 = arith.addf %285, %289 : vector<32x384xf32>
    %c0_266 = arith.constant 0 : index
    %c0_267 = arith.constant 0 : index
    %291 = vector.load %arg13[%c0_266, %c0_267] : memref<32x1xf32, #tpu.memory_space<vmem>>, vector<32x1xf32>
    %292 = vector.broadcast %291 : vector<32x1xf32> to vector<32x384xf32>
    %293 = arith.addf %290, %292 : vector<32x384xf32>
    %c0_268 = arith.constant 0 : index
    %c0_269 = arith.constant 0 : index
    %294 = vector.load %arg15[%c0_268, %c0_269] : memref<384x256xf32, #tpu.memory_space<vmem>>, vector<384x256xf32>
    %cst_270 = arith.constant dense<0.000000e+00> : vector<32x256xf32>
    %295 = tpu.matmul %293, %294, %cst_270 {dimension_numbers = #tpu.dot_dimension_numbers<[1], [0], [0], [1], [0, 0, 1, 1], [], []>} : vector<32x384xf32>, vector<384x256xf32>, vector<32x256xf32> -> vector<32x256xf32>
    %c0_271 = arith.constant 0 : index
    %c0_272 = arith.constant 0 : index
    %c0_273 = arith.constant 0 : index
    %296 = vector.load %arg16[%c0_271, %c0_272, %c0_273] : memref<1x32x256xf32, #tpu.memory_space<vmem>>, vector<1x32x256xf32>
    %297 = vector.shape_cast %296 : vector<1x32x256xf32> to vector<32x256xf32>
    %298 = vector.shape_cast %295 : vector<32x256xf32> to vector<1x32x256xf32>
    tpu.vector_store %arg16[%c0_271, %c0_272, %c0_273], %298 {strides = array<i32>} : memref<1x32x256xf32, #tpu.memory_space<vmem>>, vector<1x32x256xf32>,
    return
  }
  func.func @transform_0(%arg0: i32) -> (i32, i32, i32) {
    %c0_i32 = arith.constant 0 : i32
    %c0_i32_0 = arith.constant 0 : i32
    %c0_i32_1 = arith.constant 0 : i32
    return %arg0, %c0_i32, %c0_i32_0 : i32, i32, i32
  }
  func.func @transform_1(%arg0: i32) -> (i32, i32, i32) {
    %c0_i32 = arith.constant 0 : i32
    %c0_i32_0 = arith.constant 0 : i32
    %c0_i32_1 = arith.constant 0 : i32
    %c0_i32_2 = arith.constant 0 : i32
    return %c0_i32, %c0_i32_0, %c0_i32_1 : i32, i32, i32
  }
  func.func @transform_2(%arg0: i32) -> (i32, i32) {
    %c0_i32 = arith.constant 0 : i32
    %c0_i32_0 = arith.constant 0 : i32
    %c0_i32_1 = arith.constant 0 : i32
    return %c0_i32, %c0_i32_0 : i32, i32
  }
  func.func @transform_3(%arg0: i32) -> (i32, i32, i32) {
    %c0_i32 = arith.constant 0 : i32
    %c0_i32_0 = arith.constant 0 : i32
    %c0_i32_1 = arith.constant 0 : i32
    %c0_i32_2 = arith.constant 0 : i32
    return %c0_i32, %c0_i32_0, %c0_i32_1 : i32, i32, i32
  }
  func.func @transform_4(%arg0: i32) -> (i32, i32) {
    %c0_i32 = arith.constant 0 : i32
    %c0_i32_0 = arith.constant 0 : i32
    %c0_i32_1 = arith.constant 0 : i32
    return %c0_i32, %c0_i32_0 : i32, i32
  }
  func.func @transform_5(%arg0: i32) -> (i32, i32, i32) {
    %c0_i32 = arith.constant 0 : i32
    %c0_i32_0 = arith.constant 0 : i32
    %c0_i32_1 = arith.constant 0 : i32
    %c0_i32_2 = arith.constant 0 : i32
    return %c0_i32, %c0_i32_0, %c0_i32_1 : i32, i32, i32
  }
  func.func @transform_6(%arg0: i32) -> (i32, i32) {
    %c0_i32 = arith.constant 0 : i32
    %c0_i32_0 = arith.constant 0 : i32
    %c0_i32_1 = arith.constant 0 : i32
    return %c0_i32, %c0_i32_0 : i32, i32
  }
  func.func @transform_7(%arg0: i32) -> (i32, i32, i32) {
    %c0_i32 = arith.constant 0 : i32
    %c0_i32_0 = arith.constant 0 : i32
    %c0_i32_1 = arith.constant 0 : i32
    %c0_i32_2 = arith.constant 0 : i32
    return %c0_i32, %c0_i32_0, %c0_i32_1 : i32, i32, i32
  }
  func.func @transform_8(%arg0: i32) -> (i32, i32) {
    %c0_i32 = arith.constant 0 : i32
    %c0_i32_0 = arith.constant 0 : i32
    %c0_i32_1 = arith.constant 0 : i32
    return %c0_i32, %c0_i32_0 : i32, i32
  }
  func.func @transform_9(%arg0: i32) -> (i32, i32, i32) {
    %c0_i32 = arith.constant 0 : i32
    %c0_i32_0 = arith.constant 0 : i32
    %c0_i32_1 = arith.constant 0 : i32
    %c0_i32_2 = arith.constant 0 : i32
    return %c0_i32, %c0_i32_0, %c0_i32_1 : i32, i32, i32
  }
  func.func @transform_10(%arg0: i32) -> (i32, i32) {
    %c0_i32 = arith.constant 0 : i32
    %c0_i32_0 = arith.constant 0 : i32
    %c0_i32_1 = arith.constant 0 : i32
    return %c0_i32, %c0_i32_0 : i32, i32
  }
  func.func @transform_11(%arg0: i32) -> (i32, i32, i32) {
    %c0_i32 = arith.constant 0 : i32
    %c0_i32_0 = arith.constant 0 : i32
    %c0_i32_1 = arith.constant 0 : i32
    %c0_i32_2 = arith.constant 0 : i32
    return %c0_i32, %c0_i32_0, %c0_i32_1 : i32, i32, i32
  }
  func.func @transform_12(%arg0: i32) -> (i32, i32) {
    %c0_i32 = arith.constant 0 : i32
    %c0_i32_0 = arith.constant 0 : i32
    %c0_i32_1 = arith.constant 0 : i32
    return %c0_i32, %c0_i32_0 : i32, i32
  }
  func.func @transform_13(%arg0: i32) -> (i32, i32) {
    %c0_i32 = arith.constant 0 : i32
    %c0_i32_0 = arith.constant 0 : i32
    %c0_i32_1 = arith.constant 0 : i32
    return %c0_i32, %c0_i32_0 : i32, i32
  }
  func.func @transform_14(%arg0: i32) -> (i32, i32) {
    %c0_i32 = arith.constant 0 : i32
    %c0_i32_0 = arith.constant 0 : i32
    %c0_i32_1 = arith.constant 0 : i32
    return %c0_i32, %c0_i32_0 : i32, i32
  }
  func.func @transform_15(%arg0: i32) -> (i32, i32, i32) {
    %c0_i32 = arith.constant 0 : i32
    %c0_i32_0 = arith.constant 0 : i32
    %c0_i32_1 = arith.constant 0 : i32
    return %arg0, %c0_i32, %c0_i32_0 : i32, i32, i32
  }
}

</mosaic_0001>

<bundles_post_ra>
// kernel: dip6_forward.1
= control target key start
LH: loop header
LB: loop body
LE: loop exit
PB: predicated region body
PF: predicated region fallthrough
CT: control target
= control target key end

     0   :  { %s11219_s18 = smov 0   ;;  %s17519_s0 = inlined_call_operand.vmem [shape: f32[2,4,384], index: 0, kind: input, shape index: {}]   ;;  %s17520_s1 = inlined_call_operand.vmem [shape: f32[9,32,4], index: 1, kind: input, shape index: {}]   ;;  %s17521_s2 = inlined_call_operand.vmem [shape: f32[32,1], index: 2, kind: input, shape index: {}]   ;;  %s17522_s3 = inlined_call_operand.vmem [shape: f32[9,32,32], index: 3, kind: input, shape index: {}]   ;;  %s17523_s4 = inlined_call_operand.vmem [shape: f32[32,1], index: 4, kind: input, shape index: {}]   ;;  %s17524_s5 = inlined_call_operand.vmem [shape: f32[9,32,32], index: 5, kind: input, shape index: {}]   ;;  %s17525_s6 = inlined_call_operand.vmem [shape: f32[32,1], index: 6, kind: input, shape index: {}]   ;;  %s17526_s7 = inlined_call_operand.vmem [shape: f32[9,32,32], index: 7, kind: input, shape index: {}]   ;;  %s17527_s8 = inlined_call_operand.vmem [shape: f32[32,1], index: 8, kind: input, shape index: {}]   ;;  %s17528_s9 = inlined_call_operand.vmem [shape: f32[9,32,32], index: 9, kind: input, shape index: {}]   ;;  %s17529_s10 = inlined_call_operand.vmem [shape: f32[32,1], index: 10, kind: input, shape index: {}]   ;;  %s17530_s11 = inlined_call_operand.vmem [shape: f32[9,32,32], index: 11, kind: input, shape index: {}]   ;;  %s17531_s12 = inlined_call_operand.vmem [shape: f32[32,1], index: 12, kind: input, shape index: {}]   ;;  %s17532_s13 = inlined_call_operand.vmem [shape: f32[32,384], index: 13, kind: input, shape index: {}]   ;;  %s17533_s14 = inlined_call_operand.vmem [shape: f32[384,256], index: 14, kind: input, shape index: {}]   ;;  %s17534_s15 = inlined_call_operand.vmem [shape: f32[2,32,256], index: 15, kind: output, shape index: {}]  }
   0x1   :  { %17557 = sst [smem:[#allocation41_spill]] %s17519_s0 }
   0x2   :  { %17558 = sst [smem:[#allocation42_spill]] %s17520_s1 }
   0x3 LB: > { %s8975_s19 = sadd.s32 4294967295, %s11128_s18   ;;  %p8979_p0 = scmp.ge.s32.totalorder %s11128_s18, 1  ;;  %s11128_s18 = sphi %s11219_s18, %s25_s18  }
   0x4   : > { %p437_p1 = scmp.lt.s32.totalorder %s11128_s18, 3 }
   0x6   : > { %p438_p2 = pnand %p8979_p0, %p437_p1 }
   0x8   : > { %441 = sbr.rel (%p438_p2) target bundleno = 3119 (0xc2f), region = 80 }
   0xd   : > { %p485_p3 = scmp.lt.s32.totalorder %s8975_s19, 1  ;;  %s17559_s0 = sld [smem:[#allocation41_spill]]  ;;  %v526_v22 = vlaneseq  ;;  %vm573_vm1 = vcmask 1043456   ;;  %vm560_vm2 = vcmask 31744   ;;  %vm1911_vm10 = vcmask 261120  }
   0xe   : > { %s17551_s24 = smov 19   ;;  %s17553_s25 = smov 18  }
   0xf   : > { %s17950_s19 = smov (!%p485_p3, %s8975_s19), 1  ;;  %s17549_s26 = smov 17   ;;  %v11273_v23 = vand.u32 127, %v526_v22 }
  0x10   : > { %s9853_s20 = smul.u32 12, %s17950_s19  ;;  %s17546_s27 = smov 1  }
  0x11   : > { %s17544_s28 = smov 127   ;;  %s17539_s29 = smov 111   ;;  %17560 = vst [vmem:[#allocation2_spill] sm:$0xff] %v11273_v23  ;;  %vm551_vm0 = vcmp.lt.s32.totalorder %v11273_v23, 18  ;;  %vm528_vm3 = vcmp.lt.s32.totalorder %v11273_v23, 19  ;;  %vm793_vm4 = vcmp.lt.s32.totalorder %v11273_v23, 17 }
  0x12   : > { %s17561_s1 = sld [smem:[#allocation42_spill]]  ;;  %vm937_vm5 = vcmp.lt.s32.totalorder %v11273_v23, 1  ;;  %s17537_s30 = smov 109   ;;  %vm1209_vm6 = vcmp.lt.s32.totalorder %v11273_v23, 127  ;;  %vm1353_vm7 = vcmp.lt.s32.totalorder %v11273_v23, 111  ;;  %vm1497_vm8 = vcmp.lt.s32.totalorder %v11273_v23, 110 }
  0x13   : > { %s489_s23 = scalar_lea.vmem %s17559_s0, %s9853_s20  ;;  %vm1641_vm9 = vcmp.lt.s32.totalorder %v11273_v23, 109  ;;  %s17639_s21 = smov 109  }
  0x14   : > { %v11233_v0 = vld [vmem:[%s489_s23] sm:$0xff]  ;;  %v11235_v1 = vld [vmem:[%s489_s23 + $0x8] sm:$0xf]  ;;  %s17535_s23 = smov 110   ;;  %s17715_s22 = smov 127  }
  0x15   : > { %511 = vst [vmem:[#allocation1] ss:$2 sm:$0xff] %v11233_v0  ;;  %s17795_s16 = smov 17  }
  0x16   : > { %513 = vst [vmem:[#allocation1 + $0x10] ss:$2 sm:$0xff] %v11235_v1 }
  0x18   : > { %v8983_v28 = vld [vmem:[%s17561_s1 + $0x20] sm:$0xff]  ;;  %v8984_v37 = vld [vmem:[%s17561_s1 + $0x28] sm:$0xff]  ;;  %v8985_v44 = vld [vmem:[%s17561_s1 + $0x30] sm:$0xff] }
  0x19   : > { %v532_v38 = vld [vmem:[%s17561_s1] sm:$0xff]  ;;  %v533_v48 = vld [vmem:[%s17561_s1 + $0x8] sm:$0xff]  ;;  %v8986_v50 = vld [vmem:[%s17561_s1 + $0x38] sm:$0xff] }
  0x1a   : > { %v534_v51 = vld [vmem:[%s17561_s1 + $0x10] sm:$0xff]  ;;  %v535_v58 = vld [vmem:[%s17561_s1 + $0x18] sm:$0xff]  ;;  %v9017_v60 = vld [vmem:[%s17561_s1 + $0x40] sm:$0xff] }
  0x1b   : > { %v9018_v63 = vld [vmem:[%s17561_s1 + $0x48] sm:$0xff]  ;;  %v9057_v22 = vld [vmem:[%s17561_s1 + $0x90] sm:$0xff] }
  0x1c   : > { %v514_v2 = vld.sshfl [vmem:[#allocation1] sm:$0xff pattern:$0x75316420]  ;;  %v515_v3 = vld.sshfl [vmem:[#allocation1 + $0x8] sm:$0xff pattern:$0x75316420] }
  0x1d   : > { %536 = vst [vmem:[#allocation1] ss:$2 sm:$0xff] %v11233_v0  ;;  %v516_v4 = vld.sshfl [vmem:[#allocation1 + $0x10] sm:$0xff pattern:$0x75316420] }
  0x1e   : > { %538 = vst [vmem:[#allocation1 + $0x10] ss:$2 sm:$0xff] %v11235_v1  ;;  %524 = vrot.lane.b32.xlu2 %v516_v4, %s17551_s24 }
  0x24   : > { %v540_v5 = vld.sshfl [vmem:[#allocation1 + $0x8] sm:$0xff pattern:$0x75316420]  ;;  %v539_v6 = vld.sshfl [vmem:[#allocation1] sm:$0xff pattern:$0x75316420] }
  0x25   : > { %547 = vrot.lane.b32.xlu0 %v540_v5, %s17553_s25  ;;  %545 = vrot.lane.b32.xlu1 %v539_v6, %s17553_s25  ;;  %778 = vst [vmem:[#allocation1] ss:$2 sm:$0xff] %v11233_v0  ;;  %v541_v7 = vld.sshfl [vmem:[#allocation1 + $0x10] sm:$0xff pattern:$0x75316420] }
  0x26   : > { %780 = vst [vmem:[#allocation1 + $0x10] ss:$2 sm:$0xff] %v11235_v1 }
  0x2c   : > { %v781_v8 = vld.sshfl [vmem:[#allocation1] sm:$0xff pattern:$0x75316420]  ;;  %v782_v9 = vld.sshfl [vmem:[#allocation1 + $0x8] sm:$0xff pattern:$0x75316420] }
  0x2d   : > { %549 = vrot.lane.b32.xlu0 %v541_v7, %s17553_s25  ;;  %520 = vrot.lane.b32.xlu1 %v514_v2, %s17551_s24  ;;  %v783_v10 = vld.sshfl [vmem:[#allocation1 + $0x10] sm:$0xff pattern:$0x75316420]  ;;  %922 = vst [vmem:[#allocation1] ss:$2 sm:$0xff] %v11233_v0  ;;  %v9036_v2 = vld [vmem:[%s17561_s1 + $0x60] sm:$0xff] }
  0x2e   : > { %924 = vst [vmem:[#allocation1 + $0x10] ss:$2 sm:$0xff] %v11235_v1  ;;  %787 = vrot.lane.b32.xlu2 %v781_v8, %s17549_s26  ;;  %v9037_v7 = vld [vmem:[%s17561_s1 + $0x68] sm:$0xff]  ;;  %v9038_v8 = vld [vmem:[%s17561_s1 + $0x70] sm:$0xff] }
  0x34   : > { %v926_v11 = vld.sshfl [vmem:[#allocation1 + $0x8] sm:$0xff pattern:$0x75316420]  ;;  %v925_v12 = vld.sshfl [vmem:[#allocation1] sm:$0xff pattern:$0x75316420] }
  0x35   : > { %522 = vrot.lane.b32.xlu1 %v515_v3, %s17551_s24  ;;  %791 = vrot.lane.b32.xlu0 %v783_v10, %s17549_s26  ;;  %1071 = vst [vmem:[#allocation1] ss:$2 sm:$0xff] %v11233_v0  ;;  %v927_v13 = vld.sshfl [vmem:[#allocation1 + $0x10] sm:$0xff pattern:$0x75316420] }
  0x36   : > { %789 = vrot.lane.b32.xlu2 %v782_v9, %s17549_s26  ;;  %1073 = vst [vmem:[#allocation1 + $0x10] ss:$2 sm:$0xff] %v11235_v1 }
  0x3c   : > { %v11256_v14 = vld.sshfl [vmem:[#allocation1] sm:$0xff pattern:$0x75316420]  ;;  %v11258_v15 = vld.sshfl [vmem:[#allocation1 + $0x8] sm:$0xff pattern:$0x75316420] }
  0x3d   : > { %933 = vrot.lane.b32.xlu1 %v926_v11, %s17546_s27  ;;  %931 = vrot.lane.b32.xlu0 %v925_v12, %s17546_s27  ;;  %1194 = vst [vmem:[#allocation1] ss:$2 sm:$0xff] %v11233_v0  ;;  %v11263_v16 = vld.sshfl [vmem:[#allocation1 + $0x10] sm:$0xff pattern:$0x75316420] }
  0x3e   : > { %1196 = vst [vmem:[#allocation1 + $0x10] ss:$2 sm:$0xff] %v11235_v1  ;;  %935 = vrot.lane.b32.xlu2 %v927_v13, %s17546_s27  ;;  %v9039_v13 = vld [vmem:[%s17561_s1 + $0x78] sm:$0xff] }
  0x44   : > { %v1198_v17 = vld.sshfl [vmem:[#allocation1 + $0x8] sm:$0xff pattern:$0x75316420]  ;;  %v1197_v18 = vld.sshfl [vmem:[#allocation1] sm:$0xff pattern:$0x75316420] }
  0x45   : > { %1205 = vrot.lane.b32.xlu1 %v1198_v17, %s17544_s28  ;;  %1203 = vrot.lane.b32.xlu0 %v1197_v18, %s17544_s28  ;;  %1338 = vst [vmem:[#allocation1] ss:$2 sm:$0xff] %v11233_v0  ;;  %v1199_v19 = vld.sshfl [vmem:[#allocation1 + $0x10] sm:$0xff pattern:$0x75316420] }
  0x46   : > { %1340 = vst [vmem:[#allocation1 + $0x10] ss:$2 sm:$0xff] %v11235_v1 }
  0x4c   : > { %v1342_v20 = vld.sshfl [vmem:[#allocation1 + $0x8] sm:$0xff pattern:$0x75316420]  ;;  %v1341_v25 = vld.sshfl [vmem:[#allocation1] sm:$0xff pattern:$0x75316420] }
  0x4d   : > { %1207 = vrot.lane.b32.xlu1 %v1199_v19, %s17544_s28  ;;  %1349 = vrot.lane.b32.xlu0 %v1342_v20, %s17539_s29  ;;  %1482 = vst [vmem:[#allocation1] ss:$2 sm:$0xff] %v11233_v0  ;;  %v1343_v30 = vld.sshfl [vmem:[#allocation1 + $0x10] sm:$0xff pattern:$0x75316420]  ;;  %v9056_v19 = vld [vmem:[%s17561_s1 + $0x88] sm:$0xff] }
  0x4e   : > { %1347 = vrot.lane.b32.xlu2 %v1341_v25, %s17539_s29  ;;  %1484 = vst [vmem:[#allocation1 + $0x10] ss:$2 sm:$0xff] %v11235_v1  ;;  %v9074_v20 = vld [vmem:[%s17561_s1 + $0xa0] sm:$0xff]  ;;  %v9058_v25 = vld [vmem:[%s17561_s1 + $0x98] sm:$0xff] }
  0x54   : > { %v1486_v41 = vld.sshfl [vmem:[#allocation1 + $0x8] sm:$0xff pattern:$0x75316420]  ;;  %v1485_v59 = vld.sshfl [vmem:[#allocation1] sm:$0xff pattern:$0x75316420] }
  0x55   : > { %v1487_v40 = vld.sshfl [vmem:[#allocation1 + $0x10] sm:$0xff pattern:$0x75316420]  ;;  %1493 = vrot.lane.b32.xlu0 %v1486_v41, %s17535_s23  ;;  %1626 = vst [vmem:[#allocation1] ss:$2 sm:$0xff] %v11233_v0 }
  0x56   : > { %1351 = vrot.lane.b32.xlu2 %v1343_v30, %s17539_s29  ;;  %1628 = vst [vmem:[#allocation1 + $0x10] ss:$2 sm:$0xff] %v11235_v1  ;;  %1495 = vrot.lane.b32.xlu1 %v1487_v40, %s17535_s23  ;;  %v9019_v0 = vld [vmem:[%s17561_s1 + $0x50] sm:$0xff]  ;;  %v9020_v1 = vld [vmem:[%s17561_s1 + $0x58] sm:$0xff]  ;;  %s17636_s29 = smov 111  }
  0x5c   : > { %v1629_v62 = vld.sshfl [vmem:[#allocation1] sm:$0xff pattern:$0x75316420]  ;;  %v1630_v3 = vld.sshfl [vmem:[#allocation1 + $0x8] sm:$0xff pattern:$0x75316420] }
  0x5d   : > { %v1631_v61 = vld.sshfl [vmem:[#allocation1 + $0x10] sm:$0xff pattern:$0x75316420]  ;;  %1635 = vrot.lane.b32.xlu0 %v1629_v62, %s17537_s30 }
  0x5e   : > { %1491 = vrot.lane.b32.xlu2 %v1485_v59, %s17535_s23  ;;  %1639 = vrot.lane.b32.xlu1 %v1631_v61, %s17537_s30 }
  0x66   : > { %1637 = vrot.lane.b32.xlu2 %v1630_v3, %s17537_s30  ;;  %s17637_s30 = smov 110  }
  0x78   : > { %v525_v21 = vpop.permute.xlu2 %524 }
  0x88   : > { %v788_v24 = vpop.permute.xlu2 %787 }
  0x90   : > { %v790_v31 = vpop.permute.xlu2 %789 }
  0x91   : > { %v795_v39 = vsel %vm793_vm4, %v788_v24, %v790_v31 }
  0x97   : > { %v548_v26 = vpop.permute.xlu0 %547  ;;  %v546_v27 = vpop.permute.xlu1 %545 }
  0x98   : > { %v553_v29 = vsel %vm551_vm0, %v546_v27, %v548_v26  ;;  %v936_v52 = vpop.permute.xlu2 %935 }
  0x99   : > { %8992 = vmatpush.msk.msra.mxu1 %vm573_vm1, %v553_v29 }
  0x9a   : > { %8993 = vmatmul.msk.f32.vlgmr.msra.gmra.mxu1 %vm560_vm2, %v8983_v28 }
  0x9f   : > { %v550_v32 = vpop.permute.xlu0 %549  ;;  %v521_v33 = vpop.permute.xlu1 %520 }
  0xa0   : > { %v554_v34 = vsel %vm551_vm0, %v550_v32, %v546_v27  ;;  %v552_v35 = vsel %vm551_vm0, %v548_v26, %v550_v32  ;;  %v531_v36 = vsel %vm528_vm3, %v525_v21, %v521_v33  ;;  %v9076_v26 = vld [vmem:[%s17561_s1 + $0xb0] sm:$0xff] }
  0xa1   : > { %8987 = vmatpush.msk.msra.mxu0 %vm573_vm1, %v554_v34  ;;  %8997 = vmatpush.msk.msra.mxu2 %vm573_vm1, %v552_v35 }
  0xa2   : > { %9002 = vmatpush.msk.msra.mxu3 %vm573_vm1, %v531_v36  ;;  %8988 = vmatmul.msk.f32.vlgmr.msra.gmra.mxu0 %vm560_vm2, %v8983_v28 }
  0xa3   : > { %8994 = vmatmul.msk.f32.gmra.mxu1 %vm560_vm2, %v8984_v37  ;;  %8998 = vmatmul.msk.f32.vlgmr.msra.gmra.mxu2 %vm560_vm2, %v8983_v28  ;;  %v9077_v28 = vld [vmem:[%s17561_s1 + $0xb8] sm:$0xff] }
  0xa4   : > { %9003 = vmatmul.msk.f32.vlgmr.msra.gmra.mxu3 %vm560_vm2, %v532_v38 }
  0xa5   : > { %9026 = vmatpush.msk.msrb.mxu3 %vm573_vm1, %v795_v39 }
  0xa7   : > { %v523_v42 = vpop.permute.xlu1 %522  ;;  %v792_v43 = vpop.permute.xlu0 %791 }
  0xa8   : > { %v529_v45 = vsel %vm528_vm3, %v523_v42, %v525_v21  ;;  %v530_v46 = vsel %vm528_vm3, %v521_v33, %v523_v42  ;;  %v796_v47 = vsel %vm793_vm4, %v792_v43, %v788_v24  ;;  %v794_v49 = vsel %vm793_vm4, %v790_v31, %v792_v43  ;;  %v1348_v12 = vpop.permute.xlu2 %1347  ;;  %v9075_v24 = vld [vmem:[%s17561_s1 + $0xa8] sm:$0xff] }
  0xa9   : > { %9012 = vmatpush.msk.msrb.mxu1 %vm573_vm1, %v529_v45  ;;  %9007 = vmatpush.msk.msrb.mxu0 %vm573_vm1, %v530_v46  ;;  %v9094_v42 = vld [vmem:[%s17561_s1 + $0xc8] sm:$0xff] }
  0xaa   : > { %8989 = vmatmul.msk.f32.gmra.mxu0 %vm560_vm2, %v8984_v37  ;;  %9021 = vmatpush.msk.msrb.mxu2 %vm573_vm1, %v796_v47  ;;  %v9095_v47 = vld [vmem:[%s17561_s1 + $0xd0] sm:$0xff] }
  0xab   : > { %8995 = vmatmul.msk.f32.gmra.mxu1 %vm560_vm2, %v8985_v44  ;;  %8999 = vmatmul.msk.f32.gmra.mxu2 %vm560_vm2, %v8984_v37  ;;  %v9093_v37 = vld [vmem:[%s17561_s1 + $0xc0] sm:$0xff] }
  0xac   : > { %9004 = vmatmul.msk.f32.gmra.mxu3 %vm560_vm2, %v533_v48  ;;  %9031 = vmatpush.msk.msra.mxu0 %vm573_vm1, %v794_v49 }
  0xaf   : > { %v934_v53 = vpop.permute.xlu1 %933  ;;  %v932_v55 = vpop.permute.xlu0 %931 }
  0xb0   : > { %v938_v54 = vsel %vm937_vm5, %v934_v53, %v936_v52  ;;  %v939_v56 = vsel %vm937_vm5, %v932_v55, %v934_v53  ;;  %v940_v57 = vsel %vm937_vm5, %v936_v52, %v932_v55  ;;  %v9096_v52 = vld [vmem:[%s17561_s1 + $0xd8] sm:$0xff]  ;;  %v9112_v53 = vld [vmem:[%s17561_s1 + $0xe0] sm:$0xff] }
  0xb1   : > { %9050 = vmatpush.msk.msra.mxu3 %vm573_vm1, %v938_v54  ;;  %9040 = vmatpush.msk.msra.mxu1 %vm573_vm1, %v940_v57 }
  0xb2   : > { %8990 = vmatmul.msk.f32.gmra.mxu0 %vm560_vm2, %v8985_v44  ;;  %9045 = vmatpush.msk.msra.mxu2 %vm573_vm1, %v939_v56 }
  0xb3   : > { %8996 = vmatmul.msk.f32.gmra.mxu1 %vm560_vm2, %v8986_v50  ;;  %9000 = vmatmul.msk.f32.gmra.mxu2 %vm560_vm2, %v8985_v44 }
  0xb4   : > { %9005 = vmatmul.msk.f32.gmra.mxu3 %vm560_vm2, %v534_v51 }
  0xb7   : > { %v1206_v4 = vpop.permute.xlu1 %1205  ;;  %v1204_v5 = vpop.permute.xlu0 %1203 }
  0xb8   : > { %v1211_v6 = vsel %vm1209_vm6, %v1204_v5, %v1206_v4 }
  0xba   : > { %8991 = vmatmul.msk.f32.gmra.mxu0 %vm560_vm2, %v8986_v50 }
  0xbb   : > { %9001 = vmatmul.msk.f32.gmra.mxu2 %vm560_vm2, %v8986_v50  ;;  %9013 = vmatmul.msk.f32.vlgmr.msrb.gmra.mxu1 %vm560_vm2, %v532_v38 }
  0xbc   : > { %9006 = vmatmul.msk.f32.gmra.mxu3 %vm560_vm2, %v535_v58  ;;  %9064 = vmatpush.msk.msrb.mxu1 %vm573_vm1, %v11258_v15  ;;  %v1352_v15 = vpop.permute.xlu2 %1351 }
  0xbd   : > { %v1356_v21 = vsel %vm1353_vm7, %v1352_v15, %v1348_v12 }
  0xbf   : > { %v1208_v9 = vpop.permute.xlu1 %1207 }
  0xc0   : > { %v1210_v10 = vsel %vm1209_vm6, %v1206_v4, %v1208_v9  ;;  %v1212_v11 = vsel %vm1209_vm6, %v1208_v9, %v1204_v5 }
  0xc2   : > { %9008 = vmatmul.msk.f32.vlgmr.msrb.gmra.mxu0 %vm560_vm2, %v532_v38 }
  0xc3   : > { %9014 = vmatmul.msk.f32.gmra.mxu1 %vm560_vm2, %v533_v48  ;;  %9022 = vmatmul.msk.f32.vlgmr.msrb.gmra.mxu2 %vm560_vm2, %v9017_v60 }
  0xc4   : > { %9027 = vmatmul.msk.f32.vlgmr.msrb.gmra.mxu3 %vm560_vm2, %v9017_v60  ;;  %9069 = vmatpush.msk.msrb.mxu2 %vm573_vm1, %v11263_v16  ;;  %v9055_v16 = vld [vmem:[%s17561_s1 + $0x80] sm:$0xff]  ;;  %v1492_v32 = vpop.permute.xlu2 %1491 }
  0xc5   : > { %9059 = vmatpush.msk.msrb.mxu0 %vm573_vm1, %v11256_v14  ;;  %9078 = vmatpush.msk.msrb.mxu3 %vm573_vm1, %v1211_v6  ;;  %v1350_v14 = vpop.permute.xlu0 %1349 }
  0xc6   : > { %v1355_v17 = vsel %vm1353_vm7, %v1348_v12, %v1350_v14  ;;  %v1354_v18 = vsel %vm1353_vm7, %v1350_v14, %v1352_v15 }
  0xc8   : > { %v1496_v29 = vpop.permute.xlu1 %1495 }
  0xc9   : > { %v1500_v34 = vsel %vm1497_vm8, %v1496_v29, %v1492_v32 }
  0xca   : > { %9009 = vmatmul.msk.f32.gmra.mxu0 %vm560_vm2, %v533_v48 }
  0xcb   : > { %9015 = vmatmul.msk.f32.gmra.mxu1 %vm560_vm2, %v534_v51  ;;  %9023 = vmatmul.msk.f32.gmra.mxu2 %vm560_vm2, %v9018_v63 }
  0xcc   : > { %9028 = vmatmul.msk.f32.gmra.mxu3 %vm560_vm2, %v9018_v63  ;;  %v1638_v55 = vpop.permute.xlu2 %1637 }
  0xcd   : > { %v1494_v30 = vpop.permute.xlu0 %1493 }
  0xce   : > { %v1498_v31 = vsel %vm1497_vm8, %v1494_v30, %v1496_v29  ;;  %v1499_v33 = vsel %vm1497_vm8, %v1492_v32, %v1494_v30  ;;  %v1771_v32 = vld [vmem:[%s17521_s2 + $0x8] sm:$0xff] }
  0xd0   : > { %v1640_v54 = vpop.permute.xlu1 %1639 }
  0xd1   : > { %v1642_v56 = vsel %vm1641_vm9, %v1638_v55, %v1640_v54 }
  0xd2   : > { %9010 = vmatmul.msk.f32.gmra.mxu0 %vm560_vm2, %v534_v51 }
  0xd3   : > { %9016 = vmatmul.msk.f32.gmra.mxu1 %vm560_vm2, %v535_v58  ;;  %9024 = vmatmul.msk.f32.gmra.mxu2 %vm560_vm2, %v9019_v0 }
  0xd4   : > { %9029 = vmatmul.msk.f32.gmra.mxu3 %vm560_vm2, %v9019_v0 }
  0xd5   : > { %v1636_v57 = vpop.permute.xlu0 %1635 }
  0xd6   : > { %v1644_v59 = vsel %vm1641_vm9, %v1640_v54, %v1636_v57 }
  0xda   : > { %9011 = vmatmul.msk.f32.gmra.mxu0 %vm560_vm2, %v535_v58  ;;  %v1643_v58 = vsel %vm1641_vm9, %v1636_v57, %v1638_v55 }
  0xdb   : > { %9025 = vmatmul.msk.f32.gmra.mxu2 %vm560_vm2, %v9020_v1  ;;  %9041 = vmatmul.msk.f32.vlgmr.msra.gmra.mxu1 %vm560_vm2, %v9036_v2 }
  0xdc   : > { %9030 = vmatmul.msk.f32.gmra.mxu3 %vm560_vm2, %v9020_v1  ;;  %9088 = vmatpush.msk.msra.mxu1 %vm573_vm1, %v1212_v11 }
  0xe2   : > { %9032 = vmatmul.msk.f32.vlgmr.msra.gmra.mxu0 %vm560_vm2, %v9017_v60 }
  0xe3   : > { %9042 = vmatmul.msk.f32.gmra.mxu1 %vm560_vm2, %v9037_v7  ;;  %9046 = vmatmul.msk.f32.vlgmr.msra.gmra.mxu2 %vm560_vm2, %v9036_v2 }
  0xe4   : > { %9051 = vmatmul.msk.f32.vlgmr.msra.gmra.mxu3 %vm560_vm2, %v9036_v2  ;;  %9083 = vmatpush.msk.msra.mxu0 %vm573_vm1, %v1210_v10  ;;  %v1772_v2 = vld [vmem:[%s17521_s2 + $0x10] sm:$0xff] }
  0xe5   : > { %9097 = vmatpush.msk.msra.mxu2 %vm573_vm1, %v1355_v17  ;;  %9102 = vmatpush.msk.msra.mxu3 %vm573_vm1, %v1354_v18  ;;  %v9131_v18 = vld [vmem:[%s17561_s1 + $0x100] sm:$0xff] }
  0xea   : > { %9033 = vmatmul.msk.f32.gmra.mxu0 %vm560_vm2, %v9018_v63 }
  0xeb   : > { %9043 = vmatmul.msk.f32.gmra.mxu1 %vm560_vm2, %v9038_v8  ;;  %9047 = vmatmul.msk.f32.gmra.mxu2 %vm560_vm2, %v9037_v7 }
  0xec   : > { %9052 = vmatmul.msk.f32.gmra.mxu3 %vm560_vm2, %v9037_v7  ;;  %v9114_v7 = vld [vmem:[%s17561_s1 + $0xf0] sm:$0xff] }
  0xf2   : > { %9034 = vmatmul.msk.f32.gmra.mxu0 %vm560_vm2, %v9019_v0  ;;  %v9113_v0 = vld [vmem:[%s17561_s1 + $0xe8] sm:$0xff] }
  0xf3   : > { %9044 = vmatmul.msk.f32.gmra.mxu1 %vm560_vm2, %v9039_v13  ;;  %9048 = vmatmul.msk.f32.gmra.mxu2 %vm560_vm2, %v9038_v8 }
  0xf4   : > { %9053 = vmatmul.msk.f32.gmra.mxu3 %vm560_vm2, %v9038_v8  ;;  %v1770_v8 = vld [vmem:[%s17521_s2] sm:$0xff] }
  0xfa   : > { %9035 = vmatmul.msk.f32.gmra.mxu0 %vm560_vm2, %v9020_v1  ;;  %v11138_v1 = vmov 0  }
  0xfb   : > { %9049 = vmatmul.msk.f32.gmra.mxu2 %vm560_vm2, %v9039_v13  ;;  %9065 = vmatmul.msk.f32.vlgmr.msrb.gmra.mxu1 %vm560_vm2, %v9055_v16 }
  0xfc   : > { %9054 = vmatmul.msk.f32.gmra.mxu3 %vm560_vm2, %v9039_v13  ;;  %9116 = vmatpush.msk.msrb.mxu1 %vm573_vm1, %v1499_v33  ;;  %v9115_v13 = vld [vmem:[%s17561_s1 + $0xf8] sm:$0xff] }
  0xfd   : > { %9872 = vset.pattern.permute.xlu1 %v11138_v1  ;;  %9871 = vset.pattern.permute.xlu0 %v11138_v1 }
  0xfe   : > { %1786 = vperm.xlu1 %9872, %v1772_v2   ;;  %9873 = vset.pattern.permute.xlu2 %v11138_v1 }
  0xff   : > { %1781 = vperm.xlu2 %9873, %v1771_v32  }
 0x102   : > { %9060 = vmatmul.msk.f32.vlgmr.msrb.gmra.mxu0 %vm560_vm2, %v9055_v16 }
 0x103   : > { %9066 = vmatmul.msk.f32.gmra.mxu1 %vm560_vm2, %v9056_v19  ;;  %9070 = vmatmul.msk.f32.vlgmr.msrb.gmra.mxu2 %vm560_vm2, %v9055_v16 }
 0x104   : > { %9079 = vmatmul.msk.f32.vlgmr.msrb.gmra.mxu3 %vm560_vm2, %v9074_v20  ;;  %9107 = vmatpush.msk.msrb.mxu0 %vm573_vm1, %v1356_v21 }
 0x105   : > { %9121 = vmatpush.msk.msrb.mxu2 %vm573_vm1, %v1498_v31  ;;  %9126 = vmatpush.msk.msrb.mxu3 %vm573_vm1, %v1500_v34  ;;  %v9133_v31 = vld [vmem:[%s17561_s1 + $0x110] sm:$0xff] }
 0x106   : > { %1776 = vperm.xlu1 %9872, %v1770_v8  }
 0x10a   : > { %9061 = vmatmul.msk.f32.gmra.mxu0 %vm560_vm2, %v9056_v19 }
 0x10b   : > { %9067 = vmatmul.msk.f32.gmra.mxu1 %vm560_vm2, %v9057_v22  ;;  %9071 = vmatmul.msk.f32.gmra.mxu2 %vm560_vm2, %v9056_v19 }
 0x10c   : > { %9080 = vmatmul.msk.f32.gmra.mxu3 %vm560_vm2, %v9075_v24 }
 0x112   : > { %9062 = vmatmul.msk.f32.gmra.mxu0 %vm560_vm2, %v9057_v22 }
 0x113   : > { %9068 = vmatmul.msk.f32.gmra.mxu1 %vm560_vm2, %v9058_v25  ;;  %9072 = vmatmul.msk.f32.gmra.mxu2 %vm560_vm2, %v9057_v22 }
 0x114   : > { %9081 = vmatmul.msk.f32.gmra.mxu3 %vm560_vm2, %v9076_v26 }
 0x117   : > { %v11483_v27 = vpop.f32.mrf.mxu1 }
 0x11a   : > { %9063 = vmatmul.msk.f32.gmra.mxu0 %vm560_vm2, %v9058_v25 }
 0x11b   : > { %9073 = vmatmul.msk.f32.gmra.mxu2 %vm560_vm2, %v9058_v25  ;;  %9089 = vmatmul.msk.f32.vlgmr.msra.gmra.mxu1 %vm560_vm2, %v9074_v20  ;;  %v1773_v25 = vld [vmem:[%s17521_s2 + $0x18] sm:$0xff] }
 0x11c   : > { %9082 = vmatmul.msk.f32.gmra.mxu3 %vm560_vm2, %v9077_v28  ;;  %9140 = vmatpush.msk.msra.mxu1 %vm573_vm1, %v1642_v56 }
 0x11d   : > { %1791 = vperm.xlu0 %9871, %v1773_v25  }
 0x11f   : > { %v11502_v35 = vpop.f32.mrf.mxu0 }
 0x120   : > { %v11504_v36 = vpop.f32.mrf.mxu1 }
 0x122   : > { %9084 = vmatmul.msk.f32.vlgmr.msra.gmra.mxu0 %vm560_vm2, %v9074_v20 }
 0x123   : > { %9090 = vmatmul.msk.f32.gmra.mxu1 %vm560_vm2, %v9075_v24  ;;  %9098 = vmatmul.msk.f32.vlgmr.msra.gmra.mxu2 %vm560_vm2, %v9093_v37 }
 0x124   : > { %9103 = vmatmul.msk.f32.vlgmr.msra.gmra.mxu3 %vm560_vm2, %v9093_v37  ;;  %9135 = vmatpush.msk.msra.mxu0 %vm573_vm1, %v1643_v58 }
 0x125   : > { %9145 = vmatpush.msk.msra.mxu2 %vm573_vm1, %v1644_v59 }
 0x126   : > { %v11513_v38 = vpop.f32.mrf.mxu2 }
 0x127   : > { %v11515_v39 = vpop.f32.mrf.mxu3  ;;  %v11517_v40 = vpop.f32.mrf.mxu0 }
 0x128   : > { %v11519_v41 = vpop.f32.mrf.mxu1 }
 0x12a   : > { %9085 = vmatmul.msk.f32.gmra.mxu0 %vm560_vm2, %v9075_v24  ;;  %v9132_v24 = vld [vmem:[%s17561_s1 + $0x108] sm:$0xff] }
 0x12b   : > { %9091 = vmatmul.msk.f32.gmra.mxu1 %vm560_vm2, %v9076_v26  ;;  %9099 = vmatmul.msk.f32.gmra.mxu2 %vm560_vm2, %v9094_v42 }
 0x12c   : > { %9104 = vmatmul.msk.f32.gmra.mxu3 %vm560_vm2, %v9094_v42 }
 0x12e   : > { %v11528_v43 = vpop.f32.mrf.mxu2 }
 0x12f   : > { %v11530_v44 = vpop.f32.mrf.mxu3  ;;  %v11532_v45 = vpop.f32.mrf.mxu0 }
 0x130   : > { %v11534_v46 = vpop.f32.mrf.mxu1 }
 0x132   : > { %9086 = vmatmul.msk.f32.gmra.mxu0 %vm560_vm2, %v9076_v26 }
 0x133   : > { %9092 = vmatmul.msk.f32.gmra.mxu1 %vm560_vm2, %v9077_v28  ;;  %9100 = vmatmul.msk.f32.gmra.mxu2 %vm560_vm2, %v9095_v47 }
 0x134   : > { %9105 = vmatmul.msk.f32.gmra.mxu3 %vm560_vm2, %v9095_v47 }
 0x136   : > { %v11543_v48 = vpop.f32.mrf.mxu2 }
 0x137   : > { %v11545_v49 = vpop.f32.mrf.mxu3  ;;  %v11547_v50 = vpop.f32.mrf.mxu0 }
 0x138   : > { %v11549_v51 = vpop.f32.mrf.mxu1 }
 0x13a   : > { %9087 = vmatmul.msk.f32.gmra.mxu0 %vm560_vm2, %v9077_v28 }
 0x13b   : > { %9101 = vmatmul.msk.f32.gmra.mxu2 %vm560_vm2, %v9096_v52  ;;  %9117 = vmatmul.msk.f32.vlgmr.msrb.gmra.mxu1 %vm560_vm2, %v9112_v53 }
 0x13c   : > { %9106 = vmatmul.msk.f32.gmra.mxu3 %vm560_vm2, %v9096_v52 }
 0x13e   : > { %v11571_v60 = vpop.f32.mrf.mxu2 }
 0x13f   : > { %v11573_v61 = vpop.f32.mrf.mxu3  ;;  %v11575_v62 = vpop.f32.mrf.mxu0 }
 0x140   : > { %v11577_v63 = vpop.f32.mrf.mxu1 }
 0x142   : > { %9108 = vmatmul.msk.f32.vlgmr.msrb.gmra.mxu0 %vm560_vm2, %v9093_v37 }
 0x143   : > { %9118 = vmatmul.msk.f32.gmra.mxu1 %vm560_vm2, %v9113_v0  ;;  %9122 = vmatmul.msk.f32.vlgmr.msrb.gmra.mxu2 %vm560_vm2, %v9112_v53 }
 0x144   : > { %9127 = vmatmul.msk.f32.vlgmr.msrb.gmra.mxu3 %vm560_vm2, %v9112_v53 }
 0x146   : > { %v11589_v3 = vpop.f32.mrf.mxu2 }
 0x147   : > { %v11591_v4 = vpop.f32.mrf.mxu3  ;;  %v11593_v5 = vpop.f32.mrf.mxu0 }
 0x148   : > { %v11595_v6 = vpop.f32.mrf.mxu1 }
 0x14a   : > { %9109 = vmatmul.msk.f32.gmra.mxu0 %vm560_vm2, %v9094_v42 }
 0x14b   : > { %9119 = vmatmul.msk.f32.gmra.mxu1 %vm560_vm2, %v9114_v7  ;;  %9123 = vmatmul.msk.f32.gmra.mxu2 %vm560_vm2, %v9113_v0 }
 0x14c   : > { %9128 = vmatmul.msk.f32.gmra.mxu3 %vm560_vm2, %v9113_v0 }
 0x14e   : > { %v11607_v9 = vpop.f32.mrf.mxu2 }
 0x14f   : > { %v11609_v10 = vpop.f32.mrf.mxu3  ;;  %v11611_v11 = vpop.f32.mrf.mxu0 }
 0x150   : > { %v11613_v12 = vpop.f32.mrf.mxu1 }
 0x152   : > { %9110 = vmatmul.msk.f32.gmra.mxu0 %vm560_vm2, %v9095_v47  ;;  %v9134_v47 = vld [vmem:[%s17561_s1 + $0x118] sm:$0xff] }
 0x153   : > { %9120 = vmatmul.msk.f32.gmra.mxu1 %vm560_vm2, %v9115_v13  ;;  %9124 = vmatmul.msk.f32.gmra.mxu2 %vm560_vm2, %v9114_v7 }
 0x154   : > { %9129 = vmatmul.msk.f32.gmra.mxu3 %vm560_vm2, %v9114_v7 }
 0x156   : > { %v11622_v14 = vpop.f32.mrf.mxu2 }
 0x157   : > { %v11624_v15 = vpop.f32.mrf.mxu3  ;;  %v11626_v16 = vpop.f32.mrf.mxu0 }
 0x158   : > { %v11628_v17 = vpop.f32.mrf.mxu1 }
 0x159   : > { %17562 = vst [vmem:[#allocation3_spill] sm:$0xff] %v11628_v17 }
 0x15a   : > { %9111 = vmatmul.msk.f32.gmra.mxu0 %vm560_vm2, %v9096_v52 }
 0x15b   : > { %9125 = vmatmul.msk.f32.gmra.mxu2 %vm560_vm2, %v9115_v13  ;;  %9141 = vmatmul.msk.f32.vlgmr.msra.gmra.mxu1 %vm560_vm2, %v9131_v18 }
 0x15c   : > { %9130 = vmatmul.msk.f32.gmra.mxu3 %vm560_vm2, %v9115_v13 }
 0x15e   : > { %v11637_v19 = vpop.f32.mrf.mxu2 }
 0x15f   : > { %v11639_v20 = vpop.f32.mrf.mxu3  ;;  %v11641_v21 = vpop.f32.mrf.mxu0 }
 0x160   : > { %v11643_v22 = vpop.f32.mrf.mxu1 }
 0x162   : > { %9136 = vmatmul.msk.f32.vlgmr.msra.gmra.mxu0 %vm560_vm2, %v9131_v18 }
 0x163   : > { %9142 = vmatmul.msk.f32.gmra.mxu1 %vm560_vm2, %v9132_v24  ;;  %9146 = vmatmul.msk.f32.vlgmr.msra.gmra.mxu2 %vm560_vm2, %v9131_v18 }
 0x166   : > { %v11654_v26 = vpop.f32.mrf.mxu2 }
 0x167   : > { %v11656_v28 = vpop.f32.mrf.mxu3  ;;  %v11658_v29 = vpop.f32.mrf.mxu0 }
 0x168   : > { %17563 = vst [vmem:[#allocation4_spill] sm:$0xff] %v11656_v28  ;;  %v11660_v30 = vpop.f32.mrf.mxu1 }
 0x16a   : > { %9137 = vmatmul.msk.f32.gmra.mxu0 %vm560_vm2, %v9132_v24 }
 0x16b   : > { %9143 = vmatmul.msk.f32.gmra.mxu1 %vm560_vm2, %v9133_v31  ;;  %9147 = vmatmul.msk.f32.gmra.mxu2 %vm560_vm2, %v9132_v24 }
 0x16e   : > { %v11671_v33 = vpop.f32.mrf.mxu2 }
 0x16f   : > { %v11673_v34 = vpop.f32.mrf.mxu3  ;;  %v11675_v37 = vpop.f32.mrf.mxu0 }
 0x170   : > { %v11677_v42 = vpop.f32.mrf.mxu1 }
 0x171   : > { %17564 = vst [vmem:[#allocation5_spill] sm:$0xff] %v11677_v42 }
 0x172   : > { %9138 = vmatmul.msk.f32.gmra.mxu0 %vm560_vm2, %v9133_v31 }
 0x173   : > { %9144 = vmatmul.msk.f32.gmra.mxu1 %vm560_vm2, %v9134_v47  ;;  %9148 = vmatmul.msk.f32.gmra.mxu2 %vm560_vm2, %v9133_v31 }
 0x176   : > { %v11685_v52 = vpop.f32.mrf.mxu2 }
 0x177   : > { %17565 = vst [vmem:[#allocation6_spill] sm:$0xff] %v11685_v52  ;;  %v11687_v53 = vpop.f32.mrf.mxu3  ;;  %v11689_v54 = vpop.f32.mrf.mxu0 }
 0x178   : > { %17566 = vst [vmem:[#allocation7_spill] sm:$0xff] %v11687_v53  ;;  %v11691_v55 = vpop.f32.mrf.mxu1 }
 0x179   : > { %17567 = vst [vmem:[#allocation8_spill] sm:$0xff] %v11689_v54 }
 0x17a   : > { %9139 = vmatmul.msk.f32.gmra.mxu0 %vm560_vm2, %v9134_v47 }
 0x17b   : > { %9149 = vmatmul.msk.f32.gmra.mxu2 %vm560_vm2, %v9134_v47 }
 0x17e   : > { %v11695_v56 = vpop.f32.mrf.mxu2 }
 0x17f   : > { %17568 = vst [vmem:[#allocation9_spill] sm:$0xff] %v11695_v56  ;;  %v11697_v57 = vpop.f32.mrf.mxu0  ;;  %v11701_v59 = vpop.f32.mrf.mxu3 }
 0x180   : > { %17569 = vst [vmem:[#allocation10_spill] sm:$0xff] %v11697_v57  ;;  %v11699_v58 = vpop.f32.mrf.mxu1 }
 0x181   : > { %17570 = vst [vmem:[#allocation11_spill] sm:$0xff] %v11701_v59 }
 0x186   : > { %v11703_v0 = vpop.f32.mrf.mxu2 }
 0x187   : > { %17571 = vst [vmem:[#allocation12_spill] sm:$0xff] %v11703_v0  ;;  %v1115_v1 = vpop.f32.mrf.mxu0  ;;  %v11707_v7 = vpop.f32.mrf.mxu3 }
 0x188   : > { %v11705_v2 = vpop.f32.mrf.mxu1  ;;  %17573 = vst [vmem:[#allocation14_spill] sm:$0xff] %v11707_v7 }
 0x189   : > { %17572 = vst [vmem:[#allocation13_spill] sm:$0xff] %v11705_v2 }
 0x18e   : > { %v11709_v8 = vpop.f32.mrf.mxu2 }
 0x18f   : > { %v11711_v13 = vpop.f32.mrf.mxu0  ;;  %v1259_v24 = vpop.f32.mrf.mxu3 }
 0x190   : > { %v11713_v18 = vpop.f32.mrf.mxu1 }
 0x191   : > { %17574 = vst [vmem:[#allocation15_spill] sm:$0xff] %v11713_v18 }
 0x196   : > { %v11715_v25 = vpop.f32.mrf.mxu2 }
 0x197   : > { %17575 = vst [vmem:[#allocation16_spill] sm:$0xff] %v11715_v25  ;;  %v11717_v31 = vpop.f32.mrf.mxu0  ;;  %v11723_v23 = vpop.f32.mrf.mxu3 }
 0x198   : > { %17576 = vst [vmem:[#allocation17_spill] sm:$0xff] %v11717_v31  ;;  %v11719_v32 = vpop.f32.mrf.mxu1 }
 0x199   : > { %17577 = vst [vmem:[#allocation18_spill] sm:$0xff] %v11719_v32 }
 0x19a   : > { %17579 = vst [vmem:[#allocation20_spill] sm:$0xff] %v11723_v23 }
 0x19e   : > { %v11721_v47 = vpop.f32.mrf.mxu2 }
 0x19f   : > { %17578 = vst [vmem:[#allocation19_spill] sm:$0xff] %v11721_v47  ;;  %v11725_v57 = vpop.f32.mrf.mxu0  ;;  %v11733_v18 = vpop.f32.mrf.mxu3 }
 0x1a0   : > { %v11727_v7 = vpop.f32.mrf.mxu1  ;;  %17582 = vst [vmem:[#allocation23_spill] sm:$0xff] %v11733_v18 }
 0x1a6   : > { %v11729_v17 = vpop.f32.mrf.mxu2 }
 0x1a7   : > { %17580 = vst [vmem:[#allocation21_spill] sm:$0xff] %v11729_v17  ;;  %v1288_v59 = vpop.f32.mrf.mxu0  ;;  %v11739_v32 = vpop.f32.mrf.mxu3 }
 0x1a8   : > { %v11731_v56 = vpop.f32.mrf.mxu1  ;;  %17585 = vst [vmem:[#allocation26_spill] sm:$0xff] %v11739_v32 }
 0x1a9   : > { %17581 = vst [vmem:[#allocation22_spill] sm:$0xff] %v11731_v56 }
 0x1ae   : > { %v1403_v0 = vpop.f32.mrf.mxu2 }
 0x1af   : > { %v11735_v25 = vpop.f32.mrf.mxu0  ;;  %v1432_v42 = vpop.f32.mrf.mxu3 }
 0x1b0   : > { %17583 = vst [vmem:[#allocation24_spill] sm:$0xff] %v11735_v25  ;;  %v11737_v31 = vpop.f32.mrf.mxu1 }
 0x1b1   : > { %17584 = vst [vmem:[#allocation25_spill] sm:$0xff] %v11737_v31 }
 0x1b6   : > { %v11741_v47 = vpop.f32.mrf.mxu2 }
 0x1b7   : > { %17586 = vst [vmem:[#allocation27_spill] sm:$0xff] %v11741_v47  ;;  %v11743_v54 = vpop.f32.mrf.mxu0  ;;  %v11753_v52 = vpop.f32.mrf.mxu3 }
 0x1b8   : > { %17587 = vst [vmem:[#allocation28_spill] sm:$0xff] %v11743_v54  ;;  %v11745_v2 = vpop.f32.mrf.mxu1 }
 0x1b9   : > { %17588 = vst [vmem:[#allocation29_spill] sm:$0xff] %v11745_v2 }
 0x1ba   : > { %17592 = vst [vmem:[#allocation33_spill] sm:$0xff] %v11753_v52 }
 0x1be   : > { %v11747_v17 = vpop.f32.mrf.mxu2 }
 0x1bf   : > { %17589 = vst [vmem:[#allocation30_spill] sm:$0xff] %v11747_v17  ;;  %v11749_v53 = vpop.f32.mrf.mxu0  ;;  %v11759_v47 = vpop.f32.mrf.mxu3 }
 0x1c0   : > { %17590 = vst [vmem:[#allocation31_spill] sm:$0xff] %v11749_v53  ;;  %v1547_v56 = vpop.f32.mrf.mxu1  ;;  %v712_v53 = vadd.f32 %v11530_v44, %v11517_v40  ;;  %v738_v40 = vadd.f32 %v11575_v62, %v11483_v27  ;;  %v718_v27 = vadd.f32 %v11573_v61, %v11547_v50  ;;  %v773_v50 = vadd.f32 %v11595_v6, %v11543_v48 }
 0x1c1   : > { %17595 = vst [vmem:[#allocation36_spill] sm:$0xff] %v11759_v47  ;;  %v747_v48 = vadd.f32 %v11626_v16, %v11534_v46  ;;  %v17600_v46 = vld [vmem:[#allocation4_spill] sm:$0xff] }
 0x1c2   : > { %v913_v52 = vadd.f32 %v11607_v9, %v712_v53  ;;  %v715_v9 = vadd.f32 %v11545_v49, %v11532_v45 }
 0x1c4   : > { %v916_v62 = vadd.f32 %v11622_v14, %v715_v9 }
 0x1c6   : > { %v11751_v18 = vpop.f32.mrf.mxu2  ;;  %v1060_v61 = vadd.f32 %v11660_v30, %v916_v62 }
 0x1c7   : > { %17591 = vst [vmem:[#allocation32_spill] sm:$0xff] %v11751_v18  ;;  %v1461_v25 = vpop.f32.mrf.mxu0  ;;  %v11769_v18 = vpop.f32.mrf.mxu3 }
 0x1c8   : > { %v11755_v31 = vpop.f32.mrf.mxu1  ;;  %v1188_v6 = vadd.f32 %v11711_v13, %v1060_v61  ;;  %v17603_v13 = vld [vmem:[#allocation7_spill] sm:$0xff]  ;;  %v17613_v61 = vld [vmem:[#allocation24_spill] sm:$0xff] }
 0x1c9   : > { %17593 = vst [vmem:[#allocation34_spill] sm:$0xff] %v11755_v31 }
 0x1ce   : > { %v1576_v32 = vpop.f32.mrf.mxu2 }
 0x1cf   : > { %v11757_v28 = vpop.f32.mrf.mxu0 }
 0x1d0   : > { %17594 = vst [vmem:[#allocation35_spill] sm:$0xff] %v11757_v28  ;;  %v11761_v54 = vpop.f32.mrf.mxu1  ;;  %v1057_v28 = vadd.f32 %v11643_v22, %v913_v52  ;;  %v709_v52 = vadd.f32 %v11515_v39, %v11502_v35  ;;  %v744_v35 = vadd.f32 %v11611_v11, %v11519_v41  ;;  %v776_v41 = vadd.f32 %v11613_v12, %v11571_v60 }
 0x1d1   : > { %17596 = vst [vmem:[#allocation37_spill] sm:$0xff] %v11761_v54  ;;  %v741_v54 = vadd.f32 %v11593_v5, %v11504_v36  ;;  %v767_v36 = vadd.f32 %v11549_v51, %v11513_v38  ;;  %v1605_v5 = vpop.f32.mrf.mxu3 }
 0x1d2   : > { %v917_v11 = vadd.f32 %v11624_v15, %v744_v35  ;;  %v920_v15 = vadd.f32 %v11639_v20, %v747_v48  ;;  %v17605_v20 = vld [vmem:[#allocation5_spill] sm:$0xff]  ;;  %v17615_v48 = vld [vmem:[#allocation18_spill] sm:$0xff] }
 0x1d3   : > { %v914_v44 = vadd.f32 %v11609_v10, %v741_v54  ;;  %v11800_v10 = vadd.f32 %v11589_v3, %v709_v52  ;;  %v912_v54 = vadd.f32 %v11641_v21, %v767_v36  ;;  %v17608_v36 = vld [vmem:[#allocation8_spill] sm:$0xff] }
 0x1d5   : > { %v1056_v16 = vadd.f32 %v17600_v46, %v912_v54 }
 0x1d6   : > { %v11763_v2 = vpop.f32.mrf.mxu2 }
 0x1d7   : > { %17597 = vst [vmem:[#allocation38_spill] sm:$0xff] %v11763_v2  ;;  %v11765_v17 = vpop.f32.mrf.mxu0  ;;  %v1185_v2 = vadd.f32 %v1115_v1, %v1057_v28 }
 0x1d8   : > { %17598 = vst [vmem:[#allocation39_spill] sm:$0xff] %v11765_v17  ;;  %v11772_v23 = vpop.f32.mrf.mxu1  ;;  %v770_v17 = vadd.f32 %v11577_v63, %v11528_v43  ;;  %v911_v43 = vadd.f32 %v11591_v4, %v738_v40  ;;  %v1058_v63 = vadd.f32 %v11671_v33, %v914_v44 }
 0x1d9   : > { %v1329_v22 = vadd.f32 %v1259_v24, %v1185_v2  ;;  %v17602_v2 = vld [vmem:[#allocation26_spill] sm:$0xff]  ;;  %v17604_v24 = vld [vmem:[#allocation27_spill] sm:$0xff] }
 0x1da   : > { %v915_v53 = vadd.f32 %v11658_v29, %v770_v17  ;;  %v1055_v38 = vadd.f32 %v11654_v26, %v911_v43  ;;  %v1186_v39 = vadd.f32 %v11699_v58, %v1058_v63  ;;  %v11812_v17 = vpop.permute.xlu1 %1786  ;;  %v921_v43 = vadd.f32 %v17608_v36, %v776_v41  ;;  %v17609_v63 = vld [vmem:[#allocation16_spill] sm:$0xff] }
 0x1db   : > { %v1473_v49 = vadd.f32 %v1403_v0, %v1329_v22  ;;  %v17601_v0 = vld [vmem:[#allocation6_spill] sm:$0xff] }
 0x1dc   : > { %v1059_v45 = vadd.f32 %v11673_v34, %v915_v53  ;;  %v1183_v26 = vadd.f32 %v11691_v55, %v1055_v38  ;;  %v1330_v28 = vadd.f32 %v1288_v59, %v1186_v39  ;;  %v919_v34 = vadd.f32 %v11637_v19, %v718_v27  ;;  %v1782_v19 = vpop.permute.xlu2 %1781  ;;  %v17607_v53 = vld [vmem:[#allocation32_spill] sm:$0xff]  ;;  %v17612_v39 = vld [vmem:[#allocation17_spill] sm:$0xff] }
 0x1dd   : > { %v1617_v14 = vadd.f32 %v1547_v56, %v1473_v49  ;;  %v918_v55 = vadd.f32 %v11675_v37, %v773_v50  ;;  %v17599_v56 = vld [vmem:[#allocation20_spill] sm:$0xff]  ;;  %v1061_v1 = vadd.f32 %v17601_v0, %v917_v11  ;;  %v17606_v37 = vld [vmem:[#allocation13_spill] sm:$0xff] }
 0x1de   : > { %v11774_v31 = vpop.f32.mrf.mxu2  ;;  %v1187_v4 = vadd.f32 %v11709_v8, %v1059_v45  ;;  %v1327_v60 = vadd.f32 %v11725_v57, %v1183_v26  ;;  %v1474_v12 = vadd.f32 %v1432_v42, %v1330_v28  ;;  %v1332_v58 = vadd.f32 %v17599_v56, %v1188_v6  ;;  %v1608_v45 = vpop.f32.mrf.mxu3  ;;  %v17611_v38 = vld [vmem:[#allocation12_spill] sm:$0xff]  ;;  %v17618_v56 = vld [vmem:[#allocation9_spill] sm:$0xff] }
 0x1df   : > { %v11777_v47 = vpop.f32.mrf.mxu0  ;;  %v1062_v21 = vadd.f32 %v17603_v13, %v918_v55  ;;  %v1063_v44 = vadd.f32 %v17605_v20, %v919_v34  ;;  %v1189_v9 = vadd.f32 %v17606_v37, %v1061_v1  ;;  %v17617_v34 = vld [vmem:[#allocation33_spill] sm:$0xff]  ;;  %v17623_v13 = vld [vmem:[#allocation38_spill] sm:$0xff]  ;;  %v17624_v20 = vld [vmem:[#allocation15_spill] sm:$0xff] }
 0x1e0   : > { %v1720_v29 = vpop.f32.mrf.mxu1  ;;  %v1331_v30 = vadd.f32 %v11727_v7, %v1187_v4  ;;  %v1471_v7 = vadd.f32 %v17602_v2, %v1327_v60  ;;  %v1618_v8 = vadd.f32 %v1576_v32, %v1474_v12  ;;  %v1476_v57 = vadd.f32 %v17604_v24, %v1332_v58  ;;  %v17610_v32 = vld [vmem:[#allocation34_spill] sm:$0xff]  ;;  %v498_v12 = vld [vmem:[%s17532_s13 + $0x18] sm:$0xff]  ;;  %v17625_v37 = vld [vmem:[#allocation19_spill] sm:$0xff] }
 0x1e1   : > { %v1190_v27 = vadd.f32 %v17609_v63, %v1062_v21  ;;  %v1191_v50 = vadd.f32 %v17612_v39, %v1063_v44  ;;  %v1333_v4 = vadd.f32 %v17613_v61, %v1189_v9  ;;  %v1064_v58 = vadd.f32 %v17618_v56, %v920_v15  ;;  %v17621_v2 = vld [vmem:[#allocation30_spill] sm:$0xff] }
 0x1e2   : > { %v1475_v59 = vadd.f32 %v1461_v25, %v1331_v30  ;;  %v1615_v25 = vadd.f32 %v17607_v53, %v1471_v7  ;;  %v1762_v22 = vadd.f32 %v1720_v29, %v1618_v8  ;;  %v1620_v62 = vadd.f32 %v17610_v32, %v1476_v57  ;;  %v11844_v26 = vpop.permute.xlu1 %1776  ;;  %v17616_v30 = vld [vmem:[#allocation23_spill] sm:$0xff] }
 0x1e3   : > { %v1477_v54 = vadd.f32 %v17617_v34, %v1333_v4  ;;  %v17622_v8 = vld [vmem:[#allocation31_spill] sm:$0xff]  ;;  %v1192_v44 = vadd.f32 %v17624_v20, %v1064_v58 }
 0x1e4   : > { %v1619_v42 = vadd.f32 %v1605_v5, %v1475_v59  ;;  %v1184_v5 = vadd.f32 %v17611_v38, %v1056_v16  ;;  %v1798_v60 = vadd.f32 %v1782_v19, %v1762_v22  ;;  %v17619_v59 = vld [vmem:[#allocation11_spill] sm:$0xff]  ;;  %v17629_v38 = vld [vmem:[#allocation28_spill] sm:$0xff] }
 0x1e5   : > { %v1065_v46 = vadd.f32 %v17619_v59, %v921_v43  ;;  %v17620_v16 = vld [vmem:[#allocation35_spill] sm:$0xff]  ;;  %v1621_v21 = vadd.f32 %v17623_v13, %v1477_v54  ;;  %v499_v43 = vld [vmem:[%s17532_s13 + $0x20] sm:$0xff]  ;;  %v1792_v59 = vpop.permute.xlu0 %1791 }
 0x1e6   : > { %v11806_v51 = vpop.f32.mrf.mxu2  ;;  %v1328_v6 = vadd.f32 %v17615_v48, %v1184_v5  ;;  %v1336_v5 = vadd.f32 %v17629_v38, %v1192_v44  ;;  %v1611_v61 = vpop.f32.mrf.mxu3  ;;  %v17632_v48 = vld [vmem:[#allocation39_spill] sm:$0xff] }
 0x1e7   : > { %v1691_v3 = vpop.f32.mrf.mxu0  ;;  %v1193_v9 = vadd.f32 %v17625_v37, %v1065_v46  ;;  %v505_v38 = vld [vmem:[%s17532_s13 + $0x50] sm:$0xff] }
 0x1e8   : > { %v1761_v33 = vadd.f32 %v1691_v3, %v1617_v14  ;;  %v1759_v14 = vadd.f32 %v11772_v23, %v1615_v25  ;;  %v17614_v3 = vld [vmem:[#allocation22_spill] sm:$0xff]  ;;  %v1723_v55 = vpop.f32.mrf.mxu1  ;;  %v1810_v25 = vmax.f32 %v1798_v60, 0.0 }
 0x1e9   : > { %v1334_v11 = vadd.f32 %v17614_v3, %v1190_v27  ;;  %v500_v23 = vld [vmem:[%s17532_s13 + $0x28] sm:$0xff]  ;;  %v1765_v63 = vadd.f32 %v1723_v55, %v1621_v21 }
 0x1ea   : > { %v1797_v40 = vadd.f32 %v1782_v19, %v1761_v33  ;;  %v1335_v33 = vadd.f32 %v17616_v30, %v1191_v50  ;;  %v1795_v24 = vadd.f32 %v11844_v26, %v1759_v14  ;;  %v496_v50 = vld [vmem:[%s17532_s13 + $0x8] sm:$0xff]  ;;  %v11892_v30 = vmul.f32 %v1810_v25, %v499_v43 }
 0x1eb   : > { %v1478_v0 = vadd.f32 %v17620_v16, %v1334_v11  ;;  %v1801_v34 = vadd.f32 %v11812_v17, %v1765_v63  ;;  %v17633_v60 = vld [vmem:[#allocation14_spill] sm:$0xff] }
 0x1ec   : > { %v1809_v41 = vmax.f32 %v1797_v40, 0.0  ;;  %v1479_v7 = vadd.f32 %v17621_v2, %v1335_v33  ;;  %v1807_v39 = vmax.f32 %v1795_v24, 0.0  ;;  %v501_v33 = vld [vmem:[%s17532_s13 + $0x30] sm:$0xff]  ;;  %v17634_v2 = vld [vmem:[#allocation21_spill] sm:$0xff]  ;;  %v504_v25 = vld [vmem:[%s17532_s13 + $0x48] sm:$0xff] }
 0x1ed   : > { %v1622_v57 = vadd.f32 %v1608_v45, %v1478_v0  ;;  %v17627_v45 = vld [vmem:[#allocation3_spill] sm:$0xff]  ;;  %v17635_v24 = vld [vmem:[#allocation29_spill] sm:$0xff] }
 0x1ee   : > { %v1749_v52 = vpop.f32.mrf.mxu2  ;;  %v11902_v55 = vmul.f32 %v1807_v39, %v496_v50 }
 0x1ef   : > { %v1763_v49 = vadd.f32 %v1749_v52, %v1619_v42  ;;  %v1694_v35 = vpop.f32.mrf.mxu0  ;;  %v11862_v42 = vmul.f32 %v1809_v41, %v498_v12  ;;  %v17626_v52 = vld [vmem:[#allocation37_spill] sm:$0xff] }
 0x1f0   : > { %v1764_v29 = vadd.f32 %v1694_v35, %v1620_v62  ;;  %v1623_v36 = vadd.f32 %v17626_v52, %v1479_v7  ;;  %v17628_v35 = vld [vmem:[#allocation25_spill] sm:$0xff]  ;;  %v1726_v58 = vpop.f32.mrf.mxu1 }
 0x1f1   : > { %v1799_v28 = vadd.f32 %v1782_v19, %v1763_v49  ;;  %v1472_v19 = vadd.f32 %v17622_v8, %v1328_v6  ;;  %v1054_v49 = vadd.f32 %v17627_v45, %v11800_v10  ;;  %v17630_v10 = vld [vmem:[#allocation10_spill] sm:$0xff]  ;;  %v9899_v8 = vpack.i.bf16 %v11902_v55, %v11892_v30 }
 0x1f2   : > { %v1800_v15 = vadd.f32 %v11812_v17, %v1764_v29 }
 0x1f3   : > { %v1811_v1 = vmax.f32 %v1799_v28, 0.0  ;;  %v1616_v53 = vadd.f32 %v11769_v18, %v1472_v19  ;;  %v1337_v18 = vadd.f32 %v17628_v35, %v1193_v9  ;;  %v1182_v41 = vadd.f32 %v17630_v10, %v1054_v49  ;;  %v17631_v28 = vld [vmem:[#allocation36_spill] sm:$0xff] }
 0x1f4   : > { %v1812_v14 = vmax.f32 %v1800_v15, 0.0  ;;  %v1480_v29 = vadd.f32 %v17631_v28, %v1336_v5  ;;  %v1813_v19 = vmax.f32 %v1801_v34, 0.0  ;;  %v502_v15 = vld [vmem:[%s17532_s13 + $0x38] sm:$0xff] }
 0x1f5   : > { %v11864_v40 = vmul.f32 %v1811_v1, %v500_v23  ;;  %v1760_v4 = vadd.f32 %v11806_v51, %v1616_v53  ;;  %v1481_v6 = vadd.f32 %v17632_v48, %v1337_v18  ;;  %v503_v51 = vld [vmem:[%s17532_s13 + $0x40] sm:$0xff]  ;;  %v1326_v12 = vadd.f32 %v17633_v60, %v1182_v41  ;;  %v497_v53 = vld [vmem:[%s17532_s13 + $0x10] sm:$0xff] }
 0x1f6   : > { %v1752_v22 = vpop.f32.mrf.mxu2  ;;  %v1624_v23 = vadd.f32 %v11774_v31, %v1480_v29  ;;  %v11906_v16 = vmul.f32 %v1812_v14, %v501_v33  ;;  %v11931_v52 = vmul.f32 %v1813_v19, %v502_v15 }
 0x1f7   : > { %v1766_v27 = vadd.f32 %v1752_v22, %v1622_v57  ;;  %v1697_v32 = vpop.f32.mrf.mxu0  ;;  %v11876_v62 = vpack.i.bf16 %v11864_v40, %v11862_v42  ;;  %v1625_v56 = vadd.f32 %v1611_v61, %v1481_v6  ;;  %v1796_v46 = vadd.f32 %v11844_v26, %v1760_v4  ;;  %v506_v22 = vld [vmem:[%s17532_s13 + $0x58] sm:$0xff] }
 0x1f8   : > { %v1767_v11 = vadd.f32 %v1697_v32, %v1623_v36  ;;  %v1470_v7 = vadd.f32 %v17634_v2, %v1326_v12  ;;  %v1768_v13 = vadd.f32 %v1726_v58, %v1624_v23  ;;  %v9999_v34 = vpack.i.bf16 %v11931_v52, %v11906_v16 }
 0x1f9   : > { %v1802_v3 = vadd.f32 %v11812_v17, %v1766_v27  ;;  %9875 = vrot.lane.b32.xlu1 %v11876_v62, %s17553_s25  ;;  %v1808_v20 = vmax.f32 %v1796_v46, 0.0 }
 0x1fa   : > { %v1803_v1 = vadd.f32 %v1792_v59, %v1767_v11  ;;  %v1614_v57 = vadd.f32 %v17635_v24, %v1470_v7  ;;  %v1804_v36 = vadd.f32 %v1792_v59, %v1768_v13  ;;  %v9914_v11 = vpack.i.bf16 %v11864_v40, %v11931_v52 }
 0x1fb   : > { %v1814_v54 = vmax.f32 %v1802_v3, 0.0  ;;  %v11933_v63 = vmul.f32 %v1808_v20, %v497_v53 }
 0x1fc   : > { %v1815_v44 = vmax.f32 %v1803_v1, 0.0  ;;  %v1758_v9 = vadd.f32 %v11777_v47, %v1614_v57  ;;  %v1816_v45 = vmax.f32 %v1804_v36, 0.0 }
 0x1fd   : > { %v11908_v0 = vmul.f32 %v1814_v54, %v503_v51  ;;  %v9894_v35 = vpack.i.bf16 %v11931_v52, %v11933_v63  ;;  %v9924_v61 = vpack.i.bf16 %v11902_v55, %v11933_v63  ;;  %v10019_v51 = vpack.i.bf16 %v11933_v63, %v11864_v40 }
 0x1fe   : > { %v1755_v17 = vpop.f32.mrf.mxu2  ;;  %v11935_v27 = vmul.f32 %v1815_v44, %v504_v25  ;;  %v1794_v32 = vadd.f32 %v11844_v26, %v1758_v9  ;;  %v495_v26 = vld [vmem:[%s17532_s13] sm:$0xff]  ;;  %v11955_v39 = vmul.f32 %v1816_v45, %v505_v38  ;;  %v9974_v54 = vpack.i.bf16 %v11892_v30, %v11862_v42 }
 0x1ff   : > { %v1769_v21 = vadd.f32 %v1755_v17, %v1625_v56  ;;  %v9879_v31 = vpack.i.bf16 %v11908_v0, %v11906_v16  ;;  %v9909_v49 = vpack.i.bf16 %v11862_v42, %v11908_v0  ;;  %v9969_v10 = vpack.i.bf16 %v11908_v0, %v11931_v52 }
 0x200   : > { %v1806_v5 = vmax.f32 %v1794_v32, 0.0  ;;  %v9904_v4 = vpack.i.bf16 %v11955_v39, %v11906_v16  ;;  %v9954_v41 = vpack.i.bf16 %v11931_v52, %v11955_v39  ;;  %v9964_v33 = vpack.i.bf16 %v11955_v39, %v11935_v27 }
 0x201   : > { %v1805_v37 = vadd.f32 %v1792_v59, %v1769_v21  ;;  %9900 = vrot.lane.b32.xlu1 %v9899_v8, %s17553_s25  ;;  %9880 = vrot.lane.b32.xlu0 %v9879_v31, %s17553_s25  ;;  %v10004_v12 = vpack.i.bf16 %v11908_v0, %v11892_v30 }
 0x202   : > { %v11957_v50 = vmul.f32 %v1806_v5, %v495_v26  ;;  %v9150_v26 = vld [vmem:[%s17522_s3 + $0x20] sm:$0xff] }
 0x203   : > { %v1817_v43 = vmax.f32 %v1805_v37, 0.0  ;;  %v3139_v37 = vld [vmem:[%s17523_s4 + $0x8] sm:$0xff] }
 0x204   : > { %v9889_v14 = vpack.i.bf16 %v11955_v39, %v11957_v50  ;;  %v9919_v3 = vpack.i.bf16 %v11892_v30, %v11957_v50  ;;  %v9949_v29 = vpack.i.bf16 %v11933_v63, %v11957_v50  ;;  %v9984_v6 = vpack.i.bf16 %v11957_v50, %v11864_v40 }
 0x205   : > { %v11937_v47 = vmul.f32 %v1817_v43, %v506_v22  ;;  %v12015_v60 = vpack.i.bf16 %v11902_v55, %v11957_v50 }
 0x207   : > { %v9884_v18 = vpack.i.bf16 %v11937_v47, %v11935_v27  ;;  %v9979_v28 = vpack.i.bf16 %v11906_v16, %v11937_v47  ;;  %v10014_v48 = vpack.i.bf16 %v11862_v42, %v11937_v47  ;;  %v10064_v23 = vpack.i.bf16 %v11908_v0, %v11937_v47 }
 0x209   : > { %9910 = vrot.lane.b32.xlu1 %v9909_v49, %s17551_s24  ;;  %9895 = vrot.lane.b32.xlu0 %v9894_v35, %s17553_s25 }
 0x20a   : > { %9885 = vrot.lane.b32.xlu2 %v9884_v18, %s17553_s25 }
 0x211   : > { %9925 = vrot.lane.b32.xlu1 %v9924_v61, %s17551_s24  ;;  %9905 = vrot.lane.b32.xlu0 %v9904_v4, %s17551_s24  ;;  %v3140_v61 = vld [vmem:[%s17523_s4 + $0x10] sm:$0xff] }
 0x212   : > { %9890 = vrot.lane.b32.xlu2 %v9889_v14, %s17553_s25 }
 0x219   : > { %9935 = vrot.lane.b32.xlu1 %v11876_v62, %s17549_s26  ;;  %9920 = vrot.lane.b32.xlu0 %v9919_v3, %s17551_s24  ;;  %v9989_v62 = vpack.i.bf16 %v11933_v63, %v11902_v55 }
 0x21a   : > { %9915 = vrot.lane.b32.xlu2 %v9914_v11, %s17551_s24 }
 0x221   : > { %9960 = vrot.lane.b32.xlu1 %v9899_v8, %s17549_s26  ;;  %9930 = vrot.lane.b32.xlu0 %v9879_v31, %s17549_s26 }
 0x222   : > { %9940 = vrot.lane.b32.xlu2 %v9884_v18, %s17551_s24 }
 0x229   : > { %9970 = vrot.lane.b32.xlu1 %v9969_v10, %s17546_s27  ;;  %9955 = vrot.lane.b32.xlu0 %v9954_v41, %s17549_s26 }
 0x22a   : > { %9945 = vrot.lane.b32.xlu2 %v9884_v18, %s17549_s26 }
 0x231   : > { %9990 = vrot.lane.b32.xlu1 %v9989_v62, %s17546_s27  ;;  %9980 = vrot.lane.b32.xlu0 %v9979_v28, %s17546_s27 }
 0x232   : > { %9950 = vrot.lane.b32.xlu2 %v9949_v29, %s17549_s26 }
 0x239   : > { %10015 = vrot.lane.b32.xlu1 %v10014_v48, %s17544_s28  ;;  %9985 = vrot.lane.b32.xlu0 %v9984_v6, %s17546_s27 }
 0x23a   : > { %9965 = vrot.lane.b32.xlu2 %v9964_v33, %s17546_s27 }
 0x241   : > { %10020 = vrot.lane.b32.xlu1 %v10019_v51, %s17544_s28  ;;  %10000 = vrot.lane.b32.xlu0 %v9999_v34, %s17544_s28 }
 0x242   : > { %9975 = vrot.lane.b32.xlu2 %v9974_v54, %s17546_s27  ;;  %s17714_s27 = smov 1  }
 0x249   : > { %10035 = vrot.lane.b32.xlu1 %v9974_v54, %s17636_s29  ;;  %10010 = vrot.lane.b32.xlu0 %v12015_v60, %s17544_s28 }
 0x24a   : > { %9995 = vrot.lane.b32.xlu2 %v9964_v33, %s17544_s28 }
 0x251   : > { %10045 = vrot.lane.b32.xlu1 %v10019_v51, %s17636_s29  ;;  %10030 = vrot.lane.b32.xlu0 %v9999_v34, %s17636_s29 }
 0x252   : > { %10005 = vrot.lane.b32.xlu2 %v10004_v12, %s17544_s28  ;;  %s17794_s28 = smov 19  }
 0x259   : > { %10055 = vrot.lane.b32.xlu1 %v9969_v10, %s17637_s30  ;;  %10065 = vrot.lane.b32.xlu0 %v10064_v23, %s17636_s29 }
 0x25a   : > { %10025 = vrot.lane.b32.xlu2 %v9964_v33, %s17636_s29 }
 0x261   : > { %10080 = vrot.lane.b32.xlu1 %v9989_v62, %s17637_s30  ;;  %10070 = vrot.lane.b32.xlu0 %v9979_v28, %s17637_s30 }
 0x262   : > { %10040 = vrot.lane.b32.xlu2 %v12015_v60, %s17636_s29 }
 0x264   : > { %v9886_v56 = vpop.permute.xlu2 %9885 }
 0x265   : > { %v9888_v58 = vunpack.i.h.bf16 %v9886_v56  ;;  %v9887_v59 = vunpack.i.l.bf16 %v9886_v56 }
 0x267   : > { %v1905_v1 = vsel %vm551_vm0, %v9888_v58, %v9887_v59 }
 0x268   : > { %1936 = vmatpush.msra.mxu3 %v1905_v1 }
 0x269   : > { %10095 = vrot.lane.b32.xlu1 %v9974_v54, %s17639_s21  ;;  %10075 = vrot.lane.b32.xlu0 %v9984_v6, %s17637_s30 }
 0x26a   : > { %10050 = vrot.lane.b32.xlu2 %v9964_v33, %s17637_s30 }
 0x26b   : > { %v9876_v2 = vpop.permute.xlu1 %9875 }
 0x26c   : > { %v9891_v7 = vpop.permute.xlu2 %9890  ;;  %v9878_v15 = vunpack.i.h.bf16 %v9876_v2  ;;  %v9877_v20 = vunpack.i.l.bf16 %v9876_v2  ;;  %v3141_v2 = vld [vmem:[%s17523_s4 + $0x18] sm:$0xff] }
 0x26d   : > { %v9893_v17 = vunpack.i.h.bf16 %v9891_v7  ;;  %v9892_v22 = vunpack.i.l.bf16 %v9891_v7 }
 0x26e   : > { %v1903_v9 = vsel %vm551_vm0, %v9878_v15, %v9877_v20 }
 0x26f   : > { %v1901_v8 = vsel %vm551_vm0, %v9887_v59, %v9893_v17  ;;  %v1897_v19 = vsel %vm551_vm0, %v9893_v17, %v9888_v58  ;;  %v9151_v58 = vld [vmem:[%s17522_s3 + $0x28] sm:$0xff] }
 0x270   : > { %1965 = vmatpush.msrb.mxu0 %v1901_v8  ;;  %1994 = vmatpush.msrb.mxu1 %v1897_v19 }
 0x271   : > { %10110 = vrot.lane.b32.xlu1 %v10019_v51, %s17639_s21  ;;  %10090 = vrot.lane.b32.xlu0 %v9999_v34, %s17639_s21 }
 0x272   : > { %10060 = vrot.lane.b32.xlu2 %v9974_v54, %s17637_s30 }
 0x273   : > { %v9901_v13 = vpop.permute.xlu1 %9900  ;;  %v9881_v21 = vpop.permute.xlu0 %9880 }
 0x274   : > { %v9883_v31 = vunpack.i.h.bf16 %v9881_v21  ;;  %v9882_v24 = vunpack.i.l.bf16 %v9881_v21  ;;  %v12047_v57 = vpop.permute.xlu2 %9915  ;;  %v9902_v45 = vunpack.i.l.bf16 %v9901_v13  ;;  %v9903_v4 = vunpack.i.h.bf16 %v9901_v13 }
 0x275   : > { %v9917_v59 = vunpack.i.l.bf16 %v12047_v57 }
 0x276   : > { %v1904_v44 = vsel %vm551_vm0, %v9883_v31, %v9882_v24  ;;  %v1899_v3 = vsel %vm551_vm0, %v9877_v20, %v9902_v45  ;;  %v1895_v11 = vsel %vm551_vm0, %v9902_v45, %v9878_v15  ;;  %v1898_v28 = vsel %vm551_vm0, %v9892_v22, %v9903_v4  ;;  %v12128_v15 = vld [vmem:[%s17522_s3] sm:$0xff] }
 0x277   : > { %1937 = vmatpush.msra.mxu3 %v1904_v44 }
 0x279   : > { %3149 = vperm.xlu1 %9872, %v3139_v37   ;;  %10105 = vrot.lane.b32.xlu0 %v10064_v23, %s17639_s21 }
 0x27a   : > { %10085 = vrot.lane.b32.xlu2 %v9964_v33, %s17639_s21  ;;  %1938 = vmatpush.msra.mxu3 %v1903_v9 }
 0x27b   : > { %v12058_v53 = vpop.permute.xlu1 %9910  ;;  %v9896_v25 = vpop.permute.xlu0 %9895 }
 0x27c   : > { %v9898_v36 = vunpack.i.h.bf16 %v9896_v25  ;;  %v9897_v43 = vunpack.i.l.bf16 %v9896_v25  ;;  %v9941_v32 = vpop.permute.xlu2 %9940  ;;  %v9913_v10 = vunpack.i.h.bf16 %v12058_v53  ;;  %v9912_v29 = vunpack.i.l.bf16 %v12058_v53  ;;  %v9152_v53 = vld [vmem:[%s17522_s3 + $0x30] sm:$0xff]  ;;  %v3138_v25 = vld [vmem:[%s17523_s4] sm:$0xff] }
 0x27d   : > { %v9943_v49 = vunpack.i.h.bf16 %v9941_v32  ;;  %v9942_v35 = vunpack.i.l.bf16 %v9941_v32 }
 0x27e   : > { %v1902_v18 = vsel %vm551_vm0, %v9897_v43, %v9892_v22  ;;  %v1900_v38 = vsel %vm551_vm0, %v9882_v24, %v9898_v36  ;;  %v1896_v5 = vsel %vm551_vm0, %v9898_v36, %v9883_v31  ;;  %v1894_v51 = vsel %vm551_vm0, %v9903_v4, %v9897_v43 }
 0x27f   : > { %1939 = vmatpush.msra.mxu3 %v1902_v18  ;;  %1966 = vmatpush.msrb.mxu0 %v1900_v38  ;;  %v1865_v14 = vsel %vm528_vm3, %v9943_v49, %v9942_v35  ;;  %v1856_v8 = vsel %vm528_vm3, %v9917_v59, %v9912_v29 }
 0x280   : > { %1995 = vmatpush.msrb.mxu1 %v1896_v5  ;;  %2035 = vmatpush.msrb.mxu2 %v1865_v14  ;;  %v12156_v5 = vld [vmem:[%s17522_s3 + $0x8] sm:$0xff]  ;;  %v9153_v14 = vld [vmem:[%s17522_s3 + $0x38] sm:$0xff] }
 0x281   : > { %9154 = vmatmul.msk.f32.vlgmr.msra.gmra.mxu3 %vm1911_vm10, %v9150_v26  ;;  %3154 = vperm.xlu0 %9871, %v3140_v61  }
 0x282   : > { %10100 = vrot.lane.b32.xlu2 %v12015_v60, %s17639_s21  ;;  %1967 = vmatpush.msrb.mxu0 %v1899_v3  ;;  %v9918_v60 = vunpack.i.h.bf16 %v12047_v57 }
 0x283   : > { %1996 = vmatpush.msrb.mxu1 %v1895_v11  ;;  %v9926_v41 = vpop.permute.xlu1 %9925  ;;  %v9906_v62 = vpop.permute.xlu0 %9905 }
 0x284   : > { %v9908_v48 = vunpack.i.h.bf16 %v9906_v62  ;;  %v9907_v6 = vunpack.i.l.bf16 %v9906_v62  ;;  %v12085_v33 = vpop.permute.xlu2 %9945  ;;  %1968 = vmatpush.msrb.mxu0 %v1898_v28  ;;  %v1863_v7 = vsel %vm528_vm3, %v9918_v60, %v9913_v10  ;;  %v9927_v21 = vunpack.i.l.bf16 %v9926_v41 }
 0x285   : > { %v9948_v34 = vunpack.i.h.bf16 %v12085_v33  ;;  %v9947_v54 = vunpack.i.l.bf16 %v12085_v33  ;;  %1997 = vmatpush.msrb.mxu1 %v1894_v51  ;;  %9158 = vmatmul.msk.f32.vlgmr.msrb.gmra.mxu0 %vm1911_vm10, %v9150_v26  ;;  %v9928_v20 = vunpack.i.h.bf16 %v9926_v41 }
 0x286   : > { %9162 = vmatmul.msk.f32.vlgmr.msrb.gmra.mxu1 %vm1911_vm10, %v9150_v26  ;;  %v1864_v12 = vsel %vm528_vm3, %v9912_v29, %v9907_v6  ;;  %v1861_v23 = vsel %vm528_vm3, %v9942_v35, %v9908_v48  ;;  %v1857_v56 = vsel %vm528_vm3, %v9908_v48, %v9943_v49  ;;  %v1860_v17 = vsel %vm528_vm3, %v9907_v6, %v9917_v59 }
 0x287   : > { %2036 = vmatpush.msrb.mxu2 %v1864_v12  ;;  %2064 = vmatpush.msrb.mxu3 %v1861_v23  ;;  %v2145_v1 = vsel %vm793_vm4, %v9948_v34, %v9947_v54  ;;  %v1854_v36 = vsel %vm528_vm3, %v9928_v20, %v9927_v21 }
 0x288   : > { %2093 = vmatpush.msra.mxu0 %v1857_v56  ;;  %2175 = vmatpush.msra.mxu1 %v2145_v1 }
 0x289   : > { %9155 = vmatmul.msk.f32.gmra.mxu3 %vm1911_vm10, %v9151_v58  ;;  %2037 = vmatpush.msrb.mxu2 %v1863_v7 }
 0x28a   : > { %3159 = vperm.xlu2 %9873, %v3141_v2   ;;  %2065 = vmatpush.msrb.mxu3 %v1860_v17  ;;  %v12207_v2 = vld [vmem:[%s17522_s3 + $0x40] sm:$0xff] }
 0x28b   : > { %2094 = vmatpush.msra.mxu0 %v1856_v8  ;;  %v12120_v19 = vpop.permute.xlu1 %9935  ;;  %v9921_v13 = vpop.permute.xlu0 %9920 }
 0x28c   : > { %v9923_v31 = vunpack.i.h.bf16 %v9921_v13  ;;  %v9922_v24 = vunpack.i.l.bf16 %v9921_v13  ;;  %v12122_v57 = vpop.permute.xlu2 %9950  ;;  %v9938_v45 = vunpack.i.h.bf16 %v12120_v19  ;;  %v9937_v49 = vunpack.i.l.bf16 %v12120_v19 }
 0x28d   : > { %9159 = vmatmul.msk.f32.gmra.mxu0 %vm1911_vm10, %v9151_v58  ;;  %v9953_v26 = vunpack.i.h.bf16 %v12122_v57  ;;  %v9952_v61 = vunpack.i.l.bf16 %v12122_v57 }
 0x28e   : > { %9163 = vmatmul.msk.f32.gmra.mxu1 %vm1911_vm10, %v9151_v58  ;;  %v1862_v44 = vsel %vm528_vm3, %v9927_v21, %v9922_v24  ;;  %v1859_v37 = vsel %vm528_vm3, %v9913_v10, %v9923_v31  ;;  %v1855_v9 = vsel %vm528_vm3, %v9923_v31, %v9918_v60  ;;  %v1858_v22 = vsel %vm528_vm3, %v9922_v24, %v9928_v20  ;;  %v12181_v60 = vld [vmem:[%s17522_s3 + $0x10] sm:$0xff] }
 0x28f   : > { %2038 = vmatpush.msrb.mxu2 %v1862_v44  ;;  %2066 = vmatpush.msrb.mxu3 %v1859_v37  ;;  %v2143_v10 = vsel %vm793_vm4, %v9938_v45, %v9937_v49  ;;  %v2142_v41 = vsel %vm793_vm4, %v9953_v26, %v9952_v61 }
 0x290   : > { %2095 = vmatpush.msra.mxu0 %v1855_v9  ;;  %9166 = vmatmul.msk.f32.vlgmr.msrb.gmra.mxu2 %vm1911_vm10, %v12128_v15 }
 0x291   : > { %9156 = vmatmul.msk.f32.gmra.mxu3 %vm1911_vm10, %v9152_v53 }
 0x292   : > { %3144 = vperm.xlu2 %9873, %v3138_v25   ;;  %2067 = vmatpush.msrb.mxu3 %v1858_v22 }
 0x293   : > { %2096 = vmatpush.msra.mxu0 %v1854_v36  ;;  %v9961_v43 = vpop.permute.xlu1 %9960  ;;  %v9931_v32 = vpop.permute.xlu0 %9930  ;;  %v12247_v36 = vld [vmem:[%s17522_s3 + $0x48] sm:$0xff] }
 0x294   : > { %v9933_v35 = vunpack.i.h.bf16 %v9931_v32  ;;  %v9932_v18 = vunpack.i.l.bf16 %v9931_v32  ;;  %v9966_v38 = vpop.permute.xlu2 %9965  ;;  %v9962_v12 = vunpack.i.l.bf16 %v9961_v43  ;;  %v9963_v58 = vunpack.i.h.bf16 %v9961_v43 }
 0x295   : > { %9160 = vmatmul.msk.f32.gmra.mxu0 %vm1911_vm10, %v9152_v53  ;;  %v9968_v3 = vunpack.i.h.bf16 %v9966_v38  ;;  %v9967_v11 = vunpack.i.l.bf16 %v9966_v38 }
 0x296   : > { %9164 = vmatmul.msk.f32.gmra.mxu1 %vm1911_vm10, %v9152_v53  ;;  %v2144_v4 = vsel %vm793_vm4, %v9933_v35, %v9932_v18  ;;  %v2139_v33 = vsel %vm793_vm4, %v9937_v49, %v9962_v12  ;;  %v2135_v1 = vsel %vm793_vm4, %v9962_v12, %v9938_v45  ;;  %v2138_v19 = vsel %vm793_vm4, %v9952_v61, %v9963_v58 }
 0x297   : > { %2176 = vmatpush.msra.mxu1 %v2144_v4  ;;  %v2293_v29 = vsel %vm937_vm5, %v9967_v11, %v9968_v3  ;;  %v2134_v24 = vsel %vm793_vm4, %v9963_v58, %v9953_v26 }
 0x298   : > { %9167 = vmatmul.msk.f32.gmra.mxu2 %vm1911_vm10, %v12156_v5 }
 0x299   : > { %9157 = vmatmul.msk.f32.gmra.mxu3 %vm1911_vm10, %v9153_v14  ;;  %2177 = vmatpush.msra.mxu1 %v2143_v10 }
 0x29b   : > { %v9971_v62 = vpop.permute.xlu1 %9970  ;;  %v9956_v28 = vpop.permute.xlu0 %9955  ;;  %2178 = vmatpush.msra.mxu1 %v2142_v41 }
 0x29c   : > { %v9958_v48 = vunpack.i.h.bf16 %v9956_v28  ;;  %v9957_v6 = vunpack.i.l.bf16 %v9956_v28  ;;  %v12175_v51 = vpop.permute.xlu2 %9975  ;;  %v9972_v7 = vunpack.i.l.bf16 %v9971_v62  ;;  %v9973_v13 = vunpack.i.h.bf16 %v9971_v62 }
 0x29d   : > { %2356 = vmatpush.msrb.mxu1 %v2293_v29  ;;  %9161 = vmatmul.msk.f32.gmra.mxu0 %vm1911_vm10, %v9153_v14  ;;  %v9978_v21 = vunpack.i.h.bf16 %v12175_v51  ;;  %v9977_v57 = vunpack.i.l.bf16 %v12175_v51 }
 0x29e   : > { %9165 = vmatmul.msk.f32.gmra.mxu1 %vm1911_vm10, %v9153_v14  ;;  %v2141_v23 = vsel %vm793_vm4, %v9947_v54, %v9957_v6  ;;  %v2137_v56 = vsel %vm793_vm4, %v9957_v6, %v9948_v34  ;;  %v2140_v59 = vsel %vm793_vm4, %v9932_v18, %v9958_v48  ;;  %v2136_v54 = vsel %vm793_vm4, %v9958_v48, %v9933_v35  ;;  %v12287_v14 = vld [vmem:[%s17522_s3 + $0x50] sm:$0xff] }
 0x29f   : > { %2204 = vmatpush.msra.mxu2 %v2141_v23  ;;  %2233 = vmatpush.msra.mxu3 %v2137_v56  ;;  %v2291_v25 = vsel %vm937_vm5, %v9977_v57, %v9978_v21  ;;  %v9194_v23 = vld [vmem:[%s17522_s3 + $0x60] sm:$0xff] }
 0x2a0   : > { %9168 = vmatmul.msk.f32.gmra.mxu2 %vm1911_vm10, %v12181_v60 }
 0x2a1   : > { %9170 = vmatmul.msk.f32.vlgmr.msrb.gmra.mxu3 %vm1911_vm10, %v12128_v15  ;;  %2205 = vmatpush.msra.mxu2 %v2140_v59 }
 0x2a2   : > { %2234 = vmatpush.msra.mxu3 %v2136_v54 }
 0x2a3   : > { %v9981_v34 = vpop.permute.xlu0 %9980  ;;  %2206 = vmatpush.msra.mxu2 %v2139_v33  ;;  %v9991_v31 = vpop.permute.xlu1 %9990 }
 0x2a4   : > { %v9983_v17 = vunpack.i.h.bf16 %v9981_v34  ;;  %v9982_v8 = vunpack.i.l.bf16 %v9981_v34  ;;  %2235 = vmatpush.msra.mxu3 %v2135_v1  ;;  %v12230_v9 = vpop.permute.xlu2 %9995  ;;  %v9992_v43 = vunpack.i.l.bf16 %v9991_v31  ;;  %v9993_v45 = vunpack.i.h.bf16 %v9991_v31 }
 0x2a5   : > { %9174 = vmatmul.msk.f32.vlgmr.msra.gmra.mxu0 %vm1911_vm10, %v12128_v15  ;;  %2207 = vmatpush.msra.mxu2 %v2138_v19  ;;  %v12228_v15 = vld [vmem:[%s17522_s3 + $0x18] sm:$0xff]  ;;  %v9998_v18 = vunpack.i.h.bf16 %v12230_v9  ;;  %v9997_v38 = vunpack.i.l.bf16 %v12230_v9 }
 0x2a6   : > { %9182 = vmatmul.msk.f32.vlgmr.msra.gmra.mxu1 %vm1911_vm10, %v12207_v2  ;;  %2236 = vmatpush.msra.mxu3 %v2134_v24  ;;  %v2297_v20 = vsel %vm937_vm5, %v9982_v8, %v9967_v11  ;;  %v2292_v44 = vsel %vm937_vm5, %v9983_v17, %v9972_v7  ;;  %v2289_v37 = vsel %vm937_vm5, %v9968_v3, %v9982_v8 }
 0x2a7   : > { %2327 = vmatpush.msrb.mxu0 %v2297_v20  ;;  %2357 = vmatpush.msrb.mxu1 %v2292_v44  ;;  %v2296_v53 = vsel %vm937_vm5, %v9973_v13, %v9983_v17  ;;  %v2286_v61 = vsel %vm937_vm5, %v9992_v43, %v9993_v45 }
 0x2a8   : > { %2443 = vmatpush.msrb.mxu3 %v11935_v27  ;;  %2385 = vmatpush.msrb.mxu2 %v2289_v37  ;;  %v2288_v27 = vsel %vm937_vm5, %v9972_v7, %v9973_v13 }
 0x2a9   : > { %9169 = vmatmul.msk.f32.gmra.mxu2 %vm1911_vm10, %v12228_v15  ;;  %9171 = vmatmul.msk.f32.gmra.mxu3 %vm1911_vm10, %v12156_v5 }
 0x2aa   : > { %2444 = vmatpush.msrb.mxu3 %v11906_v16  ;;  %2328 = vmatpush.msrb.mxu0 %v2296_v53 }
 0x2ab   : > { %2358 = vmatpush.msrb.mxu1 %v2291_v25  ;;  %2386 = vmatpush.msrb.mxu2 %v2288_v27  ;;  %v9986_v22 = vpop.permute.xlu0 %9985  ;;  %v12263_v26 = vpop.permute.xlu1 %10015 }
 0x2ac   : > { %2445 = vmatpush.msrb.mxu3 %v11862_v42  ;;  %v9988_v32 = vunpack.i.h.bf16 %v9986_v22  ;;  %v9987_v16 = vunpack.i.l.bf16 %v9986_v22  ;;  %v10017_v29 = vunpack.i.l.bf16 %v12263_v26 }
 0x2ad   : > { %9175 = vmatmul.msk.f32.gmra.mxu0 %vm1911_vm10, %v12156_v5 }
 0x2ae   : > { %9183 = vmatmul.msk.f32.gmra.mxu1 %vm1911_vm10, %v12247_v36  ;;  %2446 = vmatpush.msrb.mxu3 %v11957_v50  ;;  %v2295_v49 = vsel %vm937_vm5, %v9987_v16, %v9977_v57  ;;  %v2290_v35 = vsel %vm937_vm5, %v9988_v32, %v9992_v43  ;;  %v2287_v42 = vsel %vm937_vm5, %v9978_v21, %v9987_v16  ;;  %v12266_v50 = vpop.permute.xlu2 %10005 }
 0x2af   : > { %2329 = vmatpush.msrb.mxu0 %v2295_v49  ;;  %2359 = vmatpush.msrb.mxu1 %v2290_v35  ;;  %v2294_v5 = vsel %vm937_vm5, %v9993_v45, %v9988_v32  ;;  %v10008_v48 = vunpack.i.h.bf16 %v12266_v50  ;;  %v2557_v51 = vsel %vm1209_vm6, %v9998_v18, %v10017_v29  ;;  %v2565_v7 = vsel %vm1209_vm6, %v10017_v29, %v9997_v38  ;;  %v9196_v32 = vld [vmem:[%s17522_s3 + $0x70] sm:$0xff] }
 0x2b0   : > { %2387 = vmatpush.msrb.mxu2 %v2287_v42 }
 0x2b1   : > { %2501 = vmatpush.msra.mxu1 %v11937_v47  ;;  %9172 = vmatmul.msk.f32.gmra.mxu3 %vm1911_vm10, %v12181_v60  ;;  %v2561_v47 = vsel %vm1209_vm6, %v9997_v38, %v9998_v18  ;;  %v9197_v38 = vld [vmem:[%s17522_s3 + $0x78] sm:$0xff] }
 0x2b2   : > { %9186 = vmatmul.msk.f32.vlgmr.msra.gmra.mxu2 %vm1911_vm10, %v12207_v2  ;;  %2330 = vmatpush.msrb.mxu0 %v2294_v5 }
 0x2b3   : > { %2388 = vmatpush.msrb.mxu2 %v2286_v61  ;;  %2502 = vmatpush.msra.mxu1 %v11908_v0  ;;  %v12282_v4 = vpop.permute.xlu0 %10000  ;;  %v10007_v0 = vunpack.i.l.bf16 %v12266_v50  ;;  %v10021_v41 = vpop.permute.xlu1 %10020  ;;  %v9210_v50 = vld [vmem:[%s17522_s3 + $0x80] sm:$0xff] }
 0x2b4   : > { %2472 = vmatpush.msra.mxu0 %v11955_v39  ;;  %v10003_v3 = vunpack.i.h.bf16 %v12282_v4  ;;  %v10002_v11 = vunpack.i.l.bf16 %v12282_v4  ;;  %v10018_v39 = vunpack.i.h.bf16 %v12263_v26  ;;  %v10022_v6 = vunpack.i.l.bf16 %v10021_v41 }
 0x2b5   : > { %2595 = vmatpush.msra.mxu2 %v2561_v47  ;;  %9176 = vmatmul.msk.f32.gmra.mxu0 %vm1911_vm10, %v12181_v60  ;;  %v10023_v34 = vunpack.i.h.bf16 %v10021_v41 }
 0x2b6   : > { %2503 = vmatpush.msra.mxu1 %v11864_v40  ;;  %2473 = vmatpush.msra.mxu0 %v11931_v52  ;;  %v2560_v10 = vsel %vm1209_vm6, %v10002_v11, %v10003_v3  ;;  %v2559_v40 = vsel %vm1209_vm6, %v10018_v39, %v10007_v0  ;;  %v12312_v52 = vpop.permute.xlu2 %10025  ;;  %v2556_v58 = vsel %vm1209_vm6, %v10003_v3, %v10008_v48 }
 0x2b7   : > { %9184 = vmatmul.msk.f32.gmra.mxu1 %vm1911_vm10, %v12287_v14  ;;  %2596 = vmatpush.msra.mxu2 %v2560_v10  ;;  %v10028_v60 = vunpack.i.h.bf16 %v12312_v52  ;;  %v10027_v12 = vunpack.i.l.bf16 %v12312_v52  ;;  %v2564_v57 = vsel %vm1209_vm6, %v10008_v48, %v10002_v11  ;;  %v2563_v20 = vsel %vm1209_vm6, %v10022_v6, %v10018_v39 }
 0x2b8   : > { %2504 = vmatpush.msra.mxu1 %v11933_v63  ;;  %2474 = vmatpush.msra.mxu0 %v11892_v30  ;;  %v12317_v30 = vld [vmem:[%s17522_s3 + $0x58] sm:$0xff] }
 0x2b9   : > { %9173 = vmatmul.msk.f32.gmra.mxu3 %vm1911_vm10, %v12228_v15  ;;  %2597 = vmatpush.msra.mxu2 %v2559_v40  ;;  %v2713_v19 = vsel %vm1353_vm7, %v10027_v12, %v10028_v60 }
 0x2ba   : > { %9187 = vmatmul.msk.f32.gmra.mxu2 %vm1911_vm10, %v12247_v36  ;;  %2475 = vmatpush.msra.mxu0 %v11902_v55 }
 0x2bb   : > { %v10011_v63 = vpop.permute.xlu0 %10010  ;;  %v12338_v56 = vpop.permute.xlu1 %10035 }
 0x2bc   : > { %v10013_v62 = vunpack.i.h.bf16 %v10011_v63  ;;  %v10012_v28 = vunpack.i.l.bf16 %v10011_v63  ;;  %v10038_v17 = vunpack.i.h.bf16 %v12338_v56  ;;  %v10037_v8 = vunpack.i.l.bf16 %v12338_v56 }
 0x2bd   : > { %9177 = vmatmul.msk.f32.gmra.mxu0 %vm1911_vm10, %v12228_v15  ;;  %v9195_v15 = vld [vmem:[%s17522_s3 + $0x68] sm:$0xff] }
 0x2be   : > { %v2558_v55 = vsel %vm1209_vm6, %v10012_v28, %v10013_v62  ;;  %v12346_v1 = vpop.permute.xlu2 %10040  ;;  %v2554_v21 = vsel %vm1209_vm6, %v10013_v62, %v10023_v34  ;;  %v2711_v44 = vsel %vm1353_vm7, %v10037_v8, %v10038_v17  ;;  %v2562_v9 = vsel %vm1209_vm6, %v10023_v34, %v10012_v28 }
 0x2bf   : > { %9185 = vmatmul.msk.f32.gmra.mxu1 %vm1911_vm10, %v12317_v30  ;;  %2598 = vmatpush.msra.mxu2 %v2558_v55  ;;  %v10043_v31 = vunpack.i.h.bf16 %v12346_v1  ;;  %v10042_v24 = vunpack.i.l.bf16 %v12346_v1 }
 0x2c1   : > { %9190 = vmatmul.msk.f32.vlgmr.msra.gmra.mxu3 %vm1911_vm10, %v12207_v2  ;;  %v2555_v2 = vsel %vm1209_vm6, %v10007_v0, %v10022_v6  ;;  %v2710_v25 = vsel %vm1353_vm7, %v10042_v24, %v10043_v31  ;;  %v9211_v6 = vld [vmem:[%s17522_s3 + $0x88] sm:$0xff] }
 0x2c2   : > { %9188 = vmatmul.msk.f32.gmra.mxu2 %vm1911_vm10, %v12287_v14  ;;  %2624 = vmatpush.msra.mxu3 %v2557_v51 }
 0x2c3   : > { %v12342_v59 = vpop.permute.xlu0 %10030  ;;  %v10046_v27 = vpop.permute.xlu1 %10045 }
 0x2c4   : > { %2625 = vmatpush.msra.mxu3 %v2556_v58  ;;  %v10033_v54 = vunpack.i.h.bf16 %v12342_v59  ;;  %v10032_v33 = vunpack.i.l.bf16 %v12342_v59  ;;  %v10047_v43 = vunpack.i.l.bf16 %v10046_v27  ;;  %v10048_v16 = vunpack.i.h.bf16 %v10046_v27 }
 0x2c5   : > { %9198 = vmatmul.msk.f32.vlgmr.msrb.gmra.mxu0 %vm1911_vm10, %v9194_v23 }
 0x2c6   : > { %2626 = vmatpush.msra.mxu3 %v2555_v2  ;;  %v2712_v13 = vsel %vm1353_vm7, %v10032_v33, %v10033_v54  ;;  %2653 = vmatpush.msrb.mxu0 %v2565_v7  ;;  %v2707_v49 = vsel %vm1353_vm7, %v10038_v17, %v10047_v43  ;;  %v2706_v35 = vsel %vm1353_vm7, %v10043_v31, %v10048_v16  ;;  %v12411_v42 = vpop.permute.xlu2 %10050  ;;  %v12492_v17 = vld [vmem:[%s17522_s3 + $0xa8] sm:$0xff] }
 0x2c7   : > { %9202 = vmatmul.msk.f32.vlgmr.msrb.gmra.mxu1 %vm1911_vm10, %v9194_v23  ;;  %v10053_v5 = vunpack.i.h.bf16 %v12411_v42  ;;  %v10052_v61 = vunpack.i.l.bf16 %v12411_v42  ;;  %v2715_v63 = vsel %vm1353_vm7, %v10047_v43, %v10037_v8  ;;  %v2714_v55 = vsel %vm1353_vm7, %v10048_v16, %v10042_v24 }
 0x2c8   : > { %2747 = vmatpush.msrb.mxu1 %v2713_v19  ;;  %2627 = vmatpush.msra.mxu3 %v2554_v21 }
 0x2c9   : > { %2654 = vmatpush.msrb.mxu0 %v2564_v57  ;;  %9191 = vmatmul.msk.f32.gmra.mxu3 %vm1911_vm10, %v12247_v36 }
 0x2ca   : > { %2748 = vmatpush.msrb.mxu1 %v2712_v13  ;;  %9189 = vmatmul.msk.f32.gmra.mxu2 %vm1911_vm10, %v12317_v30  ;;  %v9213_v13 = vld [vmem:[%s17522_s3 + $0x98] sm:$0xff] }
 0x2cb   : > { %2655 = vmatpush.msrb.mxu0 %v2563_v20  ;;  %v10066_v37 = vpop.permute.xlu0 %10065  ;;  %v10056_v26 = vpop.permute.xlu1 %10055  ;;  %v9228_v20 = vld [vmem:[%s17522_s3 + $0xb0] sm:$0xff] }
 0x2cc   : > { %2749 = vmatpush.msrb.mxu1 %v2711_v44  ;;  %v10067_v53 = vunpack.i.l.bf16 %v10066_v37  ;;  %v10068_v22 = vunpack.i.h.bf16 %v10066_v37  ;;  %v10058_v0 = vunpack.i.h.bf16 %v10056_v26  ;;  %v10057_v10 = vunpack.i.l.bf16 %v10056_v26 }
 0x2cd   : > { %2656 = vmatpush.msrb.mxu0 %v2562_v9 }
 0x2ce   : > { %2750 = vmatpush.msrb.mxu1 %v2710_v25  ;;  %9199 = vmatmul.msk.f32.gmra.mxu0 %vm1911_vm10, %v9195_v15  ;;  %v2709_v36 = vsel %vm1353_vm7, %v10028_v60, %v10067_v53  ;;  %v2708_v45 = vsel %vm1353_vm7, %v10033_v54, %v10068_v22  ;;  %v2717_v47 = vsel %vm1353_vm7, %v10067_v53, %v10027_v12  ;;  %v10061_v4 = vpop.permute.xlu2 %10060  ;;  %v9226_v54 = vld [vmem:[%s17522_s3 + $0xa0] sm:$0xff] }
 0x2cf   : > { %9203 = vmatmul.msk.f32.gmra.mxu1 %vm1911_vm10, %v9195_v15  ;;  %v2716_v39 = vsel %vm1353_vm7, %v10068_v22, %v10032_v33  ;;  %v10063_v41 = vunpack.i.h.bf16 %v10061_v4  ;;  %v10062_v40 = vunpack.i.l.bf16 %v10061_v4  ;;  %v2860_v12 = vsel %vm1497_vm8, %v10057_v10, %v10058_v0  ;;  %v9212_v33 = vld [vmem:[%s17522_s3 + $0x90] sm:$0xff] }
 0x2d1   : > { %9192 = vmatmul.msk.f32.gmra.mxu3 %vm1911_vm10, %v12287_v14 }
 0x2d2   : > { %9206 = vmatmul.msk.f32.vlgmr.msrb.gmra.mxu2 %vm1911_vm10, %v9194_v23  ;;  %v2863_v23 = vsel %vm1497_vm8, %v10062_v40, %v10063_v41 }
 0x2d3   : > { %2776 = vmatpush.msrb.mxu2 %v2709_v36  ;;  %v12413_v18 = vpop.permute.xlu0 %10070  ;;  %v10081_v52 = vpop.permute.xlu1 %10080 }
 0x2d4   : > { %v10072_v14 = vunpack.i.l.bf16 %v12413_v18  ;;  %v10073_v3 = vunpack.i.h.bf16 %v12413_v18  ;;  %v10083_v51 = vunpack.i.h.bf16 %v10081_v52  ;;  %v10082_v60 = vunpack.i.l.bf16 %v10081_v52 }
 0x2d5   : > { %2777 = vmatpush.msrb.mxu2 %v2708_v45  ;;  %v9242_v45 = vld [vmem:[%s17522_s3 + $0xc0] sm:$0xff] }
 0x2d6   : > { %9200 = vmatmul.msk.f32.gmra.mxu0 %vm1911_vm10, %v9196_v32  ;;  %v2861_v28 = vsel %vm1497_vm8, %v10053_v5, %v10072_v14  ;;  %v2864_v48 = vsel %vm1497_vm8, %v10073_v3, %v10057_v10  ;;  %v2858_v59 = vsel %vm1497_vm8, %v10082_v60, %v10083_v51  ;;  %v2869_v34 = vsel %vm1497_vm8, %v10072_v14, %v10052_v61  ;;  %v10086_v8 = vpop.permute.xlu2 %10085 }
 0x2d7   : > { %9204 = vmatmul.msk.f32.gmra.mxu1 %vm1911_vm10, %v9196_v32  ;;  %2778 = vmatpush.msrb.mxu2 %v2707_v49  ;;  %v2868_v1 = vsel %vm1497_vm8, %v10058_v0, %v10073_v3  ;;  %v10088_v31 = vunpack.i.h.bf16 %v10086_v8  ;;  %v10087_v24 = vunpack.i.l.bf16 %v10086_v8 }
 0x2d9   : > { %2779 = vmatpush.msrb.mxu2 %v2706_v35  ;;  %9193 = vmatmul.msk.f32.gmra.mxu3 %vm1911_vm10, %v12317_v30  ;;  %v2865_v30 = vsel %vm1497_vm8, %v10052_v61, %v10053_v5  ;;  %v3017_v22 = vsel %vm1641_vm9, %v10087_v24, %v10088_v31  ;;  %v9229_v61 = vld [vmem:[%s17522_s3 + $0xb8] sm:$0xff] }
 0x2da   : > { %9207 = vmatmul.msk.f32.gmra.mxu2 %vm1911_vm10, %v9195_v15 }
 0x2db   : > { %v10076_v11 = vpop.permute.xlu0 %10075  ;;  %v10096_v21 = vpop.permute.xlu1 %10095 }
 0x2dc   : > { %v10077_v62 = vunpack.i.l.bf16 %v10076_v11  ;;  %v10078_v29 = vunpack.i.h.bf16 %v10076_v11  ;;  %v10098_v25 = vunpack.i.h.bf16 %v10096_v21  ;;  %v10097_v27 = vunpack.i.l.bf16 %v10096_v21 }
 0x2de   : > { %9201 = vmatmul.msk.f32.gmra.mxu0 %vm1911_vm10, %v9197_v38  ;;  %v2859_v56 = vsel %vm1497_vm8, %v10063_v41, %v10077_v62  ;;  %v2862_v58 = vsel %vm1497_vm8, %v10078_v29, %v10082_v60  ;;  %v2867_v7 = vsel %vm1497_vm8, %v10077_v62, %v10062_v40  ;;  %v2866_v19 = vsel %vm1497_vm8, %v10083_v51, %v10078_v29  ;;  %v10101_v15 = vpop.permute.xlu2 %10100  ;;  %v9243_v41 = vld [vmem:[%s17522_s3 + $0xc8] sm:$0xff]  ;;  %v9244_v29 = vld [vmem:[%s17522_s3 + $0xd0] sm:$0xff]  ;;  %v9245_v60 = vld [vmem:[%s17522_s3 + $0xd8] sm:$0xff] }
 0x2df   : > { %9205 = vmatmul.msk.f32.gmra.mxu1 %vm1911_vm10, %v9197_v38  ;;  %v10103_v49 = vunpack.i.h.bf16 %v10101_v15  ;;  %v10102_v35 = vunpack.i.l.bf16 %v10101_v15  ;;  %v3015_v26 = vsel %vm1641_vm9, %v10097_v27, %v10098_v25 }
 0x2e1   : > { %9214 = vmatmul.msk.f32.vlgmr.msrb.gmra.mxu3 %vm1911_vm10, %v9210_v50  ;;  %v3014_v4 = vsel %vm1641_vm9, %v10102_v35, %v10103_v49 }
 0x2e2   : > { %9208 = vmatmul.msk.f32.gmra.mxu2 %vm1911_vm10, %v9196_v32  ;;  %2805 = vmatpush.msrb.mxu3 %v2717_v47 }
 0x2e3   : > { %v10091_v2 = vpop.permute.xlu0 %10090  ;;  %v10111_v43 = vpop.permute.xlu1 %10110 }
 0x2e4   : > { %2806 = vmatpush.msrb.mxu3 %v2716_v39  ;;  %v10093_v44 = vunpack.i.h.bf16 %v10091_v2  ;;  %v10092_v37 = vunpack.i.l.bf16 %v10091_v2  ;;  %v10113_v47 = vunpack.i.h.bf16 %v10111_v43  ;;  %v9259_v2 = vld [vmem:[%s17522_s3 + $0xe8] sm:$0xff] }
 0x2e6   : > { %9218 = vmatmul.msk.f32.vlgmr.msra.gmra.mxu0 %vm1911_vm10, %v9210_v50  ;;  %2807 = vmatpush.msrb.mxu3 %v2715_v63  ;;  %v3016_v42 = vsel %vm1641_vm9, %v10092_v37, %v10093_v44  ;;  %v3010_v40 = vsel %vm1641_vm9, %v10103_v49, %v10113_v47  ;;  %v3018_v52 = vsel %vm1641_vm9, %v10113_v47, %v10102_v35  ;;  %v9276_v49 = vld [vmem:[%s17522_s3 + $0x110] sm:$0xff] }
 0x2e7   : > { %9222 = vmatmul.msk.f32.vlgmr.msra.gmra.mxu1 %vm1911_vm10, %v9210_v50  ;;  %2899 = vmatpush.msra.mxu0 %v2865_v30 }
 0x2e8   : > { %2928 = vmatpush.msra.mxu1 %v2861_v28  ;;  %2808 = vmatpush.msrb.mxu3 %v2714_v55 }
 0x2e9   : > { %2900 = vmatpush.msra.mxu0 %v2864_v48  ;;  %9215 = vmatmul.msk.f32.gmra.mxu3 %vm1911_vm10, %v9211_v6 }
 0x2ea   : > { %2929 = vmatpush.msra.mxu1 %v2860_v12  ;;  %9209 = vmatmul.msk.f32.gmra.mxu2 %vm1911_vm10, %v9197_v38  ;;  %v10112_v38 = vunpack.i.l.bf16 %v10111_v43 }
 0x2eb   : > { %2901 = vmatpush.msra.mxu0 %v2863_v23  ;;  %v10106_v57 = vpop.permute.xlu0 %10105 }
 0x2ec   : > { %2930 = vmatpush.msra.mxu1 %v2859_v56  ;;  %v10107_v9 = vunpack.i.l.bf16 %v10106_v57  ;;  %v10108_v32 = vunpack.i.h.bf16 %v10106_v57  ;;  %v3011_v11 = vsel %vm1641_vm9, %v10098_v25, %v10112_v38  ;;  %v3019_v39 = vsel %vm1641_vm9, %v10112_v38, %v10097_v27  ;;  %v9275_v27 = vld [vmem:[%s17522_s3 + $0x108] sm:$0xff] }
 0x2ed   : > { %2902 = vmatpush.msra.mxu0 %v2862_v58 }
 0x2ee   : > { %2931 = vmatpush.msra.mxu1 %v2858_v59  ;;  %9219 = vmatmul.msk.f32.gmra.mxu0 %vm1911_vm10, %v9211_v6  ;;  %v3013_v18 = vsel %vm1641_vm9, %v10088_v31, %v10107_v9  ;;  %v3021_v50 = vsel %vm1641_vm9, %v10107_v9, %v10087_v24  ;;  %v3012_v5 = vsel %vm1641_vm9, %v10093_v44, %v10108_v32  ;;  %v9258_v59 = vld [vmem:[%s17522_s3 + $0xe0] sm:$0xff] }
 0x2ef   : > { %9223 = vmatmul.msk.f32.gmra.mxu1 %vm1911_vm10, %v9211_v6  ;;  %v3020_v14 = vsel %vm1641_vm9, %v10108_v32, %v10092_v37  ;;  %v9274_v44 = vld [vmem:[%s17522_s3 + $0x100] sm:$0xff] }
 0x2f1   : > { %9216 = vmatmul.msk.f32.gmra.mxu3 %vm1911_vm10, %v9212_v33 }
 0x2f2   : > { %9230 = vmatmul.msk.f32.vlgmr.msra.gmra.mxu2 %vm1911_vm10, %v9226_v54 }
 0x2f3   : > { %2957 = vmatpush.msra.mxu2 %v2869_v34 }
 0x2f5   : > { %2958 = vmatpush.msra.mxu2 %v2868_v1 }
 0x2f6   : > { %9220 = vmatmul.msk.f32.gmra.mxu0 %vm1911_vm10, %v9212_v33 }
 0x2f7   : > { %9224 = vmatmul.msk.f32.gmra.mxu1 %vm1911_vm10, %v9212_v33  ;;  %2959 = vmatpush.msra.mxu2 %v2867_v7 }
 0x2f9   : > { %2960 = vmatpush.msra.mxu2 %v2866_v19  ;;  %9217 = vmatmul.msk.f32.gmra.mxu3 %vm1911_vm10, %v9213_v13 }
 0x2fa   : > { %9231 = vmatmul.msk.f32.gmra.mxu2 %vm1911_vm10, %v12492_v17 }
 0x2fe   : > { %9221 = vmatmul.msk.f32.gmra.mxu0 %vm1911_vm10, %v9213_v13 }
 0x2ff   : > { %9225 = vmatmul.msk.f32.gmra.mxu1 %vm1911_vm10, %v9213_v13  ;;  %v9260_v13 = vld [vmem:[%s17522_s3 + $0xf0] sm:$0xff] }
 0x301   : > { %9234 = vmatmul.msk.f32.vlgmr.msra.gmra.mxu3 %vm1911_vm10, %v9226_v54 }
 0x302   : > { %9232 = vmatmul.msk.f32.gmra.mxu2 %vm1911_vm10, %v9228_v20  ;;  %v12508_v53 = vpop.f32.mrf.mxu0  ;;  %3051 = vmatpush.msra.mxu3 %v3017_v22 }
 0x303   : > { %v12513_v36 = vpop.f32.mrf.mxu1 }
 0x304   : > { %v12515_v16 = vpop.f32.mrf.mxu3  ;;  %3052 = vmatpush.msra.mxu3 %v3016_v42 }
 0x306   : > { %9238 = vmatmul.msk.f32.vlgmr.msrb.gmra.mxu0 %vm1911_vm10, %v9226_v54  ;;  %3053 = vmatpush.msra.mxu3 %v3015_v26  ;;  %v9277_v26 = vld [vmem:[%s17522_s3 + $0x118] sm:$0xff] }
 0x307   : > { %9246 = vmatmul.msk.f32.vlgmr.msrb.gmra.mxu1 %vm1911_vm10, %v9242_v45  ;;  %3080 = vmatpush.msrb.mxu0 %v3013_v18 }
 0x308   : > { %3109 = vmatpush.msrb.mxu1 %v3021_v50  ;;  %3054 = vmatpush.msra.mxu3 %v3014_v4 }
 0x309   : > { %3081 = vmatpush.msrb.mxu0 %v3012_v5  ;;  %9235 = vmatmul.msk.f32.gmra.mxu3 %vm1911_vm10, %v12492_v17 }
 0x30a   : > { %3110 = vmatpush.msrb.mxu1 %v3020_v14  ;;  %v12539_v3 = vpop.f32.mrf.mxu0  ;;  %9233 = vmatmul.msk.f32.gmra.mxu2 %vm1911_vm10, %v9229_v61 }
 0x30b   : > { %v12548_v0 = vpop.f32.mrf.mxu1  ;;  %3082 = vmatpush.msrb.mxu0 %v3011_v11 }
 0x30c   : > { %3111 = vmatpush.msrb.mxu1 %v3019_v39  ;;  %v12550_v10 = vpop.f32.mrf.mxu3 }
 0x30d   : > { %3083 = vmatpush.msrb.mxu0 %v3010_v40 }
 0x30e   : > { %3112 = vmatpush.msrb.mxu1 %v3018_v52  ;;  %9239 = vmatmul.msk.f32.gmra.mxu0 %vm1911_vm10, %v12492_v17 }
 0x30f   : > { %9247 = vmatmul.msk.f32.gmra.mxu1 %vm1911_vm10, %v9243_v41 }
 0x311   : > { %9236 = vmatmul.msk.f32.gmra.mxu3 %vm1911_vm10, %v9228_v20 }
 0x312   : > { %v12562_v63 = vpop.f32.mrf.mxu0  ;;  %9250 = vmatmul.msk.f32.vlgmr.msrb.gmra.mxu2 %vm1911_vm10, %v9242_v45 }
 0x313   : > { %v12566_v30 = vpop.f32.mrf.mxu1  ;;  %v12568_v62 = vpop.f32.mrf.mxu2 }
 0x314   : > { %v12570_v28 = vpop.f32.mrf.mxu3 }
 0x316   : > { %9240 = vmatmul.msk.f32.gmra.mxu0 %vm1911_vm10, %v9228_v20  ;;  %v9261_v20 = vld [vmem:[%s17522_s3 + $0xf8] sm:$0xff] }
 0x317   : > { %9248 = vmatmul.msk.f32.gmra.mxu1 %vm1911_vm10, %v9244_v29 }
 0x319   : > { %9237 = vmatmul.msk.f32.gmra.mxu3 %vm1911_vm10, %v9229_v61 }
 0x31a   : > { %v12577_v55 = vpop.f32.mrf.mxu0  ;;  %9251 = vmatmul.msk.f32.gmra.mxu2 %vm1911_vm10, %v9243_v41 }
 0x31b   : > { %v12581_v48 = vpop.f32.mrf.mxu1  ;;  %v12583_v6 = vpop.f32.mrf.mxu2 }
 0x31c   : > { %v12585_v51 = vpop.f32.mrf.mxu3 }
 0x31e   : > { %9241 = vmatmul.msk.f32.gmra.mxu0 %vm1911_vm10, %v9229_v61 }
 0x31f   : > { %9249 = vmatmul.msk.f32.gmra.mxu1 %vm1911_vm10, %v9245_v60 }
 0x321   : > { %9254 = vmatmul.msk.f32.vlgmr.msrb.gmra.mxu3 %vm1911_vm10, %v9242_v45 }
 0x322   : > { %v12592_v12 = vpop.f32.mrf.mxu0  ;;  %9252 = vmatmul.msk.f32.gmra.mxu2 %vm1911_vm10, %v9244_v29 }
 0x323   : > { %v12596_v23 = vpop.f32.mrf.mxu1  ;;  %v12598_v56 = vpop.f32.mrf.mxu2 }
 0x324   : > { %v12600_v58 = vpop.f32.mrf.mxu3 }
 0x326   : > { %9262 = vmatmul.msk.f32.vlgmr.msra.gmra.mxu0 %vm1911_vm10, %v9258_v59 }
 0x327   : > { %9266 = vmatmul.msk.f32.vlgmr.msra.gmra.mxu1 %vm1911_vm10, %v9258_v59 }
 0x329   : > { %9255 = vmatmul.msk.f32.gmra.mxu3 %vm1911_vm10, %v9243_v41 }
 0x32a   : > { %v12607_v54 = vpop.f32.mrf.mxu0  ;;  %9253 = vmatmul.msk.f32.gmra.mxu2 %vm1911_vm10, %v9245_v60 }
 0x32b   : > { %v12611_v33 = vpop.f32.mrf.mxu1 }
 0x32c   : > { %v12613_v34 = vpop.f32.mrf.mxu2  ;;  %v12615_v1 = vpop.f32.mrf.mxu3 }
 0x32e   : > { %9263 = vmatmul.msk.f32.gmra.mxu0 %vm1911_vm10, %v9259_v2 }
 0x32f   : > { %9267 = vmatmul.msk.f32.gmra.mxu1 %vm1911_vm10, %v9259_v2 }
 0x331   : > { %9256 = vmatmul.msk.f32.gmra.mxu3 %vm1911_vm10, %v9244_v29 }
 0x332   : > { %v12622_v7 = vpop.f32.mrf.mxu0  ;;  %9270 = vmatmul.msk.f32.vlgmr.msra.gmra.mxu2 %vm1911_vm10, %v9258_v59 }
 0x334   : > { %v12626_v17 = vpop.f32.mrf.mxu1  ;;  %v12628_v8 = vpop.f32.mrf.mxu3 }
 0x335   : > { %v12630_v19 = vpop.f32.mrf.mxu2 }
 0x336   : > { %9264 = vmatmul.msk.f32.gmra.mxu0 %vm1911_vm10, %v9260_v13 }
 0x337   : > { %9268 = vmatmul.msk.f32.gmra.mxu1 %vm1911_vm10, %v9260_v13 }
 0x339   : > { %9257 = vmatmul.msk.f32.gmra.mxu3 %vm1911_vm10, %v9245_v60 }
 0x33a   : > { %v12637_v21 = vpop.f32.mrf.mxu0  ;;  %9271 = vmatmul.msk.f32.gmra.mxu2 %vm1911_vm10, %v9259_v2 }
 0x33c   : > { %v12641_v31 = vpop.f32.mrf.mxu1  ;;  %v12643_v24 = vpop.f32.mrf.mxu3 }
 0x33d   : > { %v12645_v57 = vpop.f32.mrf.mxu2 }
 0x33e   : > { %9265 = vmatmul.msk.f32.gmra.mxu0 %vm1911_vm10, %v9261_v20 }
 0x33f   : > { %9269 = vmatmul.msk.f32.gmra.mxu1 %vm1911_vm10, %v9261_v20 }
 0x341   : > { %9278 = vmatmul.msk.f32.vlgmr.msra.gmra.mxu3 %vm1911_vm10, %v9274_v44 }
 0x342   : > { %v12655_v37 = vpop.f32.mrf.mxu0  ;;  %9272 = vmatmul.msk.f32.gmra.mxu2 %vm1911_vm10, %v9260_v13 }
 0x344   : > { %v12659_v15 = vpop.f32.mrf.mxu1  ;;  %v12663_v25 = vpop.f32.mrf.mxu3 }
 0x345   : > { %v12661_v9 = vpop.f32.mrf.mxu2 }
 0x346   : > { %9282 = vmatmul.msk.f32.vlgmr.msrb.gmra.mxu0 %vm1911_vm10, %v9274_v44 }
 0x347   : > { %9286 = vmatmul.msk.f32.vlgmr.msrb.gmra.mxu1 %vm1911_vm10, %v9274_v44 }
 0x349   : > { %9279 = vmatmul.msk.f32.gmra.mxu3 %vm1911_vm10, %v9275_v27 }
 0x34a   : > { %9273 = vmatmul.msk.f32.gmra.mxu2 %vm1911_vm10, %v9261_v20 }
 0x34b   : > { %v12672_v22 = vpop.f32.mrf.mxu0 }
 0x34c   : > { %v12674_v43 = vpop.f32.mrf.mxu1  ;;  %v12678_v45 = vpop.f32.mrf.mxu3 }
 0x34d   : > { %v12676_v32 = vpop.f32.mrf.mxu2 }
 0x34e   : > { %9283 = vmatmul.msk.f32.gmra.mxu0 %vm1911_vm10, %v9275_v27 }
 0x34f   : > { %9287 = vmatmul.msk.f32.gmra.mxu1 %vm1911_vm10, %v9275_v27 }
 0x351   : > { %9280 = vmatmul.msk.f32.gmra.mxu3 %vm1911_vm10, %v9276_v49 }
 0x353   : > { %v12686_v35 = vpop.f32.mrf.mxu0 }
 0x354   : > { %v12688_v42 = vpop.f32.mrf.mxu1  ;;  %v12690_v18 = vpop.f32.mrf.mxu3 }
 0x355   : > { %v12692_v38 = vpop.f32.mrf.mxu2 }
 0x356   : > { %9284 = vmatmul.msk.f32.gmra.mxu0 %vm1911_vm10, %v9276_v49 }
 0x357   : > { %9288 = vmatmul.msk.f32.gmra.mxu1 %vm1911_vm10, %v9276_v49 }
 0x359   : > { %9281 = vmatmul.msk.f32.gmra.mxu3 %vm1911_vm10, %v9277_v26 }
 0x35b   : > { %v12700_v50 = vpop.f32.mrf.mxu0 }
 0x35c   : > { %v12702_v5 = vpop.f32.mrf.mxu1  ;;  %v12704_v61 = vpop.f32.mrf.mxu3 }
 0x35d   : > { %v12706_v47 = vpop.f32.mrf.mxu2 }
 0x35e   : > { %9285 = vmatmul.msk.f32.gmra.mxu0 %vm1911_vm10, %v9277_v26 }
 0x35f   : > { %9289 = vmatmul.msk.f32.gmra.mxu1 %vm1911_vm10, %v9277_v26 }
 0x363   : > { %v12710_v4 = vpop.f32.mrf.mxu0 }
 0x364   : > { %v12712_v14 = vpop.f32.mrf.mxu1  ;;  %v12716_v39 = vpop.f32.mrf.mxu3 }
 0x365   : > { %v12714_v11 = vpop.f32.mrf.mxu2 }
 0x36b   : > { %v12718_v41 = vpop.f32.mrf.mxu0 }
 0x36c   : > { %v12720_v40 = vpop.f32.mrf.mxu1  ;;  %v12724_v29 = vpop.f32.mrf.mxu3 }
 0x36d   : > { %17640 = vst [vmem:[#allocation20_spill] sm:$0xff] %v12720_v40  ;;  %v12722_v52 = vpop.f32.mrf.mxu2 }
 0x36e   : > { %17641 = vst [vmem:[#allocation4_spill] sm:$0xff] %v12722_v52 }
 0x36f   : > { %17642 = vst [vmem:[#allocation6_spill] sm:$0xff] %v12724_v29 }
 0x373   : > { %v12726_v60 = vpop.f32.mrf.mxu0 }
 0x374   : > { %v12728_v59 = vpop.f32.mrf.mxu1  ;;  %v12732_v13 = vpop.f32.mrf.mxu3 }
 0x375   : > { %v12730_v2 = vpop.f32.mrf.mxu2  ;;  %17644 = vst [vmem:[#allocation7_spill] sm:$0xff] %v12732_v13 }
 0x376   : > { %17643 = vst [vmem:[#allocation26_spill] sm:$0xff] %v12730_v2 }
 0x37b   : > { %v12734_v20 = vpop.f32.mrf.mxu0 }
 0x37c   : > { %17645 = vst [vmem:[#allocation27_spill] sm:$0xff] %v12734_v20  ;;  %v12736_v44 = vpop.f32.mrf.mxu1  ;;  %v12740_v49 = vpop.f32.mrf.mxu3 }
 0x37d   : > { %17646 = vst [vmem:[#allocation5_spill] sm:$0xff] %v12736_v44  ;;  %v12738_v27 = vpop.f32.mrf.mxu2 }
 0x37e   : > { %17647 = vst [vmem:[#allocation13_spill] sm:$0xff] %v12738_v27 }
 0x37f   : > { %17648 = vst [vmem:[#allocation32_spill] sm:$0xff] %v12740_v49 }
 0x383   : > { %v12742_v26 = vpop.f32.mrf.mxu0 }
 0x384   : > { %17649 = vst [vmem:[#allocation8_spill] sm:$0xff] %v12742_v26  ;;  %v12744_v46 = vpop.f32.mrf.mxu1  ;;  %v12748_v52 = vpop.f32.mrf.mxu3 }
 0x385   : > { %17650 = vst [vmem:[#allocation16_spill] sm:$0xff] %v12744_v46  ;;  %v12746_v29 = vpop.f32.mrf.mxu2 }
 0x386   : > { %17651 = vst [vmem:[#allocation34_spill] sm:$0xff] %v12746_v29 }
 0x387   : > { %17652 = vst [vmem:[#allocation12_spill] sm:$0xff] %v12748_v52 }
 0x38b   : > { %v12750_v40 = vpop.f32.mrf.mxu0 }
 0x38c   : > { %17653 = vst [vmem:[#allocation17_spill] sm:$0xff] %v12750_v40  ;;  %v12752_v2 = vpop.f32.mrf.mxu1  ;;  %v12756_v20 = vpop.f32.mrf.mxu3 }
 0x38d   : > { %17654 = vst [vmem:[#allocation24_spill] sm:$0xff] %v12752_v2  ;;  %v12754_v13 = vpop.f32.mrf.mxu2 }
 0x38e   : > { %17655 = vst [vmem:[#allocation22_spill] sm:$0xff] %v12754_v13 }
 0x38f   : > { %17656 = vst [vmem:[#allocation18_spill] sm:$0xff] %v12756_v20 }
 0x393   : > { %v12758_v44 = vpop.f32.mrf.mxu0 }
 0x394   : > { %17657 = vst [vmem:[#allocation23_spill] sm:$0xff] %v12758_v44  ;;  %v12760_v27 = vpop.f32.mrf.mxu1  ;;  %v12762_v49 = vpop.f32.mrf.mxu3 }
 0x395   : > { %17658 = vst [vmem:[#allocation33_spill] sm:$0xff] %v12760_v27  ;;  %v12764_v26 = vpop.f32.mrf.mxu2 }
 0x396   : > { %17659 = vst [vmem:[#allocation9_spill] sm:$0xff] %v12762_v49 }
 0x397   : > { %17660 = vst [vmem:[#allocation11_spill] sm:$0xff] %v12764_v26 }
 0x39b   : > { %v12766_v46 = vpop.f32.mrf.mxu0 }
 0x39c   : > { %17661 = vst [vmem:[#allocation35_spill] sm:$0xff] %v12766_v46  ;;  %v12768_v29 = vpop.f32.mrf.mxu1  ;;  %v12770_v52 = vpop.f32.mrf.mxu3 }
 0x39d   : > { %17662 = vst [vmem:[#allocation30_spill] sm:$0xff] %v12768_v29  ;;  %v12772_v40 = vpop.f32.mrf.mxu2 }
 0x39e   : > { %17663 = vst [vmem:[#allocation31_spill] sm:$0xff] %v12770_v52 }
 0x39f   : > { %17664 = vst [vmem:[#allocation38_spill] sm:$0xff] %v12772_v40 }
 0x3a3   : > { %v12774_v2 = vpop.f32.mrf.mxu0 }
 0x3a4   : > { %17665 = vst [vmem:[#allocation15_spill] sm:$0xff] %v12774_v2  ;;  %v12776_v13 = vpop.f32.mrf.mxu1  ;;  %v12780_v44 = vpop.f32.mrf.mxu3 }
 0x3a5   : > { %17666 = vst [vmem:[#allocation19_spill] sm:$0xff] %v12776_v13  ;;  %v12778_v20 = vpop.f32.mrf.mxu2 }
 0x3a6   : > { %17667 = vst [vmem:[#allocation37_spill] sm:$0xff] %v12778_v20 }
 0x3a7   : > { %17668 = vst [vmem:[#allocation3_spill] sm:$0xff] %v12780_v44 }
 0x3ab   : > { %v12782_v27 = vpop.f32.mrf.mxu0 }
 0x3ac   : > { %17669 = vst [vmem:[#allocation25_spill] sm:$0xff] %v12782_v27  ;;  %v12784_v49 = vpop.f32.mrf.mxu1  ;;  %v12786_v26 = vpop.f32.mrf.mxu3 }
 0x3ad   : > { %17670 = vst [vmem:[#allocation28_spill] sm:$0xff] %v12784_v49  ;;  %v12788_v46 = vpop.f32.mrf.mxu2  ;;  %v2041_v49 = vadd.f32 %v12568_v62, %v12515_v16  ;;  %v2070_v16 = vadd.f32 %v12600_v58, %v12508_v53  ;;  %v2102_v62 = vadd.f32 %v12607_v54, %v12548_v0  ;;  %v2076_v53 = vadd.f32 %v12628_v8, %v12562_v63 }
 0x3ae   : > { %17671 = vst [vmem:[#allocation10_spill] sm:$0xff] %v12786_v26  ;;  %v2044_v26 = vadd.f32 %v12583_v6, %v12550_v10  ;;  %v2073_v6 = vadd.f32 %v12615_v1, %v12539_v3  ;;  %v2079_v3 = vadd.f32 %v12643_v24, %v12577_v55 }
 0x3af   : > { %17672 = vst [vmem:[#allocation36_spill] sm:$0xff] %v12788_v46  ;;  %v2099_v46 = vadd.f32 %v12592_v12, %v12513_v36  ;;  %v2050_v36 = vadd.f32 %v12613_v34, %v12585_v51  ;;  %v2105_v12 = vadd.f32 %v12622_v7, %v12566_v30  ;;  %v2251_v0 = vadd.f32 %v12630_v19, %v2070_v16 }
 0x3b0   : > { %v2253_v10 = vadd.f32 %v12611_v33, %v2044_v26  ;;  %v2254_v58 = vadd.f32 %v12645_v57, %v2073_v6  ;;  %v2257_v63 = vadd.f32 %v12661_v9, %v2076_v53  ;;  %v2260_v7 = vadd.f32 %v12676_v32, %v2079_v3  ;;  %v12863_v9 = vpop.permute.xlu2 %3159  ;;  %v17687_v6 = vld [vmem:[#allocation26_spill] sm:$0xff]  ;;  %v17690_v3 = vld [vmem:[#allocation27_spill] sm:$0xff] }
 0x3b1   : > { %v2259_v51 = vadd.f32 %v12641_v31, %v2050_v36  ;;  %v2252_v30 = vadd.f32 %v12663_v25, %v2099_v46  ;;  %v2403_v33 = vadd.f32 %v12659_v15, %v2251_v0  ;;  %v2258_v34 = vadd.f32 %v12690_v18, %v2105_v12  ;;  %v17689_v0 = vld [vmem:[#allocation37_spill] sm:$0xff] }
 0x3b2   : > { %v2405_v1 = vadd.f32 %v12672_v22, %v2253_v10  ;;  %v2409_v8 = vadd.f32 %v12688_v42, %v2257_v63  ;;  %v2412_v31 = vadd.f32 %v12702_v5, %v2260_v7  ;;  %v17677_v42 = vld [vmem:[#allocation8_spill] sm:$0xff]  ;;  %v17686_v10 = vld [vmem:[#allocation3_spill] sm:$0xff]  ;;  %v17694_v7 = vld [vmem:[#allocation33_spill] sm:$0xff] }
 0x3b3   : > { %v12790_v29 = vpop.f32.mrf.mxu0  ;;  %v2404_v55 = vadd.f32 %v12692_v38, %v2252_v30  ;;  %v2410_v19 = vadd.f32 %v12714_v11, %v2258_v34  ;;  %v2519_v24 = vadd.f32 %v12710_v4, %v2403_v33  ;;  %v17678_v38 = vld [vmem:[#allocation12_spill] sm:$0xff]  ;;  %v17691_v30 = vld [vmem:[#allocation5_spill] sm:$0xff]  ;;  %v17692_v33 = vld [vmem:[#allocation19_spill] sm:$0xff] }
 0x3b4   : > { %17673 = vst [vmem:[#allocation39_spill] sm:$0xff] %v12790_v29  ;;  %v12792_v52 = vpop.f32.mrf.mxu1  ;;  %v12794_v40 = vpop.f32.mrf.mxu3 }
 0x3b5   : > { %17674 = vst [vmem:[#allocation14_spill] sm:$0xff] %v12792_v52  ;;  %v12796_v2 = vpop.f32.mrf.mxu2  ;;  %v2520_v57 = vadd.f32 %v12712_v14, %v2404_v55  ;;  %v2526_v32 = vadd.f32 %v12728_v59, %v2410_v19  ;;  %v17679_v14 = vld [vmem:[#allocation20_spill] sm:$0xff] }
 0x3b6   : > { %v17683_v59 = vld [vmem:[#allocation4_spill] sm:$0xff] }
 0x3b7   : > { %v2672_v18 = vadd.f32 %v17677_v42, %v2520_v57  ;;  %v17696_v19 = vld [vmem:[#allocation32_spill] sm:$0xff] }
 0x3b8   : > { %v17697_v57 = vld [vmem:[#allocation16_spill] sm:$0xff] }
 0x3b9   : > { %v2824_v36 = vadd.f32 %v17686_v10, %v2672_v18 }
 0x3bb   : > { %v12798_v13 = vpop.f32.mrf.mxu0  ;;  %v2976_v34 = vadd.f32 %v12796_v2, %v2824_v36  ;;  %v17699_v2 = vld [vmem:[#allocation39_spill] sm:$0xff] }
 0x3bc   : > { %17675 = vst [vmem:[#allocation21_spill] sm:$0xff] %v12798_v13  ;;  %v12800_v20 = vpop.f32.mrf.mxu1  ;;  %v12802_v44 = vpop.f32.mrf.mxu3  ;;  %v2250_v13 = vadd.f32 %v12596_v23, %v2041_v49 }
 0x3bd   : > { %17676 = vst [vmem:[#allocation29_spill] sm:$0xff] %v12800_v20  ;;  %v12806_v27 = vpop.f32.mrf.mxu2  ;;  %v2047_v20 = vadd.f32 %v12598_v56, %v12570_v28  ;;  %v2108_v56 = vadd.f32 %v12637_v21, %v12581_v48  ;;  %v2406_v48 = vadd.f32 %v12674_v43, %v2254_v58  ;;  %v2411_v21 = vadd.f32 %v12700_v50, %v2259_v51 }
 0x3be   : > { %v2402_v54 = vadd.f32 %v12655_v37, %v2250_v13  ;;  %v2525_v43 = vadd.f32 %v12726_v60, %v2409_v8  ;;  %v2671_v50 = vadd.f32 %v17678_v38, %v2519_v24  ;;  %v17682_v60 = vld [vmem:[#allocation9_spill] sm:$0xff]  ;;  %v2528_v58 = vadd.f32 %v17690_v3, %v2412_v31 }
 0x3bf   : > { %v2256_v28 = vadd.f32 %v12626_v17, %v2047_v20  ;;  %v2255_v17 = vadd.f32 %v12678_v45, %v2102_v62  ;;  %v2261_v25 = vadd.f32 %v12704_v61, %v2108_v56  ;;  %v17680_v61 = vld [vmem:[#allocation7_spill] sm:$0xff]  ;;  %v2527_v24 = vadd.f32 %v17696_v19, %v2411_v21  ;;  %v17702_v21 = vld [vmem:[#allocation18_spill] sm:$0xff] }
 0x3c0   : > { %v2518_v45 = vadd.f32 %v12716_v39, %v2402_v54  ;;  %v2677_v49 = vadd.f32 %v17682_v60, %v2525_v43  ;;  %v17684_v39 = vld [vmem:[#allocation6_spill] sm:$0xff] }
 0x3c1   : > { %v2408_v46 = vadd.f32 %v12686_v35, %v2256_v28  ;;  %v2407_v22 = vadd.f32 %v12706_v47, %v2255_v17  ;;  %v2522_v35 = vadd.f32 %v12718_v41, %v2406_v48  ;;  %v17681_v47 = vld [vmem:[#allocation23_spill] sm:$0xff]  ;;  %v2413_v26 = vadd.f32 %v17683_v59, %v2261_v25  ;;  %v17688_v28 = vld [vmem:[#allocation34_spill] sm:$0xff] }
 0x3c2   : > { %v2678_v20 = vadd.f32 %v17681_v47, %v2526_v32  ;;  %v2521_v16 = vadd.f32 %v17684_v39, %v2405_v1  ;;  %v17685_v41 = vld [vmem:[#allocation11_spill] sm:$0xff]  ;;  %v2670_v12 = vadd.f32 %v17687_v6, %v2518_v45  ;;  %v2829_v56 = vadd.f32 %v17689_v0, %v2677_v49  ;;  %v17693_v1 = vld [vmem:[#allocation13_spill] sm:$0xff]  ;;  %v17695_v17 = vld [vmem:[#allocation14_spill] sm:$0xff]  ;;  %v3145_v49 = vpop.permute.xlu2 %3144 }
 0x3c3   : > { %v12812_v29 = vpop.f32.mrf.mxu0  ;;  %v2523_v11 = vadd.f32 %v17679_v14, %v2407_v22  ;;  %v2524_v13 = vadd.f32 %v17680_v61, %v2408_v46  ;;  %v2823_v62 = vadd.f32 %v17685_v41, %v2671_v50  ;;  %v2529_v54 = vadd.f32 %v17691_v30, %v2413_v26  ;;  %v17698_v32 = vld [vmem:[#allocation17_spill] sm:$0xff]  ;;  %v3155_v50 = vpop.permute.xlu0 %3154  ;;  %v17700_v14 = vld [vmem:[#allocation24_spill] sm:$0xff] }
 0x3c4   : > { %v12814_v52 = vpop.f32.mrf.mxu1  ;;  %v12830_v23 = vpop.f32.mrf.mxu3  ;;  %v2830_v51 = vadd.f32 %v12794_v40, %v2678_v20  ;;  %v2673_v48 = vadd.f32 %v17693_v1, %v2521_v16  ;;  %v2981_v46 = vadd.f32 %v17695_v17, %v2829_v56  ;;  %v2822_v25 = vadd.f32 %v17697_v57, %v2670_v12  ;;  %v17703_v20 = vld [vmem:[#allocation31_spill] sm:$0xff]  ;;  %v17705_v16 = vld [vmem:[#allocation36_spill] sm:$0xff]  ;;  %v17711_v17 = vld [vmem:[#allocation25_spill] sm:$0xff] }
 0x3c5   : > { %v2968_v5 = vpop.f32.mrf.mxu2  ;;  %v2676_v53 = vadd.f32 %v17688_v28, %v2524_v13  ;;  %v2975_v63 = vadd.f32 %v17692_v33, %v2823_v62  ;;  %v3128_v31 = vadd.f32 %v12814_v52, %v2976_v34  ;;  %v2675_v45 = vadd.f32 %v17698_v32, %v2523_v11  ;;  %v17704_v52 = vld [vmem:[#allocation35_spill] sm:$0xff]  ;;  %v17706_v62 = vld [vmem:[#allocation10_spill] sm:$0xff]  ;;  %v11074_v1 = vld [vmem:[%s17532_s13 + $0x38] sm:$0xff] }
 0x3c6   : > { %v2982_v8 = vadd.f32 %v2968_v5, %v2830_v51  ;;  %v2825_v61 = vadd.f32 %v17700_v14, %v2673_v48  ;;  %v17701_v5 = vld [vmem:[#allocation22_spill] sm:$0xff]  ;;  %v2674_v47 = vadd.f32 %v17702_v21, %v2522_v35  ;;  %v2680_v60 = vadd.f32 %v17703_v20, %v2528_v58  ;;  %v17709_v58 = vld [vmem:[#allocation15_spill] sm:$0xff]  ;;  %v17713_v32 = vld [vmem:[#allocation28_spill] sm:$0xff] }
 0x3c7   : > { %v2828_v55 = vadd.f32 %v17694_v7, %v2676_v53  ;;  %v3127_v40 = vadd.f32 %v12812_v29, %v2975_v63  ;;  %v2679_v13 = vadd.f32 %v17701_v5, %v2527_v24  ;;  %v2681_v59 = vadd.f32 %v17704_v52, %v2529_v54  ;;  %v17707_v28 = vld [vmem:[#allocation30_spill] sm:$0xff]  ;;  %v17710_v54 = vld [vmem:[#allocation29_spill] sm:$0xff] }
 0x3c8   : > { %v2832_v41 = vadd.f32 %v17705_v16, %v2680_v60  ;;  %v2827_v10 = vadd.f32 %v17706_v62, %v2675_v45  ;;  %v3164_v6 = vadd.f32 %v3145_v49, %v3128_v31  ;;  %v17708_v51 = vld [vmem:[#allocation38_spill] sm:$0xff]  ;;  %v2974_v30 = vadd.f32 %v17709_v58, %v2822_v25 }
 0x3c9   : > { %v2980_v42 = vadd.f32 %v17699_v2, %v2828_v55  ;;  %v3163_v36 = vadd.f32 %v3145_v49, %v3127_v40  ;;  %v2831_v53 = vadd.f32 %v17707_v28, %v2679_v13  ;;  %v2833_v35 = vadd.f32 %v12802_v44, %v2681_v59  ;;  %v11075_v44 = vld [vmem:[%s17532_s13 + $0x40] sm:$0xff]  ;;  %v11076_v5 = vld [vmem:[%s17532_s13 + $0x8] sm:$0xff] }
 0x3ca   : > { %v2826_v3 = vadd.f32 %v17708_v51, %v2674_v47  ;;  %v2984_v33 = vadd.f32 %v17710_v54, %v2832_v41  ;;  %v2979_v63 = vadd.f32 %v12806_v27, %v2827_v10  ;;  %v3176_v27 = vmax.f32 %v3164_v6, 0.0 }
 0x3cb   : > { %v12859_v37 = vpop.f32.mrf.mxu0  ;;  %v3175_v24 = vmax.f32 %v3163_v36, 0.0  ;;  %v3126_v2 = vadd.f32 %v12830_v23, %v2974_v30  ;;  %v11077_v23 = vld [vmem:[%s17532_s13 + $0x10] sm:$0xff]  ;;  %v11081_v36 = vld [vmem:[%s17532_s13 + $0x48] sm:$0xff]  ;;  %v11084_v30 = vld [vmem:[%s17532_s13 + $0x18] sm:$0xff] }
 0x3cc   : > { %v12861_v15 = vpop.f32.mrf.mxu1  ;;  %v12873_v4 = vpop.f32.mrf.mxu3  ;;  %v2978_v45 = vadd.f32 %v17713_v32, %v2826_v3  ;;  %v11083_v3 = vld [vmem:[%s17532_s13] sm:$0xff] }
 0x3cd   : > { %v2971_v12 = vpop.f32.mrf.mxu2  ;;  %v3131_v40 = vadd.f32 %v12861_v15, %v2979_v63  ;;  %v3150_v15 = vpop.permute.xlu1 %3149  ;;  %v12940_v13 = vmul.f32 %v11076_v5, %v3175_v24  ;;  %v3162_v52 = vadd.f32 %v3145_v49, %v3126_v2  ;;  %v11080_v49 = vld [vmem:[%s17532_s13 + $0x50] sm:$0xff] }
 0x3ce   : > { %v2985_v34 = vadd.f32 %v2971_v12, %v2833_v35  ;;  %v3130_v21 = vadd.f32 %v12859_v37, %v2978_v45 }
 0x3cf   : > { %v3167_v47 = vadd.f32 %v3150_v15, %v3131_v40  ;;  %v3174_v28 = vmax.f32 %v3162_v52, 0.0 }
 0x3d0   : > { %v3166_v41 = vadd.f32 %v3150_v15, %v3130_v21 }
 0x3d1   : > { %v12995_v58 = vmul.f32 %v11083_v3, %v3174_v28 }
 0x3d3   : > { %v3091_v22 = vpop.f32.mrf.mxu0  ;;  %v10279_v40 = vpack.i.bf16 %v12940_v13, %v12995_v58 }
 0x3d4   : > { %v3120_v43 = vpop.f32.mrf.mxu1  ;;  %v3133_v18 = vadd.f32 %v3091_v22, %v2981_v46  ;;  %v3062_v29 = vpop.f32.mrf.mxu3  ;;  %v2977_v46 = vadd.f32 %v17711_v17, %v2825_v61 }
 0x3d5   : > { %v3134_v38 = vadd.f32 %v3120_v43, %v2982_v8  ;;  %v3132_v11 = vadd.f32 %v3062_v29, %v2980_v42  ;;  %v17712_v8 = vld [vmem:[#allocation21_spill] sm:$0xff] }
 0x3d6   : > { %v3169_v26 = vadd.f32 %v3155_v50, %v3133_v18  ;;  %v2983_v19 = vadd.f32 %v17712_v8, %v2831_v53  ;;  %v3129_v42 = vadd.f32 %v12873_v4, %v2977_v46  ;;  %v12945_v4 = vmul.f32 %v11077_v23, %v3176_v27 }
 0x3d7   : > { %v3170_v39 = vadd.f32 %v3155_v50, %v3134_v38  ;;  %v3168_v55 = vadd.f32 %v3155_v50, %v3132_v11  ;;  %v11079_v11 = vld [vmem:[%s17532_s13 + $0x58] sm:$0xff] }
 0x3d8   : > { %v3181_v0 = vmax.f32 %v3169_v26, 0.0  ;;  %v3165_v59 = vadd.f32 %v3150_v15, %v3129_v42  ;;  %v11078_v26 = vld [vmem:[%s17532_s13 + $0x30] sm:$0xff]  ;;  %v12961_v62 = vpack.i.bf16 %v12945_v4, %v12940_v13  ;;  %v10189_v8 = vpack.i.bf16 %v12945_v4, %v12995_v58 }
 0x3d9   : > { %v3182_v56 = vmax.f32 %v3170_v39, 0.0  ;;  %v3180_v38 = vmax.f32 %v3168_v55, 0.0 }
 0x3da   : > { %v12916_v48 = vmul.f32 %v11074_v1, %v3181_v0  ;;  %v3177_v53 = vmax.f32 %v3165_v59, 0.0  ;;  %v3178_v0 = vmax.f32 %v3166_v41, 0.0 }
 0x3db   : > { %v12921_v7 = vmul.f32 %v11075_v44, %v3182_v56  ;;  %v3094_v57 = vpop.f32.mrf.mxu0  ;;  %v12952_v39 = vmul.f32 %v11078_v26, %v3180_v38  ;;  %v11082_v56 = vld [vmem:[%s17532_s13 + $0x28] sm:$0xff] }
 0x3dc   : > { %v3123_v25 = vpop.f32.mrf.mxu1  ;;  %v3136_v31 = vadd.f32 %v3094_v57, %v2984_v33  ;;  %v3065_v18 = vpop.f32.mrf.mxu3  ;;  %v13000_v54 = vmul.f32 %v11084_v30, %v3177_v53  ;;  %v11085_v33 = vld [vmem:[%s17532_s13 + $0x20] sm:$0xff]  ;;  %v10224_v24 = vpack.i.bf16 %v12916_v48, %v12945_v4 }
 0x3dd   : > { %v3137_v22 = vadd.f32 %v3123_v25, %v2985_v34  ;;  %v12928_v43 = vpack.i.bf16 %v12921_v7, %v12916_v48  ;;  %v3135_v61 = vadd.f32 %v3065_v18, %v2983_v19  ;;  %v13005_v63 = vmul.f32 %v11085_v33, %v3178_v0 }
 0x3de   : > { %v3172_v50 = vadd.f32 %v12863_v9, %v3136_v31  ;;  %v10169_v55 = vpack.i.bf16 %v12921_v7, %v12952_v39  ;;  %v10259_v57 = vpack.i.bf16 %v12916_v48, %v12952_v39 }
 0x3df   : > { %v3173_v14 = vadd.f32 %v12863_v9, %v3137_v22  ;;  %10115 = vrot.lane.b32.xlu2 %v12928_v43, %s17553_s25  ;;  %v3171_v29 = vadd.f32 %v12863_v9, %v3135_v61  ;;  %v3179_v9 = vmax.f32 %v3167_v47, 0.0  ;;  %v13017_v1 = vpack.i.bf16 %v13005_v63, %v13000_v54 }
 0x3e0   : > { %v3184_v20 = vmax.f32 %v3172_v50, 0.0  ;;  %v10229_v19 = vpack.i.bf16 %v12940_v13, %v13005_v63  ;;  %v4506_v50 = vld [vmem:[%s17525_s6 + $0x8] sm:$0xff] }
 0x3e1   : > { %v3185_v60 = vmax.f32 %v3173_v14, 0.0  ;;  %v3183_v37 = vmax.f32 %v3171_v29, 0.0  ;;  %v12988_v51 = vmul.f32 %v11082_v56, %v3179_v9  ;;  %v4507_v9 = vld [vmem:[%s17525_s6 + $0x10] sm:$0xff]  ;;  %v9290_v56 = vld [vmem:[%s17524_s5 + $0x20] sm:$0xff] }
 0x3e2   : > { %v12966_v10 = vmul.f32 %v11080_v49, %v3184_v20 }
 0x3e3   : > { %v12957_v16 = vmul.f32 %v11079_v11, %v3185_v60  ;;  %v12971_v6 = vmul.f32 %v11081_v36, %v3183_v37  ;;  %v13009_v34 = vpack.i.bf16 %v12995_v58, %v12988_v51  ;;  %v10174_v44 = vpack.i.bf16 %v12988_v51, %v13000_v54 }
 0x3e4   : > { %v10194_v46 = vpack.i.bf16 %v12916_v48, %v12966_v10  ;;  %v10219_v27 = vpack.i.bf16 %v12966_v10, %v12995_v58  ;;  %v10319_v31 = vpack.i.bf16 %v12945_v4, %v12988_v51 }
 0x3e5   : > { %v12975_v12 = vpack.i.bf16 %v12952_v39, %v12957_v16  ;;  %v12983_v35 = vpack.i.bf16 %v12966_v10, %v12971_v6  ;;  %v10209_v17 = vpack.i.bf16 %v12957_v16, %v12971_v6  ;;  %v10284_v25 = vpack.i.bf16 %v12921_v7, %v12957_v16 }
 0x3e7   : > { %10120 = vrot.lane.b32.xlu1 %v12975_v12, %s17553_s25  ;;  %10140 = vrot.lane.b32.xlu2 %v12961_v62, %s17553_s25 }
 0x3e8   : > { %10125 = vrot.lane.b32.xlu0 %v12983_v35, %s17553_s25 }
 0x3ef   : > { %10135 = vrot.lane.b32.xlu1 %v13009_v34, %s17553_s25  ;;  %10150 = vrot.lane.b32.xlu2 %v12928_v43, %s17551_s24 }
 0x3f0   : > { %10130 = vrot.lane.b32.xlu0 %v13017_v1, %s17553_s25 }
 0x3f7   : > { %10145 = vrot.lane.b32.xlu1 %v12975_v12, %s17551_s24  ;;  %10165 = vrot.lane.b32.xlu2 %v12961_v62, %s17551_s24 }
 0x3f8   : > { %10155 = vrot.lane.b32.xlu0 %v13017_v1, %s17551_s24 }
 0x3ff   : > { %10160 = vrot.lane.b32.xlu1 %v13009_v34, %s17551_s24  ;;  %10175 = vrot.lane.b32.xlu2 %v10174_v44, %s17549_s26 }
 0x400   : > { %10180 = vrot.lane.b32.xlu0 %v12983_v35, %s17551_s24  ;;  %s17793_s24 = smov 18  }
 0x407   : > { %10170 = vrot.lane.b32.xlu1 %v10169_v55, %s17549_s26  ;;  %10210 = vrot.lane.b32.xlu2 %v10209_v17, %s17714_s27 }
 0x408   : > { %10185 = vrot.lane.b32.xlu0 %v10209_v17, %s17549_s26 }
 0x40f   : > { %10215 = vrot.lane.b32.xlu2 %v10174_v44, %s17714_s27  ;;  %10195 = vrot.lane.b32.xlu1 %v10194_v46, %s17549_s26  ;;  %v4505_v44 = vld [vmem:[%s17525_s6] sm:$0xff] }
 0x410   : > { %10190 = vrot.lane.b32.xlu0 %v10189_v8, %s17549_s26 }
 0x417   : > { %10230 = vrot.lane.b32.xlu2 %v10229_v19, %s17714_s27  ;;  %10205 = vrot.lane.b32.xlu1 %v10229_v19, %s17549_s26 }
 0x418   : > { %10200 = vrot.lane.b32.xlu0 %v10169_v55, %s17714_s27  ;;  %v9291_v55 = vld [vmem:[%s17524_s5 + $0x28] sm:$0xff] }
 0x41f   : > { %10240 = vrot.lane.b32.xlu2 %v12928_v43, %s17715_s22  ;;  %10225 = vrot.lane.b32.xlu1 %v10224_v24, %s17714_s27 }
 0x420   : > { %10220 = vrot.lane.b32.xlu0 %v10219_v27, %s17714_s27 }
 0x427   : > { %10255 = vrot.lane.b32.xlu2 %v12961_v62, %s17715_s22  ;;  %10235 = vrot.lane.b32.xlu1 %v12975_v12, %s17715_s22 }
 0x428   : > { %10245 = vrot.lane.b32.xlu0 %v13017_v1, %s17715_s22 }
 0x42f   : > { %10265 = vrot.lane.b32.xlu2 %v13017_v1, %s17636_s29  ;;  %10250 = vrot.lane.b32.xlu1 %v13009_v34, %s17715_s22 }
 0x430   : > { %10270 = vrot.lane.b32.xlu0 %v12983_v35, %s17715_s22 }
 0x437   : > { %10300 = vrot.lane.b32.xlu2 %v12983_v35, %s17637_s30  ;;  %10260 = vrot.lane.b32.xlu1 %v10259_v57, %s17636_s29 }
 0x438   : > { %10275 = vrot.lane.b32.xlu0 %v12983_v35, %s17636_s29 }
 0x439   : > { %v10116_v22 = vpop.permute.xlu2 %10115 }
 0x43a   : > { %v10118_v14 = vunpack.i.h.bf16 %v10116_v22  ;;  %v10117_v15 = vunpack.i.l.bf16 %v10116_v22 }
 0x43c   : > { %v3264_v52 = vsel %vm551_vm0, %v10117_v15, %v10118_v14 }
 0x43f   : > { %10305 = vrot.lane.b32.xlu2 %v13017_v1, %s17637_s30  ;;  %10285 = vrot.lane.b32.xlu1 %v10284_v25, %s17636_s29 }
 0x440   : > { %10280 = vrot.lane.b32.xlu0 %v10279_v40, %s17636_s29 }
 0x441   : > { %v10141_v32 = vpop.permute.xlu2 %10140 }
 0x442   : > { %v10143_v49 = vunpack.i.h.bf16 %v10141_v32  ;;  %v10142_v36 = vunpack.i.l.bf16 %v10141_v32 }
 0x444   : > { %v3262_v33 = vsel %vm551_vm0, %v10142_v36, %v10143_v49 }
 0x447   : > { %10320 = vrot.lane.b32.xlu2 %v10319_v31, %s17637_s30  ;;  %10295 = vrot.lane.b32.xlu1 %v10319_v31, %s17636_s29 }
 0x448   : > { %10290 = vrot.lane.b32.xlu0 %v10259_v57, %s17637_s30 }
 0x449   : > { %v13103_v2 = vpop.permute.xlu2 %10150 }
 0x44a   : > { %v10153_v57 = vunpack.i.h.bf16 %v13103_v2 }
 0x44f   : > { %10330 = vrot.lane.b32.xlu2 %v12928_v43, %s17639_s21  ;;  %10315 = vrot.lane.b32.xlu1 %v10284_v25, %s17637_s30  ;;  %v10152_v25 = vunpack.i.l.bf16 %v13103_v2 }
 0x450   : > { %10310 = vrot.lane.b32.xlu0 %v10279_v40, %s17637_s30 }
 0x451   : > { %v13124_v26 = vpop.permute.xlu2 %10165 }
 0x457   : > { %10350 = vrot.lane.b32.xlu2 %v12961_v62, %s17639_s21  ;;  %10325 = vrot.lane.b32.xlu1 %v12975_v12, %s17639_s21 }
 0x458   : > { %10335 = vrot.lane.b32.xlu0 %v12983_v35, %s17639_s21  ;;  %v4508_v35 = vld [vmem:[%s17525_s6 + $0x18] sm:$0xff] }
 0x459   : > { %v10121_v45 = vpop.permute.xlu1 %10120 }
 0x45a   : > { %v10126_v42 = vpop.permute.xlu0 %10125  ;;  %v10122_v18 = vunpack.i.l.bf16 %v10121_v45  ;;  %v10123_v61 = vunpack.i.h.bf16 %v10121_v45 }
 0x45b   : > { %v10128_v43 = vunpack.i.h.bf16 %v10126_v42  ;;  %v10127_v38 = vunpack.i.l.bf16 %v10126_v42 }
 0x45c   : > { %v3272_v60 = vsel %vm551_vm0, %v10118_v14, %v10123_v61  ;;  %v3268_v29 = vsel %vm551_vm0, %v10123_v61, %v10117_v15  ;;  %v10167_v14 = vunpack.i.l.bf16 %v13124_v26 }
 0x45d   : > { %v3273_v23 = vsel %vm551_vm0, %v10122_v18, %v10127_v38  ;;  %v3269_v21 = vsel %vm551_vm0, %v10127_v38, %v10128_v43  ;;  %v3265_v47 = vsel %vm551_vm0, %v10128_v43, %v10122_v18  ;;  %v9292_v38 = vld [vmem:[%s17524_s5 + $0x30] sm:$0xff] }
 0x45e   : > { %3303 = vmatpush.msrb.mxu2 %v3273_v23  ;;  %3332 = vmatpush.msrb.mxu3 %v3269_v21  ;;  %v3224_v23 = vsel %vm528_vm3, %v10152_v25, %v10153_v57 }
 0x45f   : > { %4516 = vperm.xlu2 %9873, %v4506_v50   ;;  %10345 = vrot.lane.b32.xlu1 %v13009_v34, %s17639_s21  ;;  %v10168_v50 = vunpack.i.h.bf16 %v13124_v26 }
 0x460   : > { %3361 = vmatpush.msra.mxu0 %v3265_v47  ;;  %10340 = vrot.lane.b32.xlu0 %v13017_v1, %s17639_s21  ;;  %v13150_v1 = vpop.permute.xlu2 %10175 }
 0x461   : > { %v10136_v20 = vpop.permute.xlu1 %10135  ;;  %3304 = vmatpush.msrb.mxu2 %v3272_v60  ;;  %3333 = vmatpush.msrb.mxu3 %v3268_v29 }
 0x462   : > { %3362 = vmatpush.msra.mxu0 %v3264_v52  ;;  %v10131_v59 = vpop.permute.xlu0 %10130  ;;  %v10138_v11 = vunpack.i.h.bf16 %v10136_v20  ;;  %v10137_v37 = vunpack.i.l.bf16 %v10136_v20 }
 0x463   : > { %v10133_v41 = vunpack.i.h.bf16 %v10131_v59  ;;  %v10132_v62 = vunpack.i.l.bf16 %v10131_v59 }
 0x464   : > { %v3270_v0 = vsel %vm551_vm0, %v10143_v49, %v10138_v11  ;;  %v3266_v30 = vsel %vm551_vm0, %v10138_v11, %v10142_v36 }
 0x465   : > { %v3271_v12 = vsel %vm551_vm0, %v10137_v37, %v10132_v62  ;;  %v3267_v28 = vsel %vm551_vm0, %v10132_v62, %v10133_v41  ;;  %v3263_v53 = vsel %vm551_vm0, %v10133_v41, %v10137_v37  ;;  %v3222_v37 = vsel %vm528_vm3, %v10167_v14, %v10168_v50  ;;  %v3234_v41 = vld [vmem:[%s17524_s5] sm:$0xff] }
 0x466   : > { %3305 = vmatpush.msrb.mxu2 %v3271_v12  ;;  %3334 = vmatpush.msrb.mxu3 %v3267_v28  ;;  %v10178_v12 = vunpack.i.h.bf16 %v13150_v1  ;;  %v10177_v28 = vunpack.i.l.bf16 %v13150_v1 }
 0x467   : > { %4521 = vperm.xlu1 %9872, %v4507_v9   ;;  %3363 = vmatpush.msra.mxu0 %v3263_v53 }
 0x468   : > { %4526 = vperm.xlu0 %9871, %v4508_v35   ;;  %3306 = vmatpush.msrb.mxu2 %v3270_v0  ;;  %v13169_v45 = vpop.permute.xlu2 %10210  ;;  %v9293_v35 = vld [vmem:[%s17524_s5 + $0x38] sm:$0xff] }
 0x469   : > { %v10146_v3 = vpop.permute.xlu1 %10145  ;;  %3335 = vmatpush.msrb.mxu3 %v3266_v30  ;;  %3364 = vmatpush.msra.mxu0 %v3262_v33  ;;  %v10213_v21 = vunpack.i.h.bf16 %v13169_v45  ;;  %v10212_v47 = vunpack.i.l.bf16 %v13169_v45 }
 0x46a   : > { %9294 = vmatmul.msk.f32.vlgmr.msrb.gmra.mxu2 %vm1911_vm10, %v9290_v56  ;;  %9298 = vmatmul.msk.f32.vlgmr.msrb.gmra.mxu3 %vm1911_vm10, %v9290_v56  ;;  %v10156_v34 = vpop.permute.xlu0 %10155  ;;  %v10148_v8 = vunpack.i.h.bf16 %v10146_v3  ;;  %v10147_v19 = vunpack.i.l.bf16 %v10146_v3 }
 0x46b   : > { %9302 = vmatmul.msk.f32.vlgmr.msra.gmra.mxu0 %vm1911_vm10, %v9290_v56  ;;  %v10158_v42 = vunpack.i.h.bf16 %v10156_v34  ;;  %v10157_v18 = vunpack.i.l.bf16 %v10156_v34  ;;  %v3664_v53 = vsel %vm937_vm5, %v10213_v21, %v10212_v47  ;;  %v3510_v34 = vsel %vm793_vm4, %v10178_v12, %v10177_v28 }
 0x46c   : > { %v3232_v2 = vsel %vm528_vm3, %v10153_v57, %v10148_v8  ;;  %v3228_v43 = vsel %vm528_vm3, %v10148_v8, %v10152_v25  ;;  %v3235_v8 = vld [vmem:[%s17524_s5 + $0x8] sm:$0xff]  ;;  %v13242_v25 = vld [vmem:[%s17524_s5 + $0x40] sm:$0xff] }
 0x46d   : > { %v3227_v59 = vsel %vm528_vm3, %v10157_v18, %v10158_v42 }
 0x470   : > { %4511 = vperm.xlu0 %9871, %v4505_v44  }
 0x471   : > { %v10161_v17 = vpop.permute.xlu1 %10160 }
 0x472   : > { %9295 = vmatmul.msk.f32.gmra.mxu2 %vm1911_vm10, %v9291_v55  ;;  %9299 = vmatmul.msk.f32.gmra.mxu3 %vm1911_vm10, %v9291_v55  ;;  %v10181_v46 = vpop.permute.xlu0 %10180  ;;  %v10162_v32 = vunpack.i.l.bf16 %v10161_v17  ;;  %v10163_v61 = vunpack.i.h.bf16 %v10161_v17 }
 0x473   : > { %9303 = vmatmul.msk.f32.gmra.mxu0 %vm1911_vm10, %v9291_v55  ;;  %v10183_v24 = vunpack.i.h.bf16 %v10181_v46  ;;  %v10182_v27 = vunpack.i.l.bf16 %v10181_v46  ;;  %v13227_v46 = vpop.permute.xlu2 %10215 }
 0x474   : > { %v3231_v60 = vsel %vm528_vm3, %v10162_v32, %v10157_v18  ;;  %v3223_v26 = vsel %vm528_vm3, %v10158_v42, %v10162_v32  ;;  %v3230_v11 = vsel %vm528_vm3, %v10168_v50, %v10163_v61  ;;  %v3226_v49 = vsel %vm528_vm3, %v10163_v61, %v10167_v14  ;;  %v3236_v50 = vld [vmem:[%s17524_s5 + $0x10] sm:$0xff] }
 0x475   : > { %v3233_v40 = vsel %vm528_vm3, %v10147_v19, %v10182_v27  ;;  %v3229_v31 = vsel %vm528_vm3, %v10182_v27, %v10183_v24  ;;  %v3225_v22 = vsel %vm528_vm3, %v10183_v24, %v10147_v19 }
 0x476   : > { %3402 = vmatpush.msra.mxu1 %v3233_v40  ;;  %3431 = vmatpush.msra.mxu2 %v3229_v31 }
 0x477   : > { %3460 = vmatpush.msra.mxu3 %v3225_v22 }
 0x478   : > { %3403 = vmatpush.msra.mxu1 %v3232_v2  ;;  %3432 = vmatpush.msra.mxu2 %v3228_v43  ;;  %v10218_v43 = vunpack.i.h.bf16 %v13227_v46 }
 0x479   : > { %v10171_v15 = vpop.permute.xlu1 %10170  ;;  %3461 = vmatpush.msra.mxu3 %v3224_v23 }
 0x47a   : > { %9296 = vmatmul.msk.f32.gmra.mxu2 %vm1911_vm10, %v9292_v38  ;;  %9300 = vmatmul.msk.f32.gmra.mxu3 %vm1911_vm10, %v9292_v38  ;;  %v10186_v20 = vpop.permute.xlu0 %10185  ;;  %v10173_v62 = vunpack.i.h.bf16 %v10171_v15  ;;  %v10172_v9 = vunpack.i.l.bf16 %v10171_v15 }
 0x47b   : > { %9304 = vmatmul.msk.f32.gmra.mxu0 %vm1911_vm10, %v9292_v38  ;;  %v10188_v29 = vunpack.i.h.bf16 %v10186_v20  ;;  %v10187_v52 = vunpack.i.l.bf16 %v10186_v20  ;;  %3404 = vmatpush.msra.mxu1 %v3231_v60  ;;  %v10217_v38 = vunpack.i.l.bf16 %v13227_v46  ;;  %v10231_v23 = vpop.permute.xlu2 %10230 }
 0x47c   : > { %3433 = vmatpush.msra.mxu2 %v3227_v59  ;;  %3462 = vmatpush.msra.mxu3 %v3223_v26  ;;  %v3511_v30 = vsel %vm793_vm4, %v10173_v62, %v10172_v9 }
 0x47d   : > { %3405 = vmatpush.msra.mxu1 %v3230_v11  ;;  %v3512_v36 = vsel %vm793_vm4, %v10188_v29, %v10187_v52  ;;  %v3662_v60 = vsel %vm937_vm5, %v10218_v43, %v10217_v38 }
 0x47e   : > { %3434 = vmatpush.msra.mxu2 %v3226_v49  ;;  %3463 = vmatpush.msra.mxu3 %v3222_v37  ;;  %v3237_v37 = vld [vmem:[%s17524_s5 + $0x18] sm:$0xff] }
 0x47f   : > { %9306 = vmatmul.msk.f32.vlgmr.msra.gmra.mxu1 %vm1911_vm10, %v3234_v41  ;;  %3542 = vmatpush.msrb.mxu0 %v3512_v36 }
 0x480   : > { %3694 = vmatpush.msrb.mxu3 %v3664_v53 }
 0x481   : > { %v10196_v0 = vpop.permute.xlu1 %10195  ;;  %3543 = vmatpush.msrb.mxu0 %v3511_v30 }
 0x482   : > { %v10198_v56 = vunpack.i.h.bf16 %v10196_v0  ;;  %v10197_v3 = vunpack.i.l.bf16 %v10196_v0  ;;  %9297 = vmatmul.msk.f32.gmra.mxu2 %vm1911_vm10, %v9293_v35  ;;  %v10191_v33 = vpop.permute.xlu0 %10190  ;;  %9301 = vmatmul.msk.f32.gmra.mxu3 %vm1911_vm10, %v9293_v35 }
 0x483   : > { %9305 = vmatmul.msk.f32.gmra.mxu0 %vm1911_vm10, %v9293_v35  ;;  %v10193_v1 = vunpack.i.h.bf16 %v10191_v33  ;;  %v10192_v44 = vunpack.i.l.bf16 %v10191_v33  ;;  %v13292_v49 = vpop.permute.xlu2 %10240  ;;  %v13332_v35 = vld [vmem:[%s17524_s5 + $0x58] sm:$0xff] }
 0x484   : > { %v3508_v55 = vsel %vm793_vm4, %v10187_v52, %v10197_v3  ;;  %v3504_v17 = vsel %vm793_vm4, %v10197_v3, %v10188_v29  ;;  %3544 = vmatpush.msrb.mxu0 %v3510_v34  ;;  %v3507_v24 = vsel %vm793_vm4, %v10172_v9, %v10198_v56  ;;  %v3503_v27 = vsel %vm793_vm4, %v10198_v56, %v10173_v62  ;;  %v13270_v29 = vld [vmem:[%s17524_s5 + $0x48] sm:$0xff] }
 0x485   : > { %3571 = vmatpush.msrb.mxu1 %v3508_v55  ;;  %3600 = vmatpush.msrb.mxu2 %v3504_v17  ;;  %v3509_v19 = vsel %vm793_vm4, %v10193_v1, %v10192_v44 }
 0x486   : > { %3545 = vmatpush.msrb.mxu0 %v3509_v19 }
 0x487   : > { %3572 = vmatpush.msrb.mxu1 %v3507_v24  ;;  %3601 = vmatpush.msrb.mxu2 %v3503_v27 }
 0x488   : > { %9307 = vmatmul.msk.f32.gmra.mxu1 %vm1911_vm10, %v3235_v8 }
 0x489   : > { %v10206_v57 = vpop.permute.xlu1 %10205 }
 0x48a   : > { %v10208_v40 = vunpack.i.h.bf16 %v10206_v57  ;;  %v10207_v31 = vunpack.i.l.bf16 %v10206_v57  ;;  %9310 = vmatmul.msk.f32.vlgmr.msra.gmra.mxu2 %vm1911_vm10, %v3234_v41  ;;  %v10201_v22 = vpop.permute.xlu0 %10200  ;;  %9314 = vmatmul.msk.f32.vlgmr.msra.gmra.mxu3 %vm1911_vm10, %v3234_v41 }
 0x48b   : > { %9322 = vmatmul.msk.f32.vlgmr.msrb.gmra.mxu0 %vm1911_vm10, %v13242_v25  ;;  %v10203_v32 = vunpack.i.h.bf16 %v10201_v22  ;;  %v10202_v42 = vunpack.i.l.bf16 %v10201_v22 }
 0x48c   : > { %v3506_v18 = vsel %vm793_vm4, %v10177_v28, %v10207_v31  ;;  %v3502_v2 = vsel %vm793_vm4, %v10207_v31, %v10178_v12  ;;  %v3505_v14 = vsel %vm793_vm4, %v10192_v44, %v10208_v40  ;;  %v3501_v61 = vsel %vm793_vm4, %v10208_v40, %v10193_v1  ;;  %v13358_v1 = vld [vmem:[%s17524_s5 + $0x60] sm:$0xff] }
 0x48d   : > { %3573 = vmatpush.msrb.mxu1 %v3506_v18  ;;  %3602 = vmatpush.msrb.mxu2 %v3502_v2  ;;  %v3663_v15 = vsel %vm937_vm5, %v10203_v32, %v10202_v42 }
 0x48e   : > { %3695 = vmatpush.msrb.mxu3 %v3663_v15 }
 0x48f   : > { %3574 = vmatpush.msrb.mxu1 %v3505_v14  ;;  %3603 = vmatpush.msrb.mxu2 %v3501_v61 }
 0x490   : > { %9308 = vmatmul.msk.f32.gmra.mxu1 %vm1911_vm10, %v3236_v50  ;;  %3696 = vmatpush.msrb.mxu3 %v3662_v60 }
 0x491   : > { %3810 = vmatpush.msra.mxu2 %v12971_v6  ;;  %v10226_v20 = vpop.permute.xlu1 %10225 }
 0x492   : > { %9311 = vmatmul.msk.f32.gmra.mxu2 %vm1911_vm10, %v3235_v8  ;;  %v10221_v52 = vpop.permute.xlu0 %10220  ;;  %v10227_v59 = vunpack.i.l.bf16 %v10226_v20  ;;  %9315 = vmatmul.msk.f32.gmra.mxu3 %vm1911_vm10, %v3235_v8  ;;  %v10228_v11 = vunpack.i.h.bf16 %v10226_v20  ;;  %v9335_v20 = vld [vmem:[%s17524_s5 + $0x68] sm:$0xff] }
 0x493   : > { %9323 = vmatmul.msk.f32.gmra.mxu0 %vm1911_vm10, %v13270_v29  ;;  %v10223_v6 = vunpack.i.h.bf16 %v10221_v52  ;;  %v10222_v26 = vunpack.i.l.bf16 %v10221_v52  ;;  %3811 = vmatpush.msra.mxu2 %v12952_v39  ;;  %v10232_v39 = vunpack.i.l.bf16 %v10231_v23 }
 0x494   : > { %v3659_v45 = vsel %vm937_vm5, %v10202_v42, %v10228_v11 }
 0x495   : > { %v3661_v41 = vsel %vm937_vm5, %v10227_v59, %v10222_v26  ;;  %v3660_v62 = vsel %vm937_vm5, %v10212_v47, %v10223_v6  ;;  %v3656_v9 = vsel %vm937_vm5, %v10223_v6, %v10213_v21  ;;  %3812 = vmatpush.msra.mxu2 %v13000_v54  ;;  %v13302_v21 = vld [vmem:[%s17524_s5 + $0x50] sm:$0xff]  ;;  %v3655_v54 = vsel %vm937_vm5, %v10228_v11, %v10203_v32 }
 0x496   : > { %3697 = vmatpush.msrb.mxu3 %v3661_v41  ;;  %3723 = vmatpush.msra.mxu0 %v3660_v62  ;;  %v10233_v47 = vunpack.i.h.bf16 %v10231_v23  ;;  %v3658_v12 = vsel %vm937_vm5, %v10217_v38, %v10232_v39  ;;  %v9336_v41 = vld [vmem:[%s17524_s5 + $0x70] sm:$0xff] }
 0x497   : > { %3813 = vmatpush.msra.mxu2 %v12995_v58  ;;  %3752 = vmatpush.msra.mxu1 %v3656_v9 }
 0x498   : > { %9309 = vmatmul.msk.f32.gmra.mxu1 %vm1911_vm10, %v3237_v37  ;;  %3839 = vmatpush.msra.mxu3 %v12966_v10  ;;  %v3654_v10 = vsel %vm937_vm5, %v10232_v39, %v10218_v43  ;;  %v3657_v28 = vsel %vm937_vm5, %v10222_v26, %v10233_v47  ;;  %v3653_v53 = vsel %vm937_vm5, %v10233_v47, %v10227_v59 }
 0x499   : > { %v13295_v36 = vpop.permute.xlu1 %10235  ;;  %3724 = vmatpush.msra.mxu0 %v3659_v45  ;;  %3753 = vmatpush.msra.mxu1 %v3655_v54  ;;  %v9337_v54 = vld [vmem:[%s17524_s5 + $0x78] sm:$0xff] }
 0x49a   : > { %9312 = vmatmul.msk.f32.gmra.mxu2 %vm1911_vm10, %v3236_v50  ;;  %v13308_v58 = vpop.permute.xlu0 %10245  ;;  %9316 = vmatmul.msk.f32.gmra.mxu3 %vm1911_vm10, %v3236_v50  ;;  %v10238_v56 = vunpack.i.h.bf16 %v13295_v36  ;;  %v10237_v44 = vunpack.i.l.bf16 %v13295_v36 }
 0x49b   : > { %9324 = vmatmul.msk.f32.gmra.mxu0 %vm1911_vm10, %v13302_v21  ;;  %3840 = vmatpush.msra.mxu3 %v12916_v48  ;;  %v10248_v30 = vunpack.i.h.bf16 %v13308_v58  ;;  %v10247_v33 = vunpack.i.l.bf16 %v13308_v58 }
 0x49c   : > { %3725 = vmatpush.msra.mxu0 %v3658_v12  ;;  %3754 = vmatpush.msra.mxu1 %v3654_v10 }
 0x49d   : > { %3841 = vmatpush.msra.mxu3 %v13005_v63  ;;  %v13335_v63 = vpop.permute.xlu2 %10255  ;;  %v3926_v22 = vsel %vm1209_vm6, %v10247_v33, %v10248_v30 }
 0x49e   : > { %3726 = vmatpush.msra.mxu0 %v3657_v28  ;;  %3755 = vmatpush.msra.mxu1 %v3653_v53  ;;  %v10257_v57 = vunpack.i.l.bf16 %v13335_v63  ;;  %v10258_v32 = vunpack.i.h.bf16 %v13335_v63 }
 0x49f   : > { %3842 = vmatpush.msra.mxu3 %v12940_v13 }
 0x4a0   : > { %3868 = vmatpush.msrb.mxu0 %v12957_v16  ;;  %9326 = vmatmul.msk.f32.vlgmr.msrb.gmra.mxu1 %vm1911_vm10, %v13242_v25  ;;  %v3921_v23 = vsel %vm1209_vm6, %v10257_v57, %v10258_v32 }
 0x4a1   : > { %v13327_v48 = vpop.permute.xlu1 %10250 }
 0x4a2   : > { %3869 = vmatpush.msrb.mxu0 %v12921_v7  ;;  %9313 = vmatmul.msk.f32.gmra.mxu2 %vm1911_vm10, %v3237_v37  ;;  %v10271_v0 = vpop.permute.xlu0 %10270  ;;  %v10242_v7 = vunpack.i.l.bf16 %v13292_v49  ;;  %v10253_v55 = vunpack.i.h.bf16 %v13327_v48  ;;  %v10252_v17 = vunpack.i.l.bf16 %v13327_v48 }
 0x4a3   : > { %9317 = vmatmul.msk.f32.gmra.mxu3 %vm1911_vm10, %v3237_v37  ;;  %9325 = vmatmul.msk.f32.gmra.mxu0 %vm1911_vm10, %v13332_v35  ;;  %v10273_v13 = vunpack.i.h.bf16 %v10271_v0  ;;  %v10272_v16 = vunpack.i.l.bf16 %v10271_v0 }
 0x4a4   : > { %3870 = vmatpush.msrb.mxu0 %v12988_v51  ;;  %v3927_v51 = vsel %vm1209_vm6, %v10238_v56, %v10242_v7  ;;  %v3925_v43 = vsel %vm1209_vm6, %v10253_v55, %v10257_v57  ;;  %v3922_v38 = vsel %vm1209_vm6, %v10248_v30, %v10252_v17  ;;  %v3930_v61 = vsel %vm1209_vm6, %v10252_v17, %v10247_v33  ;;  %v9351_v57 = vld [vmem:[%s17524_s5 + $0x88] sm:$0xff] }
 0x4a5   : > { %v3928_v3 = vsel %vm1209_vm6, %v10272_v16, %v10273_v13  ;;  %v3924_v8 = vsel %vm1209_vm6, %v10273_v13, %v10237_v44  ;;  %v3932_v19 = vsel %vm1209_vm6, %v10237_v44, %v10272_v16  ;;  %v3929_v60 = vsel %vm1209_vm6, %v10258_v32, %v10253_v55  ;;  %v9366_v32 = vld [vmem:[%s17524_s5 + $0xa0] sm:$0xff] }
 0x4a6   : > { %3871 = vmatpush.msrb.mxu0 %v12945_v4  ;;  %3962 = vmatpush.msrb.mxu1 %v3928_v3  ;;  %v10243_v4 = vunpack.i.h.bf16 %v13292_v49 }
 0x4a8   : > { %9327 = vmatmul.msk.f32.gmra.mxu1 %vm1911_vm10, %v13270_v29  ;;  %v3923_v42 = vsel %vm1209_vm6, %v10242_v7, %v10243_v4  ;;  %v3931_v18 = vsel %vm1209_vm6, %v10243_v4, %v10238_v56 }
 0x4a9   : > { %v13351_v34 = vpop.permute.xlu1 %10260  ;;  %3963 = vmatpush.msrb.mxu1 %v3927_v51 }
 0x4aa   : > { %9330 = vmatmul.msk.f32.vlgmr.msrb.gmra.mxu2 %vm1911_vm10, %v13242_v25  ;;  %v13366_v46 = vpop.permute.xlu0 %10275  ;;  %v13379_v25 = vpop.permute.xlu2 %10265  ;;  %v10263_v40 = vunpack.i.h.bf16 %v13351_v34  ;;  %v10262_v31 = vunpack.i.l.bf16 %v13351_v34 }
 0x4ab   : > { %9338 = vmatmul.msk.f32.vlgmr.msrb.gmra.mxu3 %vm1911_vm10, %v13358_v1  ;;  %9342 = vmatmul.msk.f32.vlgmr.msra.gmra.mxu0 %vm1911_vm10, %v13358_v1  ;;  %v10278_v24 = vunpack.i.h.bf16 %v13366_v46  ;;  %v10277_v27 = vunpack.i.l.bf16 %v13366_v46  ;;  %v10268_v50 = vunpack.i.h.bf16 %v13379_v25  ;;  %v10267_v14 = vunpack.i.l.bf16 %v13379_v25 }
 0x4ac   : > { %3991 = vmatpush.msrb.mxu2 %v3924_v8  ;;  %4020 = vmatpush.msrb.mxu3 %v3932_v19  ;;  %v4079_v15 = vsel %vm1353_vm7, %v10262_v31, %v10263_v40 }
 0x4ad   : > { %3964 = vmatpush.msrb.mxu1 %v3926_v22  ;;  %v4080_v2 = vsel %vm1353_vm7, %v10277_v27, %v10278_v24  ;;  %v4078_v11 = vsel %vm1353_vm7, %v10267_v14, %v10268_v50  ;;  %v9352_v22 = vld [vmem:[%s17524_s5 + $0x90] sm:$0xff] }
 0x4ae   : > { %3992 = vmatpush.msrb.mxu2 %v3923_v42  ;;  %4021 = vmatpush.msrb.mxu3 %v3931_v18 }
 0x4af   : > { %3965 = vmatpush.msrb.mxu1 %v3925_v43  ;;  %4114 = vmatpush.msra.mxu0 %v4080_v2  ;;  %v9353_v43 = vld [vmem:[%s17524_s5 + $0x98] sm:$0xff] }
 0x4b0   : > { %9328 = vmatmul.msk.f32.gmra.mxu1 %vm1911_vm10, %v13302_v21  ;;  %3993 = vmatpush.msrb.mxu2 %v3922_v38 }
 0x4b1   : > { %4022 = vmatpush.msrb.mxu3 %v3930_v61  ;;  %4115 = vmatpush.msra.mxu0 %v4079_v15  ;;  %v13415_v52 = vpop.permute.xlu1 %10285  ;;  %v9367_v61 = vld [vmem:[%s17524_s5 + $0xa8] sm:$0xff] }
 0x4b2   : > { %3994 = vmatpush.msrb.mxu2 %v3921_v23  ;;  %v13417_v59 = vpop.permute.xlu0 %10280  ;;  %v10287_v62 = vunpack.i.l.bf16 %v13415_v52  ;;  %v10288_v39 = vunpack.i.h.bf16 %v13415_v52 }
 0x4b3   : > { %4023 = vmatpush.msrb.mxu3 %v3929_v60  ;;  %9331 = vmatmul.msk.f32.gmra.mxu2 %vm1911_vm10, %v13270_v29  ;;  %v10283_v6 = vunpack.i.h.bf16 %v13417_v59  ;;  %v10282_v26 = vunpack.i.l.bf16 %v13417_v59  ;;  %v13433_v29 = vpop.permute.xlu2 %10300 }
 0x4b4   : > { %9339 = vmatmul.msk.f32.gmra.mxu3 %vm1911_vm10, %v9335_v20  ;;  %9343 = vmatmul.msk.f32.gmra.mxu0 %vm1911_vm10, %v9335_v20  ;;  %v4076_v45 = vsel %vm1353_vm7, %v10278_v24, %v10287_v62  ;;  %v4075_v47 = vsel %vm1353_vm7, %v10263_v40, %v10288_v39  ;;  %v10303_v53 = vunpack.i.h.bf16 %v13433_v29  ;;  %v10302_v48 = vunpack.i.l.bf16 %v13433_v29 }
 0x4b5   : > { %4116 = vmatpush.msra.mxu0 %v4078_v11  ;;  %v4077_v37 = vsel %vm1353_vm7, %v10282_v26, %v10283_v6  ;;  %v4084_v33 = vsel %vm1353_vm7, %v10287_v62, %v10277_v27  ;;  %v4083_v17 = vsel %vm1353_vm7, %v10288_v39, %v10262_v31 }
 0x4b6   : > { %v4232_v51 = vsel %vm1497_vm8, %v10302_v48, %v10303_v53 }
 0x4b7   : > { %4117 = vmatpush.msra.mxu0 %v4077_v37 }
 0x4b8   : > { %9329 = vmatmul.msk.f32.gmra.mxu1 %vm1911_vm10, %v13332_v35 }
 0x4b9   : > { %v13443_v9 = vpop.permute.xlu1 %10295 }
 0x4ba   : > { %v10297_v36 = vunpack.i.l.bf16 %v13443_v9  ;;  %v10298_v58 = vunpack.i.h.bf16 %v13443_v9 }
 0x4bb   : > { %9332 = vmatmul.msk.f32.gmra.mxu2 %vm1911_vm10, %v13302_v21  ;;  %v13448_v49 = vpop.permute.xlu2 %10305  ;;  %v13455_v21 = vpop.permute.xlu0 %10290 }
 0x4bc   : > { %9340 = vmatmul.msk.f32.gmra.mxu3 %vm1911_vm10, %v9336_v41  ;;  %9344 = vmatmul.msk.f32.gmra.mxu0 %vm1911_vm10, %v9336_v41  ;;  %v4074_v12 = vsel %vm1353_vm7, %v10268_v50, %v10297_v36  ;;  %v4073_v28 = vsel %vm1353_vm7, %v10283_v6, %v10298_v58  ;;  %v10293_v13 = vunpack.i.h.bf16 %v13455_v21  ;;  %v10292_v16 = vunpack.i.l.bf16 %v13455_v21 }
 0x4bd   : > { %v10308_v7 = vunpack.i.h.bf16 %v13448_v49  ;;  %v10307_v30 = vunpack.i.l.bf16 %v13448_v49  ;;  %v4082_v19 = vsel %vm1353_vm7, %v10297_v36, %v10267_v14  ;;  %v4081_v25 = vsel %vm1353_vm7, %v10298_v58, %v10282_v26  ;;  %v13565_v26 = vld [vmem:[%s17524_s5 + $0xc0] sm:$0xff] }
 0x4be   : > { %v4231_v46 = vsel %vm1497_vm8, %v10292_v16, %v10293_v13 }
 0x4bf   : > { %v4230_v34 = vsel %vm1497_vm8, %v10307_v30, %v10308_v7 }
 0x4c0   : > { %9346 = vmatmul.msk.f32.vlgmr.msra.gmra.mxu1 %vm1911_vm10, %v13358_v1 }
 0x4c1   : > { %4143 = vmatpush.msra.mxu1 %v4076_v45  ;;  %v13469_v10 = vpop.permute.xlu1 %10315 }
 0x4c2   : > { %v10317_v63 = vunpack.i.l.bf16 %v13469_v10  ;;  %v10318_v56 = vunpack.i.h.bf16 %v13469_v10 }
 0x4c3   : > { %4144 = vmatpush.msra.mxu1 %v4075_v47  ;;  %9333 = vmatmul.msk.f32.gmra.mxu2 %vm1911_vm10, %v13332_v35  ;;  %v9350_v35 = vld [vmem:[%s17524_s5 + $0x80] sm:$0xff]  ;;  %v13480_v0 = vpop.permute.xlu2 %10320  ;;  %v10311_v3 = vpop.permute.xlu0 %10310  ;;  %v9368_v47 = vld [vmem:[%s17524_s5 + $0xb0] sm:$0xff] }
 0x4c4   : > { %9341 = vmatmul.msk.f32.gmra.mxu3 %vm1911_vm10, %v9337_v54  ;;  %9345 = vmatmul.msk.f32.gmra.mxu0 %vm1911_vm10, %v9337_v54  ;;  %v10322_v1 = vunpack.i.l.bf16 %v13480_v0  ;;  %v4228_v4 = vsel %vm1497_vm8, %v10303_v53, %v10317_v63  ;;  %v10313_v44 = vunpack.i.h.bf16 %v10311_v3  ;;  %v10312_v55 = vunpack.i.l.bf16 %v10311_v3  ;;  %v9383_v3 = vld [vmem:[%s17524_s5 + $0xc8] sm:$0xff] }
 0x4c5   : > { %4145 = vmatpush.msra.mxu1 %v4074_v12  ;;  %v4227_v8 = vsel %vm1497_vm8, %v10293_v13, %v10318_v56  ;;  %v10323_v24 = vunpack.i.h.bf16 %v13480_v0  ;;  %v4236_v18 = vsel %vm1497_vm8, %v10317_v63, %v10302_v48  ;;  %v4235_v50 = vsel %vm1497_vm8, %v10318_v56, %v10292_v16 }
 0x4c6   : > { %v4226_v27 = vsel %vm1497_vm8, %v10308_v7, %v10322_v1  ;;  %v4229_v40 = vsel %vm1497_vm8, %v10312_v55, %v10313_v44  ;;  %v4234_v14 = vsel %vm1497_vm8, %v10322_v1, %v10307_v30 }
 0x4c7   : > { %4146 = vmatpush.msra.mxu1 %v4073_v28  ;;  %v4225_v31 = vsel %vm1497_vm8, %v10313_v44, %v10323_v24  ;;  %v4233_v15 = vsel %vm1497_vm8, %v10323_v24, %v10312_v55 }
 0x4c8   : > { %9347 = vmatmul.msk.f32.gmra.mxu1 %vm1911_vm10, %v9335_v20 }
 0x4c9   : > { %v10326_v38 = vpop.permute.xlu1 %10325 }
 0x4ca   : > { %v10328_v37 = vunpack.i.h.bf16 %v10326_v38  ;;  %v10327_v29 = vunpack.i.l.bf16 %v10326_v38  ;;  %v9400_v38 = vld [vmem:[%s17524_s5 + $0xf0] sm:$0xff] }
 0x4cb   : > { %9354 = vmatmul.msk.f32.vlgmr.msra.gmra.mxu2 %vm1911_vm10, %v9350_v35  ;;  %v10336_v42 = vpop.permute.xlu0 %10335  ;;  %v10331_v2 = vpop.permute.xlu2 %10330 }
 0x4cc   : > { %9358 = vmatmul.msk.f32.vlgmr.msra.gmra.mxu3 %vm1911_vm10, %v9350_v35  ;;  %9362 = vmatmul.msk.f32.vlgmr.msrb.gmra.mxu0 %vm1911_vm10, %v9350_v35  ;;  %v10338_v20 = vunpack.i.h.bf16 %v10336_v42  ;;  %v10337_v60 = vunpack.i.l.bf16 %v10336_v42  ;;  %v10333_v52 = vunpack.i.h.bf16 %v10331_v2  ;;  %v10332_v59 = vunpack.i.l.bf16 %v10331_v2 }
 0x4cd   : > { %4172 = vmatpush.msra.mxu2 %v4084_v33  ;;  %4266 = vmatpush.msra.mxu3 %v4232_v51  ;;  %v9369_v51 = vld [vmem:[%s17524_s5 + $0xb8] sm:$0xff] }
 0x4ce   : > { %4295 = vmatpush.msrb.mxu0 %v4228_v4  ;;  %v4384_v39 = vsel %vm1641_vm9, %v10337_v60, %v10338_v20  ;;  %v4380_v49 = vsel %vm1641_vm9, %v10338_v20, %v10327_v29  ;;  %v4379_v58 = vsel %vm1641_vm9, %v10332_v59, %v10333_v52  ;;  %v4383_v53 = vsel %vm1641_vm9, %v10328_v37, %v10332_v59  ;;  %v9384_v4 = vld [vmem:[%s17524_s5 + $0xd0] sm:$0xff]  ;;  %v9401_v20 = vld [vmem:[%s17524_s5 + $0xf8] sm:$0xff] }
 0x4cf   : > { %4173 = vmatpush.msra.mxu2 %v4083_v17  ;;  %4267 = vmatpush.msra.mxu3 %v4231_v46  ;;  %v4387_v48 = vsel %vm1641_vm9, %v10333_v52, %v10328_v37 }
 0x4d0   : > { %4296 = vmatpush.msrb.mxu0 %v4227_v8  ;;  %9348 = vmatmul.msk.f32.gmra.mxu1 %vm1911_vm10, %v9336_v41  ;;  %v9385_v8 = vld [vmem:[%s17524_s5 + $0xd8] sm:$0xff] }
 0x4d1   : > { %4174 = vmatpush.msra.mxu2 %v4082_v19  ;;  %4268 = vmatpush.msra.mxu3 %v4230_v34  ;;  %v10346_v41 = vpop.permute.xlu1 %10345 }
 0x4d2   : > { %4297 = vmatpush.msrb.mxu0 %v4226_v27  ;;  %v10348_v10 = vunpack.i.h.bf16 %v10346_v41  ;;  %v10347_v28 = vunpack.i.l.bf16 %v10346_v41 }
 0x4d3   : > { %4175 = vmatpush.msra.mxu2 %v4081_v25  ;;  %4269 = vmatpush.msra.mxu3 %v4229_v40  ;;  %v10341_v6 = vpop.permute.xlu0 %10340  ;;  %v10351_v11 = vpop.permute.xlu2 %10350 }
 0x4d4   : > { %4298 = vmatpush.msrb.mxu0 %v4225_v31  ;;  %9355 = vmatmul.msk.f32.gmra.mxu2 %vm1911_vm10, %v9351_v57  ;;  %v10343_v62 = vunpack.i.h.bf16 %v10341_v6  ;;  %v10342_v9 = vunpack.i.l.bf16 %v10341_v6  ;;  %v10353_v21 = vunpack.i.h.bf16 %v10351_v11  ;;  %v10352_v12 = vunpack.i.l.bf16 %v10351_v11 }
 0x4d5   : > { %9359 = vmatmul.msk.f32.gmra.mxu3 %vm1911_vm10, %v9351_v57  ;;  %9363 = vmatmul.msk.f32.gmra.mxu0 %vm1911_vm10, %v9351_v57  ;;  %v9398_v57 = vld [vmem:[%s17524_s5 + $0xe0] sm:$0xff] }
 0x4d6   : > { %v4382_v63 = vsel %vm1641_vm9, %v10342_v9, %v10343_v62  ;;  %v4378_v0 = vsel %vm1641_vm9, %v10343_v62, %v10347_v28  ;;  %v4386_v13 = vsel %vm1641_vm9, %v10347_v28, %v10342_v9  ;;  %v4381_v16 = vsel %vm1641_vm9, %v10348_v10, %v10352_v12  ;;  %v9415_v62 = vld [vmem:[%s17524_s5 + $0x108] sm:$0xff]  ;;  %v9417_v28 = vld [vmem:[%s17524_s5 + $0x118] sm:$0xff] }
 0x4d7   : > { %v4377_v56 = vsel %vm1641_vm9, %v10352_v12, %v10353_v21  ;;  %v4385_v7 = vsel %vm1641_vm9, %v10353_v21, %v10348_v10 }
 0x4d8   : > { %9349 = vmatmul.msk.f32.gmra.mxu1 %vm1911_vm10, %v9337_v54  ;;  %v4388_v54 = vsel %vm1641_vm9, %v10327_v29, %v10337_v60 }
 0x4dc   : > { %9356 = vmatmul.msk.f32.gmra.mxu2 %vm1911_vm10, %v9352_v22 }
 0x4dd   : > { %9360 = vmatmul.msk.f32.gmra.mxu3 %vm1911_vm10, %v9352_v22  ;;  %9364 = vmatmul.msk.f32.gmra.mxu0 %vm1911_vm10, %v9352_v22 }
 0x4e0   : > { %9370 = vmatmul.msk.f32.vlgmr.msrb.gmra.mxu1 %vm1911_vm10, %v9366_v32 }
 0x4e1   : > { %4324 = vmatpush.msrb.mxu1 %v4236_v18 }
 0x4e3   : > { %4325 = vmatpush.msrb.mxu1 %v4235_v50 }
 0x4e4   : > { %9357 = vmatmul.msk.f32.gmra.mxu2 %vm1911_vm10, %v9353_v43 }
 0x4e5   : > { %9361 = vmatmul.msk.f32.gmra.mxu3 %vm1911_vm10, %v9353_v43  ;;  %9365 = vmatmul.msk.f32.gmra.mxu0 %vm1911_vm10, %v9353_v43 }
 0x4e6   : > { %4326 = vmatpush.msrb.mxu1 %v4234_v14 }
 0x4e8   : > { %4327 = vmatpush.msrb.mxu1 %v4233_v15  ;;  %v13559_v23 = vpop.f32.mrf.mxu0 }
 0x4e9   : > { %9371 = vmatmul.msk.f32.gmra.mxu1 %vm1911_vm10, %v9367_v61 }
 0x4ec   : > { %9374 = vmatmul.msk.f32.vlgmr.msrb.gmra.mxu2 %vm1911_vm10, %v9366_v32 }
 0x4ed   : > { %9378 = vmatmul.msk.f32.vlgmr.msrb.gmra.mxu3 %vm1911_vm10, %v9366_v32  ;;  %9386 = vmatmul.msk.f32.vlgmr.msra.gmra.mxu0 %vm1911_vm10, %v13565_v26  ;;  %v13575_v36 = vpop.f32.mrf.mxu2  ;;  %v13577_v45 = vpop.f32.mrf.mxu3  ;;  %v9399_v32 = vld [vmem:[%s17524_s5 + $0xe8] sm:$0xff] }
 0x4ee   : > { %4418 = vmatpush.msrb.mxu2 %v4384_v39  ;;  %4447 = vmatpush.msrb.mxu3 %v4380_v49 }
 0x4ef   : > { %4476 = vmatpush.msra.mxu0 %v4388_v54  ;;  %v9416_v54 = vld [vmem:[%s17524_s5 + $0x110] sm:$0xff] }
 0x4f0   : > { %4419 = vmatpush.msrb.mxu2 %v4383_v53  ;;  %4448 = vmatpush.msrb.mxu3 %v4379_v58  ;;  %v13590_v35 = vpop.f32.mrf.mxu0 }
 0x4f1   : > { %4477 = vmatpush.msra.mxu0 %v4387_v48  ;;  %9372 = vmatmul.msk.f32.gmra.mxu1 %vm1911_vm10, %v9368_v47 }
 0x4f2   : > { %4420 = vmatpush.msrb.mxu2 %v4382_v63  ;;  %4449 = vmatpush.msrb.mxu3 %v4378_v0 }
 0x4f3   : > { %4478 = vmatpush.msra.mxu0 %v4386_v13 }
 0x4f4   : > { %4421 = vmatpush.msrb.mxu2 %v4381_v16  ;;  %4450 = vmatpush.msrb.mxu3 %v4377_v56 }
 0x4f5   : > { %4479 = vmatpush.msra.mxu0 %v4385_v7  ;;  %9375 = vmatmul.msk.f32.gmra.mxu2 %vm1911_vm10, %v9367_v61  ;;  %v13609_v30 = vpop.f32.mrf.mxu2  ;;  %v13611_v33 = vpop.f32.mrf.mxu3 }
 0x4f6   : > { %9379 = vmatmul.msk.f32.gmra.mxu3 %vm1911_vm10, %v9367_v61  ;;  %9387 = vmatmul.msk.f32.gmra.mxu0 %vm1911_vm10, %v9383_v3 }
 0x4f8   : > { %v13618_v1 = vpop.f32.mrf.mxu0 }
 0x4f9   : > { %9373 = vmatmul.msk.f32.gmra.mxu1 %vm1911_vm10, %v9369_v51 }
 0x4fc   : > { %v13624_v44 = vpop.f32.mrf.mxu1 }
 0x4fd   : > { %9376 = vmatmul.msk.f32.gmra.mxu2 %vm1911_vm10, %v9368_v47  ;;  %v13627_v55 = vpop.f32.mrf.mxu2  ;;  %v13629_v17 = vpop.f32.mrf.mxu3 }
 0x4fe   : > { %9380 = vmatmul.msk.f32.gmra.mxu3 %vm1911_vm10, %v9368_v47  ;;  %9388 = vmatmul.msk.f32.gmra.mxu0 %vm1911_vm10, %v9384_v4 }
 0x500   : > { %v13633_v46 = vpop.f32.mrf.mxu0 }
 0x501   : > { %9390 = vmatmul.msk.f32.vlgmr.msra.gmra.mxu1 %vm1911_vm10, %v13565_v26 }
 0x505   : > { %v13640_v19 = vpop.f32.mrf.mxu1  ;;  %9377 = vmatmul.msk.f32.gmra.mxu2 %vm1911_vm10, %v9369_v51  ;;  %v13643_v34 = vpop.f32.mrf.mxu2 }
 0x506   : > { %9381 = vmatmul.msk.f32.gmra.mxu3 %vm1911_vm10, %v9369_v51  ;;  %9389 = vmatmul.msk.f32.gmra.mxu0 %vm1911_vm10, %v9385_v8  ;;  %v13647_v24 = vpop.f32.mrf.mxu3 }
 0x508   : > { %v13649_v27 = vpop.f32.mrf.mxu0 }
 0x509   : > { %9391 = vmatmul.msk.f32.gmra.mxu1 %vm1911_vm10, %v9383_v3 }
 0x50d   : > { %v13655_v25 = vpop.f32.mrf.mxu1  ;;  %9394 = vmatmul.msk.f32.vlgmr.msra.gmra.mxu2 %vm1911_vm10, %v13565_v26  ;;  %v13659_v40 = vpop.f32.mrf.mxu2  ;;  %v9414_v26 = vld [vmem:[%s17524_s5 + $0x100] sm:$0xff] }
 0x50e   : > { %9402 = vmatmul.msk.f32.vlgmr.msra.gmra.mxu3 %vm1911_vm10, %v9398_v57  ;;  %9406 = vmatmul.msk.f32.vlgmr.msrb.gmra.mxu0 %vm1911_vm10, %v9398_v57  ;;  %v13663_v31 = vpop.f32.mrf.mxu3 }
 0x510   : > { %v13665_v22 = vpop.f32.mrf.mxu0 }
 0x511   : > { %9392 = vmatmul.msk.f32.gmra.mxu1 %vm1911_vm10, %v9384_v4 }
 0x515   : > { %v13671_v42 = vpop.f32.mrf.mxu1  ;;  %9395 = vmatmul.msk.f32.gmra.mxu2 %vm1911_vm10, %v9383_v3  ;;  %v13674_v18 = vpop.f32.mrf.mxu2 }
 0x516   : > { %9403 = vmatmul.msk.f32.gmra.mxu3 %vm1911_vm10, %v9399_v32  ;;  %9407 = vmatmul.msk.f32.gmra.mxu0 %vm1911_vm10, %v9399_v32  ;;  %v13678_v2 = vpop.f32.mrf.mxu3 }
 0x518   : > { %v13680_v43 = vpop.f32.mrf.mxu0 }
 0x519   : > { %9393 = vmatmul.msk.f32.gmra.mxu1 %vm1911_vm10, %v9385_v8 }
 0x51d   : > { %9396 = vmatmul.msk.f32.gmra.mxu2 %vm1911_vm10, %v9384_v4  ;;  %v13687_v50 = vpop.f32.mrf.mxu1  ;;  %v13689_v14 = vpop.f32.mrf.mxu2 }
 0x51e   : > { %9404 = vmatmul.msk.f32.gmra.mxu3 %vm1911_vm10, %v9400_v38  ;;  %9408 = vmatmul.msk.f32.gmra.mxu0 %vm1911_vm10, %v9400_v38  ;;  %v13693_v61 = vpop.f32.mrf.mxu3 }
 0x520   : > { %v13695_v15 = vpop.f32.mrf.mxu0 }
 0x521   : > { %9410 = vmatmul.msk.f32.vlgmr.msrb.gmra.mxu1 %vm1911_vm10, %v9398_v57 }
 0x525   : > { %9397 = vmatmul.msk.f32.gmra.mxu2 %vm1911_vm10, %v9385_v8  ;;  %v13702_v60 = vpop.f32.mrf.mxu1  ;;  %v13704_v52 = vpop.f32.mrf.mxu2 }
 0x526   : > { %9405 = vmatmul.msk.f32.gmra.mxu3 %vm1911_vm10, %v9401_v20  ;;  %9409 = vmatmul.msk.f32.gmra.mxu0 %vm1911_vm10, %v9401_v20  ;;  %v13708_v59 = vpop.f32.mrf.mxu3 }
 0x528   : > { %v13710_v6 = vpop.f32.mrf.mxu0 }
 0x529   : > { %9411 = vmatmul.msk.f32.gmra.mxu1 %vm1911_vm10, %v9399_v32 }
 0x52d   : > { %9418 = vmatmul.msk.f32.vlgmr.msrb.gmra.mxu2 %vm1911_vm10, %v9414_v26  ;;  %v13717_v11 = vpop.f32.mrf.mxu1  ;;  %v13719_v37 = vpop.f32.mrf.mxu2 }
 0x52e   : > { %9422 = vmatmul.msk.f32.vlgmr.msrb.gmra.mxu3 %vm1911_vm10, %v9414_v26  ;;  %9426 = vmatmul.msk.f32.vlgmr.msra.gmra.mxu0 %vm1911_vm10, %v9414_v26  ;;  %v13723_v29 = vpop.f32.mrf.mxu3 }
 0x531   : > { %9412 = vmatmul.msk.f32.gmra.mxu1 %vm1911_vm10, %v9400_v38  ;;  %v13726_v41 = vpop.f32.mrf.mxu0 }
 0x535   : > { %9419 = vmatmul.msk.f32.gmra.mxu2 %vm1911_vm10, %v9415_v62  ;;  %v13732_v9 = vpop.f32.mrf.mxu1 }
 0x536   : > { %9423 = vmatmul.msk.f32.gmra.mxu3 %vm1911_vm10, %v9415_v62  ;;  %9427 = vmatmul.msk.f32.gmra.mxu0 %vm1911_vm10, %v9415_v62  ;;  %v13736_v39 = vpop.f32.mrf.mxu2 }
 0x537   : > { %v13738_v49 = vpop.f32.mrf.mxu3 }
 0x539   : > { %9413 = vmatmul.msk.f32.gmra.mxu1 %vm1911_vm10, %v9401_v20  ;;  %v13741_v21 = vpop.f32.mrf.mxu0 }
 0x53d   : > { %9420 = vmatmul.msk.f32.gmra.mxu2 %vm1911_vm10, %v9416_v54  ;;  %v13747_v58 = vpop.f32.mrf.mxu1 }
 0x53e   : > { %9424 = vmatmul.msk.f32.gmra.mxu3 %vm1911_vm10, %v9416_v54  ;;  %9428 = vmatmul.msk.f32.gmra.mxu0 %vm1911_vm10, %v9416_v54  ;;  %v13751_v47 = vpop.f32.mrf.mxu2 }
 0x53f   : > { %v13753_v12 = vpop.f32.mrf.mxu3 }
 0x541   : > { %v13755_v10 = vpop.f32.mrf.mxu0 }
 0x545   : > { %9421 = vmatmul.msk.f32.gmra.mxu2 %vm1911_vm10, %v9417_v28  ;;  %v13761_v53 = vpop.f32.mrf.mxu1 }
 0x546   : > { %9425 = vmatmul.msk.f32.gmra.mxu3 %vm1911_vm10, %v9417_v28  ;;  %9429 = vmatmul.msk.f32.gmra.mxu0 %vm1911_vm10, %v9417_v28  ;;  %v13765_v48 = vpop.f32.mrf.mxu2 }
 0x547   : > { %v13767_v63 = vpop.f32.mrf.mxu3 }
 0x549   : > { %v13769_v0 = vpop.f32.mrf.mxu0 }
 0x54d   : > { %v13771_v13 = vpop.f32.mrf.mxu1 }
 0x54e   : > { %v13773_v16 = vpop.f32.mrf.mxu2 }
 0x54f   : > { %v13775_v56 = vpop.f32.mrf.mxu3 }
 0x552   : > { %v13777_v3 = vpop.f32.mrf.mxu0 }
 0x553   : > { %17717 = vst [vmem:[#allocation8_spill] sm:$0xff] %v13777_v3 }
 0x555   : > { %v13779_v7 = vpop.f32.mrf.mxu1 }
 0x557   : > { %v13781_v51 = vpop.f32.mrf.mxu2 }
 0x558   : > { %17718 = vst [vmem:[#allocation12_spill] sm:$0xff] %v13781_v51  ;;  %v13783_v4 = vpop.f32.mrf.mxu3 }
 0x559   : > { %17719 = vst [vmem:[#allocation20_spill] sm:$0xff] %v13783_v4 }
 0x55a   : > { %v13785_v8 = vpop.f32.mrf.mxu0 }
 0x55d   : > { %v13787_v57 = vpop.f32.mrf.mxu1 }
 0x55e   : > { %17720 = vst [vmem:[#allocation7_spill] sm:$0xff] %v13787_v57 }
 0x55f   : > { %v13789_v32 = vpop.f32.mrf.mxu2 }
 0x560   : > { %17721 = vst [vmem:[#allocation23_spill] sm:$0xff] %v13789_v32  ;;  %v13791_v38 = vpop.f32.mrf.mxu3 }
 0x561   : > { %17722 = vst [vmem:[#allocation9_spill] sm:$0xff] %v13791_v38 }
 0x562   : > { %v13793_v20 = vpop.f32.mrf.mxu0 }
 0x563   : > { %17723 = vst [vmem:[#allocation4_spill] sm:$0xff] %v13793_v20 }
 0x566   : > { %v13795_v26 = vpop.f32.mrf.mxu1 }
 0x567   : > { %17724 = vst [vmem:[#allocation6_spill] sm:$0xff] %v13795_v26  ;;  %v13797_v62 = vpop.f32.mrf.mxu2 }
 0x568   : > { %17725 = vst [vmem:[#allocation11_spill] sm:$0xff] %v13797_v62  ;;  %v13799_v54 = vpop.f32.mrf.mxu3 }
 0x569   : > { %17726 = vst [vmem:[#allocation3_spill] sm:$0xff] %v13799_v54 }
 0x56a   : > { %v13801_v28 = vpop.f32.mrf.mxu0 }
 0x56b   : > { %17727 = vst [vmem:[#allocation26_spill] sm:$0xff] %v13801_v28 }
 0x56e   : > { %v13803_v5 = vpop.f32.mrf.mxu1 }
 0x56f   : > { %17728 = vst [vmem:[#allocation34_spill] sm:$0xff] %v13803_v5  ;;  %v13805_v4 = vpop.f32.mrf.mxu2 }
 0x570   : > { %17729 = vst [vmem:[#allocation37_spill] sm:$0xff] %v13805_v4  ;;  %v13807_v51 = vpop.f32.mrf.mxu3 }
 0x571   : > { %17730 = vst [vmem:[#allocation27_spill] sm:$0xff] %v13807_v51 }
 0x573   : > { %v13809_v57 = vpop.f32.mrf.mxu0 }
 0x574   : > { %17731 = vst [vmem:[#allocation5_spill] sm:$0xff] %v13809_v57 }
 0x576   : > { %v13811_v32 = vpop.f32.mrf.mxu1 }
 0x577   : > { %17732 = vst [vmem:[#allocation19_spill] sm:$0xff] %v13811_v32 }
 0x578   : > { %v13813_v38 = vpop.f32.mrf.mxu2 }
 0x579   : > { %17733 = vst [vmem:[#allocation13_spill] sm:$0xff] %v13813_v38  ;;  %v13815_v20 = vpop.f32.mrf.mxu3 }
 0x57a   : > { %17734 = vst [vmem:[#allocation33_spill] sm:$0xff] %v13815_v20 }
 0x57b   : > { %v13817_v26 = vpop.f32.mrf.mxu0 }
 0x57c   : > { %17735 = vst [vmem:[#allocation14_spill] sm:$0xff] %v13817_v26 }
 0x57e   : > { %v13819_v62 = vpop.f32.mrf.mxu1 }
 0x57f   : > { %17736 = vst [vmem:[#allocation32_spill] sm:$0xff] %v13819_v62 }
 0x580   : > { %v13821_v54 = vpop.f32.mrf.mxu2 }
 0x581   : > { %17737 = vst [vmem:[#allocation16_spill] sm:$0xff] %v13821_v54  ;;  %v4031_v28 = vpop.f32.mrf.mxu3 }
 0x583   : > { %v13823_v5 = vpop.f32.mrf.mxu0 }
 0x584   : > { %17738 = vst [vmem:[#allocation17_spill] sm:$0xff] %v13823_v5 }
 0x586   : > { %v13825_v4 = vpop.f32.mrf.mxu1 }
 0x587   : > { %17739 = vst [vmem:[#allocation39_spill] sm:$0xff] %v13825_v4 }
 0x588   : > { %v13827_v51 = vpop.f32.mrf.mxu2 }
 0x589   : > { %17740 = vst [vmem:[#allocation24_spill] sm:$0xff] %v13827_v51  ;;  %v13829_v57 = vpop.f32.mrf.mxu3 }
 0x58a   : > { %17741 = vst [vmem:[#allocation22_spill] sm:$0xff] %v13829_v57 }
 0x58b   : > { %v13831_v32 = vpop.f32.mrf.mxu0 }
 0x58c   : > { %17742 = vst [vmem:[#allocation18_spill] sm:$0xff] %v13831_v32 }
 0x58e   : > { %v13833_v38 = vpop.f32.mrf.mxu1 }
 0x58f   : > { %17743 = vst [vmem:[#allocation31_spill] sm:$0xff] %v13833_v38 }
 0x590   : > { %v13835_v20 = vpop.f32.mrf.mxu2 }
 0x591   : > { %17744 = vst [vmem:[#allocation35_spill] sm:$0xff] %v13835_v20  ;;  %v13837_v26 = vpop.f32.mrf.mxu3 }
 0x592   : > { %17745 = vst [vmem:[#allocation36_spill] sm:$0xff] %v13837_v26 }
 0x593   : > { %v13839_v62 = vpop.f32.mrf.mxu0 }
 0x594   : > { %17746 = vst [vmem:[#allocation10_spill] sm:$0xff] %v13839_v62 }
 0x596   : > { %v13841_v54 = vpop.f32.mrf.mxu1 }
 0x597   : > { %17747 = vst [vmem:[#allocation30_spill] sm:$0xff] %v13841_v54 }
 0x598   : > { %v13843_v3 = vpop.f32.mrf.mxu2 }
 0x599   : > { %17748 = vst [vmem:[#allocation38_spill] sm:$0xff] %v13843_v3  ;;  %v13845_v5 = vpop.f32.mrf.mxu3 }
 0x59a   : > { %17749 = vst [vmem:[#allocation15_spill] sm:$0xff] %v13845_v5  ;;  %v3408_v5 = vadd.f32 %v13624_v44, %v13575_v36  ;;  %v3417_v36 = vadd.f32 %v13671_v42, %v13643_v34  ;;  %v3443_v34 = vadd.f32 %v13689_v14, %v13629_v17 }
 0x59b   : > { %v13847_v4 = vpop.f32.mrf.mxu0 }
 0x59c   : > { %17750 = vst [vmem:[#allocation29_spill] sm:$0xff] %v13847_v4  ;;  %v3472_v4 = vadd.f32 %v13693_v61, %v13618_v1  ;;  %v3617_v3 = vadd.f32 %v13649_v27, %v3408_v5  ;;  %v3440_v1 = vadd.f32 %v13674_v18, %v13611_v33  ;;  %v3626_v33 = vadd.f32 %v13695_v15, %v3417_v36  ;;  %v17764_v36 = vld [vmem:[#allocation34_spill] sm:$0xff] }
 0x59d   : > { %v3624_v17 = vadd.f32 %v13717_v11, %v3443_v34  ;;  %v17767_v34 = vld [vmem:[#allocation26_spill] sm:$0xff] }
 0x59e   : > { %v13849_v57 = vpop.f32.mrf.mxu1  ;;  %v3625_v44 = vadd.f32 %v13751_v47, %v3472_v4  ;;  %v3621_v27 = vadd.f32 %v13702_v60, %v3440_v1  ;;  %v3769_v18 = vadd.f32 %v13723_v29, %v3617_v3 }
 0x59f   : > { %17751 = vst [vmem:[#allocation25_spill] sm:$0xff] %v13849_v57  ;;  %v3411_v57 = vadd.f32 %v13640_v19, %v13609_v30  ;;  %v3776_v15 = vadd.f32 %v13741_v21, %v3624_v17 }
 0x5a0   : > { %v4183_v51 = vpop.f32.mrf.mxu2 }
 0x5a1   : > { %v13851_v32 = vpop.f32.mrf.mxu3  ;;  %v3620_v5 = vadd.f32 %v13665_v22, %v3411_v57 }
 0x5a3   : > { %v13853_v38 = vpop.f32.mrf.mxu0 }
 0x5a4   : > { %17752 = vst [vmem:[#allocation21_spill] sm:$0xff] %v13853_v38  ;;  %v3414_v38 = vadd.f32 %v13655_v25, %v13627_v55  ;;  %v3469_v55 = vadd.f32 %v13678_v2, %v13590_v35  ;;  %v3777_v25 = vadd.f32 %v13771_v13, %v3625_v44  ;;  %v3475_v35 = vadd.f32 %v13708_v59, %v13633_v46  ;;  %v17765_v44 = vld [vmem:[#allocation37_spill] sm:$0xff] }
 0x5a5   : > { %v3773_v2 = vadd.f32 %v13726_v41, %v3621_v27  ;;  %v3772_v46 = vadd.f32 %v13738_v49, %v3620_v5  ;;  %v3885_v41 = vadd.f32 %v13773_v16, %v3769_v18  ;;  %v17759_v16 = vld [vmem:[#allocation7_spill] sm:$0xff]  ;;  %v17768_v27 = vld [vmem:[#allocation16_spill] sm:$0xff]  ;;  %v17771_v18 = vld [vmem:[#allocation14_spill] sm:$0xff] }
 0x5a6   : > { %v13859_v62 = vpop.f32.mrf.mxu1 }
 0x5a7   : > { %v4037_v4 = vadd.f32 %v17759_v16, %v3885_v41  ;;  %v17778_v41 = vld [vmem:[#allocation18_spill] sm:$0xff] }
 0x5a8   : > { %v13855_v20 = vpop.f32.mrf.mxu2 }
 0x5a9   : > { %v13857_v26 = vpop.f32.mrf.mxu3 }
 0x5aa   : > { %17753 = vst [vmem:[#allocation28_spill] sm:$0xff] %v13857_v26  ;;  %v3437_v26 = vadd.f32 %v13659_v40, %v13577_v45  ;;  %v3623_v45 = vadd.f32 %v13680_v43, %v3414_v38  ;;  %v3446_v40 = vadd.f32 %v13704_v52, %v13647_v24  ;;  %v3893_v43 = vadd.f32 %v13785_v8, %v3777_v25  ;;  %v17762_v38 = vld [vmem:[#allocation6_spill] sm:$0xff] }
 0x5ab   : > { %v13861_v54 = vpop.f32.mrf.mxu0  ;;  %v3622_v24 = vadd.f32 %v13736_v39, %v3469_v55  ;;  %v3628_v52 = vadd.f32 %v13765_v48, %v3475_v35  ;;  %v17769_v35 = vld [vmem:[#allocation27_spill] sm:$0xff] }
 0x5ac   : > { %17754 = vst [vmem:[#allocation40_spill] sm:$0xff] %v13861_v54  ;;  %v3466_v54 = vadd.f32 %v13663_v31, %v13559_v23  ;;  %v3618_v19 = vadd.f32 %v13687_v50, %v3437_v26  ;;  %v3627_v50 = vadd.f32 %v13732_v9, %v3446_v40  ;;  %v3775_v60 = vadd.f32 %v13753_v12, %v3623_v45  ;;  %v17756_v12 = vld [vmem:[#allocation12_spill] sm:$0xff]  ;;  %v17766_v45 = vld [vmem:[#allocation3_spill] sm:$0xff] }
 0x5ad   : > { %v4045_v59 = vadd.f32 %v4031_v28, %v3893_v43  ;;  %v3774_v11 = vadd.f32 %v13761_v53, %v3622_v24  ;;  %v3780_v39 = vadd.f32 %v13779_v7, %v3628_v52  ;;  %v3888_v48 = vadd.f32 %v17756_v12, %v3772_v46  ;;  %v17758_v53 = vld [vmem:[#allocation23_spill] sm:$0xff]  ;;  %v17761_v7 = vld [vmem:[#allocation4_spill] sm:$0xff]  ;;  %v17780_v12 = vld [vmem:[#allocation38_spill] sm:$0xff] }
 0x5ae   : > { %v3770_v31 = vadd.f32 %v13710_v6, %v3618_v19  ;;  %v3619_v22 = vadd.f32 %v13719_v37, %v3466_v54  ;;  %v4335_v61 = vpop.f32.mrf.mxu1  ;;  %v3779_v6 = vadd.f32 %v13755_v10, %v3627_v50  ;;  %v3778_v37 = vadd.f32 %v13767_v63, %v3626_v33  ;;  %v17757_v10 = vld [vmem:[#allocation20_spill] sm:$0xff]  ;;  %v17763_v54 = vld [vmem:[#allocation11_spill] sm:$0xff] }
 0x5af   : > { %v4197_v49 = vadd.f32 %v4183_v51, %v4045_v59  ;;  %v3889_v13 = vadd.f32 %v17757_v10, %v3773_v2  ;;  %v3891_v3 = vadd.f32 %v17758_v53, %v3775_v60  ;;  %v3896_v51 = vadd.f32 %v17761_v7, %v3780_v39  ;;  %v17772_v43 = vld [vmem:[#allocation32_spill] sm:$0xff]  ;;  %v17773_v24 = vld [vmem:[#allocation19_spill] sm:$0xff]  ;;  %v17781_v10 = vld [vmem:[#allocation29_spill] sm:$0xff] }
 0x5b0   : > { %v13881_v30 = vpop.f32.mrf.mxu2  ;;  %v3771_v14 = vadd.f32 %v13747_v58, %v3619_v22  ;;  %v3886_v9 = vadd.f32 %v13775_v56, %v3770_v31  ;;  %v17755_v58 = vld [vmem:[#allocation8_spill] sm:$0xff]  ;;  %v17760_v56 = vld [vmem:[#allocation9_spill] sm:$0xff]  ;;  %v4040_v26 = vadd.f32 %v17762_v38, %v3888_v48  ;;  %v3894_v28 = vadd.f32 %v17763_v54, %v3778_v37  ;;  %v17776_v52 = vld [vmem:[#allocation31_spill] sm:$0xff] }
 0x5b1   : > { %v13888_v23 = vpop.f32.mrf.mxu3  ;;  %v3890_v47 = vadd.f32 %v17755_v58, %v3774_v11  ;;  %v3892_v8 = vadd.f32 %v17760_v56, %v3776_v15  ;;  %v4349_v57 = vadd.f32 %v4335_v61, %v4197_v49  ;;  %v4043_v1 = vadd.f32 %v17764_v36, %v3891_v3  ;;  %v17770_v22 = vld [vmem:[#allocation5_spill] sm:$0xff]  ;;  %v17775_v15 = vld [vmem:[#allocation22_spill] sm:$0xff]  ;;  %v17784_v38 = vld [vmem:[#allocation39_spill] sm:$0xff] }
 0x5b2   : > { %v3887_v29 = vadd.f32 %v13769_v0, %v3771_v14  ;;  %v13929_v0 = vpop.permute.xlu0 %4526  ;;  %v4038_v5 = vadd.f32 %v17765_v44, %v3886_v9  ;;  %v3895_v19 = vadd.f32 %v17766_v45, %v3779_v6  ;;  %v4189_v33 = vadd.f32 %v17767_v34, %v4037_v4  ;;  %v17774_v14 = vld [vmem:[#allocation33_spill] sm:$0xff]  ;;  %v4522_v6 = vpop.permute.xlu1 %4521  ;;  %v17782_v4 = vld [vmem:[#allocation36_spill] sm:$0xff] }
 0x5b3   : > { %v13901_v42 = vpop.f32.mrf.mxu0  ;;  %v4044_v25 = vadd.f32 %v17768_v27, %v3892_v8  ;;  %v4192_v17 = vadd.f32 %v17770_v22, %v4040_v26  ;;  %v4195_v2 = vadd.f32 %v17771_v18, %v4043_v1  ;;  %v4046_v46 = vadd.f32 %v17773_v24, %v3894_v28  ;;  %v17777_v11 = vld [vmem:[#allocation13_spill] sm:$0xff]  ;;  %v17785_v36 = vld [vmem:[#allocation24_spill] sm:$0xff]  ;;  %v17789_v22 = vld [vmem:[#allocation30_spill] sm:$0xff] }
 0x5b4   : > { %v4039_v31 = vadd.f32 %v17769_v35, %v3887_v29  ;;  %v4190_v50 = vadd.f32 %v17772_v43, %v4038_v5  ;;  %v4042_v61 = vadd.f32 %v17774_v14, %v3890_v47  ;;  %v4048_v60 = vadd.f32 %v17775_v15, %v3896_v51  ;;  %v17779_v29 = vld [vmem:[#allocation35_spill] sm:$0xff]  ;;  %v17783_v8 = vld [vmem:[#allocation25_spill] sm:$0xff]  ;;  %v17786_v44 = vld [vmem:[#allocation40_spill] sm:$0xff]  ;;  %v4517_v14 = vpop.permute.xlu2 %4516 }
 0x5b5   : > { %v4196_v59 = vadd.f32 %v17776_v52, %v4044_v25  ;;  %v4041_v37 = vadd.f32 %v17777_v11, %v3889_v13  ;;  %v4347_v49 = vadd.f32 %v13851_v32, %v4195_v2  ;;  %v4341_v56 = vadd.f32 %v17782_v4, %v4189_v33 }
 0x5b6   : > { %v4342_v9 = vadd.f32 %v17778_v41, %v4190_v50  ;;  %v4191_v39 = vadd.f32 %v17779_v29, %v4039_v31  ;;  %v4338_v58 = vpop.f32.mrf.mxu1  ;;  %v4194_v48 = vadd.f32 %v17780_v12, %v4042_v61  ;;  %v4200_v47 = vadd.f32 %v13855_v20, %v4048_v60  ;;  %v17788_v31 = vld [vmem:[#allocation10_spill] sm:$0xff]  ;;  %v17791_v61 = vld [vmem:[#allocation21_spill] sm:$0xff] }
 0x5b7   : > { %v4348_v53 = vadd.f32 %v17781_v10, %v4196_v59  ;;  %v4193_v26 = vadd.f32 %v17784_v38, %v4041_v37  ;;  %v4047_v1 = vadd.f32 %v17785_v36, %v3895_v19  ;;  %v4493_v5 = vadd.f32 %v13881_v30, %v4341_v56  ;;  %v17790_v19 = vld [vmem:[#allocation15_spill] sm:$0xff] }
 0x5b8   : > { %v13921_v21 = vpop.f32.mrf.mxu2  ;;  %v4343_v7 = vadd.f32 %v17783_v8, %v4191_v39  ;;  %v4494_v13 = vadd.f32 %v13888_v23, %v4342_v9  ;;  %v4346_v32 = vadd.f32 %v13859_v62, %v4194_v48  ;;  %v4352_v54 = vadd.f32 %v4338_v58, %v4200_v47  ;;  %v11088_v48 = vld [vmem:[%s17532_s13 + $0x30] sm:$0xff] }
 0x5b9   : > { %v13927_v63 = vpop.f32.mrf.mxu3  ;;  %v4345_v62 = vadd.f32 %v17788_v31, %v4193_v26  ;;  %v4199_v18 = vadd.f32 %v17789_v22, %v4047_v1  ;;  %v4344_v43 = vadd.f32 %v17790_v19, %v4192_v17  ;;  %v11087_v17 = vld [vmem:[%s17532_s13 + $0x38] sm:$0xff]  ;;  %v11093_v1 = vld [vmem:[%s17532_s13 + $0x28] sm:$0xff]  ;;  %v11097_v31 = vld [vmem:[%s17532_s13 + $0x20] sm:$0xff] }
 0x5ba   : > { %v4495_v20 = vadd.f32 %v17786_v44, %v4343_v7  ;;  %v4512_v34 = vpop.permute.xlu0 %4511  ;;  %v4498_v33 = vadd.f32 %v13901_v42, %v4346_v32  ;;  %v17792_v42 = vld [vmem:[#allocation28_spill] sm:$0xff] }
 0x5bb   : > { %v4487_v55 = vpop.f32.mrf.mxu0  ;;  %v4530_v2 = vadd.f32 %v4512_v34, %v4494_v13  ;;  %v4351_v15 = vadd.f32 %v17791_v61, %v4199_v18  ;;  %v4529_v59 = vadd.f32 %v4512_v34, %v4493_v5  ;;  %v4496_v39 = vadd.f32 %v13921_v21, %v4344_v43 }
 0x5bc   : > { %v4501_v40 = vadd.f32 %v4487_v55, %v4349_v57  ;;  %v4531_v52 = vadd.f32 %v4512_v34, %v4495_v20  ;;  %v11094_v20 = vld [vmem:[%s17532_s13 + $0x50] sm:$0xff] }
 0x5bd   : > { %v4542_v29 = vmax.f32 %v4530_v2, 0.0  ;;  %v4541_v7 = vmax.f32 %v4529_v59, 0.0  ;;  %v4532_v38 = vadd.f32 %v4517_v14, %v4496_v39 }
 0x5be   : > { %v4537_v3 = vadd.f32 %v4522_v6, %v4501_v40  ;;  %v17787_v40 = vld [vmem:[#allocation17_spill] sm:$0xff] }
 0x5bf   : > { %v4198_v35 = vadd.f32 %v17787_v40, %v4046_v46  ;;  %v11086_v46 = vld [vmem:[%s17532_s13 + $0x40] sm:$0xff]  ;;  %v4544_v34 = vmax.f32 %v4532_v38, 0.0  ;;  %v11096_v40 = vld [vmem:[%s17532_s13 + $0x18] sm:$0xff] }
 0x5c0   : > { %v4429_v16 = vpop.f32.mrf.mxu2  ;;  %v4549_v23 = vmax.f32 %v4537_v3, 0.0 }
 0x5c1   : > { %v4499_v51 = vadd.f32 %v4429_v16, %v4347_v49  ;;  %v4458_v57 = vpop.f32.mrf.mxu3  ;;  %v4350_v60 = vadd.f32 %v17792_v42, %v4198_v35  ;;  %v4497_v49 = vadd.f32 %v13927_v63, %v4345_v62  ;;  %v4543_v16 = vmax.f32 %v4531_v52, 0.0 }
 0x5c2   : > { %v4500_v28 = vadd.f32 %v4458_v57, %v4348_v53  ;;  %v13975_v11 = vmul.f32 %v11086_v46, %v4549_v23  ;;  %v11089_v53 = vld [vmem:[%s17532_s13 + $0x58] sm:$0xff]  ;;  %v14057_v35 = vmul.f32 %v11096_v40, %v4544_v34 }
 0x5c3   : > { %v4535_v55 = vadd.f32 %v4522_v6, %v4499_v51  ;;  %v4490_v45 = vpop.f32.mrf.mxu0  ;;  %v11090_v51 = vld [vmem:[%s17532_s13 + $0x8] sm:$0xff]  ;;  %v4533_v26 = vadd.f32 %v4517_v14, %v4497_v49 }
 0x5c4   : > { %v4536_v27 = vadd.f32 %v4522_v6, %v4500_v28  ;;  %v4504_v25 = vadd.f32 %v4490_v45, %v4352_v54  ;;  %v4534_v6 = vadd.f32 %v4517_v14, %v4498_v33  ;;  %v14009_v57 = vmul.f32 %v11090_v51, %v4542_v29  ;;  %v11092_v28 = vld [vmem:[%s17532_s13 + $0x10] sm:$0xff] }
 0x5c5   : > { %v4547_v50 = vmax.f32 %v4535_v55, 0.0  ;;  %v14021_v36 = vmul.f32 %v11092_v28, %v4543_v16  ;;  %v11095_v55 = vld [vmem:[%s17532_s13] sm:$0xff]  ;;  %v4545_v33 = vmax.f32 %v4533_v26, 0.0 }
 0x5c6   : > { %v4548_v24 = vmax.f32 %v4536_v27, 0.0  ;;  %v4540_v30 = vadd.f32 %v13929_v0, %v4504_v25  ;;  %v4546_v4 = vmax.f32 %v4534_v6, 0.0  ;;  %v14036_v45 = vmul.f32 %v11095_v55, %v4541_v7 }
 0x5c7   : > { %v13987_v10 = vmul.f32 %v11088_v48, %v4547_v50  ;;  %v14040_v23 = vpack.i.bf16 %v14021_v36, %v14009_v57  ;;  %v14062_v62 = vmul.f32 %v11097_v31, %v4545_v33 }
 0x5c8   : > { %v13980_v37 = vmul.f32 %v11087_v17, %v4548_v24  ;;  %v4552_v41 = vmax.f32 %v4540_v30, 0.0  ;;  %v4432_v9 = vpop.f32.mrf.mxu2  ;;  %v14026_v44 = vmul.f32 %v11093_v1, %v4546_v4  ;;  %v10424_v50 = vpack.i.bf16 %v14021_v36, %v14036_v45 }
 0x5c9   : > { %v4502_v58 = vadd.f32 %v4432_v9, %v4350_v60  ;;  %v4461_v12 = vpop.f32.mrf.mxu3  ;;  %v14068_v22 = vpack.i.bf16 %v14062_v62, %v14057_v35  ;;  %v10389_v19 = vpack.i.bf16 %v13975_v11, %v13987_v10  ;;  %v10429_v14 = vpack.i.bf16 %v14036_v45, %v14057_v35 }
 0x5ca   : > { %v13992_v47 = vmul.f32 %v11089_v53, %v4552_v41  ;;  %v4503_v3 = vadd.f32 %v4461_v12, %v4351_v15  ;;  %v13996_v21 = vpack.i.bf16 %v13975_v11, %v13980_v37  ;;  %v14052_v25 = vpack.i.bf16 %v14036_v45, %v14026_v44 }
 0x5cb   : > { %v4538_v63 = vadd.f32 %v13929_v0, %v4502_v58  ;;  %v10394_v2 = vpack.i.bf16 %v13987_v10, %v14026_v44  ;;  %v10399_v24 = vpack.i.bf16 %v14026_v44, %v14057_v35  ;;  %v10469_v15 = vpack.i.bf16 %v14009_v57, %v14062_v62 }
 0x5cc   : > { %v4539_v56 = vadd.f32 %v13929_v0, %v4503_v3  ;;  %10360 = vrot.lane.b32.xlu0 %v13996_v21, %s17553_s25  ;;  %v14004_v8 = vpack.i.bf16 %v13987_v10, %v13992_v47  ;;  %v11091_v0 = vld [vmem:[%s17532_s13 + $0x48] sm:$0xff]  ;;  %v10479_v42 = vpack.i.bf16 %v13980_v37, %v13987_v10  ;;  %v10514_v52 = vpack.i.bf16 %v14009_v57, %v14036_v45 }
 0x5cd   : > { %v4550_v13 = vmax.f32 %v4538_v63, 0.0  ;;  %v10509_v59 = vpack.i.bf16 %v14021_v36, %v13980_v37  ;;  %v10534_v6 = vpack.i.bf16 %v13975_v11, %v13992_v47  ;;  %v10559_v17 = vpack.i.bf16 %v14021_v36, %v14026_v44 }
 0x5ce   : > { %v4551_v32 = vmax.f32 %v4539_v56, 0.0  ;;  %10355 = vrot.lane.b32.xlu2 %v14004_v8, %s17553_s25  ;;  %v5873_v56 = vld [vmem:[%s17527_s8 + $0x8] sm:$0xff] }
 0x5cf   : > { %v14016_v54 = vmul.f32 %v11091_v0, %v4550_v13  ;;  %v5874_v13 = vld [vmem:[%s17527_s8 + $0x10] sm:$0xff] }
 0x5d0   : > { %v14031_v5 = vmul.f32 %v11094_v20, %v4551_v32 }
 0x5d1   : > { %v10409_v18 = vpack.i.bf16 %v13992_v47, %v14016_v54  ;;  %v10414_v43 = vpack.i.bf16 %v14062_v62, %v14016_v54 }
 0x5d2   : > { %v14044_v27 = vpack.i.bf16 %v14031_v5, %v14016_v54  ;;  %v10404_v30 = vpack.i.bf16 %v13992_v47, %v14031_v5  ;;  %v10459_v61 = vpack.i.bf16 %v13980_v37, %v14031_v5  ;;  %v10504_v60 = vpack.i.bf16 %v14031_v5, %v14057_v35 }
 0x5d4   : > { %10380 = vrot.lane.b32.xlu0 %v14040_v23, %s17793_s24  ;;  %10365 = vrot.lane.b32.xlu1 %v14044_v27, %s17793_s24 }
 0x5d6   : > { %10375 = vrot.lane.b32.xlu2 %v14052_v25, %s17793_s24 }
 0x5dc   : > { %10385 = vrot.lane.b32.xlu0 %v13996_v21, %s17794_s28  ;;  %10370 = vrot.lane.b32.xlu1 %v14068_v22, %s17793_s24 }
 0x5de   : > { %10410 = vrot.lane.b32.xlu2 %v10409_v18, %s17795_s16 }
 0x5e4   : > { %10395 = vrot.lane.b32.xlu0 %v10394_v2, %s17794_s28  ;;  %10390 = vrot.lane.b32.xlu1 %v10389_v19, %s17795_s16 }
 0x5e6   : > { %10415 = vrot.lane.b32.xlu2 %v10414_v43, %s17794_s28 }
 0x5ec   : > { %10425 = vrot.lane.b32.xlu0 %v10424_v50, %s17795_s16  ;;  %10400 = vrot.lane.b32.xlu1 %v10399_v24, %s17795_s16 }
 0x5ee   : > { %10420 = vrot.lane.b32.xlu2 %v14040_v23, %s17794_s28 }
 0x5f4   : > { %10435 = vrot.lane.b32.xlu0 %v14004_v8, %s17714_s27  ;;  %10405 = vrot.lane.b32.xlu1 %v10404_v30, %s17794_s28 }
 0x5f6   : > { %10455 = vrot.lane.b32.xlu2 %v14044_v27, %s17714_s27 }
 0x5fc   : > { %10445 = vrot.lane.b32.xlu0 %v14068_v22, %s17714_s27  ;;  %10430 = vrot.lane.b32.xlu1 %v10429_v14, %s17794_s28 }
 0x5fe   : > { %10460 = vrot.lane.b32.xlu2 %v10459_v61, %s17795_s16 }
 0x604   : > { %10470 = vrot.lane.b32.xlu0 %v10469_v15, %s17795_s16  ;;  %10440 = vrot.lane.b32.xlu1 %v13996_v21, %s17714_s27 }
 0x606   : > { %10465 = vrot.lane.b32.xlu2 %v14040_v23, %s17714_s27 }
 0x60c   : > { %10475 = vrot.lane.b32.xlu0 %v10389_v19, %s17715_s22  ;;  %10450 = vrot.lane.b32.xlu1 %v14052_v25, %s17714_s27  ;;  %v9430_v19 = vld [vmem:[%s17526_s7 + $0x20] sm:$0xff] }
 0x60e   : > { %10500 = vrot.lane.b32.xlu2 %v14044_v27, %s17636_s29 }
 0x614   : > { %10485 = vrot.lane.b32.xlu0 %v14052_v25, %s17715_s22  ;;  %10480 = vrot.lane.b32.xlu1 %v10479_v42, %s17636_s29 }
 0x616   : > { %10505 = vrot.lane.b32.xlu2 %v10504_v60, %s17715_s22  ;;  %v5872_v60 = vld [vmem:[%s17527_s8] sm:$0xff] }
 0x61c   : > { %10515 = vrot.lane.b32.xlu0 %v10514_v52, %s17636_s29  ;;  %10490 = vrot.lane.b32.xlu1 %v14068_v22, %s17636_s29  ;;  %v9431_v52 = vld [vmem:[%s17526_s7 + $0x28] sm:$0xff] }
 0x61e   : > { %10510 = vrot.lane.b32.xlu2 %v10509_v59, %s17715_s22 }
 0x624   : > { %10525 = vrot.lane.b32.xlu0 %v14004_v8, %s17637_s30  ;;  %10495 = vrot.lane.b32.xlu1 %v10409_v18, %s17715_s22 }
 0x626   : > { %10535 = vrot.lane.b32.xlu2 %v10534_v6, %s17636_s29 }
 0x628   : > { %v10356_v46 = vpop.permute.xlu2 %10355 }
 0x629   : > { %v10357_v58 = vunpack.i.l.bf16 %v10356_v46 }
 0x62c   : > { %10540 = vrot.lane.b32.xlu0 %v14068_v22, %s17637_s30  ;;  %10520 = vrot.lane.b32.xlu1 %v10469_v15, %s17715_s22 }
 0x62e   : > { %10550 = vrot.lane.b32.xlu2 %v14044_v27, %s17637_s30 }
 0x630   : > { %v10376_v41 = vpop.permute.xlu2 %10375 }
 0x631   : > { %v10377_v28 = vunpack.i.l.bf16 %v10376_v41  ;;  %v10378_v33 = vunpack.i.h.bf16 %v10376_v41 }
 0x634   : > { %10560 = vrot.lane.b32.xlu0 %v10559_v17, %s17636_s29  ;;  %10530 = vrot.lane.b32.xlu1 %v13996_v21, %s17637_s30 }
 0x636   : > { %10555 = vrot.lane.b32.xlu2 %v14040_v23, %s17637_s30 }
 0x638   : > { %v14161_v29 = vpop.permute.xlu2 %10410 }
 0x639   : > { %v10413_v31 = vunpack.i.h.bf16 %v14161_v29 }
 0x63c   : > { %10570 = vrot.lane.b32.xlu0 %v13996_v21, %s17639_s21  ;;  %10545 = vrot.lane.b32.xlu1 %v14052_v25, %s17637_s30 }
 0x63e   : > { %v10361_v9 = vpop.permute.xlu0 %10360  ;;  %10565 = vrot.lane.b32.xlu2 %v14004_v8, %s17639_s21  ;;  %v10358_v8 = vunpack.i.h.bf16 %v10356_v46 }
 0x63f   : > { %v10363_v53 = vunpack.i.h.bf16 %v10361_v9  ;;  %v10362_v3 = vunpack.i.l.bf16 %v10361_v9 }
 0x640   : > { %v14169_v21 = vpop.permute.xlu2 %10415 }
 0x641   : > { %v4639_v51 = vsel %vm551_vm0, %v10363_v53, %v10358_v8  ;;  %v4635_v38 = vsel %vm551_vm0, %v10358_v8, %v10362_v3  ;;  %v4631_v26 = vsel %vm551_vm0, %v10362_v3, %v10363_v53  ;;  %v9432_v53 = vld [vmem:[%s17526_s7 + $0x30] sm:$0xff] }
 0x644   : > { %10590 = vrot.lane.b32.xlu0 %v14040_v23, %s17639_s21  ;;  %10575 = vrot.lane.b32.xlu1 %v14044_v27, %s17639_s21 }
 0x646   : > { %v10381_v39 = vpop.permute.xlu0 %10380  ;;  %10585 = vrot.lane.b32.xlu2 %v14052_v25, %s17639_s21  ;;  %v10366_v49 = vpop.permute.xlu1 %10365  ;;  %v5875_v25 = vld [vmem:[%s17527_s8 + $0x18] sm:$0xff] }
 0x647   : > { %v10368_v12 = vunpack.i.h.bf16 %v10366_v49  ;;  %v10367_v48 = vunpack.i.l.bf16 %v10366_v49  ;;  %v10383_v1 = vunpack.i.h.bf16 %v10381_v39  ;;  %v10382_v34 = vunpack.i.l.bf16 %v10381_v39 }
 0x648   : > { %v14204_v18 = vpop.permute.xlu2 %10420 }
 0x649   : > { %v4640_v16 = vsel %vm551_vm0, %v10357_v58, %v10367_v48  ;;  %v4636_v4 = vsel %vm551_vm0, %v10367_v48, %v10368_v12  ;;  %v4632_v7 = vsel %vm551_vm0, %v10368_v12, %v10357_v58  ;;  %v4637_v2 = vsel %vm551_vm0, %v10383_v1, %v10378_v33 }
 0x64a   : > { %4670 = vmatpush.msra.mxu1 %v4640_v16  ;;  %4699 = vmatpush.msra.mxu2 %v4636_v4  ;;  %v4633_v43 = vsel %vm551_vm0, %v10378_v33, %v10382_v34  ;;  %v4629_v50 = vsel %vm551_vm0, %v10382_v34, %v10383_v1  ;;  %v10418_v34 = vunpack.i.h.bf16 %v14169_v21  ;;  %v10423_v33 = vunpack.i.h.bf16 %v14204_v18 }
 0x64b   : > { %4728 = vmatpush.msra.mxu3 %v4632_v7 }
 0x64c   : > { %5883 = vperm.xlu0 %9871, %v5873_v56   ;;  %10580 = vrot.lane.b32.xlu1 %v14068_v22, %s17639_s21  ;;  %v10412_v22 = vunpack.i.l.bf16 %v14161_v29  ;;  %v10417_v56 = vunpack.i.l.bf16 %v14169_v21 }
 0x64d   : > { %4671 = vmatpush.msra.mxu1 %v4639_v51  ;;  %4700 = vmatpush.msra.mxu2 %v4635_v38 }
 0x64e   : > { %4729 = vmatpush.msra.mxu3 %v4631_v26  ;;  %v14191_v32 = vpop.permute.xlu0 %10385  ;;  %5888 = vperm.xlu2 %9873, %v5874_v13   ;;  %v10371_v0 = vpop.permute.xlu1 %10370  ;;  %v4879_v14 = vsel %vm793_vm4, %v10413_v31, %v10412_v22 }
 0x64f   : > { %v10373_v20 = vunpack.i.h.bf16 %v10371_v0  ;;  %v10372_v55 = vunpack.i.l.bf16 %v10371_v0  ;;  %v10388_v51 = vunpack.i.h.bf16 %v14191_v32  ;;  %v10387_v38 = vunpack.i.l.bf16 %v14191_v32 }
 0x650   : > { %v14242_v59 = vpop.permute.xlu2 %10455 }
 0x651   : > { %v4638_v23 = vsel %vm551_vm0, %v10377_v28, %v10372_v55  ;;  %v4634_v27 = vsel %vm551_vm0, %v10372_v55, %v10373_v20  ;;  %v4630_v40 = vsel %vm551_vm0, %v10373_v20, %v10377_v28  ;;  %v10458_v49 = vunpack.i.h.bf16 %v14242_v59  ;;  %v9433_v55 = vld [vmem:[%s17526_s7 + $0x38] sm:$0xff] }
 0x652   : > { %4672 = vmatpush.msra.mxu1 %v4638_v23  ;;  %4701 = vmatpush.msra.mxu2 %v4634_v27  ;;  %v10457_v58 = vunpack.i.l.bf16 %v14242_v59  ;;  %v10422_v23 = vunpack.i.l.bf16 %v14204_v18  ;;  %v4591_v27 = vsel %vm528_vm3, %v10387_v38, %v10388_v51 }
 0x653   : > { %4730 = vmatpush.msra.mxu3 %v4630_v40 }
 0x654   : > { %5893 = vperm.xlu1 %9872, %v5875_v25   ;;  %4673 = vmatpush.msra.mxu1 %v4637_v2  ;;  %v5027_v3 = vsel %vm937_vm5, %v10457_v58, %v10458_v49 }
 0x655   : > { %4702 = vmatpush.msra.mxu2 %v4633_v43  ;;  %4731 = vmatpush.msra.mxu3 %v4629_v50  ;;  %v4589_v50 = vsel %vm528_vm3, %v10422_v23, %v10423_v33 }
 0x656   : > { %9434 = vmatmul.msk.f32.vlgmr.msra.gmra.mxu1 %vm1911_vm10, %v9430_v19  ;;  %9438 = vmatmul.msk.f32.vlgmr.msra.gmra.mxu2 %vm1911_vm10, %v9430_v19  ;;  %v14217_v24 = vpop.permute.xlu0 %10395  ;;  %v14219_v30 = vpop.permute.xlu1 %10390 }
 0x657   : > { %9442 = vmatmul.msk.f32.vlgmr.msra.gmra.mxu3 %vm1911_vm10, %v9430_v19  ;;  %v10393_v61 = vunpack.i.h.bf16 %v14219_v30  ;;  %v10392_v15 = vunpack.i.l.bf16 %v14219_v30  ;;  %v10398_v8 = vunpack.i.h.bf16 %v14217_v24  ;;  %v10397_v28 = vunpack.i.l.bf16 %v14217_v24 }
 0x658   : > { %4909 = vmatpush.msrb.mxu3 %v4879_v14  ;;  %v10461_v25 = vpop.permute.xlu2 %10460 }
 0x659   : > { %v4878_v42 = vsel %vm793_vm4, %v10393_v61, %v10392_v15  ;;  %v4599_v20 = vsel %vm528_vm3, %v10388_v51, %v10398_v8  ;;  %v4595_v32 = vsel %vm528_vm3, %v10398_v8, %v10387_v38  ;;  %v4590_v19 = vsel %vm528_vm3, %v10418_v34, %v10397_v28 }
 0x65a   : > { %4910 = vmatpush.msrb.mxu3 %v4878_v42 }
 0x65c   : > { %5878 = vperm.xlu1 %9872, %v5872_v60   ;;  %v10462_v60 = vunpack.i.l.bf16 %v10461_v25 }
 0x65e   : > { %9435 = vmatmul.msk.f32.gmra.mxu1 %vm1911_vm10, %v9431_v52  ;;  %9439 = vmatmul.msk.f32.gmra.mxu2 %vm1911_vm10, %v9431_v52  ;;  %v14246_v6 = vpop.permute.xlu0 %10425  ;;  %v14248_v46 = vpop.permute.xlu1 %10400 }
 0x65f   : > { %9443 = vmatmul.msk.f32.gmra.mxu3 %vm1911_vm10, %v9431_v52  ;;  %v10428_v17 = vunpack.i.h.bf16 %v14246_v6  ;;  %v10427_v41 = vunpack.i.l.bf16 %v14246_v6  ;;  %v10403_v9 = vunpack.i.h.bf16 %v14248_v46  ;;  %v10402_v39 = vunpack.i.l.bf16 %v14248_v46  ;;  %v4601_v52 = vld [vmem:[%s17526_s7] sm:$0xff]  ;;  %v4602_v46 = vld [vmem:[%s17526_s7 + $0x8] sm:$0xff] }
 0x660   : > { %v10466_v8 = vpop.permute.xlu2 %10465 }
 0x661   : > { %v4877_v12 = vsel %vm793_vm4, %v10403_v9, %v10402_v39  ;;  %v4876_v48 = vsel %vm793_vm4, %v10428_v17, %v10427_v41 }
 0x662   : > { %4911 = vmatpush.msrb.mxu3 %v4877_v12 }
 0x664   : > { %4912 = vmatpush.msrb.mxu3 %v4876_v48  ;;  %v10463_v48 = vunpack.i.h.bf16 %v10461_v25 }
 0x666   : > { %5090 = vmatpush.msra.mxu3 %v5027_v3  ;;  %9436 = vmatmul.msk.f32.gmra.mxu1 %vm1911_vm10, %v9432_v53  ;;  %v14278_v16 = vpop.permute.xlu0 %10435  ;;  %v10406_v4 = vpop.permute.xlu1 %10405  ;;  %v4875_v3 = vsel %vm793_vm4, %v10412_v22, %v10462_v60  ;;  %v4874_v22 = vsel %vm793_vm4, %v10392_v15, %v10463_v48  ;;  %v4870_v29 = vsel %vm793_vm4, %v10463_v48, %v10393_v61 }
 0x667   : > { %9440 = vmatmul.msk.f32.gmra.mxu2 %vm1911_vm10, %v9432_v53  ;;  %9444 = vmatmul.msk.f32.gmra.mxu3 %vm1911_vm10, %v9432_v53  ;;  %v10408_v7 = vunpack.i.h.bf16 %v10406_v4  ;;  %v10407_v13 = vunpack.i.l.bf16 %v10406_v4  ;;  %v10437_v40 = vunpack.i.l.bf16 %v14278_v16  ;;  %v14332_v53 = vld [vmem:[%s17526_s7 + $0x40] sm:$0xff] }
 0x669   : > { %v4600_v26 = vsel %vm528_vm3, %v10408_v7, %v10417_v56  ;;  %v4596_v0 = vsel %vm528_vm3, %v10417_v56, %v10407_v13  ;;  %v4592_v1 = vsel %vm528_vm3, %v10407_v13, %v10408_v7  ;;  %v5031_v24 = vsel %vm937_vm5, %v10437_v40, %v10457_v58 }
 0x66a   : > { %4769 = vmatpush.msrb.mxu0 %v4600_v26  ;;  %4798 = vmatpush.msrb.mxu1 %v4596_v0  ;;  %v4871_v7 = vsel %vm793_vm4, %v10462_v60, %v10413_v31  ;;  %v10438_v26 = vunpack.i.h.bf16 %v14278_v16 }
 0x66b   : > { %4827 = vmatpush.msrb.mxu2 %v4592_v1 }
 0x66c   : > { %4770 = vmatpush.msrb.mxu0 %v4599_v20  ;;  %4799 = vmatpush.msrb.mxu1 %v4595_v32  ;;  %v14386_v32 = vld [vmem:[%s17526_s7 + $0x48] sm:$0xff] }
 0x66d   : > { %4828 = vmatpush.msrb.mxu2 %v4591_v27 }
 0x66e   : > { %9437 = vmatmul.msk.f32.gmra.mxu1 %vm1911_vm10, %v9433_v55  ;;  %v14307_v2 = vpop.permute.xlu0 %10445  ;;  %v10431_v21 = vpop.permute.xlu1 %10430 }
 0x66f   : > { %9441 = vmatmul.msk.f32.gmra.mxu2 %vm1911_vm10, %v9433_v55  ;;  %9445 = vmatmul.msk.f32.gmra.mxu3 %vm1911_vm10, %v9433_v55  ;;  %v10433_v18 = vunpack.i.h.bf16 %v10431_v21  ;;  %v10432_v43 = vunpack.i.l.bf16 %v10431_v21  ;;  %v10447_v31 = vunpack.i.l.bf16 %v14307_v2  ;;  %v10467_v55 = vunpack.i.l.bf16 %v10466_v8 }
 0x670   : > { %4829 = vmatpush.msrb.mxu2 %v4590_v19  ;;  %v14470_v19 = vld [vmem:[%s17526_s7 + $0x60] sm:$0xff] }
 0x671   : > { %v4598_v14 = vsel %vm528_vm3, %v10397_v28, %v10432_v43  ;;  %v4594_v42 = vsel %vm528_vm3, %v10432_v43, %v10418_v34  ;;  %v4597_v12 = vsel %vm528_vm3, %v10423_v33, %v10433_v18  ;;  %v4593_v58 = vsel %vm528_vm3, %v10433_v18, %v10422_v23  ;;  %v14399_v23 = vpop.permute.xlu2 %10500 }
 0x672   : > { %4830 = vmatpush.msrb.mxu2 %v4589_v50  ;;  %4771 = vmatpush.msrb.mxu0 %v4598_v14  ;;  %v10448_v28 = vunpack.i.h.bf16 %v14307_v2  ;;  %v10468_v33 = vunpack.i.h.bf16 %v10466_v8 }
 0x673   : > { %4800 = vmatpush.msrb.mxu1 %v4594_v42 }
 0x674   : > { %5061 = vmatpush.msra.mxu2 %v5031_v24  ;;  %4772 = vmatpush.msrb.mxu0 %v4597_v12  ;;  %v5025_v20 = vsel %vm937_vm5, %v10447_v31, %v10448_v28  ;;  %v5020_v2 = vsel %vm937_vm5, %v10467_v55, %v10468_v33 }
 0x675   : > { %4801 = vmatpush.msrb.mxu1 %v4593_v58  ;;  %9446 = vmatmul.msk.f32.vlgmr.msrb.gmra.mxu0 %vm1911_vm10, %v4601_v52 }
 0x676   : > { %9450 = vmatmul.msk.f32.vlgmr.msrb.gmra.mxu1 %vm1911_vm10, %v4601_v52  ;;  %v10471_v4 = vpop.permute.xlu0 %10470  ;;  %v10441_v56 = vpop.permute.xlu1 %10440  ;;  %4938 = vmatpush.msra.mxu0 %v4875_v3 }
 0x677   : > { %9454 = vmatmul.msk.f32.vlgmr.msrb.gmra.mxu2 %vm1911_vm10, %v4601_v52  ;;  %9462 = vmatmul.msk.f32.vlgmr.msrb.gmra.mxu3 %vm1911_vm10, %v14332_v53  ;;  %v10472_v13 = vunpack.i.l.bf16 %v10471_v4  ;;  %v10443_v51 = vunpack.i.h.bf16 %v10441_v56  ;;  %v10442_v38 = vunpack.i.l.bf16 %v10441_v56  ;;  %v10473_v0 = vunpack.i.h.bf16 %v10471_v4 }
 0x678   : > { %4967 = vmatpush.msra.mxu1 %v4871_v7  ;;  %4939 = vmatpush.msra.mxu0 %v4874_v22 }
 0x679   : > { %v4873_v1 = vsel %vm793_vm4, %v10402_v39, %v10472_v13  ;;  %v4869_v15 = vsel %vm793_vm4, %v10472_v13, %v10403_v9  ;;  %v5030_v30 = vsel %vm937_vm5, %v10443_v51, %v10438_v26  ;;  %v5026_v61 = vsel %vm937_vm5, %v10438_v26, %v10442_v38 }
 0x67a   : > { %4968 = vmatpush.msra.mxu1 %v4870_v29  ;;  %4940 = vmatpush.msra.mxu0 %v4873_v1  ;;  %v4872_v39 = vsel %vm793_vm4, %v10427_v41, %v10473_v0  ;;  %v4868_v9 = vsel %vm793_vm4, %v10473_v0, %v10428_v17  ;;  %v5023_v17 = vsel %vm937_vm5, %v10458_v49, %v10437_v40  ;;  %v4603_v40 = vld [vmem:[%s17526_s7 + $0x10] sm:$0xff] }
 0x67b   : > { %5062 = vmatpush.msra.mxu2 %v5030_v30  ;;  %5091 = vmatpush.msra.mxu3 %v5026_v61  ;;  %v5022_v16 = vsel %vm937_vm5, %v10442_v38, %v10443_v51 }
 0x67c   : > { %4969 = vmatpush.msra.mxu1 %v4869_v15  ;;  %4941 = vmatpush.msra.mxu0 %v4872_v39 }
 0x67d   : > { %5092 = vmatpush.msra.mxu3 %v5025_v20  ;;  %9447 = vmatmul.msk.f32.gmra.mxu0 %vm1911_vm10, %v4602_v46 }
 0x67e   : > { %4970 = vmatpush.msra.mxu1 %v4868_v9  ;;  %v10451_v41 = vpop.permute.xlu1 %10450  ;;  %5119 = vmatpush.msrb.mxu0 %v5023_v17  ;;  %v14413_v49 = vpop.permute.xlu0 %10475 }
 0x67f   : > { %9451 = vmatmul.msk.f32.gmra.mxu1 %vm1911_vm10, %v4602_v46  ;;  %v10453_v6 = vunpack.i.h.bf16 %v10451_v41  ;;  %v10452_v34 = vunpack.i.l.bf16 %v10451_v41  ;;  %9455 = vmatmul.msk.f32.gmra.mxu2 %vm1911_vm10, %v4602_v46  ;;  %v10477_v21 = vunpack.i.l.bf16 %v14413_v49  ;;  %v10478_v60 = vunpack.i.h.bf16 %v14413_v49 }
 0x680   : > { %9463 = vmatmul.msk.f32.gmra.mxu3 %vm1911_vm10, %v14386_v32  ;;  %5177 = vmatpush.msrb.mxu1 %v14016_v54 }
 0x681   : > { %v5029_v27 = vsel %vm937_vm5, %v10452_v34, %v10447_v31  ;;  %v5024_v25 = vsel %vm937_vm5, %v10453_v6, %v10467_v55  ;;  %v5021_v59 = vsel %vm937_vm5, %v10448_v28, %v10452_v34  ;;  %5120 = vmatpush.msrb.mxu0 %v5022_v16  ;;  %v5028_v54 = vsel %vm937_vm5, %v10468_v33, %v10453_v6  ;;  %v14526_v28 = vld [vmem:[%s17526_s7 + $0x68] sm:$0xff]  ;;  %v14560_v34 = vld [vmem:[%s17526_s7 + $0x70] sm:$0xff] }
 0x682   : > { %5063 = vmatpush.msra.mxu2 %v5029_v27  ;;  %5093 = vmatpush.msra.mxu3 %v5024_v25  ;;  %v5298_v0 = vsel %vm1209_vm6, %v10478_v60, %v10477_v21  ;;  %v14577_v27 = vld [vmem:[%s17526_s7 + $0x78] sm:$0xff] }
 0x683   : > { %5178 = vmatpush.msrb.mxu1 %v13987_v10  ;;  %5121 = vmatpush.msrb.mxu0 %v5021_v59  ;;  %v14425_v10 = vld [vmem:[%s17526_s7 + $0x50] sm:$0xff] }
 0x684   : > { %5235 = vmatpush.msrb.mxu3 %v13992_v47  ;;  %5064 = vmatpush.msra.mxu2 %v5028_v54 }
 0x685   : > { %5179 = vmatpush.msrb.mxu1 %v14057_v35  ;;  %5122 = vmatpush.msrb.mxu0 %v5020_v2 }
 0x686   : > { %5206 = vmatpush.msrb.mxu2 %v14031_v5  ;;  %5236 = vmatpush.msrb.mxu3 %v13975_v11  ;;  %v14429_v47 = vpop.permute.xlu1 %10480  ;;  %v14439_v5 = vpop.permute.xlu2 %10505  ;;  %v4604_v11 = vld [vmem:[%s17526_s7 + $0x18] sm:$0xff] }
 0x687   : > { %5180 = vmatpush.msrb.mxu1 %v14036_v45  ;;  %9448 = vmatmul.msk.f32.gmra.mxu0 %vm1911_vm10, %v4603_v40  ;;  %v14446_v45 = vpop.permute.xlu0 %10485  ;;  %v10483_v43 = vunpack.i.h.bf16 %v14429_v47  ;;  %v10482_v50 = vunpack.i.l.bf16 %v14429_v47  ;;  %v10507_v38 = vunpack.i.l.bf16 %v14439_v5 }
 0x688   : > { %9452 = vmatmul.msk.f32.gmra.mxu1 %vm1911_vm10, %v4603_v40  ;;  %9456 = vmatmul.msk.f32.gmra.mxu2 %vm1911_vm10, %v4603_v40  ;;  %v10487_v4 = vunpack.i.l.bf16 %v14446_v45  ;;  %v10488_v22 = vunpack.i.h.bf16 %v14446_v45  ;;  %v9490_v40 = vld [vmem:[%s17526_s7 + $0x80] sm:$0xff] }
 0x689   : > { %9464 = vmatmul.msk.f32.gmra.mxu3 %vm1911_vm10, %v14425_v10  ;;  %5207 = vmatpush.msrb.mxu2 %v13980_v37  ;;  %v14452_v37 = vld [vmem:[%s17526_s7 + $0x58] sm:$0xff]  ;;  %v5446_v13 = vsel %vm1353_vm7, %v10482_v50, %v10483_v43 }
 0x68a   : > { %5237 = vmatpush.msrb.mxu3 %v14026_v44  ;;  %v5297_v1 = vsel %vm1209_vm6, %v10487_v4, %v10507_v38 }
 0x68b   : > { %5208 = vmatpush.msrb.mxu2 %v14062_v62  ;;  %v10508_v62 = vunpack.i.h.bf16 %v14439_v5 }
 0x68c   : > { %5238 = vmatpush.msrb.mxu3 %v14021_v36  ;;  %v10503_v36 = vunpack.i.h.bf16 %v14399_v23 }
 0x68d   : > { %5209 = vmatpush.msrb.mxu2 %v14009_v57  ;;  %v10502_v57 = vunpack.i.l.bf16 %v14399_v23 }
 0x68e   : > { %v14454_v44 = vpop.permute.xlu1 %10490  ;;  %v14463_v35 = vpop.permute.xlu2 %10510 }
 0x68f   : > { %9449 = vmatmul.msk.f32.gmra.mxu0 %vm1911_vm10, %v4604_v11  ;;  %v10512_v42 = vunpack.i.l.bf16 %v14463_v35  ;;  %v14476_v52 = vpop.permute.xlu0 %10515  ;;  %v5447_v12 = vsel %vm1353_vm7, %v10502_v57, %v10503_v36  ;;  %v10493_v48 = vunpack.i.h.bf16 %v14454_v44  ;;  %v10492_v58 = vunpack.i.l.bf16 %v14454_v44 }
 0x690   : > { %9453 = vmatmul.msk.f32.gmra.mxu1 %vm1911_vm10, %v4604_v11  ;;  %9457 = vmatmul.msk.f32.gmra.mxu2 %vm1911_vm10, %v4604_v11  ;;  %v10518_v8 = vunpack.i.h.bf16 %v14476_v52  ;;  %v10517_v7 = vunpack.i.l.bf16 %v14476_v52  ;;  %v10513_v15 = vunpack.i.h.bf16 %v14463_v35  ;;  %v9492_v52 = vld [vmem:[%s17526_s7 + $0x90] sm:$0xff] }
 0x691   : > { %9465 = vmatmul.msk.f32.gmra.mxu3 %vm1911_vm10, %v14452_v37  ;;  %v5294_v51 = vsel %vm1209_vm6, %v10477_v21, %v10512_v42  ;;  %v5290_v26 = vsel %vm1209_vm6, %v10512_v42, %v10478_v60  ;;  %v5445_v29 = vsel %vm1353_vm7, %v10492_v58, %v10493_v48 }
 0x692   : > { %v5444_v30 = vsel %vm1353_vm7, %v10517_v7, %v10518_v8  ;;  %v5296_v46 = vsel %vm1209_vm6, %v10513_v15, %v10488_v22 }
 0x696   : > { %v10496_v18 = vpop.permute.xlu1 %10495  ;;  %v10536_v6 = vpop.permute.xlu2 %10535 }
 0x697   : > { %v10498_v24 = vunpack.i.h.bf16 %v10496_v18  ;;  %v10497_v14 = vunpack.i.l.bf16 %v10496_v18  ;;  %9466 = vmatmul.msk.f32.vlgmr.msra.gmra.mxu0 %vm1911_vm10, %v14332_v53  ;;  %v14549_v41 = vpop.permute.xlu0 %10525  ;;  %v10537_v16 = vunpack.i.l.bf16 %v10536_v6 }
 0x698   : > { %9470 = vmatmul.msk.f32.vlgmr.msra.gmra.mxu1 %vm1911_vm10, %v14332_v53  ;;  %9478 = vmatmul.msk.f32.vlgmr.msra.gmra.mxu2 %vm1911_vm10, %v14470_v19  ;;  %v10527_v2 = vunpack.i.l.bf16 %v14549_v41 }
 0x699   : > { %9482 = vmatmul.msk.f32.vlgmr.msra.gmra.mxu3 %vm1911_vm10, %v14470_v19  ;;  %v5295_v53 = vsel %vm1209_vm6, %v10497_v14, %v10508_v62  ;;  %v5291_v3 = vsel %vm1209_vm6, %v10508_v62, %v10498_v24  ;;  %v5299_v56 = vsel %vm1209_vm6, %v10498_v24, %v10497_v14  ;;  %v5443_v35 = vsel %vm1353_vm7, %v10503_v36, %v10537_v16 }
 0x69a   : > { %5481 = vmatpush.msra.mxu3 %v5447_v12  ;;  %5329 = vmatpush.msra.mxu0 %v5295_v53  ;;  %v5451_v62 = vsel %vm1353_vm7, %v10537_v16, %v10502_v57 }
 0x69b   : > { %5358 = vmatpush.msra.mxu1 %v5291_v3  ;;  %5387 = vmatpush.msra.mxu2 %v5299_v56 }
 0x69c   : > { %5482 = vmatpush.msra.mxu3 %v5446_v13  ;;  %5330 = vmatpush.msra.mxu0 %v5294_v51  ;;  %v9491_v51 = vld [vmem:[%s17526_s7 + $0x88] sm:$0xff] }
 0x69d   : > { %5359 = vmatpush.msra.mxu1 %v5290_v26  ;;  %5388 = vmatpush.msra.mxu2 %v5298_v0  ;;  %v9493_v26 = vld [vmem:[%s17526_s7 + $0x98] sm:$0xff] }
 0x69e   : > { %5483 = vmatpush.msra.mxu3 %v5445_v29  ;;  %v10521_v31 = vpop.permute.xlu1 %10520  ;;  %v14579_v25 = vpop.permute.xlu2 %10550  ;;  %v9506_v29 = vld [vmem:[%s17526_s7 + $0xa0] sm:$0xff] }
 0x69f   : > { %v10522_v61 = vunpack.i.l.bf16 %v10521_v31  ;;  %5389 = vmatpush.msra.mxu2 %v5297_v1  ;;  %9467 = vmatmul.msk.f32.gmra.mxu0 %vm1911_vm10, %v14386_v32  ;;  %v10523_v39 = vunpack.i.h.bf16 %v10521_v31  ;;  %v14570_v17 = vpop.permute.xlu0 %10540  ;;  %v10553_v59 = vunpack.i.h.bf16 %v14579_v25  ;;  %v10552_v54 = vunpack.i.l.bf16 %v14579_v25 }
 0x6a0   : > { %5484 = vmatpush.msra.mxu3 %v5444_v30  ;;  %9471 = vmatmul.msk.f32.gmra.mxu1 %vm1911_vm10, %v14386_v32  ;;  %v10543_v18 = vunpack.i.h.bf16 %v14570_v17  ;;  %v10542_v24 = vunpack.i.l.bf16 %v14570_v17 }
 0x6a1   : > { %9479 = vmatmul.msk.f32.gmra.mxu2 %vm1911_vm10, %v14526_v28  ;;  %v5293_v9 = vsel %vm1209_vm6, %v10507_v38, %v10522_v61  ;;  %v5289_v20 = vsel %vm1209_vm6, %v10522_v61, %v10487_v4  ;;  %9483 = vmatmul.msk.f32.gmra.mxu3 %vm1911_vm10, %v14526_v28  ;;  %v5292_v32 = vsel %vm1209_vm6, %v10488_v22, %v10523_v39 }
 0x6a2   : > { %5390 = vmatpush.msra.mxu2 %v5296_v46  ;;  %5331 = vmatpush.msra.mxu0 %v5293_v9  ;;  %v5288_v55 = vsel %vm1209_vm6, %v10523_v39, %v10513_v15  ;;  %v5599_v36 = vsel %vm1497_vm8, %v10552_v54, %v10553_v59  ;;  %v5595_v57 = vsel %vm1497_vm8, %v10553_v59, %v10527_v2  ;;  %v14709_v15 = vld [vmem:[%s17526_s7 + $0xc0] sm:$0xff] }
 0x6a3   : > { %5360 = vmatpush.msra.mxu1 %v5289_v20  ;;  %v5597_v56 = vsel %vm1497_vm8, %v10542_v24, %v10543_v18 }
 0x6a4   : > { %5332 = vmatpush.msra.mxu0 %v5292_v32 }
 0x6a5   : > { %5361 = vmatpush.msra.mxu1 %v5288_v55 }
 0x6a6   : > { %v14572_v33 = vpop.permute.xlu1 %10530  ;;  %v14611_v21 = vpop.permute.xlu2 %10555 }
 0x6a7   : > { %9468 = vmatmul.msk.f32.gmra.mxu0 %vm1911_vm10, %v14425_v10  ;;  %v10561_v49 = vpop.permute.xlu0 %10560  ;;  %v10532_v5 = vunpack.i.l.bf16 %v14572_v33  ;;  %v10558_v3 = vunpack.i.h.bf16 %v14611_v21  ;;  %v10557_v4 = vunpack.i.l.bf16 %v14611_v21 }
 0x6a8   : > { %9472 = vmatmul.msk.f32.gmra.mxu1 %vm1911_vm10, %v14425_v10  ;;  %v10538_v10 = vunpack.i.h.bf16 %v10536_v6  ;;  %v10562_v45 = vunpack.i.l.bf16 %v10561_v49  ;;  %v10563_v23 = vunpack.i.h.bf16 %v10561_v49  ;;  %v5603_v6 = vsel %vm1497_vm8, %v10527_v2, %v10552_v54 }
 0x6a9   : > { %9480 = vmatmul.msk.f32.gmra.mxu2 %vm1911_vm10, %v14560_v34  ;;  %9484 = vmatmul.msk.f32.gmra.mxu3 %vm1911_vm10, %v14560_v34 }
 0x6aa   : > { %v5442_v42 = vsel %vm1353_vm7, %v10483_v43, %v10538_v10  ;;  %v5450_v12 = vsel %vm1353_vm7, %v10538_v10, %v10482_v50  ;;  %v5441_v47 = vsel %vm1353_vm7, %v10493_v48, %v10562_v45  ;;  %v5449_v50 = vsel %vm1353_vm7, %v10562_v45, %v10492_v58 }
 0x6ab   : > { %v5440_v44 = vsel %vm1353_vm7, %v10518_v8, %v10563_v23  ;;  %v5448_v48 = vsel %vm1353_vm7, %v10563_v23, %v10517_v7  ;;  %v5592_v8 = vsel %vm1497_vm8, %v10557_v4, %v10558_v3 }
 0x6ae   : > { %v14596_v11 = vpop.permute.xlu1 %10545  ;;  %v10566_v38 = vpop.permute.xlu2 %10565 }
 0x6af   : > { %9469 = vmatmul.msk.f32.gmra.mxu0 %vm1911_vm10, %v14452_v37  ;;  %v10547_v14 = vunpack.i.l.bf16 %v14596_v11  ;;  %v10548_v60 = vunpack.i.h.bf16 %v14596_v11  ;;  %v10571_v0 = vpop.permute.xlu0 %10570  ;;  %v10567_v61 = vunpack.i.l.bf16 %v10566_v38  ;;  %v10568_v32 = vunpack.i.h.bf16 %v10566_v38 }
 0x6b0   : > { %9473 = vmatmul.msk.f32.gmra.mxu1 %vm1911_vm10, %v14452_v37  ;;  %v10533_v37 = vunpack.i.h.bf16 %v14572_v33  ;;  %v10573_v46 = vunpack.i.h.bf16 %v10571_v0  ;;  %v10572_v9 = vunpack.i.l.bf16 %v10571_v0 }
 0x6b1   : > { %9481 = vmatmul.msk.f32.gmra.mxu2 %vm1911_vm10, %v14577_v27  ;;  %9485 = vmatmul.msk.f32.gmra.mxu3 %vm1911_vm10, %v14577_v27  ;;  %v5593_v13 = vsel %vm1497_vm8, %v10543_v18, %v10547_v14  ;;  %v5596_v58 = vsel %vm1497_vm8, %v10548_v60, %v10557_v4  ;;  %v5601_v33 = vsel %vm1497_vm8, %v10547_v14, %v10542_v24  ;;  %v9507_v18 = vld [vmem:[%s17526_s7 + $0xa8] sm:$0xff]  ;;  %v9509_v4 = vld [vmem:[%s17526_s7 + $0xb8] sm:$0xff] }
 0x6b2   : > { %v5594_v43 = vsel %vm1497_vm8, %v10532_v5, %v10533_v37  ;;  %v5746_v45 = vsel %vm1641_vm9, %v10572_v9, %v10573_v46  ;;  %v5600_v17 = vsel %vm1497_vm8, %v10558_v3, %v10548_v60  ;;  %v9523_v14 = vld [vmem:[%s17526_s7 + $0xc8] sm:$0xff] }
 0x6b6   : > { %v10576_v7 = vpop.permute.xlu1 %10575  ;;  %v10586_v39 = vpop.permute.xlu2 %10585 }
 0x6b7   : > { %9486 = vmatmul.msk.f32.vlgmr.msrb.gmra.mxu0 %vm1911_vm10, %v14470_v19  ;;  %v10528_v19 = vunpack.i.h.bf16 %v14549_v41  ;;  %v10577_v31 = vunpack.i.l.bf16 %v10576_v7  ;;  %v10591_v55 = vpop.permute.xlu0 %10590  ;;  %v10587_v25 = vunpack.i.l.bf16 %v10586_v39  ;;  %v5754_v41 = vsel %vm1641_vm9, %v10573_v46, %v10568_v32 }
 0x6b8   : > { %9494 = vmatmul.msk.f32.vlgmr.msrb.gmra.mxu1 %vm1911_vm10, %v9490_v40  ;;  %5510 = vmatpush.msrb.mxu0 %v5443_v35  ;;  %v10593_v2 = vunpack.i.h.bf16 %v10591_v55  ;;  %v10592_v10 = vunpack.i.l.bf16 %v10591_v55  ;;  %v9554_v55 = vld [vmem:[%s17526_s7 + $0x100] sm:$0xff] }
 0x6b9   : > { %9498 = vmatmul.msk.f32.vlgmr.msrb.gmra.mxu2 %vm1911_vm10, %v9490_v40  ;;  %9502 = vmatmul.msk.f32.vlgmr.msrb.gmra.mxu3 %vm1911_vm10, %v9490_v40  ;;  %v5598_v53 = vsel %vm1497_vm8, %v10528_v19, %v10532_v5  ;;  %v5755_v54 = vsel %vm1641_vm9, %v10567_v61, %v10577_v31  ;;  %v5602_v40 = vsel %vm1497_vm8, %v10533_v37, %v10528_v19  ;;  %v10588_v37 = vunpack.i.h.bf16 %v10586_v39 }
 0x6ba   : > { %5539 = vmatpush.msrb.mxu1 %v5451_v62  ;;  %5633 = vmatpush.msrb.mxu2 %v5599_v36  ;;  %v5750_v5 = vsel %vm1641_vm9, %v10568_v32, %v10572_v9  ;;  %v5744_v23 = vsel %vm1641_vm9, %v10592_v10, %v10593_v2 }
 0x6bb   : > { %5662 = vmatpush.msrb.mxu3 %v5595_v57  ;;  %5511 = vmatpush.msrb.mxu0 %v5442_v42  ;;  %v5748_v36 = vsel %vm1641_vm9, %v10588_v37, %v10592_v10  ;;  %v5752_v21 = vsel %vm1641_vm9, %v10593_v2, %v10588_v37  ;;  %v9508_v42 = vld [vmem:[%s17526_s7 + $0xb0] sm:$0xff]  ;;  %v9557_v37 = vld [vmem:[%s17526_s7 + $0x118] sm:$0xff] }
 0x6bc   : > { %5540 = vmatpush.msrb.mxu1 %v5450_v12  ;;  %5634 = vmatpush.msrb.mxu2 %v5598_v53  ;;  %v9524_v53 = vld [vmem:[%s17526_s7 + $0xd0] sm:$0xff] }
 0x6bd   : > { %5663 = vmatpush.msrb.mxu3 %v5594_v43  ;;  %5512 = vmatpush.msrb.mxu0 %v5441_v47  ;;  %v9556_v10 = vld [vmem:[%s17526_s7 + $0x110] sm:$0xff] }
 0x6be   : > { %5541 = vmatpush.msrb.mxu1 %v5449_v50  ;;  %5635 = vmatpush.msrb.mxu2 %v5597_v56  ;;  %v10581_v1 = vpop.permute.xlu1 %10580  ;;  %v9525_v56 = vld [vmem:[%s17526_s7 + $0xd8] sm:$0xff] }
 0x6bf   : > { %5664 = vmatpush.msrb.mxu3 %v5593_v13  ;;  %5513 = vmatpush.msrb.mxu0 %v5440_v44  ;;  %v10582_v16 = vunpack.i.l.bf16 %v10581_v1 }
 0x6c0   : > { %5542 = vmatpush.msrb.mxu1 %v5448_v48  ;;  %5636 = vmatpush.msrb.mxu2 %v5596_v58  ;;  %v9538_v48 = vld [vmem:[%s17526_s7 + $0xe0] sm:$0xff] }
 0x6c1   : > { %5665 = vmatpush.msrb.mxu3 %v5592_v8  ;;  %9487 = vmatmul.msk.f32.gmra.mxu0 %vm1911_vm10, %v14526_v28  ;;  %v10578_v28 = vunpack.i.h.bf16 %v10576_v7  ;;  %v5753_v19 = vsel %vm1641_vm9, %v10587_v25, %v10582_v16 }
 0x6c2   : > { %9495 = vmatmul.msk.f32.gmra.mxu1 %vm1911_vm10, %v9491_v51  ;;  %9499 = vmatmul.msk.f32.gmra.mxu2 %vm1911_vm10, %v9491_v51 }
 0x6c3   : > { %9503 = vmatmul.msk.f32.gmra.mxu3 %vm1911_vm10, %v9491_v51  ;;  %v5751_v59 = vsel %vm1641_vm9, %v10577_v31, %v10578_v28  ;;  %v5747_v49 = vsel %vm1641_vm9, %v10578_v28, %v10567_v61  ;;  %v9541_v61 = vld [vmem:[%s17526_s7 + $0xf8] sm:$0xff] }
 0x6c9   : > { %9488 = vmatmul.msk.f32.gmra.mxu0 %vm1911_vm10, %v14560_v34 }
 0x6ca   : > { %9496 = vmatmul.msk.f32.gmra.mxu1 %vm1911_vm10, %v9492_v52  ;;  %9500 = vmatmul.msk.f32.gmra.mxu2 %vm1911_vm10, %v9492_v52 }
 0x6cb   : > { %9504 = vmatmul.msk.f32.gmra.mxu3 %vm1911_vm10, %v9492_v52  ;;  %v9539_v52 = vld [vmem:[%s17526_s7 + $0xe8] sm:$0xff] }
 0x6d1   : > { %9489 = vmatmul.msk.f32.gmra.mxu0 %vm1911_vm10, %v14577_v27  ;;  %v10583_v27 = vunpack.i.h.bf16 %v10581_v1 }
 0x6d2   : > { %9497 = vmatmul.msk.f32.gmra.mxu1 %vm1911_vm10, %v9493_v26  ;;  %9501 = vmatmul.msk.f32.gmra.mxu2 %vm1911_vm10, %v9493_v26 }
 0x6d3   : > { %v14700_v22 = vpop.f32.mrf.mxu1  ;;  %9505 = vmatmul.msk.f32.gmra.mxu3 %vm1911_vm10, %v9493_v26  ;;  %v5749_v35 = vsel %vm1641_vm9, %v10582_v16, %v10583_v27  ;;  %v5745_v62 = vsel %vm1641_vm9, %v10583_v27, %v10587_v25 }
 0x6d9   : > { %v14711_v30 = vpop.f32.mrf.mxu2  ;;  %9510 = vmatmul.msk.f32.vlgmr.msra.gmra.mxu0 %vm1911_vm10, %v9506_v29 }
 0x6da   : > { %v14714_v20 = vpop.f32.mrf.mxu3  ;;  %9514 = vmatmul.msk.f32.vlgmr.msra.gmra.mxu1 %vm1911_vm10, %v9506_v29  ;;  %9518 = vmatmul.msk.f32.vlgmr.msra.gmra.mxu2 %vm1911_vm10, %v9506_v29  ;;  %v9540_v29 = vld [vmem:[%s17526_s7 + $0xf0] sm:$0xff] }
 0x6db   : > { %v14724_v34 = vpop.f32.mrf.mxu1  ;;  %9526 = vmatmul.msk.f32.vlgmr.msra.gmra.mxu3 %vm1911_vm10, %v14709_v15  ;;  %5691 = vmatpush.msra.mxu0 %v5603_v6 }
 0x6dc   : > { %5785 = vmatpush.msra.mxu1 %v5751_v59  ;;  %5814 = vmatpush.msra.mxu2 %v5747_v49  ;;  %v9555_v49 = vld [vmem:[%s17526_s7 + $0x108] sm:$0xff] }
 0x6dd   : > { %5843 = vmatpush.msra.mxu3 %v5755_v54  ;;  %5692 = vmatpush.msra.mxu0 %v5602_v40 }
 0x6de   : > { %5786 = vmatpush.msra.mxu1 %v5750_v5  ;;  %5815 = vmatpush.msra.mxu2 %v5746_v45 }
 0x6df   : > { %5844 = vmatpush.msra.mxu3 %v5754_v41  ;;  %5693 = vmatpush.msra.mxu0 %v5601_v33 }
 0x6e0   : > { %5787 = vmatpush.msra.mxu1 %v5749_v35  ;;  %5816 = vmatpush.msra.mxu2 %v5745_v62 }
 0x6e1   : > { %v14767_v24 = vpop.f32.mrf.mxu2  ;;  %5845 = vmatpush.msra.mxu3 %v5753_v19  ;;  %5694 = vmatpush.msra.mxu0 %v5600_v17 }
 0x6e2   : > { %v14773_v11 = vpop.f32.mrf.mxu3  ;;  %5788 = vmatpush.msra.mxu1 %v5748_v36  ;;  %5817 = vmatpush.msra.mxu2 %v5744_v23 }
 0x6e3   : > { %v14780_v57 = vpop.f32.mrf.mxu1  ;;  %5846 = vmatpush.msra.mxu3 %v5752_v21  ;;  %9511 = vmatmul.msk.f32.gmra.mxu0 %vm1911_vm10, %v9507_v18 }
 0x6e4   : > { %9515 = vmatmul.msk.f32.gmra.mxu1 %vm1911_vm10, %v9507_v18  ;;  %9519 = vmatmul.msk.f32.gmra.mxu2 %vm1911_vm10, %v9507_v18 }
 0x6e5   : > { %9527 = vmatmul.msk.f32.gmra.mxu3 %vm1911_vm10, %v9523_v14 }
 0x6ea   : > { %v14789_v60 = vpop.f32.mrf.mxu2  ;;  %v14791_v12 = vpop.f32.mrf.mxu3 }
 0x6eb   : > { %v14796_v3 = vpop.f32.mrf.mxu1  ;;  %9512 = vmatmul.msk.f32.gmra.mxu0 %vm1911_vm10, %v9508_v42 }
 0x6ec   : > { %9516 = vmatmul.msk.f32.gmra.mxu1 %vm1911_vm10, %v9508_v42  ;;  %9520 = vmatmul.msk.f32.gmra.mxu2 %vm1911_vm10, %v9508_v42 }
 0x6ed   : > { %9528 = vmatmul.msk.f32.gmra.mxu3 %vm1911_vm10, %v9524_v53 }
 0x6f2   : > { %v14805_v43 = vpop.f32.mrf.mxu2  ;;  %v14807_v47 = vpop.f32.mrf.mxu3 }
 0x6f3   : > { %v14809_v50 = vpop.f32.mrf.mxu0  ;;  %v14814_v13 = vpop.f32.mrf.mxu1  ;;  %9513 = vmatmul.msk.f32.gmra.mxu0 %vm1911_vm10, %v9509_v4 }
 0x6f4   : > { %9517 = vmatmul.msk.f32.gmra.mxu1 %vm1911_vm10, %v9509_v4  ;;  %9521 = vmatmul.msk.f32.gmra.mxu2 %vm1911_vm10, %v9509_v4 }
 0x6f5   : > { %9529 = vmatmul.msk.f32.gmra.mxu3 %vm1911_vm10, %v9525_v56 }
 0x6fa   : > { %v14820_v44 = vpop.f32.mrf.mxu2  ;;  %v14825_v58 = vpop.f32.mrf.mxu3 }
 0x6fb   : > { %9530 = vmatmul.msk.f32.vlgmr.msrb.gmra.mxu0 %vm1911_vm10, %v14709_v15  ;;  %v14829_v51 = vpop.f32.mrf.mxu0 }
 0x6fc   : > { %v14831_v8 = vpop.f32.mrf.mxu1  ;;  %9534 = vmatmul.msk.f32.vlgmr.msrb.gmra.mxu1 %vm1911_vm10, %v14709_v15  ;;  %9542 = vmatmul.msk.f32.vlgmr.msrb.gmra.mxu2 %vm1911_vm10, %v9538_v48 }
 0x6fd   : > { %9546 = vmatmul.msk.f32.vlgmr.msrb.gmra.mxu3 %vm1911_vm10, %v9538_v48 }
 0x702   : > { %v14840_v7 = vpop.f32.mrf.mxu2 }
 0x703   : > { %v14842_v38 = vpop.f32.mrf.mxu3  ;;  %9531 = vmatmul.msk.f32.gmra.mxu0 %vm1911_vm10, %v9523_v14 }
 0x704   : > { %9535 = vmatmul.msk.f32.gmra.mxu1 %vm1911_vm10, %v9523_v14  ;;  %9543 = vmatmul.msk.f32.gmra.mxu2 %vm1911_vm10, %v9539_v52  ;;  %v14847_v26 = vpop.f32.mrf.mxu0 }
 0x705   : > { %v14849_v0 = vpop.f32.mrf.mxu1  ;;  %9547 = vmatmul.msk.f32.gmra.mxu3 %vm1911_vm10, %v9539_v52 }
 0x70b   : > { %9532 = vmatmul.msk.f32.gmra.mxu0 %vm1911_vm10, %v9524_v53  ;;  %v14856_v28 = vpop.f32.mrf.mxu2 }
 0x70c   : > { %v14858_v31 = vpop.f32.mrf.mxu3  ;;  %9536 = vmatmul.msk.f32.gmra.mxu1 %vm1911_vm10, %v9524_v53  ;;  %9544 = vmatmul.msk.f32.gmra.mxu2 %vm1911_vm10, %v9540_v29  ;;  %v14862_v1 = vpop.f32.mrf.mxu0 }
 0x70d   : > { %v14864_v15 = vpop.f32.mrf.mxu1  ;;  %9548 = vmatmul.msk.f32.gmra.mxu3 %vm1911_vm10, %v9540_v29 }
 0x713   : > { %9533 = vmatmul.msk.f32.gmra.mxu0 %vm1911_vm10, %v9525_v56  ;;  %v14871_v39 = vpop.f32.mrf.mxu2 }
 0x714   : > { %v14873_v46 = vpop.f32.mrf.mxu3  ;;  %9537 = vmatmul.msk.f32.gmra.mxu1 %vm1911_vm10, %v9525_v56  ;;  %9545 = vmatmul.msk.f32.gmra.mxu2 %vm1911_vm10, %v9541_v61  ;;  %v14877_v9 = vpop.f32.mrf.mxu0 }
 0x715   : > { %v14879_v32 = vpop.f32.mrf.mxu1  ;;  %9549 = vmatmul.msk.f32.gmra.mxu3 %vm1911_vm10, %v9541_v61 }
 0x71b   : > { %9550 = vmatmul.msk.f32.vlgmr.msra.gmra.mxu0 %vm1911_vm10, %v9538_v48  ;;  %v14886_v6 = vpop.f32.mrf.mxu2 }
 0x71c   : > { %v14888_v27 = vpop.f32.mrf.mxu3  ;;  %9558 = vmatmul.msk.f32.vlgmr.msra.gmra.mxu1 %vm1911_vm10, %v9554_v55  ;;  %9562 = vmatmul.msk.f32.vlgmr.msra.gmra.mxu2 %vm1911_vm10, %v9554_v55  ;;  %v14892_v16 = vpop.f32.mrf.mxu0 }
 0x71d   : > { %9566 = vmatmul.msk.f32.vlgmr.msra.gmra.mxu3 %vm1911_vm10, %v9554_v55  ;;  %v14895_v59 = vpop.f32.mrf.mxu1 }
 0x723   : > { %9551 = vmatmul.msk.f32.gmra.mxu0 %vm1911_vm10, %v9539_v52 }
 0x724   : > { %v14901_v25 = vpop.f32.mrf.mxu2  ;;  %9559 = vmatmul.msk.f32.gmra.mxu1 %vm1911_vm10, %v9555_v49  ;;  %9563 = vmatmul.msk.f32.gmra.mxu2 %vm1911_vm10, %v9555_v49  ;;  %v14905_v54 = vpop.f32.mrf.mxu3 }
 0x725   : > { %v14907_v40 = vpop.f32.mrf.mxu0  ;;  %9567 = vmatmul.msk.f32.gmra.mxu3 %vm1911_vm10, %v9555_v49  ;;  %v14910_v2 = vpop.f32.mrf.mxu1 }
 0x72b   : > { %9552 = vmatmul.msk.f32.gmra.mxu0 %vm1911_vm10, %v9540_v29 }
 0x72c   : > { %v14916_v5 = vpop.f32.mrf.mxu2  ;;  %9560 = vmatmul.msk.f32.gmra.mxu1 %vm1911_vm10, %v9556_v10  ;;  %9564 = vmatmul.msk.f32.gmra.mxu2 %vm1911_vm10, %v9556_v10  ;;  %v14920_v45 = vpop.f32.mrf.mxu3 }
 0x72d   : > { %v14922_v41 = vpop.f32.mrf.mxu0  ;;  %9568 = vmatmul.msk.f32.gmra.mxu3 %vm1911_vm10, %v9556_v10  ;;  %v14925_v33 = vpop.f32.mrf.mxu1 }
 0x72e   : > { %17797 = vst [vmem:[#allocation8_spill] sm:$0xff] %v14925_v33 }
 0x733   : > { %9553 = vmatmul.msk.f32.gmra.mxu0 %vm1911_vm10, %v9541_v61 }
 0x734   : > { %v14931_v35 = vpop.f32.mrf.mxu2  ;;  %9561 = vmatmul.msk.f32.gmra.mxu1 %vm1911_vm10, %v9557_v37  ;;  %9565 = vmatmul.msk.f32.gmra.mxu2 %vm1911_vm10, %v9557_v37  ;;  %v14935_v62 = vpop.f32.mrf.mxu3 }
 0x735   : > { %17798 = vst [vmem:[#allocation12_spill] sm:$0xff] %v14931_v35  ;;  %v14937_v19 = vpop.f32.mrf.mxu0  ;;  %9569 = vmatmul.msk.f32.gmra.mxu3 %vm1911_vm10, %v9557_v37  ;;  %v14940_v17 = vpop.f32.mrf.mxu1 }
 0x736   : > { %17799 = vst [vmem:[#allocation20_spill] sm:$0xff] %v14935_v62 }
 0x737   : > { %17800 = vst [vmem:[#allocation23_spill] sm:$0xff] %v14937_v19 }
 0x73c   : > { %v14942_v18 = vpop.f32.mrf.mxu2  ;;  %v14944_v36 = vpop.f32.mrf.mxu3 }
 0x73d   : > { %17801 = vst [vmem:[#allocation7_spill] sm:$0xff] %v14942_v18 }
 0x73e   : > { %17802 = vst [vmem:[#allocation9_spill] sm:$0xff] %v14944_v36  ;;  %v5127_v23 = vpop.f32.mrf.mxu0 }
 0x73f   : > { %v14946_v21 = vpop.f32.mrf.mxu1 }
 0x745   : > { %v14948_v14 = vpop.f32.mrf.mxu2 }
 0x746   : > { %v14950_v42 = vpop.f32.mrf.mxu3  ;;  %v14952_v53 = vpop.f32.mrf.mxu0 }
 0x747   : > { %17803 = vst [vmem:[#allocation4_spill] sm:$0xff] %v14952_v53  ;;  %v14954_v4 = vpop.f32.mrf.mxu1 }
 0x748   : > { %17804 = vst [vmem:[#allocation6_spill] sm:$0xff] %v14954_v4 }
 0x74d   : > { %v14956_v56 = vpop.f32.mrf.mxu2 }
 0x74e   : > { %17805 = vst [vmem:[#allocation11_spill] sm:$0xff] %v14956_v56  ;;  %v14958_v48 = vpop.f32.mrf.mxu3  ;;  %v14960_v52 = vpop.f32.mrf.mxu0 }
 0x74f   : > { %17806 = vst [vmem:[#allocation34_spill] sm:$0xff] %v14958_v48  ;;  %v14962_v29 = vpop.f32.mrf.mxu1 }
 0x750   : > { %17807 = vst [vmem:[#allocation37_spill] sm:$0xff] %v14960_v52 }
 0x751   : > { %17808 = vst [vmem:[#allocation3_spill] sm:$0xff] %v14962_v29 }
 0x755   : > { %v14964_v61 = vpop.f32.mrf.mxu2 }
 0x756   : > { %17809 = vst [vmem:[#allocation26_spill] sm:$0xff] %v14964_v61  ;;  %v14966_v55 = vpop.f32.mrf.mxu3  ;;  %v14968_v49 = vpop.f32.mrf.mxu0 }
 0x757   : > { %17810 = vst [vmem:[#allocation16_spill] sm:$0xff] %v14966_v55  ;;  %v14970_v10 = vpop.f32.mrf.mxu1 }
 0x758   : > { %17811 = vst [vmem:[#allocation27_spill] sm:$0xff] %v14970_v10 }
 0x75d   : > { %v14972_v37 = vpop.f32.mrf.mxu2 }
 0x75e   : > { %17812 = vst [vmem:[#allocation5_spill] sm:$0xff] %v14972_v37  ;;  %v14974_v63 = vpop.f32.mrf.mxu3 }
 0x75f   : > { %17813 = vst [vmem:[#allocation14_spill] sm:$0xff] %v14974_v63 }
 0x760   : > { %v14976_v18 = vpop.f32.mrf.mxu0 }
 0x761   : > { %v5366_v62 = vpop.f32.mrf.mxu1 }
 0x767   : > { %v5395_v35 = vpop.f32.mrf.mxu2 }
 0x768   : > { %v14978_v48 = vpop.f32.mrf.mxu3  ;;  %v14980_v52 = vpop.f32.mrf.mxu0 }
 0x769   : > { %17814 = vst [vmem:[#allocation32_spill] sm:$0xff] %v14980_v52  ;;  %v14982_v29 = vpop.f32.mrf.mxu1 }
 0x76a   : > { %17815 = vst [vmem:[#allocation19_spill] sm:$0xff] %v14982_v29 }
 0x76f   : > { %v14984_v61 = vpop.f32.mrf.mxu2 }
 0x770   : > { %17816 = vst [vmem:[#allocation33_spill] sm:$0xff] %v14984_v61  ;;  %v14986_v55 = vpop.f32.mrf.mxu3  ;;  %v14988_v56 = vpop.f32.mrf.mxu0 }
 0x771   : > { %17817 = vst [vmem:[#allocation22_spill] sm:$0xff] %v14986_v55  ;;  %v14990_v10 = vpop.f32.mrf.mxu1 }
 0x772   : > { %17818 = vst [vmem:[#allocation31_spill] sm:$0xff] %v14988_v56 }
 0x773   : > { %17819 = vst [vmem:[#allocation13_spill] sm:$0xff] %v14990_v10 }
 0x777   : > { %v14992_v37 = vpop.f32.mrf.mxu2 }
 0x778   : > { %17820 = vst [vmem:[#allocation18_spill] sm:$0xff] %v14992_v37  ;;  %v14994_v4 = vpop.f32.mrf.mxu3  ;;  %v14996_v36 = vpop.f32.mrf.mxu0 }
 0x779   : > { %17821 = vst [vmem:[#allocation35_spill] sm:$0xff] %v14994_v4  ;;  %v14998_v63 = vpop.f32.mrf.mxu1 }
 0x77a   : > { %17822 = vst [vmem:[#allocation38_spill] sm:$0xff] %v14996_v36 }
 0x77b   : > { %17823 = vst [vmem:[#allocation29_spill] sm:$0xff] %v14998_v63 }
 0x77f   : > { %v15000_v53 = vpop.f32.mrf.mxu2 }
 0x780   : > { %17824 = vst [vmem:[#allocation36_spill] sm:$0xff] %v15000_v53  ;;  %v15002_v52 = vpop.f32.mrf.mxu3  ;;  %v5518_v29 = vpop.f32.mrf.mxu0 }
 0x781   : > { %17825 = vst [vmem:[#allocation25_spill] sm:$0xff] %v15002_v52  ;;  %v5547_v61 = vpop.f32.mrf.mxu1 }
 0x787   : > { %v15004_v19 = vpop.f32.mrf.mxu2 }
 0x788   : > { %17826 = vst [vmem:[#allocation39_spill] sm:$0xff] %v15004_v19  ;;  %v5670_v55 = vpop.f32.mrf.mxu3  ;;  %v15006_v56 = vpop.f32.mrf.mxu0 }
 0x789   : > { %17827 = vst [vmem:[#allocation24_spill] sm:$0xff] %v15006_v56  ;;  %v15008_v10 = vpop.f32.mrf.mxu1  ;;  %v4807_v56 = vadd.f32 %v14831_v8, %v14767_v24  ;;  %v4833_v24 = vadd.f32 %v14820_v44, %v14714_v20 }
 0x78f   : > { %v15010_v37 = vpop.f32.mrf.mxu2 }
 0x790   : > { %17828 = vst [vmem:[#allocation40_spill] sm:$0xff] %v15010_v37  ;;  %v15012_v4 = vpop.f32.mrf.mxu3  ;;  %v15014_v36 = vpop.f32.mrf.mxu0  ;;  %v4778_v37 = vadd.f32 %v14829_v51, %v14724_v34 }
 0x791   : > { %17829 = vst [vmem:[#allocation17_spill] sm:$0xff] %v15012_v4  ;;  %v15016_v63 = vpop.f32.mrf.mxu1  ;;  %v4836_v4 = vadd.f32 %v14840_v7, %v14773_v11  ;;  %v4781_v11 = vadd.f32 %v14847_v26, %v14780_v57  ;;  %v4813_v57 = vadd.f32 %v14864_v15, %v14805_v43  ;;  %v4986_v43 = vadd.f32 %v14879_v32, %v4833_v24 }
 0x792   : > { %17830 = vst [vmem:[#allocation10_spill] sm:$0xff] %v15014_v36  ;;  %v4987_v36 = vadd.f32 %v14842_v38, %v4778_v37  ;;  %v17843_v37 = vld [vmem:[#allocation34_spill] sm:$0xff] }
 0x793   : > { %17831 = vst [vmem:[#allocation30_spill] sm:$0xff] %v15016_v63  ;;  %v4775_v63 = vadd.f32 %v14809_v50, %v14700_v22  ;;  %v4810_v22 = vadd.f32 %v14849_v0, %v14789_v60  ;;  %v4990_v20 = vadd.f32 %v14858_v31, %v4781_v11 }
 0x794   : > { %v5139_v50 = vadd.f32 %v14901_v25, %v4987_v36  ;;  %v17837_v36 = vld [vmem:[#allocation4_spill] sm:$0xff] }
 0x795   : > { %v4984_v34 = vadd.f32 %v14825_v58, %v4775_v63  ;;  %v4784_v63 = vadd.f32 %v14862_v1, %v14796_v3  ;;  %v4991_v31 = vadd.f32 %v14907_v40, %v4810_v22  ;;  %v17845_v22 = vld [vmem:[#allocation12_spill] sm:$0xff] }
 0x796   : > { %v5255_v38 = vadd.f32 %v14946_v21, %v5139_v50  ;;  %v17846_v50 = vld [vmem:[#allocation5_spill] sm:$0xff] }
 0x797   : > { %v15018_v53 = vpop.f32.mrf.mxu2  ;;  %v5136_v7 = vadd.f32 %v14886_v6, %v4984_v34  ;;  %v4993_v0 = vadd.f32 %v14873_v46, %v4784_v63  ;;  %v15071_v6 = vpop.permute.xlu1 %5893  ;;  %v5143_v32 = vadd.f32 %v14920_v45, %v4991_v31  ;;  %v17851_v31 = vld [vmem:[#allocation29_spill] sm:$0xff] }
 0x798   : > { %17832 = vst [vmem:[#allocation15_spill] sm:$0xff] %v15018_v53  ;;  %v15020_v52 = vpop.f32.mrf.mxu3  ;;  %v15022_v33 = vpop.f32.mrf.mxu0  ;;  %v4988_v53 = vadd.f32 %v14892_v16, %v4807_v56  ;;  %v5407_v15 = vadd.f32 %v14976_v18, %v5255_v38  ;;  %v17841_v56 = vld [vmem:[#allocation6_spill] sm:$0xff] }
 0x799   : > { %17833 = vst [vmem:[#allocation21_spill] sm:$0xff] %v15020_v52  ;;  %v15024_v19 = vpop.f32.mrf.mxu1  ;;  %v4804_v52 = vadd.f32 %v14814_v13, %v14711_v30  ;;  %v4839_v30 = vadd.f32 %v14856_v28, %v14791_v12  ;;  %v4842_v12 = vadd.f32 %v14871_v39, %v14807_v47  ;;  %v5252_v1 = vadd.f32 %v14940_v17, %v5136_v7  ;;  %v17836_v17 = vld [vmem:[#allocation23_spill] sm:$0xff]  ;;  %v17849_v7 = vld [vmem:[#allocation33_spill] sm:$0xff] }
 0x79a   : > { %17834 = vst [vmem:[#allocation28_spill] sm:$0xff] %v15022_v33  ;;  %v4989_v33 = vadd.f32 %v14895_v59, %v4836_v4  ;;  %v5140_v51 = vadd.f32 %v14905_v54, %v4988_v53  ;;  %v5559_v54 = vadd.f32 %v14978_v48, %v5407_v15  ;;  %v5138_v18 = vadd.f32 %v17836_v17, %v4986_v43  ;;  %v17840_v53 = vld [vmem:[#allocation9_spill] sm:$0xff]  ;;  %v17850_v43 = vld [vmem:[#allocation20_spill] sm:$0xff] }
 0x79b   : > { %v4985_v3 = vadd.f32 %v14877_v9, %v4804_v52  ;;  %v4992_v46 = vadd.f32 %v14910_v2, %v4839_v30  ;;  %v5142_v9 = vadd.f32 %v14916_v5, %v4990_v20  ;;  %v5404_v25 = vadd.f32 %v14968_v49, %v5252_v1  ;;  %v17838_v2 = vld [vmem:[#allocation14_spill] sm:$0xff]  ;;  %v17839_v5 = vld [vmem:[#allocation39_spill] sm:$0xff]  ;;  %v5884_v49 = vpop.permute.xlu0 %5883  ;;  %v17852_v15 = vld [vmem:[#allocation24_spill] sm:$0xff] }
 0x79c   : > { %v5141_v13 = vadd.f32 %v5127_v23, %v4989_v33  ;;  %v5256_v44 = vadd.f32 %v14948_v14, %v5140_v51  ;;  %v4994_v33 = vadd.f32 %v14922_v41, %v4813_v57  ;;  %v5711_v14 = vadd.f32 %v17839_v5, %v5559_v54  ;;  %v17842_v52 = vld [vmem:[#allocation11_spill] sm:$0xff] }
 0x79d   : > { %v15074_v16 = vadd.f32 %v14888_v27, %v4985_v3  ;;  %v5144_v23 = vadd.f32 %v17837_v36, %v4992_v46  ;;  %v5556_v21 = vadd.f32 %v17838_v2, %v5404_v25  ;;  %v5254_v4 = vadd.f32 %v17840_v53, %v5138_v18  ;;  %v17847_v20 = vld [vmem:[#allocation19_spill] sm:$0xff]  ;;  %v17859_v53 = vld [vmem:[#allocation16_spill] sm:$0xff] }
 0x79e   : > { %v5257_v26 = vadd.f32 %v14950_v42, %v5141_v13  ;;  %v5408_v28 = vadd.f32 %v5366_v62, %v5256_v44  ;;  %v5258_v48 = vadd.f32 %v17841_v56, %v5142_v9  ;;  %v5145_v30 = vadd.f32 %v17845_v22, %v4993_v0  ;;  %v17862_v22 = vld [vmem:[#allocation7_spill] sm:$0xff] }
 0x79f   : > { %v15050_v8 = vpop.f32.mrf.mxu2  ;;  %v5260_v24 = vadd.f32 %v17843_v37, %v5144_v23  ;;  %v5406_v13 = vadd.f32 %v17846_v50, %v5254_v4  ;;  %v15103_v54 = vpop.permute.xlu1 %5878  ;;  %v17857_v23 = vld [vmem:[#allocation40_spill] sm:$0xff]  ;;  %v5253_v50 = vadd.f32 %v17862_v22, %v15074_v16 }
 0x7a0   : > { %v15058_v58 = vpop.f32.mrf.mxu3  ;;  %v5699_v60 = vpop.f32.mrf.mxu0  ;;  %v5409_v47 = vadd.f32 %v5395_v35, %v5257_v26  ;;  %v5560_v59 = vadd.f32 %v5518_v29, %v5408_v28  ;;  %v17835_v35 = vld [vmem:[#allocation8_spill] sm:$0xff]  ;;  %v5259_v29 = vadd.f32 %v17842_v52, %v5143_v32  ;;  %v5146_v28 = vadd.f32 %v17850_v43, %v4994_v33 }
 0x7a1   : > { %v5793_v39 = vpop.f32.mrf.mxu1  ;;  %v4995_v62 = vadd.f32 %v17835_v35, %v4842_v12  ;;  %v5412_v38 = vadd.f32 %v17849_v7, %v5260_v24  ;;  %v5558_v1 = vadd.f32 %v17851_v31, %v5406_v13  ;;  %v17856_v18 = vld [vmem:[#allocation28_spill] sm:$0xff]  ;;  %v17860_v24 = vld [vmem:[#allocation3_spill] sm:$0xff]  ;;  %v17863_v13 = vld [vmem:[#allocation18_spill] sm:$0xff] }
 0x7a2   : > { %v5561_v40 = vadd.f32 %v5547_v61, %v5409_v47  ;;  %v5712_v27 = vadd.f32 %v5670_v55, %v5560_v59  ;;  %v17844_v55 = vld [vmem:[#allocation36_spill] sm:$0xff]  ;;  %v5863_v11 = vadd.f32 %v5793_v39, %v5711_v14  ;;  %v5411_v63 = vadd.f32 %v17847_v20, %v5259_v29  ;;  %v17853_v39 = vld [vmem:[#allocation22_spill] sm:$0xff]  ;;  %v5889_v29 = vpop.permute.xlu2 %5888 }
 0x7a3   : > { %v5708_v34 = vadd.f32 %v17844_v55, %v5556_v21  ;;  %v5564_v9 = vadd.f32 %v15008_v10, %v5412_v38  ;;  %v5710_v33 = vadd.f32 %v17856_v18, %v5558_v1  ;;  %v11099_v21 = vld [vmem:[%s17532_s13 + $0x28] sm:$0xff]  ;;  %v5261_v55 = vadd.f32 %v17860_v24, %v5145_v30  ;;  %v11100_v16 = vld [vmem:[%s17532_s13 + $0x18] sm:$0xff]  ;;  %v17867_v1 = vld [vmem:[#allocation27_spill] sm:$0xff] }
 0x7a4   : > { %v5713_v42 = vadd.f32 %v5699_v60, %v5561_v40  ;;  %v17848_v60 = vld [vmem:[#allocation32_spill] sm:$0xff]  ;;  %v5563_v47 = vadd.f32 %v17852_v15, %v5411_v63  ;;  %v5899_v59 = vadd.f32 %v5884_v49, %v5863_v11  ;;  %v17854_v40 = vld [vmem:[#allocation37_spill] sm:$0xff]  ;;  %v5405_v15 = vadd.f32 %v17867_v1, %v5253_v50 }
 0x7a5   : > { %v5410_v12 = vadd.f32 %v17848_v60, %v5258_v48  ;;  %v5860_v26 = vadd.f32 %v15024_v19, %v5708_v34  ;;  %v5147_v35 = vadd.f32 %v17854_v40, %v4995_v62  ;;  %v17855_v19 = vld [vmem:[#allocation17_spill] sm:$0xff]  ;;  %v5862_v56 = vadd.f32 %v15058_v58, %v5710_v33  ;;  %v17865_v60 = vld [vmem:[#allocation10_spill] sm:$0xff]  ;;  %v11107_v50 = vld [vmem:[%s17532_s13 + $0x58] sm:$0xff] }
 0x7a6   : > { %v5715_v17 = vadd.f32 %v17855_v19, %v5563_v47  ;;  %v17861_v34 = vld [vmem:[#allocation13_spill] sm:$0xff]  ;;  %v17868_v47 = vld [vmem:[#allocation35_spill] sm:$0xff]  ;;  %v17870_v33 = vld [vmem:[#allocation38_spill] sm:$0xff] }
 0x7a7   : > { %v5822_v45 = vpop.f32.mrf.mxu2  ;;  %v5562_v46 = vadd.f32 %v17853_v39, %v5410_v12  ;;  %v5896_v10 = vadd.f32 %v15103_v54, %v5860_v26  ;;  %v5263_v4 = vadd.f32 %v17859_v53, %v5147_v35  ;;  %v5898_v7 = vadd.f32 %v15103_v54, %v5862_v56  ;;  %v17866_v26 = vld [vmem:[#allocation30_spill] sm:$0xff]  ;;  %v17869_v39 = vld [vmem:[#allocation21_spill] sm:$0xff] }
 0x7a8   : > { %v5864_v41 = vadd.f32 %v5822_v45, %v5712_v27  ;;  %v5851_v61 = vpop.f32.mrf.mxu3  ;;  %v5702_v44 = vpop.f32.mrf.mxu0  ;;  %v11098_v27 = vld [vmem:[%s17532_s13 + $0x20] sm:$0xff] }
 0x7a9   : > { %v5865_v51 = vadd.f32 %v5851_v61, %v5713_v42  ;;  %v5796_v25 = vpop.f32.mrf.mxu1  ;;  %v5714_v2 = vadd.f32 %v17857_v23, %v5562_v46  ;;  %v5716_v62 = vadd.f32 %v5702_v44, %v5564_v9  ;;  %v17858_v42 = vld [vmem:[#allocation26_spill] sm:$0xff]  ;;  %v5415_v58 = vadd.f32 %v17863_v13, %v5263_v4  ;;  %v11101_v9 = vld [vmem:[%s17532_s13 + $0x38] sm:$0xff]  ;;  %v11103_v40 = vld [vmem:[%s17532_s13 + $0x40] sm:$0xff] }
 0x7aa   : > { %v5900_v57 = vadd.f32 %v5884_v49, %v5864_v41  ;;  %v5262_v45 = vadd.f32 %v17858_v42, %v5146_v28  ;;  %v5911_v41 = vmax.f32 %v5899_v59, 0.0  ;;  %v5908_v20 = vmax.f32 %v5896_v10, 0.0  ;;  %v17871_v23 = vld [vmem:[#allocation15_spill] sm:$0xff]  ;;  %v17872_v4 = vld [vmem:[#allocation25_spill] sm:$0xff] }
 0x7ab   : > { %v5901_v3 = vadd.f32 %v5884_v49, %v5865_v51  ;;  %v5866_v61 = vadd.f32 %v5796_v25, %v5714_v2  ;;  %v5910_v10 = vmax.f32 %v5898_v7, 0.0 }
 0x7ac   : > { %v5912_v0 = vmax.f32 %v5900_v57, 0.0  ;;  %v5414_v11 = vadd.f32 %v17861_v34, %v5262_v45  ;;  %v17864_v57 = vld [vmem:[#allocation31_spill] sm:$0xff]  ;;  %v15141_v43 = vmul.f32 %v11100_v16, %v5911_v41 }
 0x7ad   : > { %v5913_v32 = vmax.f32 %v5901_v3, 0.0  ;;  %v5413_v44 = vadd.f32 %v17864_v57, %v5261_v55  ;;  %v5567_v3 = vadd.f32 %v17866_v26, %v5415_v58  ;;  %v5902_v28 = vadd.f32 %v5889_v29, %v5866_v61  ;;  %v11105_v55 = vld [vmem:[%s17532_s13 + $0x30] sm:$0xff] }
 0x7ae   : > { %v15111_v36 = vmul.f32 %v11098_v27, %v5912_v0  ;;  %v5566_v12 = vadd.f32 %v17865_v60, %v5414_v11  ;;  %v5557_v27 = vadd.f32 %v17870_v33, %v5405_v15 }
 0x7af   : > { %v15118_v5 = vmul.f32 %v11099_v21, %v5913_v32  ;;  %v5825_v14 = vpop.f32.mrf.mxu2  ;;  %v5565_v0 = vadd.f32 %v17868_v47, %v5413_v44  ;;  %v11102_v32 = vld [vmem:[%s17532_s13] sm:$0xff] }
 0x7b0   : > { %v5867_v48 = vadd.f32 %v5825_v14, %v5715_v17  ;;  %v5854_v52 = vpop.f32.mrf.mxu3  ;;  %v5705_v38 = vpop.f32.mrf.mxu0  ;;  %v5718_v46 = vadd.f32 %v17869_v39, %v5566_v12  ;;  %v15154_v25 = vmul.f32 %v11102_v32, %v5908_v20  ;;  %v5914_v14 = vmax.f32 %v5902_v28, 0.0  ;;  %v11109_v12 = vld [vmem:[%s17532_s13 + $0x8] sm:$0xff] }
 0x7b1   : > { %v5868_v49 = vadd.f32 %v5854_v52, %v5716_v62  ;;  %v15125_v37 = vpack.i.bf16 %v15118_v5, %v15111_v36  ;;  %v5719_v19 = vadd.f32 %v5705_v38, %v5567_v3  ;;  %v5799_v17 = vpop.f32.mrf.mxu1  ;;  %v5717_v2 = vadd.f32 %v17871_v23, %v5565_v0 }
 0x7b2   : > { %v5903_v51 = vadd.f32 %v5889_v29, %v5867_v48  ;;  %v15169_v53 = vpack.i.bf16 %v15154_v25, %v15141_v43  ;;  %v5709_v56 = vadd.f32 %v17872_v4, %v5557_v27  ;;  %v15187_v34 = vmul.f32 %v11105_v55, %v5914_v14 }
 0x7b3   : > { %v5904_v63 = vadd.f32 %v5889_v29, %v5868_v49  ;;  %10595 = vrot.lane.b32.xlu1 %v15125_v37, %s17793_s24  ;;  %v5869_v48 = vadd.f32 %v5799_v17, %v5717_v2  ;;  %v11104_v49 = vld [vmem:[%s17532_s13 + $0x10] sm:$0xff]  ;;  %v10629_v3 = vpack.i.bf16 %v15118_v5, %v15141_v43 }
 0x7b4   : > { %v5915_v30 = vmax.f32 %v5903_v51, 0.0  ;;  %v5861_v41 = vadd.f32 %v15050_v8, %v5709_v56  ;;  %v15182_v24 = vmul.f32 %v11104_v49, %v5910_v10  ;;  %v11106_v8 = vld [vmem:[%s17532_s13 + $0x50] sm:$0xff]  ;;  %v7240_v56 = vld [vmem:[%s17529_s10 + $0x8] sm:$0xff] }
 0x7b5   : > { %v5916_v31 = vmax.f32 %v5904_v63, 0.0  ;;  %v5905_v51 = vadd.f32 %v15071_v6, %v5869_v48 }
 0x7b6   : > { %v15149_v59 = vmul.f32 %v11101_v9, %v5915_v30  ;;  %v5897_v58 = vadd.f32 %v15103_v54, %v5861_v41  ;;  %v10639_v20 = vpack.i.bf16 %v15182_v24, %v15154_v25  ;;  %v11108_v54 = vld [vmem:[%s17532_s13 + $0x48] sm:$0xff]  ;;  %v10709_v1 = vpack.i.bf16 %v15182_v24, %v15118_v5 }
 0x7b7   : > { %v15159_v35 = vmul.f32 %v11103_v40, %v5916_v31  ;;  %v5828_v18 = vpop.f32.mrf.mxu2  ;;  %v5917_v57 = vmax.f32 %v5905_v51, 0.0  ;;  %v10694_v31 = vpack.i.bf16 %v15111_v36, %v15141_v43 }
 0x7b8   : > { %v5870_v21 = vadd.f32 %v5828_v18, %v5718_v46  ;;  %v5857_v62 = vpop.f32.mrf.mxu3  ;;  %v5909_v44 = vmax.f32 %v5897_v58, 0.0  ;;  %v10684_v15 = vpack.i.bf16 %v15149_v59, %v15187_v34  ;;  %v10824_v48 = vpack.i.bf16 %v15149_v59, %v15182_v24 }
 0x7b9   : > { %v5871_v42 = vadd.f32 %v5857_v62, %v5719_v19  ;;  %v15165_v45 = vpack.i.bf16 %v15159_v35, %v15149_v59  ;;  %v15213_v60 = vmul.f32 %v11108_v54, %v5917_v57  ;;  %v10624_v38 = vpack.i.bf16 %v15159_v35, %v15187_v34  ;;  %v7241_v57 = vld [vmem:[%s17529_s10 + $0x10] sm:$0xff] }
 0x7ba   : > { %v5906_v52 = vadd.f32 %v15071_v6, %v5870_v21  ;;  %v15218_v7 = vmul.f32 %v11109_v12, %v5909_v44 }
 0x7bb   : > { %v5907_v29 = vadd.f32 %v15071_v6, %v5871_v42  ;;  %10600 = vrot.lane.b32.xlu0 %v15165_v45, %s17793_s24  ;;  %10620 = vrot.lane.b32.xlu1 %v15169_v53, %s17793_s24  ;;  %v10614_v6 = vpack.i.bf16 %v15187_v34, %v15182_v24 }
 0x7bc   : > { %v5918_v61 = vmax.f32 %v5906_v52, 0.0  ;;  %v10609_v26 = vpack.i.bf16 %v15218_v7, %v15213_v60  ;;  %v10669_v47 = vpack.i.bf16 %v15218_v7, %v15111_v36  ;;  %v10729_v0 = vpack.i.bf16 %v15218_v7, %v15154_v25 }
 0x7bd   : > { %v5919_v11 = vmax.f32 %v5907_v29, 0.0  ;;  %v10789_v2 = vpack.i.bf16 %v15182_v24, %v15218_v7 }
 0x7be   : > { %v15193_v22 = vmul.f32 %v11106_v8, %v5918_v61 }
 0x7bf   : > { %v15198_v13 = vmul.f32 %v11107_v50, %v5919_v11 }
 0x7c0   : > { %v10689_v16 = vpack.i.bf16 %v15193_v22, %v15213_v60  ;;  %v10659_v28 = vpack.i.bf16 %v15149_v59, %v15193_v22  ;;  %v10819_v12 = vpack.i.bf16 %v15193_v22, %v15154_v25 }
 0x7c1   : > { %v10604_v63 = vpack.i.bf16 %v15198_v13, %v15193_v22  ;;  %v15222_v30 = vpack.i.bf16 %v15198_v13, %v15213_v60  ;;  %v10704_v39 = vpack.i.bf16 %v15159_v35, %v15198_v13 }
 0x7c3   : > { %10640 = vrot.lane.b32.xlu1 %v10639_v20, %s17794_s28  ;;  %10615 = vrot.lane.b32.xlu0 %v10614_v6, %s17793_s24 }
 0x7c4   : > { %10605 = vrot.lane.b32.xlu2 %v10604_v63, %s17793_s24 }
 0x7cb   : > { %10655 = vrot.lane.b32.xlu1 %v15222_v30, %s17795_s16  ;;  %10625 = vrot.lane.b32.xlu0 %v10624_v38, %s17794_s28 }
 0x7cc   : > { %10610 = vrot.lane.b32.xlu2 %v10609_v26, %s17793_s24 }
 0x7d3   : > { %10665 = vrot.lane.b32.xlu1 %v10639_v20, %s17795_s16  ;;  %10635 = vrot.lane.b32.xlu0 %v10624_v38, %s17795_s16 }
 0x7d4   : > { %10630 = vrot.lane.b32.xlu2 %v10629_v3, %s17794_s28 }
 0x7db   : > { %10690 = vrot.lane.b32.xlu1 %v10689_v16, %s17714_s27  ;;  %10660 = vrot.lane.b32.xlu0 %v10659_v28, %s17794_s28 }
 0x7dc   : > { %10645 = vrot.lane.b32.xlu2 %v15222_v30, %s17794_s28 }
 0x7e3   : > { %10695 = vrot.lane.b32.xlu1 %v10694_v31, %s17714_s27  ;;  %10680 = vrot.lane.b32.xlu0 %v10659_v28, %s17795_s16 }
 0x7e4   : > { %10650 = vrot.lane.b32.xlu2 %v10629_v3, %s17795_s16 }
 0x7eb   : > { %10710 = vrot.lane.b32.xlu1 %v10709_v1, %s17714_s27  ;;  %10685 = vrot.lane.b32.xlu0 %v10684_v15, %s17714_s27 }
 0x7ec   : > { %10670 = vrot.lane.b32.xlu2 %v10669_v47, %s17794_s28 }
 0x7f3   : > { %10730 = vrot.lane.b32.xlu1 %v10729_v0, %s17715_s22  ;;  %10705 = vrot.lane.b32.xlu0 %v10704_v39, %s17714_s27 }
 0x7f4   : > { %10675 = vrot.lane.b32.xlu2 %v10669_v47, %s17795_s16 }
 0x7fb   : > { %10745 = vrot.lane.b32.xlu1 %v10689_v16, %s17636_s29  ;;  %10715 = vrot.lane.b32.xlu0 %v10684_v15, %s17715_s22 }
 0x7fc   : > { %10700 = vrot.lane.b32.xlu2 %v10729_v0, %s17714_s27 }
 0x803   : > { %10755 = vrot.lane.b32.xlu1 %v10729_v0, %s17636_s29  ;;  %10725 = vrot.lane.b32.xlu0 %v10684_v15, %s17636_s29 }
 0x804   : > { %10720 = vrot.lane.b32.xlu2 %v10694_v31, %s17715_s22 }
 0x80b   : > { %10780 = vrot.lane.b32.xlu1 %v10604_v63, %s17637_s30  ;;  %10750 = vrot.lane.b32.xlu0 %v10704_v39, %s17715_s22  ;;  %v9570_v63 = vld [vmem:[%s17528_s9 + $0x20] sm:$0xff] }
 0x80c   : > { %10735 = vrot.lane.b32.xlu2 %v10689_v16, %s17715_s22 }
 0x813   : > { %10785 = vrot.lane.b32.xlu1 %v15125_v37, %s17637_s30  ;;  %10770 = vrot.lane.b32.xlu0 %v10704_v39, %s17636_s29  ;;  %v10794_v37 = vpack.i.bf16 %v15187_v34, %v15213_v60 }
 0x814   : > { %10740 = vrot.lane.b32.xlu2 %v10694_v31, %s17636_s29 }
 0x81b   : > { %10800 = vrot.lane.b32.xlu1 %v15169_v53, %s17637_s30  ;;  %10775 = vrot.lane.b32.xlu0 %v15165_v45, %s17637_s30 }
 0x81c   : > { %10760 = vrot.lane.b32.xlu2 %v10709_v1, %s17715_s22 }
 0x81e   : > { %v10606_v46 = vpop.permute.xlu2 %10605 }
 0x81f   : > { %v10608_v9 = vunpack.i.h.bf16 %v10606_v46  ;;  %v10607_v32 = vunpack.i.l.bf16 %v10606_v46 }
 0x821   : > { %v5999_v19 = vsel %vm551_vm0, %v10607_v32, %v10608_v9 }
 0x822   : > { %6095 = vmatpush.msrb.mxu2 %v5999_v19 }
 0x823   : > { %10810 = vrot.lane.b32.xlu1 %v10629_v3, %s17639_s21  ;;  %10795 = vrot.lane.b32.xlu0 %v10794_v37, %s17637_s30 }
 0x824   : > { %10765 = vrot.lane.b32.xlu2 %v10709_v1, %s17636_s29 }
 0x825   : > { %v10596_v17 = vpop.permute.xlu1 %10595 }
 0x826   : > { %v10611_v18 = vpop.permute.xlu2 %10610  ;;  %v10598_v45 = vunpack.i.h.bf16 %v10596_v17  ;;  %v10597_v53 = vunpack.i.l.bf16 %v10596_v17  ;;  %v9571_v17 = vld [vmem:[%s17528_s9 + $0x28] sm:$0xff] }
 0x827   : > { %v10612_v33 = vunpack.i.l.bf16 %v10611_v18  ;;  %v10613_v61 = vunpack.i.h.bf16 %v10611_v18  ;;  %v7242_v18 = vld [vmem:[%s17529_s10 + $0x18] sm:$0xff] }
 0x828   : > { %v5997_v52 = vsel %vm551_vm0, %v10597_v53, %v10598_v45 }
 0x829   : > { %v6007_v27 = vsel %vm551_vm0, %v10608_v9, %v10612_v33  ;;  %v6003_v23 = vsel %vm551_vm0, %v10612_v33, %v10607_v32 }
 0x82a   : > { %6037 = vmatpush.msrb.mxu0 %v6007_v27  ;;  %6066 = vmatpush.msrb.mxu1 %v6003_v23  ;;  %v15394_v27 = vld [vmem:[%s17528_s9] sm:$0xff] }
 0x82b   : > { %10830 = vrot.lane.b32.xlu1 %v10669_v47, %s17639_s21  ;;  %10805 = vrot.lane.b32.xlu0 %v10624_v38, %s17639_s21 }
 0x82c   : > { %10790 = vrot.lane.b32.xlu2 %v10789_v2, %s17637_s30 }
 0x82d   : > { %v10601_v10 = vpop.permute.xlu0 %10600  ;;  %v10621_v21 = vpop.permute.xlu1 %10620 }
 0x82e   : > { %v10603_v62 = vunpack.i.h.bf16 %v10601_v10  ;;  %v10602_v14 = vunpack.i.l.bf16 %v10601_v10  ;;  %v15300_v42 = vpop.permute.xlu2 %10630  ;;  %v10622_v51 = vunpack.i.l.bf16 %v10621_v21  ;;  %v10623_v44 = vunpack.i.h.bf16 %v10621_v21 }
 0x82f   : > { %v10633_v26 = vunpack.i.h.bf16 %v15300_v42  ;;  %v10632_v3 = vunpack.i.l.bf16 %v15300_v42 }
 0x830   : > { %v5998_v4 = vsel %vm551_vm0, %v10602_v14, %v10603_v62  ;;  %v6001_v38 = vsel %vm551_vm0, %v10622_v51, %v10597_v53  ;;  %v6000_v1 = vsel %vm551_vm0, %v10623_v44, %v10613_v61 }
 0x831   : > { %6096 = vmatpush.msrb.mxu2 %v5998_v4  ;;  %v5965_v33 = vsel %vm528_vm3, %v10633_v26, %v10632_v3 }
 0x833   : > { %7250 = vperm.xlu1 %9872, %v7240_v56   ;;  %10825 = vrot.lane.b32.xlu0 %v10824_v48, %s17639_s21  ;;  %v9572_v56 = vld [vmem:[%s17528_s9 + $0x30] sm:$0xff] }
 0x834   : > { %10815 = vrot.lane.b32.xlu2 %v15222_v30, %s17639_s21  ;;  %6097 = vmatpush.msrb.mxu2 %v5997_v52  ;;  %v6005_v30 = vsel %vm551_vm0, %v10598_v45, %v10622_v51 }
 0x835   : > { %v15314_v29 = vpop.permute.xlu1 %10640  ;;  %v10616_v41 = vpop.permute.xlu0 %10615 }
 0x836   : > { %v10618_v49 = vunpack.i.h.bf16 %v10616_v41  ;;  %v10617_v55 = vunpack.i.l.bf16 %v10616_v41  ;;  %v15316_v11 = vpop.permute.xlu2 %10645  ;;  %v10643_v9 = vunpack.i.h.bf16 %v15314_v29  ;;  %v10642_v32 = vunpack.i.l.bf16 %v15314_v29  ;;  %v7239_v41 = vld [vmem:[%s17529_s10] sm:$0xff] }
 0x837   : > { %v10648_v8 = vunpack.i.h.bf16 %v15316_v11  ;;  %v10647_v50 = vunpack.i.l.bf16 %v15316_v11 }
 0x838   : > { %v6006_v58 = vsel %vm551_vm0, %v10603_v62, %v10618_v49  ;;  %v6002_v20 = vsel %vm551_vm0, %v10618_v49, %v10602_v14  ;;  %v5996_v6 = vsel %vm551_vm0, %v10613_v61, %v10617_v55  ;;  %v6004_v31 = vsel %vm551_vm0, %v10617_v55, %v10623_v44  ;;  %v15438_v49 = vld [vmem:[%s17528_s9 + $0x8] sm:$0xff] }
 0x839   : > { %6038 = vmatpush.msrb.mxu0 %v6006_v58  ;;  %6067 = vmatpush.msrb.mxu1 %v6002_v20  ;;  %v5967_v54 = vsel %vm528_vm3, %v10648_v8, %v10647_v50  ;;  %v5964_v23 = vsel %vm528_vm3, %v10643_v9, %v10642_v32 }
 0x83a   : > { %6098 = vmatpush.msrb.mxu2 %v5996_v6  ;;  %6136 = vmatpush.msrb.mxu3 %v5967_v54 }
 0x83b   : > { %9582 = vmatmul.msk.f32.vlgmr.msrb.gmra.mxu2 %vm1911_vm10, %v9570_v63  ;;  %7255 = vperm.xlu0 %9871, %v7241_v57  }
 0x83c   : > { %10820 = vrot.lane.b32.xlu2 %v10819_v12, %s17639_s21  ;;  %6039 = vmatpush.msrb.mxu0 %v6005_v30 }
 0x83d   : > { %6068 = vmatpush.msrb.mxu1 %v6001_v38  ;;  %v15348_v16 = vpop.permute.xlu1 %10655  ;;  %v15350_v28 = vpop.permute.xlu0 %10625 }
 0x83e   : > { %v10658_v15 = vunpack.i.h.bf16 %v15348_v16  ;;  %v10657_v47 = vunpack.i.l.bf16 %v15348_v16  ;;  %v10628_v0 = vunpack.i.h.bf16 %v15350_v28  ;;  %v10627_v39 = vunpack.i.l.bf16 %v15350_v28  ;;  %v15360_v46 = vpop.permute.xlu2 %10650  ;;  %6040 = vmatpush.msrb.mxu0 %v6004_v31  ;;  %v9573_v31 = vld [vmem:[%s17528_s9 + $0x38] sm:$0xff] }
 0x83f   : > { %6069 = vmatpush.msrb.mxu1 %v6000_v1  ;;  %9574 = vmatmul.msk.f32.vlgmr.msrb.gmra.mxu0 %vm1911_vm10, %v9570_v63  ;;  %v10653_v45 = vunpack.i.h.bf16 %v15360_v46  ;;  %v10652_v53 = vunpack.i.l.bf16 %v15360_v46  ;;  %v15485_v1 = vld [vmem:[%s17528_s9 + $0x10] sm:$0xff] }
 0x840   : > { %9578 = vmatmul.msk.f32.vlgmr.msrb.gmra.mxu1 %vm1911_vm10, %v9570_v63  ;;  %v5966_v19 = vsel %vm528_vm3, %v10628_v0, %v10627_v39  ;;  %v6246_v37 = vsel %vm793_vm4, %v10658_v15, %v10657_v47 }
 0x841   : > { %6137 = vmatpush.msrb.mxu3 %v5966_v19  ;;  %6276 = vmatpush.msra.mxu2 %v6246_v37  ;;  %v6244_v61 = vsel %vm793_vm4, %v10653_v45, %v10652_v53 }
 0x843   : > { %9583 = vmatmul.msk.f32.gmra.mxu2 %vm1911_vm10, %v9571_v17  ;;  %6138 = vmatpush.msrb.mxu3 %v5965_v33 }
 0x844   : > { %7260 = vperm.xlu2 %9873, %v7242_v18  }
 0x845   : > { %v15402_v2 = vpop.permute.xlu1 %10665  ;;  %v15404_v10 = vpop.permute.xlu0 %10635  ;;  %6139 = vmatpush.msrb.mxu3 %v5964_v23  ;;  %v15523_v23 = vld [vmem:[%s17528_s9 + $0x40] sm:$0xff] }
 0x846   : > { %v10638_v21 = vunpack.i.h.bf16 %v15404_v10  ;;  %v10637_v62 = vunpack.i.l.bf16 %v15404_v10  ;;  %v10671_v14 = vpop.permute.xlu2 %10670  ;;  %9586 = vmatmul.msk.f32.vlgmr.msrb.gmra.mxu3 %vm1911_vm10, %v15394_v27  ;;  %v10668_v48 = vunpack.i.h.bf16 %v15402_v2  ;;  %v10667_v52 = vunpack.i.l.bf16 %v15402_v2 }
 0x847   : > { %9575 = vmatmul.msk.f32.gmra.mxu0 %vm1911_vm10, %v9571_v17  ;;  %v10672_v54 = vunpack.i.l.bf16 %v10671_v14 }
 0x848   : > { %9579 = vmatmul.msk.f32.gmra.mxu1 %vm1911_vm10, %v9571_v17  ;;  %v6245_v4 = vsel %vm793_vm4, %v10638_v21, %v10637_v62  ;;  %v6243_v58 = vsel %vm793_vm4, %v10668_v48, %v10667_v52 }
 0x849   : > { %6277 = vmatpush.msra.mxu2 %v6245_v4  ;;  %v5957_v28 = vsel %vm528_vm3, %v10672_v54, %v10633_v26 }
 0x84b   : > { %9584 = vmatmul.msk.f32.gmra.mxu2 %vm1911_vm10, %v9572_v56 }
 0x84c   : > { %7245 = vperm.xlu2 %9873, %v7239_v41   ;;  %6278 = vmatpush.msra.mxu2 %v6244_v61  ;;  %v15574_v61 = vld [vmem:[%s17528_s9 + $0x48] sm:$0xff] }
 0x84d   : > { %v15440_v55 = vpop.permute.xlu1 %10690  ;;  %v10661_v51 = vpop.permute.xlu0 %10660 }
 0x84e   : > { %v10693_v20 = vunpack.i.h.bf16 %v15440_v55  ;;  %v10692_v6 = vunpack.i.l.bf16 %v15440_v55  ;;  %v10663_v63 = vunpack.i.h.bf16 %v10661_v51  ;;  %v10662_v57 = vunpack.i.l.bf16 %v10661_v51  ;;  %v15450_v44 = vpop.permute.xlu2 %10675  ;;  %6279 = vmatpush.msra.mxu2 %v6243_v58  ;;  %9587 = vmatmul.msk.f32.gmra.mxu3 %vm1911_vm10, %v15438_v49 }
 0x84f   : > { %9576 = vmatmul.msk.f32.gmra.mxu0 %vm1911_vm10, %v9572_v56  ;;  %v10677_v42 = vunpack.i.l.bf16 %v15450_v44  ;;  %v10678_v29 = vunpack.i.h.bf16 %v15450_v44 }
 0x850   : > { %9580 = vmatmul.msk.f32.gmra.mxu1 %vm1911_vm10, %v9572_v56  ;;  %v5963_v12 = vsel %vm528_vm3, %v10647_v50, %v10662_v57  ;;  %v5959_v30 = vsel %vm528_vm3, %v10662_v57, %v10648_v8  ;;  %v6394_v38 = vsel %vm937_vm5, %v10692_v6, %v10693_v20  ;;  %v5962_v11 = vsel %vm528_vm3, %v10627_v39, %v10663_v63 }
 0x851   : > { %6165 = vmatpush.msra.mxu0 %v5963_v12  ;;  %6194 = vmatpush.msra.mxu1 %v5959_v30  ;;  %v10673_v8 = vunpack.i.h.bf16 %v10671_v14  ;;  %v5958_v50 = vsel %vm528_vm3, %v10663_v63, %v10628_v0  ;;  %v5961_v39 = vsel %vm528_vm3, %v10632_v3, %v10672_v54  ;;  %v6236_v10 = vsel %vm793_vm4, %v10677_v42, %v10653_v45 }
 0x852   : > { %6457 = vmatpush.msrb.mxu2 %v6394_v38  ;;  %v6235_v45 = vsel %vm793_vm4, %v10678_v29, %v10668_v48 }
 0x853   : > { %9585 = vmatmul.msk.f32.gmra.mxu2 %vm1911_vm10, %v9573_v31  ;;  %6166 = vmatpush.msra.mxu0 %v5962_v11  ;;  %v5960_v3 = vsel %vm528_vm3, %v10642_v32, %v10673_v8  ;;  %v5956_v26 = vsel %vm528_vm3, %v10673_v8, %v10643_v9  ;;  %v6240_v9 = vsel %vm793_vm4, %v10652_v53, %v10677_v42 }
 0x854   : > { %6195 = vmatpush.msra.mxu1 %v5958_v50  ;;  %v6239_v53 = vsel %vm793_vm4, %v10667_v52, %v10678_v29 }
 0x855   : > { %v15491_v19 = vpop.permute.xlu1 %10695  ;;  %v10681_v37 = vpop.permute.xlu0 %10680  ;;  %6167 = vmatpush.msra.mxu0 %v5961_v39 }
 0x856   : > { %v10683_v0 = vunpack.i.h.bf16 %v10681_v37  ;;  %v10682_v17 = vunpack.i.l.bf16 %v10681_v37  ;;  %v15497_v18 = vpop.permute.xlu2 %10700  ;;  %6196 = vmatpush.msra.mxu1 %v5957_v28  ;;  %9588 = vmatmul.msk.f32.gmra.mxu3 %vm1911_vm10, %v15485_v1  ;;  %v10698_v41 = vunpack.i.h.bf16 %v15491_v19  ;;  %v10697_v46 = vunpack.i.l.bf16 %v15491_v19  ;;  %v15656_v19 = vld [vmem:[%s17528_s9 + $0x58] sm:$0xff] }
 0x857   : > { %9577 = vmatmul.msk.f32.gmra.mxu0 %vm1911_vm10, %v9573_v31  ;;  %v10703_v51 = vunpack.i.h.bf16 %v15497_v18  ;;  %v10702_v58 = vunpack.i.l.bf16 %v15497_v18 }
 0x858   : > { %9581 = vmatmul.msk.f32.gmra.mxu1 %vm1911_vm10, %v9573_v31  ;;  %6168 = vmatpush.msra.mxu0 %v5960_v3  ;;  %v6242_v33 = vsel %vm793_vm4, %v10657_v47, %v10682_v17  ;;  %v6238_v32 = vsel %vm793_vm4, %v10682_v17, %v10658_v15  ;;  %v6241_v47 = vsel %vm793_vm4, %v10637_v62, %v10683_v0  ;;  %v15539_v15 = vld [vmem:[%s17528_s9 + $0x18] sm:$0xff] }
 0x859   : > { %6197 = vmatpush.msra.mxu1 %v5956_v26  ;;  %6305 = vmatpush.msra.mxu3 %v6242_v33  ;;  %v6237_v16 = vsel %vm793_vm4, %v10683_v0, %v10638_v21  ;;  %v6391_v48 = vsel %vm937_vm5, %v10702_v58, %v10703_v51 }
 0x85a   : > { %6334 = vmatpush.msrb.mxu0 %v6238_v32 }
 0x85b   : > { %9602 = vmatmul.msk.f32.vlgmr.msra.gmra.mxu2 %vm1911_vm10, %v15523_v23  ;;  %6306 = vmatpush.msra.mxu3 %v6241_v47 }
 0x85c   : > { %6335 = vmatpush.msrb.mxu0 %v6237_v16 }
 0x85d   : > { %v15545_v62 = vpop.permute.xlu1 %10710  ;;  %v10686_v14 = vpop.permute.xlu0 %10685  ;;  %6307 = vmatpush.msra.mxu3 %v6240_v9 }
 0x85e   : > { %v10688_v21 = vunpack.i.h.bf16 %v10686_v14  ;;  %v10687_v4 = vunpack.i.l.bf16 %v10686_v14  ;;  %v15551_v56 = vpop.permute.xlu2 %10720  ;;  %6336 = vmatpush.msrb.mxu0 %v6236_v10  ;;  %9589 = vmatmul.msk.f32.gmra.mxu3 %vm1911_vm10, %v15539_v15 }
 0x85f   : > { %9590 = vmatmul.msk.f32.vlgmr.msra.gmra.mxu0 %vm1911_vm10, %v15394_v27  ;;  %6308 = vmatpush.msra.mxu3 %v6239_v53  ;;  %v10723_v11 = vunpack.i.h.bf16 %v15551_v56  ;;  %v10722_v8 = vunpack.i.l.bf16 %v15551_v56 }
 0x860   : > { %9594 = vmatmul.msk.f32.vlgmr.msra.gmra.mxu1 %vm1911_vm10, %v15394_v27  ;;  %6337 = vmatpush.msrb.mxu0 %v6235_v45  ;;  %v6393_v52 = vsel %vm937_vm5, %v10687_v4, %v10688_v21  ;;  %v6392_v27 = vsel %vm937_vm5, %v10697_v46, %v10698_v41 }
 0x861   : > { %6458 = vmatpush.msrb.mxu2 %v6393_v52  ;;  %v6660_v17 = vsel %vm1209_vm6, %v10722_v8, %v10723_v11 }
 0x862   : > { %6544 = vmatpush.msra.mxu0 %v15213_v60 }
 0x863   : > { %9603 = vmatmul.msk.f32.gmra.mxu2 %vm1911_vm10, %v15574_v61 }
 0x864   : > { %6545 = vmatpush.msra.mxu0 %v15187_v34  ;;  %6459 = vmatpush.msrb.mxu2 %v6392_v27 }
 0x865   : > { %v10706_v2 = vpop.permute.xlu0 %10705  ;;  %v15587_v63 = vpop.permute.xlu1 %10730 }
 0x866   : > { %6546 = vmatpush.msra.mxu0 %v15141_v43  ;;  %v10708_v57 = vunpack.i.h.bf16 %v10706_v2  ;;  %v10707_v60 = vunpack.i.l.bf16 %v10706_v2  ;;  %6460 = vmatpush.msrb.mxu2 %v6391_v48  ;;  %v15591_v44 = vpop.permute.xlu2 %10735  ;;  %v10712_v43 = vunpack.i.l.bf16 %v15545_v62  ;;  %v10733_v28 = vunpack.i.h.bf16 %v15587_v63 }
 0x867   : > { %9606 = vmatmul.msk.f32.vlgmr.msra.gmra.mxu3 %vm1911_vm10, %v15523_v23  ;;  %9591 = vmatmul.msk.f32.gmra.mxu0 %vm1911_vm10, %v15438_v49  ;;  %v10732_v0 = vunpack.i.l.bf16 %v15587_v63 }
 0x868   : > { %6602 = vmatpush.msra.mxu2 %v15198_v13  ;;  %9595 = vmatmul.msk.f32.gmra.mxu1 %vm1911_vm10, %v15438_v49  ;;  %v6398_v34 = vsel %vm937_vm5, %v10707_v60, %v10692_v6  ;;  %v6390_v54 = vsel %vm937_vm5, %v10693_v20, %v10707_v60  ;;  %v15611_v13 = vld [vmem:[%s17528_s9 + $0x50] sm:$0xff]  ;;  %v10713_v49 = vunpack.i.h.bf16 %v15545_v62  ;;  %v6389_v55 = vsel %vm937_vm5, %v10688_v21, %v10708_v57 }
 0x869   : > { %6547 = vmatpush.msra.mxu0 %v15154_v25  ;;  %6428 = vmatpush.msrb.mxu1 %v6398_v34  ;;  %v6397_v25 = vsel %vm937_vm5, %v10708_v57, %v10687_v4  ;;  %v10738_v20 = vunpack.i.h.bf16 %v15591_v44  ;;  %v10737_v6 = vunpack.i.l.bf16 %v15591_v44  ;;  %v6388_v30 = vsel %vm937_vm5, %v10698_v41, %v10712_v43  ;;  %v9616_v34 = vld [vmem:[%s17528_s9 + $0x70] sm:$0xff] }
 0x86a   : > { %6603 = vmatpush.msra.mxu2 %v15159_v35  ;;  %6486 = vmatpush.msrb.mxu3 %v6390_v54  ;;  %v6396_v35 = vsel %vm937_vm5, %v10712_v43, %v10697_v46 }
 0x86b   : > { %9604 = vmatmul.msk.f32.gmra.mxu2 %vm1911_vm10, %v15611_v13  ;;  %6429 = vmatpush.msrb.mxu1 %v6397_v25  ;;  %v6662_v39 = vsel %vm1209_vm6, %v10737_v6, %v10738_v20 }
 0x86c   : > { %6604 = vmatpush.msra.mxu2 %v15118_v5  ;;  %6487 = vmatpush.msrb.mxu3 %v6389_v55  ;;  %v6387_v5 = vsel %vm937_vm5, %v10703_v51, %v10713_v49 }
 0x86d   : > { %v15626_v12 = vpop.permute.xlu0 %10715  ;;  %6430 = vmatpush.msrb.mxu1 %v6396_v35  ;;  %v15641_v50 = vpop.permute.xlu1 %10745 }
 0x86e   : > { %6605 = vmatpush.msra.mxu2 %v15182_v24  ;;  %v10718_v38 = vunpack.i.h.bf16 %v15626_v12  ;;  %v10717_v31 = vunpack.i.l.bf16 %v15626_v12  ;;  %6488 = vmatpush.msrb.mxu3 %v6388_v30  ;;  %v6395_v24 = vsel %vm937_vm5, %v10713_v49, %v10702_v58  ;;  %v15664_v37 = vpop.permute.xlu2 %10740  ;;  %v10747_v3 = vunpack.i.l.bf16 %v15641_v50  ;;  %v9630_v30 = vld [vmem:[%s17528_s9 + $0x80] sm:$0xff] }
 0x86f   : > { %9592 = vmatmul.msk.f32.gmra.mxu0 %vm1911_vm10, %v15485_v1  ;;  %9607 = vmatmul.msk.f32.gmra.mxu3 %vm1911_vm10, %v15574_v61  ;;  %v10743_v32 = vunpack.i.h.bf16 %v15664_v37  ;;  %v10742_v29 = vunpack.i.l.bf16 %v15664_v37  ;;  %v9646_v37 = vld [vmem:[%s17528_s9 + $0xa0] sm:$0xff] }
 0x870   : > { %9596 = vmatmul.msk.f32.gmra.mxu1 %vm1911_vm10, %v15485_v1  ;;  %6489 = vmatpush.msrb.mxu3 %v6387_v5  ;;  %v6661_v1 = vsel %vm1209_vm6, %v10717_v31, %v10718_v38 }
 0x871   : > { %6431 = vmatpush.msrb.mxu1 %v6395_v24  ;;  %v6812_v21 = vsel %vm1353_vm7, %v10742_v29, %v10743_v32 }
 0x872   : > { %6696 = vmatpush.msra.mxu3 %v6662_v39 }
 0x873   : > { %6573 = vmatpush.msra.mxu1 %v15193_v22  ;;  %9605 = vmatmul.msk.f32.gmra.mxu2 %vm1911_vm10, %v15656_v19  ;;  %v10748_v22 = vunpack.i.h.bf16 %v15641_v50 }
 0x874   : > { %6697 = vmatpush.msra.mxu3 %v6661_v1 }
 0x875   : > { %6574 = vmatpush.msra.mxu1 %v15149_v59  ;;  %v15678_v18 = vpop.permute.xlu0 %10725  ;;  %v6659_v59 = vsel %vm1209_vm6, %v10732_v0, %v10733_v28  ;;  %v15701_v33 = vpop.permute.xlu1 %10755  ;;  %v6814_v16 = vsel %vm1353_vm7, %v10747_v3, %v10748_v22 }
 0x876   : > { %6698 = vmatpush.msra.mxu3 %v6660_v17  ;;  %v10728_v42 = vunpack.i.h.bf16 %v15678_v18  ;;  %v10727_v26 = vunpack.i.l.bf16 %v15678_v18  ;;  %v10761_v47 = vpop.permute.xlu2 %10760  ;;  %v10757_v9 = vunpack.i.l.bf16 %v15701_v33 }
 0x877   : > { %6575 = vmatpush.msra.mxu1 %v15111_v36  ;;  %9593 = vmatmul.msk.f32.gmra.mxu0 %vm1911_vm10, %v15539_v15  ;;  %v9614_v36 = vld [vmem:[%s17528_s9 + $0x60] sm:$0xff]  ;;  %v10762_v4 = vunpack.i.l.bf16 %v10761_v47  ;;  %v10763_v52 = vunpack.i.h.bf16 %v10761_v47 }
 0x878   : > { %9608 = vmatmul.msk.f32.gmra.mxu3 %vm1911_vm10, %v15611_v13  ;;  %9597 = vmatmul.msk.f32.gmra.mxu1 %vm1911_vm10, %v15539_v15  ;;  %v10758_v15 = vunpack.i.h.bf16 %v15701_v33 }
 0x879   : > { %6699 = vmatpush.msra.mxu3 %v6659_v59  ;;  %6576 = vmatpush.msra.mxu1 %v15218_v7  ;;  %v6813_v7 = vsel %vm1353_vm7, %v10727_v26, %v10728_v42  ;;  %v6656_v58 = vsel %vm1209_vm6, %v10723_v11, %v10762_v4  ;;  %v6664_v48 = vsel %vm1209_vm6, %v10762_v4, %v10722_v8 }
 0x87a   : > { %v6811_v46 = vsel %vm1353_vm7, %v10757_v9, %v10758_v15  ;;  %v6655_v44 = vsel %vm1209_vm6, %v10733_v28, %v10763_v52  ;;  %v6663_v43 = vsel %vm1209_vm6, %v10763_v52, %v10732_v0 }
 0x87b   : > { %9622 = vmatmul.msk.f32.vlgmr.msrb.gmra.mxu2 %vm1911_vm10, %v9614_v36 }
 0x87c   : > { %6848 = vmatpush.msrb.mxu2 %v6814_v16 }
 0x87d   : > { %v10751_v62 = vpop.permute.xlu0 %10750  ;;  %v15781_v54 = vpop.permute.xlu1 %10780 }
 0x87e   : > { %6849 = vmatpush.msrb.mxu2 %v6813_v7  ;;  %v10753_v14 = vunpack.i.h.bf16 %v10751_v62  ;;  %v10752_v10 = vunpack.i.l.bf16 %v10751_v62  ;;  %v15753_v27 = vpop.permute.xlu2 %10765  ;;  %v10783_v12 = vunpack.i.h.bf16 %v15781_v54 }
 0x87f   : > { %9610 = vmatmul.msk.f32.vlgmr.msrb.gmra.mxu0 %vm1911_vm10, %v15523_v23  ;;  %v9615_v23 = vld [vmem:[%s17528_s9 + $0x68] sm:$0xff]  ;;  %v10767_v56 = vunpack.i.l.bf16 %v15753_v27  ;;  %v10768_v63 = vunpack.i.h.bf16 %v15753_v27 }
 0x880   : > { %9609 = vmatmul.msk.f32.gmra.mxu3 %vm1911_vm10, %v15656_v19  ;;  %9618 = vmatmul.msk.f32.vlgmr.msrb.gmra.mxu1 %vm1911_vm10, %v9614_v36  ;;  %v6658_v53 = vsel %vm1209_vm6, %v10738_v20, %v10752_v10  ;;  %v6666_v41 = vsel %vm1209_vm6, %v10752_v10, %v10737_v6  ;;  %v6657_v45 = vsel %vm1209_vm6, %v10718_v38, %v10753_v14  ;;  %v9617_v6 = vld [vmem:[%s17528_s9 + $0x78] sm:$0xff]  ;;  %v15883_v10 = vld [vmem:[%s17528_s9 + $0xa8] sm:$0xff] }
 0x881   : > { %6850 = vmatpush.msrb.mxu2 %v6812_v21  ;;  %6725 = vmatpush.msrb.mxu0 %v6658_v53  ;;  %v6665_v51 = vsel %vm1209_vm6, %v10753_v14, %v10717_v31  ;;  %v6808_v49 = vsel %vm1353_vm7, %v10743_v32, %v10767_v56  ;;  %v6807_v20 = vsel %vm1353_vm7, %v10758_v15, %v10768_v63 }
 0x882   : > { %6754 = vmatpush.msrb.mxu1 %v6666_v41  ;;  %v6816_v18 = vsel %vm1353_vm7, %v10767_v56, %v10742_v29  ;;  %v6815_v7 = vsel %vm1353_vm7, %v10768_v63, %v10757_v9  ;;  %v9632_v9 = vld [vmem:[%s17528_s9 + $0x90] sm:$0xff]  ;;  %v9633_v41 = vld [vmem:[%s17528_s9 + $0x98] sm:$0xff] }
 0x883   : > { %6851 = vmatpush.msrb.mxu2 %v6811_v46  ;;  %6726 = vmatpush.msrb.mxu0 %v6657_v45  ;;  %v15898_v46 = vld [vmem:[%s17528_s9 + $0xb0] sm:$0xff] }
 0x884   : > { %9623 = vmatmul.msk.f32.gmra.mxu2 %vm1911_vm10, %v9615_v23  ;;  %6755 = vmatpush.msrb.mxu1 %v6665_v51 }
 0x885   : > { %v15755_v2 = vpop.permute.xlu0 %10770  ;;  %6727 = vmatpush.msrb.mxu0 %v6656_v58  ;;  %v15804_v35 = vpop.permute.xlu1 %10785  ;;  %v15907_v58 = vld [vmem:[%s17528_s9 + $0xc0] sm:$0xff] }
 0x886   : > { %v10773_v57 = vunpack.i.h.bf16 %v15755_v2  ;;  %v10772_v60 = vunpack.i.l.bf16 %v15755_v2  ;;  %6756 = vmatpush.msrb.mxu1 %v6664_v48  ;;  %v10791_v5 = vpop.permute.xlu2 %10790  ;;  %v10788_v24 = vunpack.i.h.bf16 %v15804_v35  ;;  %v10787_v39 = vunpack.i.l.bf16 %v15804_v35 }
 0x887   : > { %9611 = vmatmul.msk.f32.gmra.mxu0 %vm1911_vm10, %v15574_v61  ;;  %v10793_v0 = vunpack.i.h.bf16 %v10791_v5  ;;  %v10792_v17 = vunpack.i.l.bf16 %v10791_v5 }
 0x888   : > { %9626 = vmatmul.msk.f32.vlgmr.msrb.gmra.mxu3 %vm1911_vm10, %v9614_v36  ;;  %9619 = vmatmul.msk.f32.gmra.mxu1 %vm1911_vm10, %v9615_v23  ;;  %v6810_v61 = vsel %vm1353_vm7, %v10748_v22, %v10772_v60  ;;  %v6809_v25 = vsel %vm1353_vm7, %v10728_v42, %v10773_v57  ;;  %v6818_v59 = vsel %vm1353_vm7, %v10772_v60, %v10747_v3  ;;  %v9631_v3 = vld [vmem:[%s17528_s9 + $0x88] sm:$0xff] }
 0x889   : > { %6728 = vmatpush.msrb.mxu0 %v6655_v44  ;;  %6757 = vmatpush.msrb.mxu1 %v6663_v43  ;;  %v6960_v32 = vsel %vm1497_vm8, %v10787_v39, %v10788_v24  ;;  %v6817_v50 = vsel %vm1353_vm7, %v10773_v57, %v10727_v26  ;;  %v6959_v15 = vsel %vm1497_vm8, %v10792_v17, %v10793_v0 }
 0x88a   : > { %6877 = vmatpush.msrb.mxu3 %v6810_v61 }
 0x88c   : > { %9624 = vmatmul.msk.f32.gmra.mxu2 %vm1911_vm10, %v9616_v34  ;;  %6878 = vmatpush.msrb.mxu3 %v6809_v25 }
 0x88d   : > { %v15793_v55 = vpop.permute.xlu0 %10775  ;;  %v10801_v1 = vpop.permute.xlu1 %10800 }
 0x88e   : > { %6879 = vmatpush.msrb.mxu3 %v6808_v49  ;;  %v10778_v38 = vunpack.i.h.bf16 %v15793_v55  ;;  %v10777_v31 = vunpack.i.l.bf16 %v15793_v55  ;;  %v10802_v36 = vunpack.i.l.bf16 %v10801_v1  ;;  %v10803_v47 = vunpack.i.h.bf16 %v10801_v1  ;;  %v10816_v4 = vpop.permute.xlu2 %10815 }
 0x88f   : > { %9612 = vmatmul.msk.f32.gmra.mxu0 %vm1911_vm10, %v15611_v13  ;;  %v10782_v13 = vunpack.i.l.bf16 %v15781_v54  ;;  %v10818_v45 = vunpack.i.h.bf16 %v10816_v4  ;;  %v10817_v52 = vunpack.i.l.bf16 %v10816_v4  ;;  %v9649_v54 = vld [vmem:[%s17528_s9 + $0xb8] sm:$0xff] }
 0x890   : > { %9627 = vmatmul.msk.f32.gmra.mxu3 %vm1911_vm10, %v9615_v23  ;;  %9620 = vmatmul.msk.f32.gmra.mxu1 %vm1911_vm10, %v9616_v34  ;;  %v6961_v28 = vsel %vm1497_vm8, %v10777_v31, %v10778_v38  ;;  %v6964_v26 = vsel %vm1497_vm8, %v10802_v36, %v10787_v39  ;;  %v6963_v29 = vsel %vm1497_vm8, %v10803_v47, %v10792_v17 }
 0x891   : > { %6880 = vmatpush.msrb.mxu3 %v6807_v20  ;;  %v6962_v8 = vsel %vm1497_vm8, %v10782_v13, %v10783_v12  ;;  %v6968_v14 = vsel %vm1497_vm8, %v10788_v24, %v10802_v36  ;;  %v6967_v21 = vsel %vm1497_vm8, %v10793_v0, %v10803_v47  ;;  %v7122_v60 = vsel %vm1641_vm9, %v10818_v45, %v10817_v52 }
 0x894   : > { %9625 = vmatmul.msk.f32.gmra.mxu2 %vm1911_vm10, %v9617_v6 }
 0x895   : > { %v10796_v11 = vpop.permute.xlu0 %10795  ;;  %v10811_v23 = vpop.permute.xlu1 %10810 }
 0x896   : > { %v10798_v22 = vunpack.i.h.bf16 %v10796_v11  ;;  %v10821_v51 = vpop.permute.xlu2 %10820  ;;  %v10813_v56 = vunpack.i.h.bf16 %v10811_v23  ;;  %v10812_v43 = vunpack.i.l.bf16 %v10811_v23 }
 0x897   : > { %9613 = vmatmul.msk.f32.gmra.mxu0 %vm1911_vm10, %v15656_v19  ;;  %v10797_v19 = vunpack.i.l.bf16 %v10796_v11  ;;  %v10823_v57 = vunpack.i.h.bf16 %v10821_v51  ;;  %v9663_v11 = vld [vmem:[%s17528_s9 + $0xc8] sm:$0xff] }
 0x898   : > { %9628 = vmatmul.msk.f32.gmra.mxu3 %vm1911_vm10, %v9616_v34  ;;  %9621 = vmatmul.msk.f32.gmra.mxu1 %vm1911_vm10, %v9617_v6  ;;  %v6965_v16 = vsel %vm1497_vm8, %v10798_v22, %v10777_v31  ;;  %v6969_v62 = vsel %vm1497_vm8, %v10778_v38, %v10798_v22  ;;  %v9664_v22 = vld [vmem:[%s17528_s9 + $0xd0] sm:$0xff] }
 0x899   : > { %v6966_v42 = vsel %vm1497_vm8, %v10797_v19, %v10782_v13  ;;  %v6970_v33 = vsel %vm1497_vm8, %v10783_v12, %v10797_v19  ;;  %v7114_v35 = vsel %vm1641_vm9, %v10823_v57, %v10818_v45  ;;  %v10822_v12 = vunpack.i.l.bf16 %v10821_v51 }
 0x89a   : > { %v7120_v13 = vsel %vm1641_vm9, %v10813_v56, %v10812_v43 }
 0x89c   : > { %9642 = vmatmul.msk.f32.vlgmr.msra.gmra.mxu2 %vm1911_vm10, %v9630_v30 }
 0x89d   : > { %7029 = vmatpush.msra.mxu2 %v6962_v8  ;;  %v10806_v53 = vpop.permute.xlu0 %10805  ;;  %v10831_v61 = vpop.permute.xlu1 %10830 }
 0x89e   : > { %v10808_v27 = vunpack.i.h.bf16 %v10806_v53  ;;  %v10807_v2 = vunpack.i.l.bf16 %v10806_v53  ;;  %v10832_v20 = vunpack.i.l.bf16 %v10831_v61 }
 0x89f   : > { %7030 = vmatpush.msra.mxu2 %v6961_v28  ;;  %9634 = vmatmul.msk.f32.vlgmr.msra.gmra.mxu0 %vm1911_vm10, %v9630_v30 }
 0x8a0   : > { %9629 = vmatmul.msk.f32.gmra.mxu3 %vm1911_vm10, %v9617_v6  ;;  %9638 = vmatmul.msk.f32.vlgmr.msra.gmra.mxu1 %vm1911_vm10, %v9630_v30  ;;  %v7121_v63 = vsel %vm1641_vm9, %v10808_v27, %v10807_v2  ;;  %v7118_v6 = vsel %vm1641_vm9, %v10817_v52, %v10823_v57  ;;  %v10833_v30 = vunpack.i.h.bf16 %v10831_v61  ;;  %v7116_v8 = vsel %vm1641_vm9, %v10812_v43, %v10832_v20 }
 0x8a1   : > { %6906 = vmatpush.msra.mxu0 %v6818_v59  ;;  %7000 = vmatpush.msra.mxu1 %v6966_v42  ;;  %v7112_v39 = vsel %vm1641_vm9, %v10832_v20, %v10813_v56  ;;  %v9695_v56 = vld [vmem:[%s17528_s9 + $0x108] sm:$0xff] }
 0x8a2   : > { %7031 = vmatpush.msra.mxu2 %v6960_v32  ;;  %v7115_v1 = vsel %vm1641_vm9, %v10822_v12, %v10833_v30 }
 0x8a3   : > { %6907 = vmatpush.msra.mxu0 %v6817_v50  ;;  %7001 = vmatpush.msra.mxu1 %v6965_v16  ;;  %v9665_v50 = vld [vmem:[%s17528_s9 + $0xd8] sm:$0xff] }
 0x8a4   : > { %7032 = vmatpush.msra.mxu2 %v6959_v15 }
 0x8a5   : > { %9643 = vmatmul.msk.f32.gmra.mxu2 %vm1911_vm10, %v9631_v3  ;;  %6908 = vmatpush.msra.mxu0 %v6816_v18  ;;  %v10826_v48 = vpop.permute.xlu0 %10825  ;;  %v9678_v18 = vld [vmem:[%s17528_s9 + $0xe0] sm:$0xff] }
 0x8a6   : > { %7002 = vmatpush.msra.mxu1 %v6964_v26  ;;  %v10828_v25 = vunpack.i.h.bf16 %v10826_v48  ;;  %v10827_v55 = vunpack.i.l.bf16 %v10826_v48 }
 0x8a7   : > { %6909 = vmatpush.msra.mxu0 %v6815_v7 }
 0x8a8   : > { %7003 = vmatpush.msra.mxu1 %v6963_v29  ;;  %9635 = vmatmul.msk.f32.gmra.mxu0 %vm1911_vm10, %v9631_v3  ;;  %v7117_v38 = vsel %vm1641_vm9, %v10807_v2, %v10828_v25  ;;  %v7113_v31 = vsel %vm1641_vm9, %v10828_v25, %v10808_v27  ;;  %v7119_v5 = vsel %vm1641_vm9, %v10827_v55, %v10822_v12  ;;  %v9694_v27 = vld [vmem:[%s17528_s9 + $0x100] sm:$0xff]  ;;  %v9697_v12 = vld [vmem:[%s17528_s9 + $0x118] sm:$0xff] }
 0x8a9   : > { %9639 = vmatmul.msk.f32.gmra.mxu1 %vm1911_vm10, %v9631_v3  ;;  %9650 = vmatmul.msk.f32.vlgmr.msra.gmra.mxu3 %vm1911_vm10, %v9646_v37  ;;  %v7111_v0 = vsel %vm1641_vm9, %v10833_v30, %v10827_v55 }
 0x8aa   : > { %7058 = vmatpush.msra.mxu3 %v6970_v33  ;;  %v9679_v33 = vld [vmem:[%s17528_s9 + $0xe8] sm:$0xff] }
 0x8ac   : > { %7059 = vmatpush.msra.mxu3 %v6969_v62 }
 0x8ad   : > { %9644 = vmatmul.msk.f32.gmra.mxu2 %vm1911_vm10, %v9632_v9 }
 0x8ae   : > { %7060 = vmatpush.msra.mxu3 %v6968_v14 }
 0x8b0   : > { %7061 = vmatpush.msra.mxu3 %v6967_v21  ;;  %9636 = vmatmul.msk.f32.gmra.mxu0 %vm1911_vm10, %v9632_v9  ;;  %v9680_v21 = vld [vmem:[%s17528_s9 + $0xf0] sm:$0xff] }
 0x8b1   : > { %9640 = vmatmul.msk.f32.gmra.mxu1 %vm1911_vm10, %v9632_v9  ;;  %9651 = vmatmul.msk.f32.gmra.mxu3 %vm1911_vm10, %v15883_v10 }
 0x8b5   : > { %9645 = vmatmul.msk.f32.gmra.mxu2 %vm1911_vm10, %v9633_v41 }
 0x8b8   : > { %9637 = vmatmul.msk.f32.gmra.mxu0 %vm1911_vm10, %v9633_v41 }
 0x8b9   : > { %9641 = vmatmul.msk.f32.gmra.mxu1 %vm1911_vm10, %v9633_v41  ;;  %9652 = vmatmul.msk.f32.gmra.mxu3 %vm1911_vm10, %v15898_v46 }
 0x8bc   : > { %v15913_v44 = vpop.f32.mrf.mxu0 }
 0x8bd   : > { %9666 = vmatmul.msk.f32.vlgmr.msrb.gmra.mxu2 %vm1911_vm10, %v15907_v58  ;;  %v15915_v34 = vpop.f32.mrf.mxu1 }
 0x8be   : > { %7210 = vmatpush.msrb.mxu2 %v7122_v60  ;;  %v15922_v49 = vpop.f32.mrf.mxu2 }
 0x8c0   : > { %7211 = vmatpush.msrb.mxu2 %v7121_v63  ;;  %9654 = vmatmul.msk.f32.vlgmr.msrb.gmra.mxu0 %vm1911_vm10, %v9646_v37  ;;  %v9696_v63 = vld [vmem:[%s17528_s9 + $0x110] sm:$0xff] }
 0x8c1   : > { %9653 = vmatmul.msk.f32.gmra.mxu3 %vm1911_vm10, %v9649_v54  ;;  %9658 = vmatmul.msk.f32.vlgmr.msrb.gmra.mxu1 %vm1911_vm10, %v9646_v37 }
 0x8c2   : > { %7152 = vmatpush.msrb.mxu0 %v7118_v6  ;;  %7181 = vmatpush.msrb.mxu1 %v7114_v35 }
 0x8c3   : > { %7212 = vmatpush.msrb.mxu2 %v7120_v13 }
 0x8c4   : > { %7153 = vmatpush.msrb.mxu0 %v7117_v38  ;;  %7182 = vmatpush.msrb.mxu1 %v7113_v31  ;;  %v15944_v24 = vpop.f32.mrf.mxu0 }
 0x8c5   : > { %7213 = vmatpush.msrb.mxu2 %v7119_v5  ;;  %v15949_v19 = vpop.f32.mrf.mxu1 }
 0x8c6   : > { %9667 = vmatmul.msk.f32.gmra.mxu2 %vm1911_vm10, %v9663_v11  ;;  %7154 = vmatpush.msrb.mxu0 %v7116_v8  ;;  %v15953_v28 = vpop.f32.mrf.mxu2 }
 0x8c7   : > { %7183 = vmatpush.msrb.mxu1 %v7112_v39 }
 0x8c8   : > { %7155 = vmatpush.msrb.mxu0 %v7115_v1 }
 0x8c9   : > { %7184 = vmatpush.msrb.mxu1 %v7111_v0  ;;  %9655 = vmatmul.msk.f32.gmra.mxu0 %vm1911_vm10, %v15883_v10  ;;  %v15963_v17 = vpop.f32.mrf.mxu3 }
 0x8ca   : > { %9659 = vmatmul.msk.f32.gmra.mxu1 %vm1911_vm10, %v15883_v10  ;;  %9670 = vmatmul.msk.f32.vlgmr.msrb.gmra.mxu3 %vm1911_vm10, %v15907_v58 }
 0x8cc   : > { %v15968_v59 = vpop.f32.mrf.mxu0 }
 0x8cd   : > { %v15971_v36 = vpop.f32.mrf.mxu1 }
 0x8ce   : > { %9668 = vmatmul.msk.f32.gmra.mxu2 %vm1911_vm10, %v9664_v22  ;;  %v15973_v42 = vpop.f32.mrf.mxu2 }
 0x8d1   : > { %9656 = vmatmul.msk.f32.gmra.mxu0 %vm1911_vm10, %v15898_v46  ;;  %v15980_v32 = vpop.f32.mrf.mxu3 }
 0x8d2   : > { %9660 = vmatmul.msk.f32.gmra.mxu1 %vm1911_vm10, %v15898_v46  ;;  %9671 = vmatmul.msk.f32.gmra.mxu3 %vm1911_vm10, %v9663_v11  ;;  %v9681_v46 = vld [vmem:[%s17528_s9 + $0xf8] sm:$0xff] }
 0x8d4   : > { %v15985_v3 = vpop.f32.mrf.mxu0 }
 0x8d5   : > { %v15988_v47 = vpop.f32.mrf.mxu1 }
 0x8d6   : > { %9669 = vmatmul.msk.f32.gmra.mxu2 %vm1911_vm10, %v9665_v50  ;;  %v15990_v16 = vpop.f32.mrf.mxu2 }
 0x8d9   : > { %9657 = vmatmul.msk.f32.gmra.mxu0 %vm1911_vm10, %v9649_v54  ;;  %v15995_v15 = vpop.f32.mrf.mxu3 }
 0x8da   : > { %9661 = vmatmul.msk.f32.gmra.mxu1 %vm1911_vm10, %v9649_v54  ;;  %9672 = vmatmul.msk.f32.gmra.mxu3 %vm1911_vm10, %v9664_v22 }
 0x8dc   : > { %v16000_v26 = vpop.f32.mrf.mxu0 }
 0x8dd   : > { %v16003_v7 = vpop.f32.mrf.mxu1 }
 0x8de   : > { %9686 = vmatmul.msk.f32.vlgmr.msra.gmra.mxu2 %vm1911_vm10, %v9678_v18  ;;  %v16005_v37 = vpop.f32.mrf.mxu2 }
 0x8e1   : > { %9674 = vmatmul.msk.f32.vlgmr.msra.gmra.mxu0 %vm1911_vm10, %v15907_v58  ;;  %v16011_v29 = vpop.f32.mrf.mxu3 }
 0x8e2   : > { %9673 = vmatmul.msk.f32.gmra.mxu3 %vm1911_vm10, %v9665_v50  ;;  %9682 = vmatmul.msk.f32.vlgmr.msra.gmra.mxu1 %vm1911_vm10, %v9678_v18 }
 0x8e4   : > { %v16016_v9 = vpop.f32.mrf.mxu0 }
 0x8e5   : > { %v16019_v62 = vpop.f32.mrf.mxu1 }
 0x8e6   : > { %9687 = vmatmul.msk.f32.gmra.mxu2 %vm1911_vm10, %v9679_v33  ;;  %v16021_v14 = vpop.f32.mrf.mxu2 }
 0x8e9   : > { %9675 = vmatmul.msk.f32.gmra.mxu0 %vm1911_vm10, %v9663_v11 }
 0x8ea   : > { %9683 = vmatmul.msk.f32.gmra.mxu1 %vm1911_vm10, %v9679_v33  ;;  %9690 = vmatmul.msk.f32.vlgmr.msra.gmra.mxu3 %vm1911_vm10, %v9678_v18  ;;  %v16026_v10 = vpop.f32.mrf.mxu3 }
 0x8ec   : > { %v16031_v4 = vpop.f32.mrf.mxu0 }
 0x8ed   : > { %v16034_v53 = vpop.f32.mrf.mxu1 }
 0x8ee   : > { %9688 = vmatmul.msk.f32.gmra.mxu2 %vm1911_vm10, %v9680_v21  ;;  %v16036_v41 = vpop.f32.mrf.mxu2 }
 0x8f1   : > { %9676 = vmatmul.msk.f32.gmra.mxu0 %vm1911_vm10, %v9664_v22 }
 0x8f2   : > { %9684 = vmatmul.msk.f32.gmra.mxu1 %vm1911_vm10, %v9680_v21  ;;  %9691 = vmatmul.msk.f32.gmra.mxu3 %vm1911_vm10, %v9679_v33  ;;  %v16041_v23 = vpop.f32.mrf.mxu3 }
 0x8f4   : > { %v16046_v45 = vpop.f32.mrf.mxu0 }
 0x8f5   : > { %v16049_v52 = vpop.f32.mrf.mxu1 }
 0x8f6   : > { %9689 = vmatmul.msk.f32.gmra.mxu2 %vm1911_vm10, %v9681_v46  ;;  %v16051_v51 = vpop.f32.mrf.mxu2 }
 0x8f9   : > { %9677 = vmatmul.msk.f32.gmra.mxu0 %vm1911_vm10, %v9665_v50 }
 0x8fa   : > { %9685 = vmatmul.msk.f32.gmra.mxu1 %vm1911_vm10, %v9681_v46  ;;  %9692 = vmatmul.msk.f32.gmra.mxu3 %vm1911_vm10, %v9680_v21 }
 0x8fb   : > { %v16056_v58 = vpop.f32.mrf.mxu3 }
 0x8fc   : > { %v16061_v2 = vpop.f32.mrf.mxu0 }
 0x8fd   : > { %v16064_v48 = vpop.f32.mrf.mxu1 }
 0x8fe   : > { %9706 = vmatmul.msk.f32.vlgmr.msrb.gmra.mxu2 %vm1911_vm10, %v9694_v27  ;;  %v16066_v57 = vpop.f32.mrf.mxu2 }
 0x901   : > { %9698 = vmatmul.msk.f32.vlgmr.msrb.gmra.mxu0 %vm1911_vm10, %v9694_v27 }
 0x902   : > { %9693 = vmatmul.msk.f32.gmra.mxu3 %vm1911_vm10, %v9681_v46  ;;  %9702 = vmatmul.msk.f32.vlgmr.msrb.gmra.mxu1 %vm1911_vm10, %v9694_v27 }
 0x903   : > { %v16071_v60 = vpop.f32.mrf.mxu3 }
 0x904   : > { %17874 = vst [vmem:[#allocation8_spill] sm:$0xff] %v16071_v60  ;;  %v16076_v43 = vpop.f32.mrf.mxu0 }
 0x905   : > { %v16079_v61 = vpop.f32.mrf.mxu1 }
 0x906   : > { %9707 = vmatmul.msk.f32.gmra.mxu2 %vm1911_vm10, %v9695_v56 }
 0x907   : > { %v16081_v54 = vpop.f32.mrf.mxu2 }
 0x909   : > { %9699 = vmatmul.msk.f32.gmra.mxu0 %vm1911_vm10, %v9695_v56 }
 0x90a   : > { %9703 = vmatmul.msk.f32.gmra.mxu1 %vm1911_vm10, %v9695_v56 }
 0x90b   : > { %v16085_v25 = vpop.f32.mrf.mxu3 }
 0x90c   : > { %17875 = vst [vmem:[#allocation23_spill] sm:$0xff] %v16085_v25  ;;  %v16090_v55 = vpop.f32.mrf.mxu0 }
 0x90d   : > { %v16093_v20 = vpop.f32.mrf.mxu1 }
 0x90e   : > { %9708 = vmatmul.msk.f32.gmra.mxu2 %vm1911_vm10, %v9696_v63 }
 0x90f   : > { %v16095_v6 = vpop.f32.mrf.mxu2 }
 0x910   : > { %17876 = vst [vmem:[#allocation4_spill] sm:$0xff] %v16095_v6 }
 0x911   : > { %9700 = vmatmul.msk.f32.gmra.mxu0 %vm1911_vm10, %v9696_v63 }
 0x912   : > { %9704 = vmatmul.msk.f32.gmra.mxu1 %vm1911_vm10, %v9696_v63 }
 0x913   : > { %v16099_v35 = vpop.f32.mrf.mxu3 }
 0x914   : > { %v16104_v13 = vpop.f32.mrf.mxu0 }
 0x915   : > { %17877 = vst [vmem:[#allocation14_spill] sm:$0xff] %v16104_v13  ;;  %v16107_v30 = vpop.f32.mrf.mxu1 }
 0x916   : > { %9709 = vmatmul.msk.f32.gmra.mxu2 %vm1911_vm10, %v9697_v12  ;;  %17878 = vst [vmem:[#allocation39_spill] sm:$0xff] %v16107_v30 }
 0x917   : > { %v16109_v38 = vpop.f32.mrf.mxu2 }
 0x918   : > { %17879 = vst [vmem:[#allocation9_spill] sm:$0xff] %v16109_v38 }
 0x919   : > { %9701 = vmatmul.msk.f32.gmra.mxu0 %vm1911_vm10, %v9697_v12 }
 0x91a   : > { %9705 = vmatmul.msk.f32.gmra.mxu1 %vm1911_vm10, %v9697_v12 }
 0x91b   : > { %v16113_v31 = vpop.f32.mrf.mxu3 }
 0x91c   : > { %17880 = vst [vmem:[#allocation6_spill] sm:$0xff] %v16113_v31  ;;  %v16115_v11 = vpop.f32.mrf.mxu0 }
 0x91d   : > { %17881 = vst [vmem:[#allocation11_spill] sm:$0xff] %v16115_v11  ;;  %v16117_v5 = vpop.f32.mrf.mxu1 }
 0x91f   : > { %v16119_v8 = vpop.f32.mrf.mxu2 }
 0x920   : > { %17882 = vst [vmem:[#allocation34_spill] sm:$0xff] %v16119_v8 }
 0x923   : > { %v16121_v39 = vpop.f32.mrf.mxu3 }
 0x924   : > { %17883 = vst [vmem:[#allocation36_spill] sm:$0xff] %v16121_v39 }
 0x925   : > { %v6552_v1 = vpop.f32.mrf.mxu0 }
 0x926   : > { %v16123_v0 = vpop.f32.mrf.mxu1 }
 0x928   : > { %v16125_v22 = vpop.f32.mrf.mxu2 }
 0x92c   : > { %v16127_v50 = vpop.f32.mrf.mxu3 }
 0x92d   : > { %17884 = vst [vmem:[#allocation12_spill] sm:$0xff] %v16127_v50  ;;  %v16129_v18 = vpop.f32.mrf.mxu0 }
 0x92e   : > { %v16131_v33 = vpop.f32.mrf.mxu1 }
 0x92f   : > { %17885 = vst [vmem:[#allocation5_spill] sm:$0xff] %v16131_v33 }
 0x930   : > { %v16133_v21 = vpop.f32.mrf.mxu2 }
 0x931   : > { %17886 = vst [vmem:[#allocation19_spill] sm:$0xff] %v16133_v21 }
 0x934   : > { %v6704_v46 = vpop.f32.mrf.mxu3 }
 0x935   : > { %v16135_v27 = vpop.f32.mrf.mxu0 }
 0x936   : > { %17887 = vst [vmem:[#allocation32_spill] sm:$0xff] %v16135_v27  ;;  %v16137_v56 = vpop.f32.mrf.mxu1 }
 0x937   : > { %17888 = vst [vmem:[#allocation33_spill] sm:$0xff] %v16137_v56 }
 0x938   : > { %v16139_v63 = vpop.f32.mrf.mxu2 }
 0x939   : > { %17889 = vst [vmem:[#allocation20_spill] sm:$0xff] %v16139_v63 }
 0x93c   : > { %v16141_v12 = vpop.f32.mrf.mxu3 }
 0x93d   : > { %17890 = vst [vmem:[#allocation29_spill] sm:$0xff] %v16141_v12  ;;  %v16143_v40 = vpop.f32.mrf.mxu0 }
 0x93e   : > { %v16145_v8 = vpop.f32.mrf.mxu1 }
 0x93f   : > { %17891 = vst [vmem:[#allocation24_spill] sm:$0xff] %v16145_v8 }
 0x940   : > { %v16147_v50 = vpop.f32.mrf.mxu2 }
 0x941   : > { %17892 = vst [vmem:[#allocation22_spill] sm:$0xff] %v16147_v50 }
 0x944   : > { %v16149_v39 = vpop.f32.mrf.mxu3 }
 0x945   : > { %17893 = vst [vmem:[#allocation37_spill] sm:$0xff] %v16149_v39 }
 0x946   : > { %v6733_v11 = vpop.f32.mrf.mxu0 }
 0x947   : > { %v6762_v38 = vpop.f32.mrf.mxu1 }
 0x949   : > { %v6856_v33 = vpop.f32.mrf.mxu2 }
 0x94d   : > { %v16151_v30 = vpop.f32.mrf.mxu3 }
 0x94e   : > { %17894 = vst [vmem:[#allocation17_spill] sm:$0xff] %v16151_v30  ;;  %v16153_v27 = vpop.f32.mrf.mxu0 }
 0x94f   : > { %17895 = vst [vmem:[#allocation28_spill] sm:$0xff] %v16153_v27  ;;  %v16155_v56 = vpop.f32.mrf.mxu1 }
 0x950   : > { %17896 = vst [vmem:[#allocation40_spill] sm:$0xff] %v16155_v56 }
 0x951   : > { %v16157_v63 = vpop.f32.mrf.mxu2 }
 0x952   : > { %17897 = vst [vmem:[#allocation26_spill] sm:$0xff] %v16157_v63 }
 0x955   : > { %v6885_v8 = vpop.f32.mrf.mxu3 }
 0x956   : > { %v16159_v13 = vpop.f32.mrf.mxu0 }
 0x957   : > { %17898 = vst [vmem:[#allocation16_spill] sm:$0xff] %v16159_v13  ;;  %v16161_v21 = vpop.f32.mrf.mxu1 }
 0x958   : > { %17899 = vst [vmem:[#allocation3_spill] sm:$0xff] %v16161_v21 }
 0x959   : > { %v16163_v6 = vpop.f32.mrf.mxu2 }
 0x95a   : > { %17900 = vst [vmem:[#allocation13_spill] sm:$0xff] %v16163_v6 }
 0x95d   : > { %v16171_v25 = vpop.f32.mrf.mxu3 }
 0x95e   : > { %v16165_v50 = vpop.f32.mrf.mxu0  ;;  %17904 = vst [vmem:[#allocation10_spill] sm:$0xff] %v16171_v25  ;;  %v6145_v25 = vadd.f32 %v15980_v32, %v15944_v24  ;;  %v6142_v32 = vadd.f32 %v15963_v17, %v15913_v44  ;;  %v6151_v44 = vadd.f32 %v16011_v29, %v15985_v3  ;;  %v6180_v3 = vadd.f32 %v16046_v45, %v15988_v47 }
 0x95f   : > { %17901 = vst [vmem:[#allocation7_spill] sm:$0xff] %v16165_v50  ;;  %v16167_v39 = vpop.f32.mrf.mxu1 }
 0x960   : > { %17902 = vst [vmem:[#allocation18_spill] sm:$0xff] %v16167_v39  ;;  %v6354_v30 = vadd.f32 %v16021_v14, %v6145_v25 }
 0x961   : > { %v16169_v12 = vpop.f32.mrf.mxu2 }
 0x962   : > { %17903 = vst [vmem:[#allocation31_spill] sm:$0xff] %v16169_v12 }
 0x965   : > { %v16173_v60 = vpop.f32.mrf.mxu3 }
 0x966   : > { %v6914_v27 = vpop.f32.mrf.mxu0  ;;  %17905 = vst [vmem:[#allocation30_spill] sm:$0xff] %v16173_v60  ;;  %v6174_v60 = vadd.f32 %v16016_v9, %v15949_v19 }
 0x967   : > { %v7008_v31 = vpop.f32.mrf.mxu1 }
 0x969   : > { %v7037_v56 = vpop.f32.mrf.mxu2 }
 0x96d   : > { %v16181_v6 = vpop.f32.mrf.mxu3 }
 0x96e   : > { %v16175_v63 = vpop.f32.mrf.mxu0  ;;  %17908 = vst [vmem:[#allocation21_spill] sm:$0xff] %v16181_v6  ;;  %v6171_v6 = vadd.f32 %v16000_v26, %v15915_v34  ;;  %v6200_v34 = vadd.f32 %v16003_v7, %v15922_v49  ;;  %v6206_v49 = vadd.f32 %v16034_v53, %v15973_v42 }
 0x96f   : > { %17906 = vst [vmem:[#allocation27_spill] sm:$0xff] %v16175_v63  ;;  %v16177_v13 = vpop.f32.mrf.mxu1  ;;  %v6203_v63 = vadd.f32 %v16019_v62, %v15953_v28  ;;  %v6148_v28 = vadd.f32 %v15995_v15, %v15968_v59  ;;  %v6177_v59 = vadd.f32 %v16031_v4, %v15971_v36  ;;  %v6209_v36 = vadd.f32 %v16049_v52, %v15990_v16 }
 0x970   : > { %v6352_v14 = vadd.f32 %v16026_v10, %v6171_v6  ;;  %v6360_v4 = vadd.f32 %v16051_v51, %v6151_v44  ;;  %v6353_v47 = vadd.f32 %v16061_v2, %v6200_v34  ;;  %v6359_v45 = vadd.f32 %v16090_v55, %v6206_v49  ;;  %v17911_v51 = vld [vmem:[#allocation17_spill] sm:$0xff]  ;;  %v17919_v34 = vld [vmem:[#allocation14_spill] sm:$0xff] }
 0x971   : > { %v16179_v21 = vpop.f32.mrf.mxu2 }
 0x972   : > { %17907 = vst [vmem:[#allocation35_spill] sm:$0xff] %v16179_v21  ;;  %v6356_v21 = vadd.f32 %v16076_v43, %v6203_v63  ;;  %v6504_v17 = vadd.f32 %v16066_v57, %v6352_v14  ;;  %v17918_v63 = vld [vmem:[#allocation19_spill] sm:$0xff] }
 0x974   : > { %v6508_v62 = vadd.f32 %v16099_v35, %v6356_v21  ;;  %v6620_v29 = vadd.f32 %v16117_v5, %v6504_v17  ;;  %v17922_v17 = vld [vmem:[#allocation5_spill] sm:$0xff] }
 0x976   : > { %v16183_v50 = vpop.f32.mrf.mxu0  ;;  %v6624_v7 = vadd.f32 %v16125_v22, %v6508_v62  ;;  %v17914_v22 = vld [vmem:[#allocation23_spill] sm:$0xff] }
 0x977   : > { %17909 = vst [vmem:[#allocation38_spill] sm:$0xff] %v16183_v50  ;;  %v16185_v39 = vpop.f32.mrf.mxu1  ;;  %v6506_v50 = vadd.f32 %v16079_v61, %v6354_v30  ;;  %v16228_v61 = vpop.permute.xlu2 %7260  ;;  %v6505_v55 = vadd.f32 %v17914_v22, %v6353_v47  ;;  %v17920_v62 = vld [vmem:[#allocation39_spill] sm:$0xff]  ;;  %v17933_v22 = vld [vmem:[#allocation37_spill] sm:$0xff] }
 0x978   : > { %17910 = vst [vmem:[#allocation15_spill] sm:$0xff] %v16185_v39  ;;  %v6355_v39 = vadd.f32 %v16041_v23, %v6174_v60  ;;  %v7066_v23 = vpop.f32.mrf.mxu3  ;;  %v6351_v60 = vadd.f32 %v16005_v37, %v6142_v32  ;;  %v6357_v37 = vadd.f32 %v16036_v41, %v6148_v28  ;;  %v6776_v53 = vadd.f32 %v6762_v38, %v6624_v7 }
 0x979   : > { %v16189_v12 = vpop.f32.mrf.mxu2  ;;  %v6622_v19 = vadd.f32 %v6552_v1, %v6506_v50  ;;  %v6772_v41 = vadd.f32 %v16143_v40, %v6620_v29  ;;  %v17913_v40 = vld [vmem:[#allocation6_spill] sm:$0xff]  ;;  %v17925_v29 = vld [vmem:[#allocation11_spill] sm:$0xff] }
 0x97a   : > { %v6507_v26 = vadd.f32 %v16081_v54, %v6355_v39  ;;  %v6358_v54 = vadd.f32 %v16056_v58, %v6177_v59  ;;  %v6509_v25 = vadd.f32 %v16093_v20, %v6357_v37  ;;  %v6928_v30 = vadd.f32 %v6914_v27, %v6776_v53  ;;  %v7251_v39 = vpop.permute.xlu1 %7250  ;;  %v17912_v20 = vld [vmem:[#allocation8_spill] sm:$0xff]  ;;  %v17924_v37 = vld [vmem:[#allocation9_spill] sm:$0xff] }
 0x97b   : > { %v6774_v10 = vadd.f32 %v6704_v46, %v6622_v19  ;;  %v6503_v16 = vadd.f32 %v16064_v48, %v6351_v60  ;;  %v6924_v38 = vadd.f32 %v17911_v51, %v6772_v41  ;;  %v6361_v1 = vadd.f32 %v17912_v20, %v6180_v3  ;;  %v17923_v59 = vld [vmem:[#allocation40_spill] sm:$0xff]  ;;  %v17928_v41 = vld [vmem:[#allocation27_spill] sm:$0xff] }
 0x97c   : > { %v6623_v15 = vadd.f32 %v16123_v0, %v6507_v26  ;;  %v6625_v52 = vadd.f32 %v16129_v18, %v6509_v25  ;;  %v7080_v2 = vadd.f32 %v7066_v23, %v6928_v30  ;;  %v17917_v18 = vld [vmem:[#allocation4_spill] sm:$0xff]  ;;  %v6362_v26 = vadd.f32 %v17919_v34, %v6209_v36  ;;  %v17921_v23 = vld [vmem:[#allocation26_spill] sm:$0xff] }
 0x97d   : > { %v6926_v57 = vadd.f32 %v6856_v33, %v6774_v10  ;;  %v17916_v33 = vld [vmem:[#allocation31_spill] sm:$0xff]  ;;  %v6510_v27 = vadd.f32 %v17917_v18, %v6358_v54  ;;  %v6513_v3 = vadd.f32 %v17924_v37, %v6361_v1  ;;  %v11110_v1 = vld [vmem:[%s17532_s13 + $0x18] sm:$0xff] }
 0x97e   : > { %v16201_v24 = vpop.f32.mrf.mxu0  ;;  %v6775_v42 = vadd.f32 %v6733_v11, %v6623_v15  ;;  %v7076_v21 = vadd.f32 %v17916_v33, %v6924_v38 }
 0x97f   : > { %v7186_v9 = vpop.f32.mrf.mxu1  ;;  %v7078_v6 = vadd.f32 %v7008_v31, %v6926_v57  ;;  %v6511_v31 = vadd.f32 %v17913_v40, %v6359_v45  ;;  %v6626_v10 = vadd.f32 %v17922_v17, %v6510_v27  ;;  %v6619_v57 = vadd.f32 %v17925_v29, %v6503_v16  ;;  %v16257_v36 = vpop.permute.xlu2 %7245  ;;  %v17943_v29 = vld [vmem:[#allocation12_spill] sm:$0xff] }
 0x980   : > { %v6927_v35 = vadd.f32 %v6885_v8, %v6775_v42  ;;  %v17915_v8 = vld [vmem:[#allocation29_spill] sm:$0xff]  ;;  %v7069_v14 = vpop.f32.mrf.mxu3  ;;  %v7228_v44 = vadd.f32 %v7186_v9, %v7076_v21  ;;  %v17926_v42 = vld [vmem:[#allocation36_spill] sm:$0xff] }
 0x981   : > { %v16216_v43 = vpop.f32.mrf.mxu2  ;;  %v6777_v50 = vadd.f32 %v17915_v8, %v6625_v52  ;;  %v6627_v32 = vadd.f32 %v17918_v63, %v6511_v31  ;;  %v6514_v53 = vadd.f32 %v17926_v42, %v6362_v26  ;;  %v17938_v26 = vld [vmem:[#allocation13_spill] sm:$0xff]  ;;  %v6771_v42 = vadd.f32 %v17943_v29, %v6619_v57 }
 0x982   : > { %v7079_v0 = vadd.f32 %v7037_v56, %v6927_v35  ;;  %v6512_v56 = vadd.f32 %v17920_v62, %v6360_v4  ;;  %v17927_v4 = vld [vmem:[#allocation28_spill] sm:$0xff]  ;;  %v7264_v51 = vadd.f32 %v16257_v36, %v7228_v44 }
 0x983   : > { %v6929_v60 = vadd.f32 %v17921_v23, %v6777_v50  ;;  %v6779_v49 = vadd.f32 %v17923_v59, %v6627_v32  ;;  %v6778_v25 = vadd.f32 %v17927_v4, %v6626_v10  ;;  %v17929_v35 = vld [vmem:[#allocation32_spill] sm:$0xff]  ;;  %v17939_v23 = vld [vmem:[#allocation30_spill] sm:$0xff] }
 0x984   : > { %v6628_v30 = vadd.f32 %v17929_v35, %v6512_v56  ;;  %v17934_v50 = vld [vmem:[#allocation16_spill] sm:$0xff]  ;;  %v7276_v56 = vmax.f32 %v7264_v51, 0.0  ;;  %v11115_v51 = vld [vmem:[%s17532_s13 + $0x40] sm:$0xff] }
 0x985   : > { %v7081_v54 = vadd.f32 %v16177_v13, %v6929_v60  ;;  %v6931_v9 = vadd.f32 %v17928_v41, %v6779_v49  ;;  %v17940_v49 = vld [vmem:[#allocation24_spill] sm:$0xff] }
 0x986   : > { %v7160_v5 = vpop.f32.mrf.mxu0  ;;  %v6780_v8 = vadd.f32 %v17933_v22, %v6628_v30 }
 0x987   : > { %v7230_v11 = vadd.f32 %v7160_v5, %v7078_v6  ;;  %v7189_v58 = vpop.f32.mrf.mxu1  ;;  %v17930_v5 = vld [vmem:[#allocation33_spill] sm:$0xff]  ;;  %v7083_v20 = vadd.f32 %v7069_v14, %v6931_v9  ;;  %v17936_v14 = vld [vmem:[#allocation34_spill] sm:$0xff]  ;;  %v17944_v9 = vld [vmem:[#allocation7_spill] sm:$0xff] }
 0x988   : > { %v7231_v19 = vadd.f32 %v7189_v58, %v7079_v0  ;;  %v6629_v52 = vadd.f32 %v17930_v5, %v6513_v3  ;;  %v17931_v58 = vld [vmem:[#allocation10_spill] sm:$0xff]  ;;  %v17932_v0 = vld [vmem:[#allocation20_spill] sm:$0xff]  ;;  %v6932_v62 = vadd.f32 %v17938_v26, %v6780_v8  ;;  %v7072_v44 = vpop.f32.mrf.mxu3  ;;  %v17942_v3 = vld [vmem:[#allocation15_spill] sm:$0xff] }
 0x989   : > { %v7266_v48 = vadd.f32 %v7251_v39, %v7230_v11  ;;  %v7218_v46 = vpop.f32.mrf.mxu2  ;;  %v7256_v11 = vpop.permute.xlu0 %7255  ;;  %v6930_v13 = vadd.f32 %v17931_v58, %v6778_v25  ;;  %v17945_v58 = vld [vmem:[#allocation22_spill] sm:$0xff] }
 0x98a   : > { %v7232_v28 = vadd.f32 %v7218_v46, %v7080_v2  ;;  %v7267_v6 = vadd.f32 %v7251_v39, %v7231_v19  ;;  %v6630_v2 = vadd.f32 %v17932_v0, %v6514_v53  ;;  %v6781_v33 = vadd.f32 %v17934_v50, %v6629_v52  ;;  %v17935_v46 = vld [vmem:[#allocation35_spill] sm:$0xff]  ;;  %v17947_v50 = vld [vmem:[#allocation18_spill] sm:$0xff] }
 0x98b   : > { %v7278_v15 = vmax.f32 %v7266_v48, 0.0  ;;  %v7082_v18 = vadd.f32 %v17935_v46, %v6930_v13  ;;  %v6621_v19 = vadd.f32 %v17936_v14, %v6505_v55  ;;  %v7084_v55 = vadd.f32 %v17942_v3, %v6932_v62  ;;  %v11116_v14 = vld [vmem:[%s17532_s13 + $0x50] sm:$0xff]  ;;  %v11118_v26 = vld [vmem:[%s17532_s13 + $0x48] sm:$0xff]  ;;  %v11119_v62 = vld [vmem:[%s17532_s13 + $0x58] sm:$0xff] }
 0x98c   : > { %v7268_v7 = vadd.f32 %v7251_v39, %v7232_v28  ;;  %v11111_v39 = vld [vmem:[%s17532_s13 + $0x28] sm:$0xff]  ;;  %v7279_v27 = vmax.f32 %v7267_v6, 0.0  ;;  %v17937_v28 = vld [vmem:[#allocation3_spill] sm:$0xff]  ;;  %v6933_v60 = vadd.f32 %v17939_v23, %v6781_v33  ;;  %v6923_v13 = vadd.f32 %v17945_v58, %v6771_v42 }
 0x98d   : > { %v16268_v40 = vmul.f32 %v11110_v1, %v7278_v15  ;;  %v6782_v34 = vadd.f32 %v17937_v28, %v6630_v2  ;;  %v6773_v15 = vadd.f32 %v17940_v49, %v6621_v19  ;;  %v8608_v58 = vld [vmem:[%s17531_s12 + $0x10] sm:$0xff] }
 0x98e   : > { %v7280_v47 = vmax.f32 %v7268_v7, 0.0  ;;  %v7163_v45 = vpop.f32.mrf.mxu0  ;;  %v17941_v7 = vld [vmem:[#allocation38_spill] sm:$0xff]  ;;  %v7085_v53 = vadd.f32 %v16189_v12, %v6933_v60  ;;  %v11114_v12 = vld [vmem:[%s17532_s13 + $0x30] sm:$0xff]  ;;  %v7075_v33 = vadd.f32 %v17947_v50, %v6923_v13 }
 0x98f   : > { %v7233_v16 = vadd.f32 %v7163_v45, %v7081_v54  ;;  %v7192_v38 = vpop.f32.mrf.mxu1  ;;  %v6934_v37 = vadd.f32 %v17941_v7, %v6782_v34  ;;  %v11112_v54 = vld [vmem:[%s17532_s13 + $0x20] sm:$0xff]  ;;  %v6925_v6 = vadd.f32 %v17944_v9, %v6773_v15  ;;  %v8607_v50 = vld [vmem:[%s17531_s12 + $0x8] sm:$0xff] }
 0x990   : > { %v16273_v31 = vmul.f32 %v11111_v39, %v7280_v47  ;;  %v7234_v10 = vadd.f32 %v7192_v38, %v7082_v18  ;;  %v16297_v4 = vmul.f32 %v11112_v54, %v7279_v27  ;;  %v11113_v47 = vld [vmem:[%s17532_s13 + $0x8] sm:$0xff]  ;;  %v11121_v15 = vld [vmem:[%s17532_s13] sm:$0xff] }
 0x991   : > { %v7269_v21 = vadd.f32 %v7256_v11, %v7233_v16  ;;  %v7221_v48 = vpop.f32.mrf.mxu2  ;;  %v16303_v45 = vmul.f32 %v11113_v47, %v7276_v56  ;;  %v7086_v35 = vadd.f32 %v7072_v44, %v6934_v37 }
 0x992   : > { %v7235_v63 = vadd.f32 %v7221_v48, %v7083_v20  ;;  %v16281_v32 = vpack.i.bf16 %v16273_v31, %v16268_v40  ;;  %v7270_v52 = vadd.f32 %v7256_v11, %v7234_v10  ;;  %v17946_v20 = vld [vmem:[#allocation21_spill] sm:$0xff]  ;;  %v16359_v60 = vpack.i.bf16 %v16297_v4, %v16268_v40 }
 0x993   : > { %v7281_v17 = vmax.f32 %v7269_v21, 0.0  ;;  %v7077_v1 = vadd.f32 %v17946_v20, %v6925_v6  ;;  %v10899_v29 = vpack.i.bf16 %v16273_v31, %v16297_v4 }
 0x994   : > { %v7271_v59 = vadd.f32 %v7256_v11, %v7235_v63  ;;  %10835 = vrot.lane.b32.xlu2 %v16281_v32, %s17793_s24  ;;  %v16321_v11 = vpack.i.bf16 %v16303_v45, %v16297_v4  ;;  %v7282_v48 = vmax.f32 %v7270_v52, 0.0  ;;  %v7227_v63 = vadd.f32 %v16201_v24, %v7075_v33 }
 0x995   : > { %v16308_v5 = vmul.f32 %v11114_v12, %v7281_v17  ;;  %v7229_v21 = vadd.f32 %v16216_v43, %v7077_v1 }
 0x996   : > { %v7283_v25 = vmax.f32 %v7271_v59, 0.0  ;;  %v7166_v41 = vpop.f32.mrf.mxu0  ;;  %v7263_v23 = vadd.f32 %v16257_v36, %v7227_v63 }
 0x997   : > { %v7236_v57 = vadd.f32 %v7166_v41, %v7084_v55  ;;  %v7195_v30 = vpop.f32.mrf.mxu1  ;;  %v7265_v28 = vadd.f32 %v16257_v36, %v7229_v21  ;;  %v11120_v36 = vld [vmem:[%s17532_s13 + $0x10] sm:$0xff] }
 0x998   : > { %v16313_v16 = vmul.f32 %v11115_v51, %v7283_v25  ;;  %v7237_v38 = vadd.f32 %v7195_v30, %v7085_v53  ;;  %v7275_v59 = vmax.f32 %v7263_v23, 0.0 }
 0x999   : > { %v7272_v39 = vadd.f32 %v16228_v61, %v7236_v57  ;;  %v7224_v0 = vpop.f32.mrf.mxu2  ;;  %v7277_v10 = vmax.f32 %v7265_v28, 0.0 }
 0x99a   : > { %v7273_v2 = vadd.f32 %v16228_v61, %v7237_v38  ;;  %v7238_v22 = vadd.f32 %v7224_v0, %v7086_v35  ;;  %v16325_v8 = vpack.i.bf16 %v16313_v16, %v16308_v5  ;;  %v16377_v7 = vmul.f32 %v11121_v15, %v7275_v59  ;;  %v9710_v59 = vld [vmem:[%s17530_s11 + $0x20] sm:$0xff] }
 0x99b   : > { %v7284_v46 = vmax.f32 %v7272_v39, 0.0  ;;  %v16372_v49 = vmul.f32 %v11120_v36, %v7277_v10 }
 0x99c   : > { %v7285_v18 = vmax.f32 %v7273_v2, 0.0  ;;  %v7274_v27 = vadd.f32 %v16228_v61, %v7238_v22  ;;  %10860 = vrot.lane.b32.xlu2 %v16321_v11, %s17793_s24  ;;  %10840 = vrot.lane.b32.xlu1 %v16325_v8, %s17793_s24  ;;  %v11117_v61 = vld [vmem:[%s17532_s13 + $0x38] sm:$0xff]  ;;  %v10879_v25 = vpack.i.bf16 %v16303_v45, %v16377_v7  ;;  %v10919_v47 = vpack.i.bf16 %v16377_v7, %v16268_v40 }
 0x99d   : > { %v16344_v34 = vmul.f32 %v11117_v61, %v7282_v48  ;;  %v16349_v24 = vmul.f32 %v11118_v26, %v7284_v46  ;;  %v10889_v37 = vpack.i.bf16 %v16372_v49, %v16273_v31  ;;  %v10849_v55 = vpack.i.bf16 %v16372_v49, %v16377_v7 }
 0x99e   : > { %v16338_v19 = vmul.f32 %v11116_v14, %v7285_v18  ;;  %v7286_v43 = vmax.f32 %v7274_v27, 0.0  ;;  %v10909_v41 = vpack.i.bf16 %v16308_v5, %v16372_v49  ;;  %v10969_v57 = vpack.i.bf16 %v16372_v49, %v16303_v45 }
 0x99f   : > { %v10869_v3 = vpack.i.bf16 %v16344_v34, %v16308_v5  ;;  %v10894_v54 = vpack.i.bf16 %v16313_v16, %v16344_v34  ;;  %v10904_v9 = vpack.i.bf16 %v16303_v45, %v16349_v24  ;;  %v10974_v35 = vpack.i.bf16 %v16308_v5, %v16349_v24 }
 0x9a0   : > { %v16354_v56 = vmul.f32 %v11119_v62, %v7286_v43  ;;  %v10854_v44 = vpack.i.bf16 %v16344_v34, %v16338_v19  ;;  %v10864_v53 = vpack.i.bf16 %v16338_v19, %v16349_v24  ;;  %v10999_v30 = vpack.i.bf16 %v16344_v34, %v16372_v49 }
 0x9a2   : > { %v10844_v17 = vpack.i.bf16 %v16354_v56, %v16349_v24  ;;  %v16392_v42 = vpack.i.bf16 %v16313_v16, %v16354_v56  ;;  %v10914_v6 = vpack.i.bf16 %v16354_v56, %v16338_v19 }
 0x9a4   : > { %10875 = vrot.lane.b32.xlu2 %v16359_v60, %s17794_s28  ;;  %10855 = vrot.lane.b32.xlu1 %v10854_v44, %s17793_s24 }
 0x9a5   : > { %10845 = vrot.lane.b32.xlu0 %v10844_v17, %s17793_s24 }
 0x9ac   : > { %10890 = vrot.lane.b32.xlu2 %v10889_v37, %s17794_s28  ;;  %10870 = vrot.lane.b32.xlu1 %v10869_v3, %s17794_s28 }
 0x9ad   : > { %10850 = vrot.lane.b32.xlu0 %v10849_v55, %s17793_s24 }
 0x9b4   : > { %10900 = vrot.lane.b32.xlu2 %v10899_v29, %s17795_s16  ;;  %10885 = vrot.lane.b32.xlu1 %v16392_v42, %s17794_s28 }
 0x9b5   : > { %10865 = vrot.lane.b32.xlu0 %v10864_v53, %s17794_s28 }
 0x9bc   : > { %10930 = vrot.lane.b32.xlu2 %v10844_v17, %s17714_s27  ;;  %10895 = vrot.lane.b32.xlu1 %v10894_v54, %s17795_s16 }
 0x9bd   : > { %10880 = vrot.lane.b32.xlu0 %v10879_v25, %s17794_s28 }
 0x9c4   : > { %10935 = vrot.lane.b32.xlu2 %v16281_v32, %s17714_s27  ;;  %10910 = vrot.lane.b32.xlu1 %v10909_v41, %s17795_s16 }
 0x9c5   : > { %10905 = vrot.lane.b32.xlu0 %v10904_v9, %s17795_s16 }
 0x9cc   : > { %10950 = vrot.lane.b32.xlu2 %v16321_v11, %s17714_s27  ;;  %10925 = vrot.lane.b32.xlu1 %v16325_v8, %s17714_s27 }
 0x9cd   : > { %10915 = vrot.lane.b32.xlu0 %v10914_v6, %s17795_s16 }
 0x9d4   : > { %10960 = vrot.lane.b32.xlu2 %v10899_v29, %s17715_s22  ;;  %10945 = vrot.lane.b32.xlu1 %v10854_v44, %s17714_s27 }
 0x9d5   : > { %10920 = vrot.lane.b32.xlu0 %v10919_v47, %s17795_s16 }
 0x9dc   : > { %10980 = vrot.lane.b32.xlu2 %v10919_v47, %s17715_s22  ;;  %10955 = vrot.lane.b32.xlu1 %v10894_v54, %s17715_s22  ;;  %v9711_v47 = vld [vmem:[%s17530_s11 + $0x28] sm:$0xff] }
 0x9dd   : > { %10940 = vrot.lane.b32.xlu0 %v10849_v55, %s17714_s27 }
 0x9e4   : > { %10990 = vrot.lane.b32.xlu2 %v16281_v32, %s17636_s29  ;;  %10975 = vrot.lane.b32.xlu1 %v10974_v35, %s17715_s22  ;;  %v10994_v32 = vpack.i.bf16 %v16338_v19, %v16377_v7 }
 0x9e5   : > { %10965 = vrot.lane.b32.xlu0 %v10914_v6, %s17715_s22 }
 0x9ec   : > { %11005 = vrot.lane.b32.xlu2 %v10864_v53, %s17637_s30  ;;  %10985 = vrot.lane.b32.xlu1 %v16325_v8, %s17636_s29 }
 0x9ed   : > { %10970 = vrot.lane.b32.xlu0 %v10969_v57, %s17715_s22 }
 0x9ee   : > { %v10836_v12 = vpop.permute.xlu2 %10835 }
 0x9ef   : > { %v10837_v33 = vunpack.i.l.bf16 %v10836_v12 }
 0x9f4   : > { %11025 = vrot.lane.b32.xlu2 %v16359_v60, %s17637_s30  ;;  %11000 = vrot.lane.b32.xlu1 %v10999_v30, %s17636_s29 }
 0x9f5   : > { %10995 = vrot.lane.b32.xlu0 %v10994_v32, %s17636_s29  ;;  %v8609_v32 = vld [vmem:[%s17531_s12 + $0x18] sm:$0xff] }
 0x9f6   : > { %v10861_v52 = vpop.permute.xlu2 %10860 }
 0x9f7   : > { %v10862_v63 = vunpack.i.l.bf16 %v10861_v52  ;;  %v10863_v44 = vunpack.i.h.bf16 %v10861_v52 }
 0x9f9   : > { %v7368_v23 = vsel %vm551_vm0, %v10837_v33, %v10862_v63 }
 0x9fc   : > { %11040 = vrot.lane.b32.xlu2 %v10869_v3, %s17639_s21  ;;  %11020 = vrot.lane.b32.xlu1 %v10869_v3, %s17637_s30  ;;  %v8606_v3 = vld [vmem:[%s17531_s12] sm:$0xff] }
 0x9fd   : > { %11010 = vrot.lane.b32.xlu0 %v10844_v17, %s17636_s29 }
 0x9fe   : > { %v16461_v38 = vpop.permute.xlu2 %10875 }
 0x9ff   : > { %v10877_v52 = vunpack.i.l.bf16 %v16461_v38 }
 0xa04   : > { %11050 = vrot.lane.b32.xlu2 %v10879_v25, %s17639_s21  ;;  %11035 = vrot.lane.b32.xlu1 %v10864_v53, %s17639_s21 }
 0xa05   : > { %11015 = vrot.lane.b32.xlu0 %v16321_v11, %s17636_s29  ;;  %v10838_v11 = vunpack.i.h.bf16 %v10836_v12  ;;  %v10878_v12 = vunpack.i.h.bf16 %v16461_v38  ;;  %s9852_s29 = sshll.u32 %s17950_s19, 6 }
 0xa06   : > { %v16472_v21 = vpop.permute.xlu2 %10890 }
 0xa07   : > { %v7372_v26 = vsel %vm551_vm0, %v10838_v11, %v10837_v33 }
 0xa0c   : > { %11070 = vrot.lane.b32.xlu2 %v10889_v37, %s17639_s21  ;;  %11055 = vrot.lane.b32.xlu1 %v16392_v42, %s17637_s30 }
 0xa0d   : > { %11030 = vrot.lane.b32.xlu0 %v10879_v25, %s17637_s30 }
 0xa0e   : > { %v10841_v51 = vpop.permute.xlu1 %10840  ;;  %v16506_v55 = vpop.permute.xlu2 %10900 }
 0xa0f   : > { %v10843_v39 = vunpack.i.h.bf16 %v10841_v51  ;;  %v10842_v0 = vunpack.i.l.bf16 %v10841_v51  ;;  %v10892_v51 = vunpack.i.l.bf16 %v16472_v21 }
 0xa11   : > { %v7373_v14 = vsel %vm551_vm0, %v10843_v39, %v10842_v0 }
 0xa14   : > { %8622 = vperm.xlu2 %9873, %v8608_v58   ;;  %11065 = vrot.lane.b32.xlu1 %v10889_v37, %s17637_s30 }
 0xa15   : > { %11045 = vrot.lane.b32.xlu0 %v16359_v60, %s17639_s21  ;;  %v7364_v60 = vsel %vm551_vm0, %v10862_v63, %v10838_v11 }
 0xa16   : > { %v10856_v13 = vpop.permute.xlu1 %10855 }
 0xa17   : > { %v10857_v20 = vunpack.i.l.bf16 %v10856_v13  ;;  %v10846_v1 = vpop.permute.xlu0 %10845  ;;  %v10858_v8 = vunpack.i.h.bf16 %v10856_v13 }
 0xa18   : > { %v10848_v2 = vunpack.i.h.bf16 %v10846_v1  ;;  %v10847_v22 = vunpack.i.l.bf16 %v10846_v1 }
 0xa19   : > { %v7369_v43 = vsel %vm551_vm0, %v10842_v0, %v10858_v8  ;;  %v7365_v28 = vsel %vm551_vm0, %v10858_v8, %v10843_v39  ;;  %v7332_v0 = vsel %vm528_vm3, %v10892_v51, %v10877_v52 }
 0xa1a   : > { %v7374_v46 = vsel %vm551_vm0, %v10848_v2, %v10847_v22  ;;  %v7370_v18 = vsel %vm551_vm0, %v10847_v22, %v10857_v20  ;;  %v7366_v27 = vsel %vm551_vm0, %v10857_v20, %v10848_v2  ;;  %v16532_v20 = vpop.permute.xlu2 %10930  ;;  %v7328_v2 = vsel %vm528_vm3, %v10877_v52, %v10878_v12 }
 0xa1b   : > { %7404 = vmatpush.msrb.mxu3 %v7374_v46  ;;  %7433 = vmatpush.msra.mxu0 %v7370_v18  ;;  %v10893_v22 = vunpack.i.h.bf16 %v16472_v21  ;;  %v10933_v33 = vunpack.i.h.bf16 %v16532_v20  ;;  %v10932_v46 = vunpack.i.l.bf16 %v16532_v20  ;;  %v9712_v18 = vld [vmem:[%s17530_s11 + $0x30] sm:$0xff] }
 0xa1c   : > { %7462 = vmatpush.msra.mxu1 %v7366_v27  ;;  %8617 = vperm.xlu1 %9872, %v8607_v50   ;;  %v7324_v50 = vsel %vm528_vm3, %v10878_v12, %v10892_v51 }
 0xa1d   : > { %11060 = vrot.lane.b32.xlu0 %v16392_v42, %s17639_s21  ;;  %7405 = vmatpush.msrb.mxu3 %v7373_v14  ;;  %v7335_v14 = vld [vmem:[%s17530_s11] sm:$0xff]  ;;  %s17506_s21 = scalar_lea.vmem %s17534_s15, %s9852_s29 }
 0xa1e   : > { %7434 = vmatpush.msra.mxu0 %v7369_v43  ;;  %7463 = vmatpush.msra.mxu1 %v7365_v28  ;;  %v10871_v61 = vpop.permute.xlu1 %10870  ;;  %v7765_v43 = vsel %vm937_vm5, %v10933_v33, %v10932_v46 }
 0xa1f   : > { %v10851_v62 = vpop.permute.xlu0 %10850  ;;  %7406 = vmatpush.msrb.mxu3 %v7372_v26  ;;  %v10873_v41 = vunpack.i.h.bf16 %v10871_v61  ;;  %v10872_v9 = vunpack.i.l.bf16 %v10871_v61  ;;  %v9713_v26 = vld [vmem:[%s17530_s11 + $0x38] sm:$0xff] }
 0xa20   : > { %v10853_v17 = vunpack.i.h.bf16 %v10851_v62  ;;  %v10852_v10 = vunpack.i.l.bf16 %v10851_v62  ;;  %7435 = vmatpush.msra.mxu0 %v7368_v23  ;;  %7464 = vmatpush.msra.mxu1 %v7364_v60  ;;  %v7336_v23 = vld [vmem:[%s17530_s11 + $0x8] sm:$0xff] }
 0xa21   : > { %v7329_v13 = vsel %vm528_vm3, %v10872_v9, %v10873_v41 }
 0xa22   : > { %v7371_v36 = vsel %vm551_vm0, %v10853_v17, %v10852_v10  ;;  %v7367_v15 = vsel %vm551_vm0, %v10852_v10, %v10863_v44  ;;  %v7363_v37 = vsel %vm551_vm0, %v10863_v44, %v10853_v17  ;;  %v16577_v62 = vpop.permute.xlu2 %10935 }
 0xa23   : > { %7407 = vmatpush.msrb.mxu3 %v7371_v36  ;;  %7436 = vmatpush.msra.mxu0 %v7367_v15  ;;  %v10938_v44 = vunpack.i.h.bf16 %v16577_v62  ;;  %v10937_v17 = vunpack.i.l.bf16 %v16577_v62 }
 0xa24   : > { %7465 = vmatpush.msra.mxu1 %v7363_v37  ;;  %9714 = vmatmul.msk.f32.vlgmr.msrb.gmra.mxu3 %vm1911_vm10, %v9710_v59 }
 0xa25   : > { %9718 = vmatmul.msk.f32.vlgmr.msra.gmra.mxu0 %vm1911_vm10, %v9710_v59  ;;  %8612 = vperm.xlu0 %9871, %v8606_v3  }
 0xa26   : > { %v10886_v29 = vpop.permute.xlu1 %10885  ;;  %9722 = vmatmul.msk.f32.vlgmr.msra.gmra.mxu1 %vm1911_vm10, %v9710_v59 }
 0xa27   : > { %v10887_v42 = vunpack.i.l.bf16 %v10886_v29  ;;  %v10866_v53 = vpop.permute.xlu0 %10865  ;;  %v10888_v6 = vunpack.i.h.bf16 %v10886_v29 }
 0xa28   : > { %v10868_v54 = vunpack.i.h.bf16 %v10866_v53  ;;  %v10867_v25 = vunpack.i.l.bf16 %v10866_v53 }
 0xa29   : > { %v7333_v58 = vsel %vm528_vm3, %v10888_v6, %v10872_v9  ;;  %v7325_v38 = vsel %vm528_vm3, %v10873_v41, %v10888_v6  ;;  %v16611_v6 = vld [vmem:[%s17530_s11 + $0x10] sm:$0xff] }
 0xa2a   : > { %v7334_v35 = vsel %vm528_vm3, %v10887_v42, %v10867_v25  ;;  %v7330_v57 = vsel %vm528_vm3, %v10867_v25, %v10868_v54  ;;  %v7326_v30 = vsel %vm528_vm3, %v10868_v54, %v10887_v42 }
 0xa2b   : > { %7503 = vmatpush.msra.mxu2 %v7334_v35  ;;  %7532 = vmatpush.msra.mxu3 %v7330_v57  ;;  %v10903_v35 = vunpack.i.h.bf16 %v16506_v55  ;;  %v10902_v57 = vunpack.i.l.bf16 %v16506_v55 }
 0xa2c   : > { %7561 = vmatpush.msrb.mxu0 %v7326_v30  ;;  %9715 = vmatmul.msk.f32.gmra.mxu3 %vm1911_vm10, %v9711_v47  ;;  %v16621_v30 = vpop.permute.xlu2 %10950 }
 0xa2d   : > { %9719 = vmatmul.msk.f32.gmra.mxu0 %vm1911_vm10, %v9711_v47  ;;  %8627 = vperm.xlu0 %9871, %v8609_v32  }
 0xa2e   : > { %7504 = vmatpush.msra.mxu2 %v7333_v58  ;;  %7533 = vmatpush.msra.mxu3 %v7329_v13  ;;  %v16536_v1 = vpop.permute.xlu1 %10895 }
 0xa2f   : > { %7562 = vmatpush.msrb.mxu0 %v7325_v38  ;;  %v10881_v39 = vpop.permute.xlu0 %10880  ;;  %9723 = vmatmul.msk.f32.gmra.mxu1 %vm1911_vm10, %v9711_v47  ;;  %v10898_v29 = vunpack.i.h.bf16 %v16536_v1  ;;  %v10897_v54 = vunpack.i.l.bf16 %v16536_v1  ;;  %v7763_v47 = vsel %vm937_vm5, %v10938_v44, %v10937_v17  ;;  %v7603_v1 = vsel %vm793_vm4, %v10902_v57, %v10903_v35 }
 0xa30   : > { %v10883_v11 = vunpack.i.h.bf16 %v10881_v39  ;;  %v10882_v8 = vunpack.i.l.bf16 %v10881_v39  ;;  %7505 = vmatpush.msra.mxu2 %v7332_v0  ;;  %7534 = vmatpush.msra.mxu3 %v7328_v2 }
 0xa31   : > { %7563 = vmatpush.msrb.mxu0 %v7324_v50  ;;  %v7604_v51 = vsel %vm793_vm4, %v10897_v54, %v10898_v29 }
 0xa32   : > { %v7331_v27 = vsel %vm528_vm3, %v10893_v22, %v10882_v8  ;;  %v7327_v21 = vsel %vm528_vm3, %v10882_v8, %v10883_v11  ;;  %v7323_v63 = vsel %vm528_vm3, %v10883_v11, %v10893_v22  ;;  %v16646_v11 = vld [vmem:[%s17530_s11 + $0x18] sm:$0xff] }
 0xa33   : > { %7506 = vmatpush.msra.mxu2 %v7331_v27  ;;  %7535 = vmatpush.msra.mxu3 %v7327_v21 }
 0xa34   : > { %7564 = vmatpush.msrb.mxu0 %v7323_v63  ;;  %9716 = vmatmul.msk.f32.gmra.mxu3 %vm1911_vm10, %v9712_v18  ;;  %v16657_v27 = vpop.permute.xlu2 %10960 }
 0xa35   : > { %9720 = vmatmul.msk.f32.gmra.mxu0 %vm1911_vm10, %v9712_v18  ;;  %9726 = vmatmul.msk.f32.vlgmr.msra.gmra.mxu2 %vm1911_vm10, %v7335_v14 }
 0xa36   : > { %7795 = vmatpush.msra.mxu0 %v7765_v43  ;;  %v16569_v28 = vpop.permute.xlu1 %10910 }
 0xa37   : > { %v16571_v61 = vpop.permute.xlu0 %10905  ;;  %9724 = vmatmul.msk.f32.gmra.mxu1 %vm1911_vm10, %v9712_v18  ;;  %v10913_v42 = vunpack.i.h.bf16 %v16569_v28  ;;  %v10912_v12 = vunpack.i.l.bf16 %v16569_v28  ;;  %v16655_v18 = vld [vmem:[%s17530_s11 + $0x40] sm:$0xff] }
 0xa38   : > { %v10907_v15 = vunpack.i.l.bf16 %v16571_v61  ;;  %v10908_v52 = vunpack.i.h.bf16 %v16571_v61 }
 0xa39   : > { %v7612_v32 = vsel %vm793_vm4, %v10898_v29, %v10913_v42  ;;  %v7608_v55 = vsel %vm793_vm4, %v10913_v42, %v10897_v54 }
 0xa3a   : > { %v7602_v0 = vsel %vm793_vm4, %v10908_v52, %v10912_v12 }
 0xa3c   : > { %9717 = vmatmul.msk.f32.gmra.mxu3 %vm1911_vm10, %v9713_v26 }
 0xa3d   : > { %9721 = vmatmul.msk.f32.gmra.mxu0 %vm1911_vm10, %v9713_v26  ;;  %9727 = vmatmul.msk.f32.gmra.mxu2 %vm1911_vm10, %v7336_v23 }
 0xa3e   : > { %v16585_v60 = vpop.permute.xlu1 %10925 }
 0xa3f   : > { %v10928_v10 = vunpack.i.h.bf16 %v16585_v60  ;;  %v10927_v59 = vunpack.i.l.bf16 %v16585_v60  ;;  %v10916_v36 = vpop.permute.xlu0 %10915  ;;  %9725 = vmatmul.msk.f32.gmra.mxu1 %vm1911_vm10, %v9713_v26 }
 0xa40   : > { %v10918_v37 = vunpack.i.h.bf16 %v10916_v36  ;;  %v10917_v3 = vunpack.i.l.bf16 %v10916_v36  ;;  %v10981_v36 = vpop.permute.xlu2 %10980 }
 0xa41   : > { %v7764_v53 = vsel %vm937_vm5, %v10928_v10, %v10927_v59  ;;  %v10982_v42 = vunpack.i.l.bf16 %v10981_v36 }
 0xa42   : > { %v7613_v25 = vsel %vm793_vm4, %v10918_v37, %v10907_v15  ;;  %v7609_v41 = vsel %vm793_vm4, %v10907_v15, %v10917_v3  ;;  %v7605_v9 = vsel %vm793_vm4, %v10917_v3, %v10918_v37  ;;  %7796 = vmatpush.msra.mxu0 %v7764_v53  ;;  %v10983_v53 = vunpack.i.h.bf16 %v10981_v36 }
 0xa43   : > { %7643 = vmatpush.msrb.mxu1 %v7613_v25  ;;  %7672 = vmatpush.msrb.mxu2 %v7609_v41  ;;  %v9754_v41 = vld [vmem:[%s17530_s11 + $0x60] sm:$0xff] }
 0xa44   : > { %7701 = vmatpush.msrb.mxu3 %v7605_v9  ;;  %7797 = vmatpush.msra.mxu0 %v7763_v47  ;;  %v10963_v9 = vunpack.i.h.bf16 %v16657_v27  ;;  %v16758_v47 = vld [vmem:[%s17530_s11 + $0x58] sm:$0xff] }
 0xa45   : > { %9728 = vmatmul.msk.f32.gmra.mxu2 %vm1911_vm10, %v16611_v6  ;;  %9730 = vmatmul.msk.f32.vlgmr.msra.gmra.mxu3 %vm1911_vm10, %v7335_v14 }
 0xa46   : > { %9734 = vmatmul.msk.f32.vlgmr.msrb.gmra.mxu0 %vm1911_vm10, %v7335_v14  ;;  %7644 = vmatpush.msrb.mxu1 %v7612_v32  ;;  %v10946_v58 = vpop.permute.xlu1 %10945  ;;  %v10952_v14 = vunpack.i.l.bf16 %v16621_v30 }
 0xa47   : > { %7673 = vmatpush.msrb.mxu2 %v7608_v55  ;;  %7702 = vmatpush.msrb.mxu3 %v7604_v51  ;;  %v10921_v13 = vpop.permute.xlu0 %10920  ;;  %v10947_v8 = vunpack.i.l.bf16 %v10946_v58  ;;  %v10948_v50 = vunpack.i.h.bf16 %v10946_v58  ;;  %v8031_v51 = vsel %vm1209_vm6, %v10963_v9, %v10982_v42 }
 0xa48   : > { %v10922_v38 = vunpack.i.l.bf16 %v10921_v13  ;;  %v10923_v39 = vunpack.i.h.bf16 %v10921_v13  ;;  %v7759_v60 = vsel %vm937_vm5, %v10937_v17, %v10952_v14  ;;  %v9755_v13 = vld [vmem:[%s17530_s11 + $0x68] sm:$0xff] }
 0xa49   : > { %7703 = vmatpush.msrb.mxu3 %v7603_v1  ;;  %v7757_v43 = vsel %vm937_vm5, %v10947_v8, %v10933_v33  ;;  %v7756_v33 = vsel %vm937_vm5, %v10948_v50, %v10928_v10  ;;  %v7760_v20 = vsel %vm937_vm5, %v10927_v59, %v10948_v50 }
 0xa4a   : > { %v7611_v2 = vsel %vm793_vm4, %v10903_v35, %v10922_v38  ;;  %v7607_v22 = vsel %vm793_vm4, %v10922_v38, %v10902_v57  ;;  %v7606_v21 = vsel %vm793_vm4, %v10923_v39, %v10908_v52 }
 0xa4b   : > { %7704 = vmatpush.msrb.mxu3 %v7602_v0  ;;  %7645 = vmatpush.msrb.mxu1 %v7611_v2 }
 0xa4c   : > { %7674 = vmatpush.msrb.mxu2 %v7607_v22 }
 0xa4d   : > { %7911 = vmatpush.msra.mxu3 %v16349_v24  ;;  %9729 = vmatmul.msk.f32.gmra.mxu2 %vm1911_vm10, %v16646_v11  ;;  %v7610_v24 = vsel %vm793_vm4, %v10912_v12, %v10923_v39  ;;  %v16790_v39 = vpop.permute.xlu2 %10990 }
 0xa4e   : > { %9731 = vmatmul.msk.f32.gmra.mxu3 %vm1911_vm10, %v7336_v23  ;;  %9735 = vmatmul.msk.f32.gmra.mxu0 %vm1911_vm10, %v7336_v23  ;;  %v16665_v63 = vpop.permute.xlu1 %10955  ;;  %v10953_v23 = vunpack.i.h.bf16 %v16621_v30 }
 0xa4f   : > { %7912 = vmatpush.msra.mxu3 %v16308_v5  ;;  %7646 = vmatpush.msrb.mxu1 %v7610_v24  ;;  %v10941_v28 = vpop.permute.xlu0 %10940  ;;  %v7761_v5 = vsel %vm937_vm5, %v10932_v46, %v10947_v8  ;;  %v10957_v3 = vunpack.i.l.bf16 %v16665_v63  ;;  %v10958_v25 = vunpack.i.h.bf16 %v16665_v63 }
 0xa50   : > { %7675 = vmatpush.msrb.mxu2 %v7606_v21  ;;  %9742 = vmatmul.msk.f32.vlgmr.msrb.gmra.mxu1 %vm1911_vm10, %v16655_v18  ;;  %v10943_v61 = vunpack.i.h.bf16 %v10941_v28  ;;  %v10942_v26 = vunpack.i.l.bf16 %v10941_v28  ;;  %v10992_v28 = vunpack.i.l.bf16 %v16790_v39 }
 0xa51   : > { %7824 = vmatpush.msra.mxu1 %v7761_v5  ;;  %7913 = vmatpush.msra.mxu3 %v16268_v40  ;;  %v7755_v40 = vsel %vm937_vm5, %v10952_v14, %v10938_v44  ;;  %v8024_v32 = vsel %vm1209_vm6, %v10957_v3, %v10958_v25 }
 0xa52   : > { %7853 = vmatpush.msra.mxu2 %v7757_v43  ;;  %v7762_v46 = vsel %vm937_vm5, %v10943_v61, %v10942_v26  ;;  %v7758_v10 = vsel %vm937_vm5, %v10942_v26, %v10953_v23  ;;  %v7754_v59 = vsel %vm937_vm5, %v10953_v23, %v10943_v61  ;;  %v10993_v43 = vunpack.i.h.bf16 %v16790_v39  ;;  %v9773_v39 = vld [vmem:[%s17530_s11 + $0x98] sm:$0xff] }
 0xa53   : > { %7825 = vmatpush.msra.mxu1 %v7760_v20  ;;  %7914 = vmatpush.msra.mxu3 %v16377_v7  ;;  %v16712_v7 = vld [vmem:[%s17530_s11 + $0x48] sm:$0xff] }
 0xa54   : > { %7854 = vmatpush.msra.mxu2 %v7756_v33  ;;  %7798 = vmatpush.msra.mxu0 %v7762_v46 }
 0xa55   : > { %7826 = vmatpush.msra.mxu1 %v7759_v60  ;;  %9746 = vmatmul.msk.f32.vlgmr.msrb.gmra.mxu2 %vm1911_vm10, %v16655_v18  ;;  %v16816_v33 = vpop.permute.xlu2 %11005 }
 0xa56   : > { %7855 = vmatpush.msra.mxu2 %v7755_v40  ;;  %9732 = vmatmul.msk.f32.gmra.mxu3 %vm1911_vm10, %v16611_v6  ;;  %v10976_v62 = vpop.permute.xlu1 %10975 }
 0xa57   : > { %9736 = vmatmul.msk.f32.gmra.mxu0 %vm1911_vm10, %v16611_v6  ;;  %7827 = vmatpush.msra.mxu1 %v7758_v10  ;;  %v10977_v44 = vunpack.i.l.bf16 %v10976_v62  ;;  %v10966_v17 = vpop.permute.xlu0 %10965  ;;  %v10978_v15 = vunpack.i.h.bf16 %v10976_v62  ;;  %v9757_v10 = vld [vmem:[%s17530_s11 + $0x78] sm:$0xff]  ;;  %v9770_v62 = vld [vmem:[%s17530_s11 + $0x80] sm:$0xff] }
 0xa58   : > { %7856 = vmatpush.msra.mxu2 %v7754_v59  ;;  %7940 = vmatpush.msrb.mxu0 %v16338_v19  ;;  %v10967_v37 = vunpack.i.l.bf16 %v10966_v17 }
 0xa59   : > { %7969 = vmatpush.msrb.mxu1 %v16354_v56  ;;  %v8028_v19 = vsel %vm1209_vm6, %v10978_v15, %v10957_v3  ;;  %v10962_v56 = vunpack.i.l.bf16 %v16657_v27  ;;  %v8032_v52 = vsel %vm1209_vm6, %v10958_v25, %v10978_v15  ;;  %v9756_v27 = vld [vmem:[%s17530_s11 + $0x70] sm:$0xff] }
 0xa5a   : > { %9743 = vmatmul.msk.f32.gmra.mxu1 %vm1911_vm10, %v16712_v7  ;;  %7941 = vmatpush.msrb.mxu0 %v16344_v34  ;;  %v8029_v29 = vsel %vm1209_vm6, %v10977_v44, %v10967_v37 }
 0xa5b   : > { %7970 = vmatpush.msrb.mxu1 %v16313_v16  ;;  %8063 = vmatpush.msrb.mxu2 %v8029_v29  ;;  %v9740_v16 = vld [vmem:[%s17530_s11 + $0x50] sm:$0xff]  ;;  %v8027_v34 = vsel %vm1209_vm6, %v10982_v42, %v10962_v56  ;;  %v8023_v55 = vsel %vm1209_vm6, %v10962_v56, %v10963_v9 }
 0xa5c   : > { %7942 = vmatpush.msrb.mxu0 %v16297_v4 }
 0xa5d   : > { %7971 = vmatpush.msrb.mxu1 %v16273_v31  ;;  %8064 = vmatpush.msrb.mxu2 %v8028_v19  ;;  %v11026_v36 = vpop.permute.xlu2 %11025 }
 0xa5e   : > { %9733 = vmatmul.msk.f32.gmra.mxu3 %vm1911_vm10, %v16646_v11  ;;  %7943 = vmatpush.msrb.mxu0 %v16303_v45  ;;  %v16735_v4 = vpop.permute.xlu1 %10985  ;;  %v11028_v19 = vunpack.i.h.bf16 %v11026_v36  ;;  %v11027_v56 = vunpack.i.l.bf16 %v11026_v36 }
 0xa5f   : > { %7972 = vmatpush.msrb.mxu1 %v16372_v49  ;;  %9737 = vmatmul.msk.f32.gmra.mxu0 %vm1911_vm10, %v16646_v11  ;;  %v10971_v31 = vpop.permute.xlu0 %10970  ;;  %v10968_v49 = vunpack.i.h.bf16 %v10966_v17  ;;  %v10987_v50 = vunpack.i.l.bf16 %v16735_v4  ;;  %v10988_v63 = vunpack.i.h.bf16 %v16735_v4  ;;  %v11007_v17 = vunpack.i.l.bf16 %v16816_v33 }
 0xa60   : > { %9747 = vmatmul.msk.f32.gmra.mxu2 %vm1911_vm10, %v16712_v7  ;;  %v10972_v45 = vunpack.i.l.bf16 %v10971_v31  ;;  %v10973_v57 = vunpack.i.h.bf16 %v10971_v31 }
 0xa61   : > { %8065 = vmatpush.msrb.mxu2 %v8027_v34  ;;  %v8025_v6 = vsel %vm1209_vm6, %v10967_v37, %v10968_v49  ;;  %v8033_v30 = vsel %vm1209_vm6, %v10968_v49, %v10977_v44  ;;  %v11008_v44 = vunpack.i.h.bf16 %v16816_v33  ;;  %v8184_v4 = vsel %vm1353_vm7, %v10988_v63, %v10987_v50  ;;  %v9771_v49 = vld [vmem:[%s17530_s11 + $0x88] sm:$0xff] }
 0xa62   : > { %9744 = vmatmul.msk.f32.gmra.mxu1 %vm1911_vm10, %v9740_v16  ;;  %v8026_v54 = vsel %vm1209_vm6, %v10983_v53, %v10972_v45  ;;  %v8022_v58 = vsel %vm1209_vm6, %v10972_v45, %v10973_v57  ;;  %v8030_v38 = vsel %vm1209_vm6, %v10973_v57, %v10983_v53  ;;  %v8183_v45 = vsel %vm1353_vm7, %v10993_v43, %v10992_v28 }
 0xa63   : > { %8066 = vmatpush.msrb.mxu2 %v8026_v54  ;;  %v8331_v54 = vsel %vm1497_vm8, %v11027_v56, %v11028_v19 }
 0xa66   : > { %9750 = vmatmul.msk.f32.vlgmr.msrb.gmra.mxu3 %vm1911_vm10, %v16655_v18  ;;  %v16760_v35 = vpop.permute.xlu1 %11000 }
 0xa67   : > { %8092 = vmatpush.msrb.mxu3 %v8025_v6  ;;  %9758 = vmatmul.msk.f32.vlgmr.msra.gmra.mxu0 %vm1911_vm10, %v9754_v41  ;;  %v16768_v12 = vpop.permute.xlu0 %10995  ;;  %v11003_v0 = vunpack.i.h.bf16 %v16760_v35  ;;  %v11002_v60 = vunpack.i.l.bf16 %v16760_v35 }
 0xa68   : > { %9748 = vmatmul.msk.f32.gmra.mxu2 %vm1911_vm10, %v9740_v16  ;;  %8121 = vmatpush.msra.mxu0 %v8033_v30  ;;  %v10998_v2 = vunpack.i.h.bf16 %v16768_v12  ;;  %v10997_v23 = vunpack.i.l.bf16 %v16768_v12  ;;  %v16874_v30 = vpop.permute.xlu2 %11040 }
 0xa69   : > { %8093 = vmatpush.msrb.mxu3 %v8024_v32  ;;  %v8180_v24 = vsel %vm1353_vm7, %v10987_v50, %v11003_v0  ;;  %v8176_v26 = vsel %vm1353_vm7, %v11003_v0, %v10988_v63  ;;  %v9772_v32 = vld [vmem:[%s17530_s11 + $0x90] sm:$0xff] }
 0xa6a   : > { %9745 = vmatmul.msk.f32.gmra.mxu1 %vm1911_vm10, %v16758_v47  ;;  %8122 = vmatpush.msra.mxu0 %v8032_v52  ;;  %v8182_v25 = vsel %vm1353_vm7, %v11002_v60, %v10997_v23 }
 0xa6b   : > { %8094 = vmatpush.msrb.mxu3 %v8023_v55  ;;  %v9786_v55 = vld [vmem:[%s17530_s11 + $0xa0] sm:$0xff] }
 0xa6c   : > { %8123 = vmatpush.msra.mxu0 %v8031_v51 }
 0xa6d   : > { %8095 = vmatpush.msrb.mxu3 %v8022_v58 }
 0xa6e   : > { %9751 = vmatmul.msk.f32.gmra.mxu3 %vm1911_vm10, %v16712_v7  ;;  %8124 = vmatpush.msra.mxu0 %v8030_v38  ;;  %v16794_v22 = vpop.permute.xlu1 %11020 }
 0xa6f   : > { %9759 = vmatmul.msk.f32.gmra.mxu0 %vm1911_vm10, %v9755_v13  ;;  %v11011_v1 = vpop.permute.xlu0 %11010  ;;  %v11023_v37 = vunpack.i.h.bf16 %v16794_v22  ;;  %v11022_v3 = vunpack.i.l.bf16 %v16794_v22  ;;  %v9787_v22 = vld [vmem:[%s17530_s11 + $0xa8] sm:$0xff] }
 0xa70   : > { %9749 = vmatmul.msk.f32.gmra.mxu2 %vm1911_vm10, %v16758_v47  ;;  %v11012_v11 = vunpack.i.l.bf16 %v11011_v1  ;;  %v11013_v8 = vunpack.i.h.bf16 %v11011_v1 }
 0xa71   : > { %v8332_v53 = vsel %vm1497_vm8, %v11022_v3, %v11023_v37 }
 0xa72   : > { %9762 = vmatmul.msk.f32.vlgmr.msra.gmra.mxu1 %vm1911_vm10, %v9754_v41  ;;  %v8181_v18 = vsel %vm1353_vm7, %v11012_v11, %v10998_v2  ;;  %v8177_v21 = vsel %vm1353_vm7, %v10998_v2, %v11013_v8  ;;  %v8185_v29 = vsel %vm1353_vm7, %v11013_v8, %v11012_v11  ;;  %v16903_v2 = vpop.permute.xlu2 %11050 }
 0xa73   : > { %8215 = vmatpush.msra.mxu1 %v8181_v18 }
 0xa75   : > { %8216 = vmatpush.msra.mxu1 %v8180_v24  ;;  %v11043_v24 = vunpack.i.h.bf16 %v16874_v30 }
 0xa76   : > { %9752 = vmatmul.msk.f32.gmra.mxu3 %vm1911_vm10, %v9740_v16  ;;  %v16819_v20 = vpop.permute.xlu1 %11035  ;;  %v8333_v16 = vsel %vm1497_vm8, %v11007_v17, %v11008_v44 }
 0xa77   : > { %9760 = vmatmul.msk.f32.gmra.mxu0 %vm1911_vm10, %v9756_v27  ;;  %v11016_v14 = vpop.permute.xlu0 %11015  ;;  %v11038_v50 = vunpack.i.h.bf16 %v16819_v20  ;;  %v11037_v18 = vunpack.i.l.bf16 %v16819_v20  ;;  %v11052_v20 = vunpack.i.l.bf16 %v16903_v2 }
 0xa78   : > { %9766 = vmatmul.msk.f32.vlgmr.msra.gmra.mxu2 %vm1911_vm10, %v9754_v41  ;;  %v11018_v5 = vunpack.i.h.bf16 %v11016_v14  ;;  %v11017_v61 = vunpack.i.l.bf16 %v11016_v14  ;;  %v9788_v14 = vld [vmem:[%s17530_s11 + $0xb0] sm:$0xff] }
 0xa79   : > { %8244 = vmatpush.msra.mxu2 %v8177_v21  ;;  %v11042_v21 = vunpack.i.l.bf16 %v16874_v30 }
 0xa7a   : > { %9763 = vmatmul.msk.f32.gmra.mxu1 %vm1911_vm10, %v9755_v13  ;;  %v8179_v46 = vsel %vm1353_vm7, %v10992_v28, %v11017_v61  ;;  %v8175_v40 = vsel %vm1353_vm7, %v11017_v61, %v10993_v43  ;;  %v8178_v59 = vsel %vm1353_vm7, %v10997_v23, %v11018_v5  ;;  %v8174_v7 = vsel %vm1353_vm7, %v11018_v5, %v11002_v60  ;;  %v11071_v33 = vpop.permute.xlu2 %11070 }
 0xa7b   : > { %8245 = vmatpush.msra.mxu2 %v8176_v26  ;;  %8217 = vmatpush.msra.mxu1 %v8179_v46  ;;  %v8485_v61 = vsel %vm1641_vm9, %v11037_v18, %v11038_v50  ;;  %v11053_v23 = vunpack.i.h.bf16 %v16903_v2  ;;  %v9821_v2 = vld [vmem:[%s17530_s11 + $0xf8] sm:$0xff] }
 0xa7d   : > { %8246 = vmatpush.msra.mxu2 %v8175_v40  ;;  %8218 = vmatpush.msra.mxu1 %v8178_v59  ;;  %v8484_v40 = vsel %vm1641_vm9, %v11042_v21, %v11043_v24  ;;  %v11072_v59 = vunpack.i.l.bf16 %v11071_v33  ;;  %v8482_v36 = vsel %vm1641_vm9, %v11052_v20, %v11053_v23 }
 0xa7e   : > { %9753 = vmatmul.msk.f32.gmra.mxu3 %vm1911_vm10, %v16758_v47  ;;  %v11056_v15 = vpop.permute.xlu1 %11055 }
 0xa7f   : > { %8247 = vmatpush.msra.mxu2 %v8174_v7  ;;  %9761 = vmatmul.msk.f32.gmra.mxu0 %vm1911_vm10, %v9757_v10  ;;  %v11031_v42 = vpop.permute.xlu0 %11030  ;;  %v11057_v41 = vunpack.i.l.bf16 %v11056_v15  ;;  %v11058_v47 = vunpack.i.h.bf16 %v11056_v15  ;;  %v9789_v15 = vld [vmem:[%s17530_s11 + $0xb8] sm:$0xff] }
 0xa80   : > { %9767 = vmatmul.msk.f32.gmra.mxu2 %vm1911_vm10, %v9755_v13  ;;  %v11033_v31 = vunpack.i.h.bf16 %v11031_v42  ;;  %v11032_v34 = vunpack.i.l.bf16 %v11031_v42 }
 0xa81   : > { %v8329_v57 = vsel %vm1497_vm8, %v11008_v44, %v11057_v41  ;;  %v8328_v52 = vsel %vm1497_vm8, %v11023_v37, %v11058_v47  ;;  %v8337_v38 = vsel %vm1497_vm8, %v11057_v41, %v11007_v17  ;;  %v8336_v1 = vsel %vm1497_vm8, %v11058_v47, %v11022_v3  ;;  %v9802_v3 = vld [vmem:[%s17530_s11 + $0xc0] sm:$0xff] }
 0xa82   : > { %9764 = vmatmul.msk.f32.gmra.mxu1 %vm1911_vm10, %v9756_v27  ;;  %v8330_v9 = vsel %vm1497_vm8, %v11032_v34, %v11033_v31  ;;  %v9818_v47 = vld [vmem:[%s17530_s11 + $0xe0] sm:$0xff] }
 0xa86   : > { %9774 = vmatmul.msk.f32.vlgmr.msra.gmra.mxu3 %vm1911_vm10, %v9770_v62  ;;  %v11066_v6 = vpop.permute.xlu1 %11065 }
 0xa87   : > { %8273 = vmatpush.msra.mxu3 %v8185_v29  ;;  %9778 = vmatmul.msk.f32.vlgmr.msrb.gmra.mxu0 %vm1911_vm10, %v9770_v62  ;;  %v11067_v35 = vunpack.i.l.bf16 %v11066_v6  ;;  %v11068_v12 = vunpack.i.h.bf16 %v11066_v6  ;;  %v16887_v58 = vpop.permute.xlu0 %11045 }
 0xa88   : > { %9768 = vmatmul.msk.f32.gmra.mxu2 %vm1911_vm10, %v9756_v27  ;;  %8367 = vmatpush.msrb.mxu0 %v8333_v16  ;;  %v11048_v43 = vunpack.i.h.bf16 %v16887_v58  ;;  %v11047_v28 = vunpack.i.l.bf16 %v16887_v58 }
 0xa89   : > { %8274 = vmatpush.msra.mxu3 %v8184_v4  ;;  %v8327_v51 = vsel %vm1497_vm8, %v11028_v19, %v11067_v35  ;;  %v8326_v13 = vsel %vm1497_vm8, %v11033_v31, %v11068_v12  ;;  %v8335_v0 = vsel %vm1497_vm8, %v11067_v35, %v11027_v56  ;;  %v8334_v11 = vsel %vm1497_vm8, %v11068_v12, %v11032_v34  ;;  %v9803_v31 = vld [vmem:[%s17530_s11 + $0xc8] sm:$0xff]  ;;  %v9805_v35 = vld [vmem:[%s17530_s11 + $0xd8] sm:$0xff] }
 0xa8a   : > { %9765 = vmatmul.msk.f32.gmra.mxu1 %vm1911_vm10, %v9757_v10  ;;  %8368 = vmatpush.msrb.mxu0 %v8332_v53  ;;  %v8479_v17 = vsel %vm1641_vm9, %v11048_v43, %v11072_v59  ;;  %v8487_v4 = vsel %vm1641_vm9, %v11072_v59, %v11047_v28  ;;  %v9819_v12 = vld [vmem:[%s17530_s11 + $0xe8] sm:$0xff] }
 0xa8b   : > { %8275 = vmatpush.msra.mxu3 %v8183_v45 }
 0xa8c   : > { %8369 = vmatpush.msrb.mxu0 %v8331_v54 }
 0xa8d   : > { %8276 = vmatpush.msra.mxu3 %v8182_v25  ;;  %v9804_v25 = vld [vmem:[%s17530_s11 + $0xd0] sm:$0xff] }
 0xa8e   : > { %9775 = vmatmul.msk.f32.gmra.mxu3 %vm1911_vm10, %v9771_v49  ;;  %8370 = vmatpush.msrb.mxu0 %v8330_v9 }
 0xa8f   : > { %9779 = vmatmul.msk.f32.gmra.mxu0 %vm1911_vm10, %v9771_v49  ;;  %v11061_v8 = vpop.permute.xlu0 %11060 }
 0xa90   : > { %9769 = vmatmul.msk.f32.gmra.mxu2 %vm1911_vm10, %v9757_v10  ;;  %v11062_v63 = vunpack.i.l.bf16 %v11061_v8  ;;  %v11063_v5 = vunpack.i.h.bf16 %v11061_v8  ;;  %v11073_v10 = vunpack.i.h.bf16 %v11071_v33 }
 0xa92   : > { %9782 = vmatmul.msk.f32.vlgmr.msrb.gmra.mxu1 %vm1911_vm10, %v9770_v62  ;;  %v8481_v46 = vsel %vm1641_vm9, %v11038_v50, %v11062_v63  ;;  %v8480_v7 = vsel %vm1641_vm9, %v11043_v24, %v11063_v5  ;;  %v8483_v62 = vsel %vm1641_vm9, %v11047_v28, %v11048_v43  ;;  %v8478_v37 = vsel %vm1641_vm9, %v11053_v23, %v11073_v10 }
 0xa93   : > { %8396 = vmatpush.msrb.mxu1 %v8329_v57  ;;  %v8489_v19 = vsel %vm1641_vm9, %v11062_v63, %v11037_v18  ;;  %v8488_v16 = vsel %vm1641_vm9, %v11063_v5, %v11042_v21  ;;  %v8486_v34 = vsel %vm1641_vm9, %v11073_v10, %v11052_v20  ;;  %v9834_v18 = vld [vmem:[%s17530_s11 + $0x100] sm:$0xff] }
 0xa95   : > { %8397 = vmatpush.msrb.mxu1 %v8328_v52 }
 0xa96   : > { %9776 = vmatmul.msk.f32.gmra.mxu3 %vm1911_vm10, %v9772_v32 }
 0xa97   : > { %8398 = vmatpush.msrb.mxu1 %v8327_v51  ;;  %9780 = vmatmul.msk.f32.gmra.mxu0 %vm1911_vm10, %v9772_v32 }
 0xa98   : > { %9790 = vmatmul.msk.f32.vlgmr.msrb.gmra.mxu2 %vm1911_vm10, %v9786_v55 }
 0xa99   : > { %8399 = vmatpush.msrb.mxu1 %v8326_v13  ;;  %8425 = vmatpush.msrb.mxu2 %v8337_v38  ;;  %v9820_v13 = vld [vmem:[%s17530_s11 + $0xf0] sm:$0xff] }
 0xa9a   : > { %9783 = vmatmul.msk.f32.gmra.mxu1 %vm1911_vm10, %v9771_v49 }
 0xa9b   : > { %8426 = vmatpush.msrb.mxu2 %v8336_v1 }
 0xa9d   : > { %8427 = vmatpush.msrb.mxu2 %v8335_v0 }
 0xa9e   : > { %9777 = vmatmul.msk.f32.gmra.mxu3 %vm1911_vm10, %v9773_v39 }
 0xa9f   : > { %8428 = vmatpush.msrb.mxu2 %v8334_v11  ;;  %9781 = vmatmul.msk.f32.gmra.mxu0 %vm1911_vm10, %v9773_v39 }
 0xaa0   : > { %9791 = vmatmul.msk.f32.gmra.mxu2 %vm1911_vm10, %v9787_v22 }
 0xaa2   : > { %9784 = vmatmul.msk.f32.gmra.mxu1 %vm1911_vm10, %v9772_v32  ;;  %v16916_v27 = vpop.f32.mrf.mxu0 }
 0xaa3   : > { %v16928_v26 = vpop.f32.mrf.mxu1 }
 0xaa6   : > { %9794 = vmatmul.msk.f32.vlgmr.msrb.gmra.mxu3 %vm1911_vm10, %v9786_v55 }
 0xaa7   : > { %8519 = vmatpush.msrb.mxu3 %v8485_v61  ;;  %9798 = vmatmul.msk.f32.vlgmr.msra.gmra.mxu0 %vm1911_vm10, %v9786_v55  ;;  %v16938_v60 = vpop.f32.mrf.mxu3  ;;  %v9835_v61 = vld [vmem:[%s17530_s11 + $0x108] sm:$0xff] }
 0xaa8   : > { %9792 = vmatmul.msk.f32.gmra.mxu2 %vm1911_vm10, %v9788_v14  ;;  %8548 = vmatpush.msra.mxu0 %v8481_v46 }
 0xaa9   : > { %8520 = vmatpush.msrb.mxu3 %v8484_v40 }
 0xaaa   : > { %9785 = vmatmul.msk.f32.gmra.mxu1 %vm1911_vm10, %v9773_v39  ;;  %8549 = vmatpush.msra.mxu0 %v8480_v7  ;;  %v16945_v44 = vpop.f32.mrf.mxu0 }
 0xaab   : > { %8521 = vmatpush.msrb.mxu3 %v8483_v62 }
 0xaac   : > { %8550 = vmatpush.msra.mxu0 %v8479_v17  ;;  %v16964_v42 = vpop.f32.mrf.mxu1 }
 0xaad   : > { %8522 = vmatpush.msrb.mxu3 %v8482_v36 }
 0xaae   : > { %9795 = vmatmul.msk.f32.gmra.mxu3 %vm1911_vm10, %v9787_v22  ;;  %8551 = vmatpush.msra.mxu0 %v8478_v37 }
 0xaaf   : > { %9799 = vmatmul.msk.f32.gmra.mxu0 %vm1911_vm10, %v9787_v22  ;;  %v16962_v29 = vpop.f32.mrf.mxu3 }
 0xab0   : > { %9793 = vmatmul.msk.f32.gmra.mxu2 %vm1911_vm10, %v9789_v15 }
 0xab2   : > { %9806 = vmatmul.msk.f32.vlgmr.msra.gmra.mxu1 %vm1911_vm10, %v9802_v3  ;;  %v16969_v56 = vpop.f32.mrf.mxu0 }
 0xab3   : > { %8577 = vmatpush.msra.mxu1 %v8489_v19 }
 0xab4   : > { %v16986_v49 = vpop.f32.mrf.mxu1 }
 0xab5   : > { %8578 = vmatpush.msra.mxu1 %v8488_v16 }
 0xab6   : > { %9796 = vmatmul.msk.f32.gmra.mxu3 %vm1911_vm10, %v9788_v14 }
 0xab7   : > { %8579 = vmatpush.msra.mxu1 %v8487_v4  ;;  %9800 = vmatmul.msk.f32.gmra.mxu0 %vm1911_vm10, %v9788_v14  ;;  %v16983_v53 = vpop.f32.mrf.mxu3 }
 0xab8   : > { %9810 = vmatmul.msk.f32.vlgmr.msra.gmra.mxu2 %vm1911_vm10, %v9802_v3  ;;  %v7508_v45 = vpop.f32.mrf.mxu2 }
 0xab9   : > { %8580 = vmatpush.msra.mxu1 %v8486_v34  ;;  %v7509_v8 = vadd.f32 %v7508_v45, %v16938_v60 }
 0xaba   : > { %9807 = vmatmul.msk.f32.gmra.mxu1 %vm1911_vm10, %v9803_v31  ;;  %v16988_v54 = vpop.f32.mrf.mxu0 }
 0xabc   : > { %v17001_v6 = vpop.f32.mrf.mxu1 }
 0xabe   : > { %9797 = vmatmul.msk.f32.gmra.mxu3 %vm1911_vm10, %v9789_v15 }
 0xabf   : > { %9801 = vmatmul.msk.f32.gmra.mxu0 %vm1911_vm10, %v9789_v15  ;;  %v16996_v48 = vpop.f32.mrf.mxu3 }
 0xac0   : > { %9811 = vmatmul.msk.f32.gmra.mxu2 %vm1911_vm10, %v9803_v31  ;;  %v7511_v41 = vpop.f32.mrf.mxu2 }
 0xac1   : > { %v7512_v28 = vadd.f32 %v7511_v41, %v16962_v29 }
 0xac2   : > { %9808 = vmatmul.msk.f32.gmra.mxu1 %vm1911_vm10, %v9804_v25 }
 0xac3   : > { %v16999_v9 = vpop.f32.mrf.mxu0 }
 0xac6   : > { %9814 = vmatmul.msk.f32.vlgmr.msra.gmra.mxu3 %vm1911_vm10, %v9802_v3 }
 0xac7   : > { %9822 = vmatmul.msk.f32.vlgmr.msrb.gmra.mxu0 %vm1911_vm10, %v9818_v47 }
 0xac8   : > { %9812 = vmatmul.msk.f32.gmra.mxu2 %vm1911_vm10, %v9804_v25  ;;  %v7514_v57 = vpop.f32.mrf.mxu2  ;;  %v7537_v30 = vpop.f32.mrf.mxu3 }
 0xac9   : > { %v7538_v33 = vadd.f32 %v7537_v30, %v16916_v27  ;;  %v7515_v7 = vadd.f32 %v7514_v57, %v16983_v53  ;;  %v9836_v27 = vld [vmem:[%s17530_s11 + $0x110] sm:$0xff] }
 0xaca   : > { %9809 = vmatmul.msk.f32.gmra.mxu1 %vm1911_vm10, %v9805_v35 }
 0xacb   : > { %v17013_v32 = vpop.f32.mrf.mxu0 }
 0xacd   : > { %v7648_v52 = vpop.f32.mrf.mxu1 }
 0xace   : > { %9815 = vmatmul.msk.f32.gmra.mxu3 %vm1911_vm10, %v9803_v31  ;;  %v7718_v24 = vadd.f32 %v7648_v52, %v7509_v8 }
 0xacf   : > { %9823 = vmatmul.msk.f32.gmra.mxu0 %vm1911_vm10, %v9819_v12 }
 0xad0   : > { %9813 = vmatmul.msk.f32.gmra.mxu2 %vm1911_vm10, %v9805_v35  ;;  %v7517_v55 = vpop.f32.mrf.mxu2 }
 0xad1   : > { %v7540_v51 = vpop.f32.mrf.mxu3  ;;  %v7518_v4 = vadd.f32 %v7517_v55, %v16996_v48 }
 0xad2   : > { %9826 = vmatmul.msk.f32.vlgmr.msrb.gmra.mxu1 %vm1911_vm10, %v9818_v47  ;;  %v7541_v17 = vadd.f32 %v7540_v51, %v16945_v44  ;;  %v9837_v44 = vld [vmem:[%s17530_s11 + $0x118] sm:$0xff] }
 0xad4   : > { %v17022_v58 = vpop.f32.mrf.mxu0 }
 0xad6   : > { %9816 = vmatmul.msk.f32.gmra.mxu3 %vm1911_vm10, %v9804_v25 }
 0xad7   : > { %v7651_v38 = vpop.f32.mrf.mxu1  ;;  %9824 = vmatmul.msk.f32.gmra.mxu0 %vm1911_vm10, %v9820_v13 }
 0xad8   : > { %9830 = vmatmul.msk.f32.vlgmr.msrb.gmra.mxu2 %vm1911_vm10, %v9818_v47  ;;  %v7677_v39 = vpop.f32.mrf.mxu2  ;;  %v7721_v23 = vadd.f32 %v7651_v38, %v7512_v28  ;;  %v7567_v38 = vadd.f32 %v16999_v9, %v16928_v26 }
 0xad9   : > { %v7543_v1 = vpop.f32.mrf.mxu3  ;;  %v7719_v46 = vadd.f32 %v7677_v39, %v7538_v33 }
 0xada   : > { %9827 = vmatmul.msk.f32.gmra.mxu1 %vm1911_vm10, %v9819_v12  ;;  %v7544_v34 = vadd.f32 %v7543_v1, %v16969_v56 }
 0xadc   : > { %v17031_v0 = vpop.f32.mrf.mxu0 }
 0xade   : > { %9817 = vmatmul.msk.f32.gmra.mxu3 %vm1911_vm10, %v9805_v35 }
 0xadf   : > { %v7654_v22 = vpop.f32.mrf.mxu1  ;;  %9825 = vmatmul.msk.f32.gmra.mxu0 %vm1911_vm10, %v9821_v2 }
 0xae0   : > { %9831 = vmatmul.msk.f32.gmra.mxu2 %vm1911_vm10, %v9819_v12  ;;  %v7724_v36 = vadd.f32 %v7654_v22, %v7515_v7 }
 0xae1   : > { %v7546_v11 = vpop.f32.mrf.mxu3 }
 0xae2   : > { %9828 = vmatmul.msk.f32.gmra.mxu1 %vm1911_vm10, %v9820_v13  ;;  %v7547_v30 = vadd.f32 %v7546_v11, %v16988_v54  ;;  %v7576_v11 = vadd.f32 %v17031_v0, %v17001_v6  ;;  %v7573_v6 = vadd.f32 %v17022_v58, %v16986_v49 }
 0xae3   : > { %v7680_v50 = vpop.f32.mrf.mxu2 }
 0xae4   : > { %v7800_v21 = vpop.f32.mrf.mxu0  ;;  %v7722_v37 = vadd.f32 %v7680_v50, %v7541_v17 }
 0xae5   : > { %v7870_v63 = vadd.f32 %v7800_v21, %v7718_v24  ;;  %v7570_v21 = vadd.f32 %v17013_v32, %v16964_v42 }
 0xae6   : > { %9838 = vmatmul.msk.f32.vlgmr.msrb.gmra.mxu3 %vm1911_vm10, %v9834_v18 }
 0xae7   : > { %v7657_v14 = vpop.f32.mrf.mxu1  ;;  %9842 = vmatmul.msk.f32.vlgmr.msra.gmra.mxu0 %vm1911_vm10, %v9834_v18 }
 0xae8   : > { %9832 = vmatmul.msk.f32.gmra.mxu2 %vm1911_vm10, %v9820_v13  ;;  %v7727_v53 = vadd.f32 %v7657_v14, %v7518_v4 }
 0xae9   : > { %v7706_v43 = vpop.f32.mrf.mxu3 }
 0xaea   : > { %9829 = vmatmul.msk.f32.gmra.mxu1 %vm1911_vm10, %v9821_v2 }
 0xaeb   : > { %v7683_v5 = vpop.f32.mrf.mxu2 }
 0xaec   : > { %v7803_v20 = vpop.f32.mrf.mxu0  ;;  %v7725_v25 = vadd.f32 %v7683_v5, %v7544_v34  ;;  %v8698_v34 = vld [vmem:[%s17533_s14 + $0x1c0] sm:$0xff] }
 0xaed   : > { %v7873_v40 = vadd.f32 %v7803_v20, %v7721_v23 }
 0xaee   : > { %9839 = vmatmul.msk.f32.gmra.mxu3 %vm1911_vm10, %v9835_v61 }
 0xaef   : > { %v7829_v60 = vpop.f32.mrf.mxu1  ;;  %9843 = vmatmul.msk.f32.gmra.mxu0 %vm1911_vm10, %v9835_v61 }
 0xaf0   : > { %v7871_v10 = vadd.f32 %v7829_v60, %v7719_v46  ;;  %9833 = vmatmul.msk.f32.gmra.mxu2 %vm1911_vm10, %v9821_v2  ;;  %v7720_v2 = vadd.f32 %v7706_v43, %v7567_v38  ;;  %v8692_v38 = vld [vmem:[%s17533_s14 + $0x190] sm:$0xff] }
 0xaf1   : > { %v7709_v59 = vpop.f32.mrf.mxu3 }
 0xaf2   : > { %9846 = vmatmul.msk.f32.vlgmr.msra.gmra.mxu1 %vm1911_vm10, %v9834_v18  ;;  %v7723_v14 = vadd.f32 %v7709_v59, %v7570_v21  ;;  %v8688_v21 = vld [vmem:[%s17533_s14 + $0x170] sm:$0xff] }
 0xaf3   : > { %v7686_v62 = vpop.f32.mrf.mxu2 }
 0xaf4   : > { %v7806_v15 = vpop.f32.mrf.mxu0  ;;  %v7728_v52 = vadd.f32 %v7686_v62, %v7547_v30  ;;  %v8694_v30 = vld [vmem:[%s17533_s14 + $0x1a0] sm:$0xff] }
 0xaf5   : > { %v7876_v3 = vadd.f32 %v7806_v15, %v7724_v36 }
 0xaf6   : > { %9840 = vmatmul.msk.f32.gmra.mxu3 %vm1911_vm10, %v9836_v27 }
 0xaf7   : > { %v7832_v29 = vpop.f32.mrf.mxu1  ;;  %9844 = vmatmul.msk.f32.gmra.mxu0 %vm1911_vm10, %v9836_v27 }
 0xaf8   : > { %v7874_v19 = vadd.f32 %v7832_v29, %v7722_v37 }
 0xaf9   : > { %v7712_v16 = vpop.f32.mrf.mxu3 }
 0xafa   : > { %9847 = vmatmul.msk.f32.gmra.mxu1 %vm1911_vm10, %v9835_v61  ;;  %v7726_v42 = vadd.f32 %v7712_v16, %v7573_v6 }
 0xafb   : > { %v7858_v31 = vpop.f32.mrf.mxu2 }
 0xafc   : > { %v7809_v45 = vpop.f32.mrf.mxu0  ;;  %v7872_v8 = vadd.f32 %v7858_v31, %v7720_v2  ;;  %v8700_v31 = vld [vmem:[%s17533_s14 + $0x1d0] sm:$0xff]  ;;  %v8667_v2 = vld [vmem:[%s17533_s14 + $0xc8] sm:$0xff] }
 0xafd   : > { %v7879_v41 = vadd.f32 %v7809_v45, %v7727_v53  ;;  %v8673_v53 = vld [vmem:[%s17533_s14 + $0xf8] sm:$0xff] }
 0xafe   : > { %9841 = vmatmul.msk.f32.gmra.mxu3 %vm1911_vm10, %v9837_v44  ;;  %8825 = vmatpush.msrb.mxu1 %v8673_v53  ;;  %v8678_v53 = vld [vmem:[%s17533_s14 + $0x120] sm:$0xff] }
 0xaff   : > { %v7835_v47 = vpop.f32.mrf.mxu1  ;;  %9845 = vmatmul.msk.f32.gmra.mxu0 %vm1911_vm10, %v9837_v44 }
 0xb00   : > { %v7877_v35 = vadd.f32 %v7835_v47, %v7725_v25  ;;  %v8696_v47 = vld [vmem:[%s17533_s14 + $0x1b0] sm:$0xff] }
 0xb01   : > { %v7715_v48 = vpop.f32.mrf.mxu3 }
 0xb02   : > { %9848 = vmatmul.msk.f32.gmra.mxu1 %vm1911_vm10, %v9836_v27  ;;  %v7729_v26 = vadd.f32 %v7715_v48, %v7576_v11  ;;  %v8732_v11 = vld [vmem:[%s17533_s14 + $0x2d0] sm:$0xff] }
 0xb03   : > { %v7861_v57 = vpop.f32.mrf.mxu2 }
 0xb04   : > { %v7945_v12 = vpop.f32.mrf.mxu0  ;;  %v7875_v5 = vadd.f32 %v7861_v57, %v7723_v14  ;;  %v8668_v57 = vld [vmem:[%s17533_s14 + $0xd0] sm:$0xff] }
 0xb05   : > { %v17074_v55 = vadd.f32 %v7945_v12, %v7871_v10  ;;  %v8736_v12 = vld [vmem:[%s17533_s14 + $0x2f0] sm:$0xff] }
 0xb06   : > { %8796 = vmatpush.msrb.mxu0 %v8736_v12  ;;  %v8718_v12 = vld [vmem:[%s17533_s14 + $0x260] sm:$0xff] }
 0xb07   : > { %v7838_v56 = vpop.f32.mrf.mxu1 }
 0xb08   : > { %v7880_v51 = vadd.f32 %v7838_v56, %v7728_v52  ;;  %v8669_v56 = vld [vmem:[%s17533_s14 + $0xd8] sm:$0xff] }
 0xb09   : > { %v7916_v13 = vpop.f32.mrf.mxu3 }
 0xb0a   : > { %9849 = vmatmul.msk.f32.gmra.mxu1 %vm1911_vm10, %v9837_v44  ;;  %v17079_v1 = vadd.f32 %v7916_v13, %v7870_v63  ;;  %v8672_v44 = vld [vmem:[%s17533_s14 + $0xf0] sm:$0xff]  ;;  %v8666_v13 = vld [vmem:[%s17533_s14 + $0xc0] sm:$0xff] }
 0xb0b   : > { %v7864_v39 = vpop.f32.mrf.mxu2  ;;  %8738 = vmatpush.msra.mxu2 %v8672_v44 }
 0xb0c   : > { %v7948_v22 = vpop.f32.mrf.mxu0 }
 0xb0d   : > { %v17081_v50 = vadd.f32 %v7948_v22, %v7874_v19  ;;  %v8702_v19 = vld [vmem:[%s17533_s14 + $0x1e0] sm:$0xff]  ;;  %v8664_v22 = vld [vmem:[%s17533_s14 + $0xb0] sm:$0xff] }
 0xb0f   : > { %v7974_v54 = vpop.f32.mrf.mxu1 }
 0xb10   : > { %v7988_v18 = vadd.f32 %v7974_v54, %v7872_v8  ;;  %v8690_v8 = vld [vmem:[%s17533_s14 + $0x180] sm:$0xff] }
 0xb11   : > { %v7919_v24 = vpop.f32.mrf.mxu3 }
 0xb12   : > { %v17087_v9 = vadd.f32 %v7919_v24, %v7873_v40  ;;  %v7878_v40 = vadd.f32 %v7864_v39, %v7726_v42  ;;  %v8734_v39 = vld [vmem:[%s17533_s14 + $0x2e0] sm:$0xff] }
 0xb13   : > { %v7867_v63 = vpop.f32.mrf.mxu2  ;;  %8797 = vmatpush.msrb.mxu0 %v8734_v39  ;;  %v8662_v24 = vld [vmem:[%s17533_s14 + $0xa0] sm:$0xff] }
 0xb14   : > { %v7881_v28 = vadd.f32 %v7867_v63, %v7729_v26  ;;  %v7951_v43 = vpop.f32.mrf.mxu0  ;;  %v8730_v26 = vld [vmem:[%s17533_s14 + $0x2c0] sm:$0xff]  ;;  %v8663_v63 = vld [vmem:[%s17533_s14 + $0xa8] sm:$0xff] }
 0xb15   : > { %v17089_v61 = vadd.f32 %v7951_v43, %v7877_v35  ;;  %v8671_v35 = vld [vmem:[%s17533_s14 + $0xe8] sm:$0xff]  ;;  %8798 = vmatpush.msrb.mxu0 %v8732_v11  ;;  %v8660_v43 = vld [vmem:[%s17533_s14 + $0x90] sm:$0xff]  ;;  %v8658_v42 = vld [vmem:[%s17533_s14 + $0x80] sm:$0xff] }
 0xb16   : > { %8826 = vmatpush.msrb.mxu1 %v8671_v35  ;;  %v8714_v11 = vld [vmem:[%s17533_s14 + $0x240] sm:$0xff] }
 0xb17   : > { %v7977_v33 = vpop.f32.mrf.mxu1  ;;  %8799 = vmatpush.msrb.mxu0 %v8730_v26  ;;  %v8644_v26 = vld [vmem:[%s17533_s14 + $0x10] sm:$0xff] }
 0xb18   : > { %v7991_v23 = vadd.f32 %v7977_v33, %v7875_v5  ;;  %8827 = vmatpush.msrb.mxu1 %v8669_v56  ;;  %v8686_v5 = vld [vmem:[%s17533_s14 + $0x160] sm:$0xff]  ;;  %v8728_v33 = vld [vmem:[%s17533_s14 + $0x2b0] sm:$0xff]  ;;  %v8651_v56 = vld [vmem:[%s17533_s14 + $0x48] sm:$0xff] }
 0xb19   : > { %v7922_v20 = vpop.f32.mrf.mxu3  ;;  %8800 = vmatpush.msrb.mxu0 %v8728_v33  ;;  %v8642_v33 = vld [vmem:[%s17533_s14] sm:$0xff] }
 0xb1a   : > { %v17093_v0 = vadd.f32 %v7922_v20, %v7876_v3  ;;  %v8704_v3 = vld [vmem:[%s17533_s14 + $0x1f0] sm:$0xff]  ;;  %8828 = vmatpush.msrb.mxu1 %v8667_v2  ;;  %v8661_v20 = vld [vmem:[%s17533_s14 + $0x98] sm:$0xff] }
 0xb1b   : > { %v17095_v46 = vpop.f32.mrf.mxu2  ;;  %8767 = vmatpush.msra.mxu3 %v8704_v3  ;;  %v8654_v3 = vld [vmem:[%s17533_s14 + $0x60] sm:$0xff]  ;;  %v8716_v2 = vld [vmem:[%s17533_s14 + $0x250] sm:$0xff] }
 0xb1c   : > { %v7954_v32 = vpop.f32.mrf.mxu0 }
 0xb1d   : > { %v17097_v60 = vadd.f32 %v7954_v32, %v7880_v51  ;;  %8768 = vmatpush.msra.mxu3 %v8702_v19  ;;  %v8684_v32 = vld [vmem:[%s17533_s14 + $0x150] sm:$0xff]  ;;  %v8722_v19 = vld [vmem:[%s17533_s14 + $0x280] sm:$0xff] }
 0xb1f   : > { %v7980_v10 = vpop.f32.mrf.mxu1  ;;  %8769 = vmatpush.msra.mxu3 %v8700_v31  ;;  %v8655_v31 = vld [vmem:[%s17533_s14 + $0x68] sm:$0xff] }
 0xb20   : > { %v7994_v59 = vadd.f32 %v7980_v10, %v7878_v40  ;;  %v8726_v40 = vld [vmem:[%s17533_s14 + $0x2a0] sm:$0xff]  ;;  %v8659_v10 = vld [vmem:[%s17533_s14 + $0x88] sm:$0xff] }
 0xb21   : > { %v7925_v7 = vpop.f32.mrf.mxu3  ;;  %8770 = vmatpush.msra.mxu3 %v8698_v34  ;;  %8801 = vmatpush.msrb.mxu0 %v8726_v40  ;;  %v8652_v34 = vld [vmem:[%s17533_s14 + $0x50] sm:$0xff] }
 0xb22   : > { %v17099_v62 = vadd.f32 %v7925_v7, %v7879_v41  ;;  %v8670_v41 = vld [vmem:[%s17533_s14 + $0xe0] sm:$0xff] }
 0xb23   : > { %v17101_v27 = vpop.f32.mrf.mxu2  ;;  %8739 = vmatpush.msra.mxu2 %v8670_v41  ;;  %8771 = vmatpush.msra.mxu3 %v8696_v47  ;;  %v8682_v7 = vld [vmem:[%s17533_s14 + $0x140] sm:$0xff]  ;;  %v8720_v41 = vld [vmem:[%s17533_s14 + $0x270] sm:$0xff]  ;;  %v8653_v47 = vld [vmem:[%s17533_s14 + $0x58] sm:$0xff] }
 0xb24   : > { %v8126_v17 = vpop.f32.mrf.mxu0 }
 0xb25   : > { %v17103_v36 = vadd.f32 %v8126_v17, %v7988_v18  ;;  %8740 = vmatpush.msra.mxu2 %v8668_v57  ;;  %8772 = vmatpush.msra.mxu3 %v8694_v30  ;;  %v8665_v18 = vld [vmem:[%s17533_s14 + $0xb8] sm:$0xff]  ;;  %v8650_v57 = vld [vmem:[%s17533_s14 + $0x40] sm:$0xff]  ;;  %v8676_v30 = vld [vmem:[%s17533_s14 + $0x110] sm:$0xff] }
 0xb26   : > { %8829 = vmatpush.msrb.mxu1 %v8665_v18  ;;  %v8647_v18 = vld [vmem:[%s17533_s14 + $0x28] sm:$0xff] }
 0xb27   : > { %v7983_v49 = vpop.f32.mrf.mxu1  ;;  %8741 = vmatpush.msra.mxu2 %v8666_v13  ;;  %8773 = vmatpush.msra.mxu3 %v8692_v38  ;;  %v8648_v13 = vld [vmem:[%s17533_s14 + $0x30] sm:$0xff]  ;;  %v8674_v38 = vld [vmem:[%s17533_s14 + $0x100] sm:$0xff] }
 0xb28   : > { %v17105_v58 = vadd.f32 %v7983_v49, %v7881_v28  ;;  %8830 = vmatpush.msrb.mxu1 %v8663_v63  ;;  %v8724_v49 = vld [vmem:[%s17533_s14 + $0x290] sm:$0xff] }
 0xb29   : > { %v17107_v15 = vpop.f32.mrf.mxu3  ;;  %8742 = vmatpush.msra.mxu2 %v8664_v22  ;;  %8774 = vmatpush.msra.mxu3 %v8690_v8  ;;  %v8649_v22 = vld [vmem:[%s17533_s14 + $0x38] sm:$0xff]  ;;  %v8646_v8 = vld [vmem:[%s17533_s14 + $0x20] sm:$0xff]  ;;  %v8712_v63 = vld [vmem:[%s17533_s14 + $0x230] sm:$0xff] }
 0xb2a   : > { %8831 = vmatpush.msrb.mxu1 %v8661_v20  ;;  %8802 = vmatpush.msrb.mxu0 %v8724_v49  ;;  %v8710_v20 = vld [vmem:[%s17533_s14 + $0x220] sm:$0xff]  ;;  %v8731_v49 = vld [vmem:[%s17533_s14 + $0x2c8] sm:$0xff] }
 0xb2b   : > { %v17109_v37 = vpop.f32.mrf.mxu2  ;;  %8743 = vmatpush.msra.mxu2 %v8662_v24  ;;  %8775 = vmatpush.msra.mxu3 %v8688_v21  ;;  %v8737_v24 = vld [vmem:[%s17533_s14 + $0x2f8] sm:$0xff] }
 0xb2c   : > { %v8129_v29 = vpop.f32.mrf.mxu0  ;;  %8832 = vmatpush.msrb.mxu1 %v8659_v10  ;;  %8803 = vmatpush.msrb.mxu0 %v8722_v19 }
 0xb2d   : > { %v17117_v16 = vadd.f32 %v8129_v29, %v7991_v23  ;;  %8744 = vmatpush.msra.mxu2 %v8660_v43  ;;  %8776 = vmatpush.msra.mxu3 %v8686_v5  ;;  %v8680_v29 = vld [vmem:[%s17533_s14 + $0x130] sm:$0xff]  ;;  %v8735_v43 = vld [vmem:[%s17533_s14 + $0x2e8] sm:$0xff] }
 0xb2e   : > { %8804 = vmatpush.msrb.mxu0 %v8720_v41  ;;  %v8699_v41 = vld [vmem:[%s17533_s14 + $0x1c8] sm:$0xff] }
 0xb2f   : > { %v17119_v4 = vpop.f32.mrf.mxu1  ;;  %8745 = vmatpush.msra.mxu2 %v8658_v42  ;;  %8777 = vmatpush.msra.mxu3 %v8684_v32  ;;  %v8643_v42 = vld [vmem:[%s17533_s14 + $0x8] sm:$0xff]  ;;  %v8733_v32 = vld [vmem:[%s17533_s14 + $0x2d8] sm:$0xff] }
 0xb30   : > { %8805 = vmatpush.msrb.mxu0 %v8718_v12  ;;  %v8723_v12 = vld [vmem:[%s17533_s14 + $0x288] sm:$0xff] }
 0xb31   : > { %v17133_v45 = vpop.f32.mrf.mxu3  ;;  %8778 = vmatpush.msra.mxu3 %v8682_v7  ;;  %v8705_v7 = vld [vmem:[%s17533_s14 + $0x1f8] sm:$0xff] }
 0xb32   : > { %8806 = vmatpush.msrb.mxu0 %v8716_v2 }
 0xb33   : > { %v17135_v25 = vpop.f32.mrf.mxu2  ;;  %8779 = vmatpush.msra.mxu3 %v8680_v29  ;;  %v8729_v29 = vld [vmem:[%s17533_s14 + $0x2b8] sm:$0xff] }
 0xb34   : > { %v8132_v48 = vpop.f32.mrf.mxu0  ;;  %8807 = vmatpush.msrb.mxu0 %v8714_v11 }
 0xb35   : > { %v17155_v52 = vadd.f32 %v8132_v48, %v7994_v59  ;;  %v8656_v59 = vld [vmem:[%s17533_s14 + $0x70] sm:$0xff]  ;;  %8780 = vmatpush.msra.mxu3 %v8678_v53 }
 0xb36   : > { %8746 = vmatpush.msra.mxu2 %v8656_v59  ;;  %8808 = vmatpush.msrb.mxu0 %v8712_v63  ;;  %v8708_v59 = vld [vmem:[%s17533_s14 + $0x210] sm:$0xff] }
 0xb37   : > { %v17160_v51 = vpop.f32.mrf.mxu1  ;;  %8781 = vmatpush.msra.mxu3 %v8676_v30  ;;  %v8697_v30 = vld [vmem:[%s17533_s14 + $0x1b8] sm:$0xff] }
 0xb38   : > { %8747 = vmatpush.msra.mxu2 %v8654_v3  ;;  %8809 = vmatpush.msrb.mxu0 %v8710_v20  ;;  %v8703_v3 = vld [vmem:[%s17533_s14 + $0x1e8] sm:$0xff]  ;;  %v8138_v20 = vadd.f32 %v17095_v46, %v17079_v1  ;;  %v8613_v1 = vpop.permute.xlu0 %8612 }
 0xb39   : > { %v17180_v54 = vpop.f32.mrf.mxu3  ;;  %8782 = vmatpush.msra.mxu3 %v8674_v38  ;;  %v8721_v38 = vld [vmem:[%s17533_s14 + $0x278] sm:$0xff] }
 0xb3a   : > { %8748 = vmatpush.msra.mxu2 %v8652_v34  ;;  %8810 = vmatpush.msrb.mxu0 %v8708_v59  ;;  %v8727_v34 = vld [vmem:[%s17533_s14 + $0x2a8] sm:$0xff] }
 0xb3b   : > { %v17200_v14 = vpop.f32.mrf.mxu2  ;;  %8883 = vmatpush.msrb.mxu3 %v8737_v24  ;;  %v8717_v24 = vld [vmem:[%s17533_s14 + $0x258] sm:$0xff] }
 0xb3c   : > { %v8135_v28 = vpop.f32.mrf.mxu0  ;;  %8749 = vmatpush.msra.mxu2 %v8650_v57 }
 0xb3d   : > { %v17212_v23 = vadd.f32 %v8135_v28, %v17105_v58  ;;  %v8657_v58 = vld [vmem:[%s17533_s14 + $0x78] sm:$0xff]  ;;  %8884 = vmatpush.msrb.mxu3 %v8735_v43  ;;  %v8715_v43 = vld [vmem:[%s17533_s14 + $0x248] sm:$0xff] }
 0xb3e   : > { %8833 = vmatpush.msrb.mxu1 %v8657_v58  ;;  %8750 = vmatpush.msra.mxu2 %v8648_v13  ;;  %v8645_v28 = vld [vmem:[%s17533_s14 + $0x18] sm:$0xff]  ;;  %v8706_v58 = vld [vmem:[%s17533_s14 + $0x200] sm:$0xff]  ;;  %v8695_v13 = vld [vmem:[%s17533_s14 + $0x1a8] sm:$0xff] }
 0xb3f   : > { %v17217_v6 = vpop.f32.mrf.mxu1  ;;  %8885 = vmatpush.msrb.mxu3 %v8733_v32  ;;  %8811 = vmatpush.msrb.mxu0 %v8706_v58 }
 0xb40   : > { %8834 = vmatpush.msrb.mxu1 %v8655_v31  ;;  %8751 = vmatpush.msra.mxu2 %v8646_v8  ;;  %v8701_v31 = vld [vmem:[%s17533_s14 + $0x1d8] sm:$0xff]  ;;  %v8719_v8 = vld [vmem:[%s17533_s14 + $0x268] sm:$0xff] }
 0xb41   : > { %v17237_v17 = vpop.f32.mrf.mxu3  ;;  %8886 = vmatpush.msrb.mxu3 %v8731_v49  ;;  %v8290_v49 = vadd.f32 %v17119_v4, %v8138_v20  ;;  %v8709_v4 = vld [vmem:[%s17533_s14 + $0x218] sm:$0xff]  ;;  %v8144_v20 = vadd.f32 %v17109_v37, %v17093_v0 }
 0xb42   : > { %8835 = vmatpush.msrb.mxu1 %v8653_v47  ;;  %8752 = vmatpush.msra.mxu2 %v8644_v26  ;;  %v8725_v47 = vld [vmem:[%s17533_s14 + $0x298] sm:$0xff]  ;;  %v8139_v26 = vadd.f32 %v17107_v15, %v17074_v55  ;;  %v8687_v55 = vld [vmem:[%s17533_s14 + $0x168] sm:$0xff] }
 0xb43   : > { %v17271_v35 = vpop.f32.mrf.mxu2  ;;  %8887 = vmatpush.msrb.mxu3 %v8729_v29  ;;  %v8713_v15 = vld [vmem:[%s17533_s14 + $0x238] sm:$0xff] }
 0xb44   : > { %v17257_v44 = vpop.f32.mrf.mxu0  ;;  %8836 = vmatpush.msrb.mxu1 %v8651_v56  ;;  %8753 = vmatpush.msra.mxu2 %v8642_v33  ;;  %v8291_v33 = vadd.f32 %v17200_v14, %v8139_v26  ;;  %v8685_v14 = vld [vmem:[%s17533_s14 + $0x158] sm:$0xff] }
 0xb45   : > { %8888 = vmatpush.msrb.mxu3 %v8727_v34  ;;  %v8442_v29 = vadd.f32 %v17257_v44, %v8290_v49  ;;  %v8679_v44 = vld [vmem:[%s17533_s14 + $0x128] sm:$0xff]  ;;  %v8148_v49 = vadd.f32 %v17237_v17, %v17097_v60 }
 0xb46   : > { %8837 = vmatpush.msrb.mxu1 %v8649_v22  ;;  %8854 = vmatpush.msrb.mxu2 %v8705_v7  ;;  %v8693_v22 = vld [vmem:[%s17533_s14 + $0x198] sm:$0xff]  ;;  %v8711_v7 = vld [vmem:[%s17533_s14 + $0x228] sm:$0xff] }
 0xb47   : > { %v17273_v48 = vpop.f32.mrf.mxu1  ;;  %8889 = vmatpush.msrb.mxu3 %v8725_v47 }
 0xb48   : > { %8838 = vmatpush.msrb.mxu1 %v8647_v18  ;;  %8855 = vmatpush.msrb.mxu2 %v8703_v3  ;;  %v8691_v18 = vld [vmem:[%s17533_s14 + $0x188] sm:$0xff]  ;;  %v8142_v3 = vadd.f32 %v17133_v45, %v17081_v50 }
 0xb49   : > { %v17293_v39 = vpop.f32.mrf.mxu3  ;;  %8890 = vmatpush.msrb.mxu3 %v8723_v12  ;;  %v8707_v45 = vld [vmem:[%s17533_s14 + $0x208] sm:$0xff] }
 0xb4a   : > { %8839 = vmatpush.msrb.mxu1 %v8645_v28  ;;  %8856 = vmatpush.msrb.mxu2 %v8701_v31  ;;  %v8689_v28 = vld [vmem:[%s17533_s14 + $0x178] sm:$0xff]  ;;  %v8294_v47 = vadd.f32 %v17271_v35, %v8142_v3  ;;  %v8292_v12 = vadd.f32 %v17293_v39, %v17103_v36  ;;  %v8145_v39 = vadd.f32 %v17180_v54, %v17089_v61 }
 0xb4b   : > { %v17341_v40 = vpop.f32.mrf.mxu2  ;;  %8891 = vmatpush.msrb.mxu3 %v8721_v38  ;;  %v8677_v38 = vld [vmem:[%s17533_s14 + $0x118] sm:$0xff] }
 0xb4c   : > { %v17313_v21 = vpop.f32.mrf.mxu0  ;;  %8840 = vmatpush.msrb.mxu1 %v8643_v42  ;;  %8857 = vmatpush.msrb.mxu2 %v8699_v41  ;;  %v8681_v41 = vld [vmem:[%s17533_s14 + $0x138] sm:$0xff] }
 0xb4d   : > { %8892 = vmatpush.msrb.mxu3 %v8719_v8  ;;  %v8618_v8 = vpop.permute.xlu1 %8617 }
 0xb4e   : > { %8858 = vmatpush.msrb.mxu2 %v8697_v30  ;;  %v8141_v30 = vadd.f32 %v17101_v27, %v17087_v9  ;;  %v8675_v9 = vld [vmem:[%s17533_s14 + $0x108] sm:$0xff] }
 0xb4f   : > { %v17327_v5 = vpop.f32.mrf.mxu1  ;;  %8893 = vmatpush.msrb.mxu3 %v8717_v24 }
 0xb50   : > { %8859 = vmatpush.msrb.mxu2 %v8695_v13  ;;  %v8443_v42 = vadd.f32 %v17327_v5, %v8291_v33  ;;  %v8683_v5 = vld [vmem:[%s17533_s14 + $0x148] sm:$0xff]  ;;  %v8297_v33 = vadd.f32 %v17341_v40, %v8145_v39  ;;  %v8623_v40 = vpop.permute.xlu2 %8622 }
 0xb51   : > { %v17343_v10 = vpop.f32.mrf.mxu3  ;;  %8894 = vmatpush.msrb.mxu3 %v8715_v43 }
 0xb52   : > { %8860 = vmatpush.msrb.mxu2 %v8693_v22 }
 0xb53   : > { %v17387_v56 = vpop.f32.mrf.mxu2  ;;  %8895 = vmatpush.msrb.mxu3 %v8713_v15 }
 0xb54   : > { %v17363_v19 = vpop.f32.mrf.mxu0  ;;  %8861 = vmatpush.msrb.mxu2 %v8691_v18  ;;  %v8293_v18 = vadd.f32 %v17160_v51, %v8141_v30 }
 0xb55   : > { %8896 = vmatpush.msrb.mxu3 %v8711_v7 }
 0xb56   : > { %8862 = vmatpush.msrb.mxu2 %v8689_v28 }
 0xb57   : > { %v17371_v53 = vpop.f32.mrf.mxu1  ;;  %8897 = vmatpush.msrb.mxu3 %v8709_v4 }
 0xb58   : > { %8863 = vmatpush.msrb.mxu2 %v8687_v55  ;;  %v8446_v35 = vadd.f32 %v17371_v53, %v8294_v47  ;;  %v8445_v53 = vadd.f32 %v17313_v21, %v8293_v18 }
 0xb59   : > { %v17379_v57 = vpop.f32.mrf.mxu3  ;;  %8898 = vmatpush.msrb.mxu3 %v8707_v45 }
 0xb5a   : > { %8864 = vmatpush.msrb.mxu2 %v8685_v14  ;;  %v8296_v14 = vadd.f32 %v17217_v6, %v8144_v20  ;;  %v8298_v3 = vadd.f32 %v17379_v57, %v17155_v52 }
 0xb5b   : > { %v8430_v32 = vpop.f32.mrf.mxu2 }
 0xb5c   : > { %v17395_v2 = vpop.f32.mrf.mxu0  ;;  %8865 = vmatpush.msrb.mxu2 %v8683_v5  ;;  %v8444_v24 = vadd.f32 %v8430_v32, %v8292_v12  ;;  %v8448_v0 = vadd.f32 %v17363_v19, %v8296_v14  ;;  %v8147_v5 = vadd.f32 %v17135_v25, %v17099_v62 }
 0xb5e   : > { %8866 = vmatpush.msrb.mxu2 %v8681_v41  ;;  %v8299_v19 = vadd.f32 %v17273_v48, %v8147_v5 }
 0xb5f   : > { %v17403_v11 = vpop.f32.mrf.mxu1 }
 0xb60   : > { %8867 = vmatpush.msrb.mxu2 %v8679_v44  ;;  %v8449_v61 = vadd.f32 %v17403_v11, %v8297_v33  ;;  %v8451_v47 = vadd.f32 %v17395_v2, %v8299_v19 }
 0xb61   : > { %v17413_v63 = vpop.f32.mrf.mxu3 }
 0xb62   : > { %8868 = vmatpush.msrb.mxu2 %v8677_v38 }
 0xb63   : > { %v8433_v27 = vpop.f32.mrf.mxu2 }
 0xb64   : > { %v8553_v59 = vpop.f32.mrf.mxu0  ;;  %8869 = vmatpush.msrb.mxu2 %v8675_v9 }
 0xb65   : > { %v8595_v58 = vadd.f32 %v8553_v59, %v8443_v42  ;;  %v8295_v42 = vadd.f32 %v17343_v10, %v17117_v16 }
 0xb67   : > { %v17438_v46 = vpop.f32.mrf.mxu1  ;;  %v17446_v31 = vadd.f32 %v8613_v1, %v8595_v58  ;;  %v8447_v32 = vadd.f32 %v8433_v27, %v8295_v42  ;;  %v8300_v58 = vadd.f32 %v17387_v56, %v8148_v49  ;;  %v8628_v56 = vpop.permute.xlu0 %8627 }
 0xb69   : > { %v8524_v34 = vpop.f32.mrf.mxu3  ;;  %8783 = vmatmul.f32.vlgmr.msra.gmra.mxu3 %v17446_v31 }
 0xb6a   : > { %v8594_v50 = vadd.f32 %v8524_v34, %v8442_v29  ;;  %v8452_v29 = vadd.f32 %v17438_v46, %v8300_v58  ;;  %v8301_v46 = vadd.f32 %v17413_v63, %v17212_v23 }
 0xb6b   : > { %v8436_v10 = vpop.f32.mrf.mxu2 }
 0xb6c   : > { %v8630_v13 = vadd.f32 %v8613_v1, %v8594_v50  ;;  %v8556_v22 = vpop.f32.mrf.mxu0  ;;  %v8450_v4 = vadd.f32 %v8436_v10, %v8298_v3 }
 0xb6d   : > { %v8598_v26 = vadd.f32 %v8556_v22, %v8446_v35 }
 0xb6e   : > { %8754 = vmatmul.f32.vlgmr.msra.gmra.mxu2 %v8630_v13  ;;  %8841 = vmatmul.f32.vlgmr.msrb.gmra.mxu1 %v8630_v13 }
 0xb6f   : > { %v8582_v36 = vpop.f32.mrf.mxu1  ;;  %v17477_v28 = vadd.f32 %v8618_v8, %v8598_v26 }
 0xb70   : > { %v8596_v43 = vadd.f32 %v8582_v36, %v8444_v24 }
 0xb71   : > { %v8527_v51 = vpop.f32.mrf.mxu3  ;;  %8786 = vmatmul.f32.gmra.mxu3 %v17477_v28 }
 0xb72   : > { %v8632_v55 = vadd.f32 %v8613_v1, %v8596_v43  ;;  %v8597_v15 = vadd.f32 %v8527_v51, %v8445_v53 }
 0xb73   : > { %v8439_v57 = vpop.f32.mrf.mxu2 }
 0xb74   : > { %v8633_v54 = vadd.f32 %v8618_v8, %v8597_v15  ;;  %8812 = vmatmul.f32.vlgmr.msrb.gmra.mxu0 %v8632_v55  ;;  %v8559_v21 = vpop.f32.mrf.mxu0  ;;  %v8453_v48 = vadd.f32 %v8439_v57, %v8301_v46 }
 0xb75   : > { %v8601_v59 = vadd.f32 %v8559_v21, %v8449_v61 }
 0xb76   : > { %8757 = vmatmul.f32.gmra.mxu2 %v8633_v54  ;;  %8844 = vmatmul.f32.gmra.mxu1 %v8633_v54 }
 0xb77   : > { %v8585_v7 = vpop.f32.mrf.mxu1  ;;  %v8637_v37 = vadd.f32 %v8623_v40, %v8601_v59 }
 0xb78   : > { %v8599_v16 = vadd.f32 %v8585_v7, %v8447_v32 }
 0xb79   : > { %v8530_v11 = vpop.f32.mrf.mxu3  ;;  %8789 = vmatmul.f32.gmra.mxu3 %v8637_v37 }
 0xb7a   : > { %v8635_v1 = vadd.f32 %v8618_v8, %v8599_v16  ;;  %v8600_v6 = vadd.f32 %v8530_v11, %v8448_v0 }
 0xb7c   : > { %v8636_v60 = vadd.f32 %v8623_v40, %v8600_v6  ;;  %8815 = vmatmul.f32.gmra.mxu0 %v8635_v1  ;;  %v8562_v17 = vpop.f32.mrf.mxu0 }
 0xb7d   : > { %v8604_v34 = vadd.f32 %v8562_v17, %v8452_v29 }
 0xb7e   : > { %8760 = vmatmul.f32.gmra.mxu2 %v8636_v60  ;;  %8847 = vmatmul.f32.gmra.mxu1 %v8636_v60 }
 0xb7f   : > { %v8588_v41 = vpop.f32.mrf.mxu1  ;;  %v8640_v50 = vadd.f32 %v8628_v56, %v8604_v34 }
 0xb80   : > { %v8602_v62 = vadd.f32 %v8588_v41, %v8450_v4 }
 0xb81   : > { %v8533_v25 = vpop.f32.mrf.mxu3  ;;  %8792 = vmatmul.f32.gmra.mxu3 %v8640_v50 }
 0xb82   : > { %v8638_v45 = vadd.f32 %v8623_v40, %v8602_v62  ;;  %v8603_v52 = vadd.f32 %v8533_v25, %v8451_v47 }
 0xb84   : > { %v8639_v44 = vadd.f32 %v8628_v56, %v8603_v52  ;;  %8818 = vmatmul.f32.gmra.mxu0 %v8638_v45 }
 0xb86   : > { %8763 = vmatmul.f32.gmra.mxu2 %v8639_v44  ;;  %8850 = vmatmul.f32.gmra.mxu1 %v8639_v44 }
 0xb87   : > { %v8591_v30 = vpop.f32.mrf.mxu1 }
 0xb88   : > { %v8605_v12 = vadd.f32 %v8591_v30, %v8453_v48 }
 0xb89   : > { %8899 = vmatmul.f32.vlgmr.msrb.gmra.mxu3 %v8632_v55 }
 0xb8a   : > { %v8641_v35 = vadd.f32 %v8628_v56, %v8605_v12 }
 0xb8c   : > { %8821 = vmatmul.f32.gmra.mxu0 %v8641_v35 }
 0xb8e   : > { %8870 = vmatmul.f32.vlgmr.msrb.gmra.mxu2 %v17446_v31 }
 0xb91   : > { %8902 = vmatmul.f32.gmra.mxu3 %v8635_v1 }
 0xb96   : > { %8873 = vmatmul.f32.gmra.mxu2 %v17477_v28 }
 0xb99   : > { %8905 = vmatmul.f32.gmra.mxu3 %v8638_v45 }
 0xb9e   : > { %8876 = vmatmul.f32.gmra.mxu2 %v8637_v37 }
 0xba1   : > { %8908 = vmatmul.f32.gmra.mxu3 %v8641_v35 }
 0xba6   : > { %8879 = vmatmul.f32.gmra.mxu2 %v8640_v50 }
 0xbeb   : > { %v8842_v51 = vpop.f32.mrf.mxu1 }
 0xbec   : > { %v8784_v23 = vpop.f32.mrf.mxu3 }
 0xbf1   : > { %v8813_v2 = vpop.f32.mrf.mxu0  ;;  %v8755_v63 = vpop.f32.mrf.mxu2 }
 0xbf2   : > { %v8785_v13 = vadd.f32 %v8784_v23, %v8755_v63 }
 0xbf3   : > { %v8845_v54 = vpop.f32.mrf.mxu1 }
 0xbf4   : > { %v8814_v31 = vadd.f32 %v8813_v2, %v8785_v13  ;;  %v8787_v38 = vpop.f32.mrf.mxu3 }
 0xbf6   : > { %8912 = vst [vmem:[%s17506_s21] sm:$0xff] %v8814_v31 }
 0xbf9   : > { %v8816_v22 = vpop.f32.mrf.mxu0  ;;  %v8758_v8 = vpop.f32.mrf.mxu2 }
 0xbfa   : > { %v8788_v18 = vadd.f32 %v8787_v38, %v8758_v8 }
 0xbfb   : > { %v8848_v40 = vpop.f32.mrf.mxu1 }
 0xbfc   : > { %v8817_v24 = vadd.f32 %v8816_v22, %v8788_v18  ;;  %v8790_v26 = vpop.f32.mrf.mxu3 }
 0xbfe   : > { %8914 = vst [vmem:[%s17506_s21 + $0x10] sm:$0xff] %v8817_v24 }
 0xc01   : > { %v8819_v9 = vpop.f32.mrf.mxu0  ;;  %v8761_v27 = vpop.f32.mrf.mxu2 }
 0xc02   : > { %v8791_v36 = vadd.f32 %v8790_v26, %v8761_v27 }
 0xc03   : > { %v8851_v16 = vpop.f32.mrf.mxu1 }
 0xc04   : > { %v8820_v39 = vadd.f32 %v8819_v9, %v8791_v36  ;;  %v8793_v53 = vpop.f32.mrf.mxu3 }
 0xc06   : > { %8916 = vst [vmem:[%s17506_s21 + $0x20] sm:$0xff] %v8820_v39 }
 0xc09   : > { %v8764_v28 = vpop.f32.mrf.mxu2  ;;  %v8822_v33 = vpop.f32.mrf.mxu0 }
 0xc0a   : > { %v8794_v43 = vadd.f32 %v8793_v53, %v8764_v28 }
 0xc0c   : > { %v8823_v55 = vadd.f32 %v8822_v33, %v8794_v43  ;;  %v8900_v15 = vpop.f32.mrf.mxu3 }
 0xc0e   : > { %8918 = vst [vmem:[%s17506_s21 + $0x30] sm:$0xff] %v8823_v55 }
 0xc11   : > { %v8871_v20 = vpop.f32.mrf.mxu2 }
 0xc12   : > { %v8872_v42 = vadd.f32 %v8871_v20, %v8842_v51 }
 0xc14   : > { %v8901_v61 = vadd.f32 %v8900_v15, %v8872_v42  ;;  %v8903_v21 = vpop.f32.mrf.mxu3 }
 0xc16   : > { %8913 = vst [vmem:[%s17506_s21 + $0x8] sm:$0xff] %v8901_v61 }
 0xc19   : > { %v8874_v14 = vpop.f32.mrf.mxu2 }
 0xc1a   : > { %v8875_v32 = vadd.f32 %v8874_v14, %v8845_v54 }
 0xc1c   : > { %v8904_v59 = vadd.f32 %v8903_v21, %v8875_v32  ;;  %v8906_v7 = vpop.f32.mrf.mxu3 }
 0xc1e   : > { %8915 = vst [vmem:[%s17506_s21 + $0x18] sm:$0xff] %v8904_v59 }
 0xc21   : > { %v8877_v49 = vpop.f32.mrf.mxu2 }
 0xc22   : > { %v8878_v0 = vadd.f32 %v8877_v49, %v8848_v40 }
 0xc24   : > { %v8907_v37 = vadd.f32 %v8906_v7, %v8878_v0  ;;  %v8909_v58 = vpop.f32.mrf.mxu3 }
 0xc26   : > { %8917 = vst [vmem:[%s17506_s21 + $0x28] sm:$0xff] %v8907_v37 }
 0xc29   : > { %v8880_v10 = vpop.f32.mrf.mxu2 }
 0xc2a   : > { %v8881_v11 = vadd.f32 %v8880_v10, %v8851_v16 }
 0xc2c   : > { %v8910_v1 = vadd.f32 %v8909_v58, %v8881_v11 }
 0xc2e   : > { %8919 = vst [vmem:[%s17506_s21 + $0x38] sm:$0xff] %v8910_v1 }
 0xc2f PF: > { %s25_s18 = sadd.s32 1, %s11128_s18  }
 0xc30   : > { %p22_p4 = scmp.ge.s32.totalorder %s25_s18, 4  }
 0xc32   :  { %24 = sbr.rel (!%p22_p4) target bundleno = 3 (0x3), region = 167 }

</bundles_post_ra>
